<compile_context>
chip_gen: v7x
topology: tpu7x:2x2x1
jax: 0.10.0
libtpu: 0.0.40
codegen_flags: <defaults>
</compile_context>

<pallas_src>
import jax
import jax.numpy as jnp
from jax.experimental import pallas as pl
from jax.experimental.pallas import tpu as pltpu


# ----------------------------- Pallas kernel -------------------------------

def gan_forward_kernel(
    z_ref,
    gw1_ref, gb1_ref, gw2_ref, gb2_ref, gw3_ref, gb3_ref,
    dw1_ref, db1_ref, dw2_ref, db2_ref, dw3_ref, db3_ref, dw4_ref, db4_ref,
    out_ref,
):
    z = z_ref[...]                      # (tb, 2) f32

    # ---- Generator ---------------------------------------------------------
    # Layer 1 (K=2): VPU broadcast-FMA instead of a nearly-empty MXU matmul.
    gw1 = gw1_ref[...]                  # (2, 128) f32 (cols >= 32 are zero pad)
    h = z[:, 0:1] * gw1[0:1, :] + z[:, 1:2] * gw1[1:2, :] + gb1_ref[...]
    h = jnp.maximum(h, 0.0)
    # Layers 2/3: zero-padded 128x128, bf16 inputs on the MXU, f32 accumulation.
    h = jnp.dot(h.astype(jnp.bfloat16), gw2_ref[...],
                preferred_element_type=jnp.float32) + gb2_ref[...]
    h = jnp.maximum(h, 0.0)
    # Real generator output lives in lanes 0:2; padded lanes are exactly zero
    # (zero weight cols + zero bias).
    gen = jnp.dot(h.astype(jnp.bfloat16), gw3_ref[...],
                  preferred_element_type=jnp.float32) + gb3_ref[...]

    # ---- Discriminator (Dropout layers are identity in eval mode) ----------
    # Layer 1 (K=2): VPU broadcast-FMA.
    dw1 = dw1_ref[...]                  # (2, 512) f32
    d = gen[:, 0:1] * dw1[0:1, :] + gen[:, 1:2] * dw1[1:2, :] + db1_ref[...]
    d = jnp.maximum(d, 0.0)
    # Layers 2,3: dominant FLOPs -> bf16 inputs, f32 accumulation on the MXU.
    d = jnp.dot(d.astype(jnp.bfloat16), dw2_ref[...],
                preferred_element_type=jnp.float32) + db2_ref[...]
    d = jnp.maximum(d, 0.0)
    d = jnp.dot(d.astype(jnp.bfloat16), dw3_ref[...],
                preferred_element_type=jnp.float32) + db3_ref[...]
    d = jnp.maximum(d, 0.0)
    # Final 128 -> 1 (N=1): elementwise multiply + lane reduce (VPU/XLU), not MXU.
    logit = jnp.sum(d * dw4_ref[...], axis=-1, keepdims=True) + db4_ref[0, 0]
    # Numerically-stable sigmoid: one EUP tanh, no exp overflow for large |logit|.
    score = 0.5 * (1.0 + jnp.tanh(0.5 * logit))

    # Pack one lane-dense (tb,128) output slab:
    #   lanes 0,1 = generator output, lane 2 = discriminator score, rest = 0.
    # The (1,128) iota==2 mask is shape-static -> constant-folded by Mosaic.
    lane = jax.lax.broadcasted_iota(jnp.int32, (1, 128), 1)
    out_ref[...] = jnp.where(lane == 2, score, gen)


# ------------------------------- Wrapper ------------------------------------

def prepare_kernel_params(params):
    """Pad skinny generator dims to 128 lanes (bf16 for the MXU layers),
    transpose the final weight to a (1,128) row, and cast the big
    discriminator weights to bf16."""
    (gw1, gb1, gw2, gb2, gw3, gb3,
     dw1, db1, dw2, db2, dw3, db3, dw4, db4) = params

    def pad_w(w, rows, cols):
        r, c = w.shape
        return jnp.pad(w, ((0, rows - r), (0, cols - c)))

    def pad_b(b, cols):
        b = b.reshape(1, -1)
        return jnp.pad(b, ((0, 0), (0, cols - b.shape[1])))

    return (
        pad_w(gw1, 2, 128), pad_b(gb1, 128),                       # 2   -> 32 (VPU, f32)
        pad_w(gw2, 128, 128).astype(jnp.bfloat16), pad_b(gb2, 128),  # 32 -> 64 (bf16 MXU)
        pad_w(gw3, 128, 128).astype(jnp.bfloat16), pad_b(gb3, 128),  # 64 -> 2  (bf16 MXU)
        dw1, db1.reshape(1, -1),                                   # 2   -> 512 (VPU, f32)
        dw2.astype(jnp.bfloat16), db2.reshape(1, -1),              # 512 -> 256 (bf16 MXU)
        dw3.astype(jnp.bfloat16), db3.reshape(1, -1),              # 256 -> 128 (bf16 MXU)
        dw4.reshape(1, 128),                                       # 128 -> 1 as (1,128) row
        db4.reshape(1, 1),                                         # scalar bias -> SMEM
    )


def _round_up(x, m):
    return -(-x // m) * m


def _choose_tile(n, block_batch):
    """Pick the batch tile: multiple of 8 sublanes, capped by block_batch.
    Prefers >= 2 grid steps (and an even count) so v7x's two TensorCores both
    get work on the 'parallel' batch axis."""
    n8 = _round_up(max(n, 1), 8)
    tb = max(8, min(_round_up(block_batch, 8), n8))
    steps = -(-n8 // tb)
    if steps == 1 and n8 >= 16:
        tb = _round_up(-(-n8 // 2), 8)
        steps = -(-n8 // tb)
    if steps > 1 and steps % 2 == 1:
        tb_alt = _round_up(-(-n8 // (steps + 1)), 8)
        if tb_alt >= 8 and (-(-n8 // tb_alt)) % 2 == 0:
            tb = tb_alt
    n_pad = _round_up(n8, tb)
    return tb, n_pad


def gan_forward(z, params, *, block_batch=4096):
    """z: (N, 2) f32 latents. Returns (generated (N,2), scores (N,1)).

    block_batch: max rows per grid step. 4096 keeps the (tile,512) f32
    activations + bf16 copies + double-buffered I/O + ~0.4 MB resident weights
    under the 32 MiB scoped VMEM limit, so it is safe on v7x (64 MiB physical)
    as well as v5e/v6e.  On v6e, block_batch up to 8192 with
    vmem_limit_bytes ~96 MiB amortizes per-step overhead a bit further."""
    kparams = prepare_kernel_params(params)
    n = z.shape[0]

    tb, n_pad = _choose_tile(n, block_batch)
    if n_pad != n:
        z = jnp.pad(z, ((0, n_pad - n), (0, 0)))
    grid = (n_pad // tb,)

    def resident(shape):
        # Same block index every grid step -> DMA'd once, stays in VMEM.
        # (Weights total ~0.4 MB, so default double-buffering costs <1 MB;
        #  kept for lowering robustness rather than pl.Buffered(1).)
        return pl.BlockSpec(shape, lambda i, _s=len(shape): (0,) * _s)

    (gw1p, gb1p, gw2p, gb2p, gw3p, gb3p,
     dw1k, db1k, dw2k, db2k, dw3k, db3k, dw4k, db4k) = kparams

    in_specs = [
        pl.BlockSpec((tb, 2), lambda i: (i, 0)),            # z, row-tiled
        resident(gw1p.shape), resident(gb1p.shape),
        resident(gw2p.shape), resident(gb2p.shape),
        resident(gw3p.shape), resident(gb3p.shape),
        resident(dw1k.shape), resident(db1k.shape),
        resident(dw2k.shape), resident(db2k.shape),
        resident(dw3k.shape), resident(db3k.shape),
        resident(dw4k.shape),
        pl.BlockSpec(memory_space=pltpu.MemorySpace.SMEM),  # db4 scalar bias
    ]
    out_specs = pl.BlockSpec((tb, 128), lambda i: (i, 0))   # lane-dense slab
    out_shape = jax.ShapeDtypeStruct((n_pad, 128), jnp.float32)

    flops_per_row = 2 * (2 * 32 + 32 * 64 + 64 * 2 +
                         2 * 512 + 512 * 256 + 256 * 128 + 128 * 1)
    param_bytes = sum(int(p.size) * p.dtype.itemsize for p in kparams)
    cost = pl.CostEstimate(
        flops=int(n_pad) * flops_per_row,
        transcendentals=int(n_pad),
        bytes_accessed=param_bytes + int(n_pad) * (2 + 128) * 4,
    )

    out = pl.pallas_call(
        gan_forward_kernel,
        grid=grid,
        in_specs=in_specs,
        out_specs=out_specs,
        out_shape=out_shape,
        compiler_params=pltpu.CompilerParams(
            dimension_semantics=("parallel",),
            vmem_limit_bytes=32 * 1024 * 1024,
        ),
        cost_estimate=cost,
    )(z, *kparams)

    gen = out[:n, 0:2]
    score = out[:n, 2:3]
    return gen, score


# ------------------------- Parameter construction ---------------------------

def init_linear(key, fan_in, fan_out):
    """PyTorch-style Linear init: U(-1/sqrt(fan_in), 1/sqrt(fan_in)).
    Weight stored (fan_in, fan_out); bias (fan_out,)."""
    kw, kb = jax.random.split(key)
    bound = 1.0 / jnp.sqrt(jnp.float32(fan_in))
    w = jax.random.uniform(kw, (fan_in, fan_out), jnp.float32, -bound, bound)
    b = jax.random.uniform(kb, (fan_out,), jnp.float32, -bound, bound)
    return w, b


def make_params(key):
    keys = jax.random.split(key, 7)
    gw1, gb1 = init_linear(keys[0], 2, 32)
    gw2, gb2 = init_linear(keys[1], 32, 64)
    gw3, gb3 = init_linear(keys[2], 64, 2)
    dw1, db1 = init_linear(keys[3], 2, 512)
    dw2, db2 = init_linear(keys[4], 512, 256)
    dw3, db3 = init_linear(keys[5], 256, 128)
    dw4, db4 = init_linear(keys[6], 128, 1)
    return (gw1, gb1, gw2, gb2, gw3, gb3,
            dw1, db1, dw2, db2, dw3, db3, dw4, db4)


# --------------------------- Pure-JAX reference ------------------------------

def gan_forward_ref(z, params):
    """Matches the kernel's precision choices (bf16 on the MXU layers, f32
    accumulation) so tolerances stay tight."""
    (gw1, gb1, gw2, gb2, gw3, gb3,
     dw1, db1, dw2, db2, dw3, db3, dw4, db4) = params
    hi = jax.lax.Precision.HIGHEST

    def bf16_dot(a, w):
        return jnp.dot(a.astype(jnp.bfloat16), w.astype(jnp.bfloat16),
                       preferred_element_type=jnp.float32)

    h = jnp.maximum(jnp.dot(z, gw1, precision=hi) + gb1, 0.0)
    h = jnp.maximum(bf16_dot(h, gw2) + gb2, 0.0)
    gen = bf16_dot(h, gw3) + gb3
    d = jnp.maximum(jnp.dot(gen, dw1, precision=hi) + db1, 0.0)
    d = jnp.maximum(bf16_dot(d, dw2) + db2, 0.0)
    d = jnp.maximum(bf16_dot(d, dw3) + db3, 0.0)
    logit = jnp.dot(d, dw4, precision=hi) + db4
    score = jax.nn.sigmoid(logit)
    return gen, score


# ---------------------------------- Main -------------------------------------

if __name__ == "__main__":
    key = jax.random.PRNGKey(0)
    kz, kp = jax.random.split(key)

    batch = 1000  # latent samples; auto tile chooser -> 2 tiles of 504 rows
    z = jax.random.normal(kz, (batch, 2), jnp.float32)
    params = make_params(kp)

    gen, score = gan_forward(z, params)
    gen, score = jax.block_until_ready((gen, score))

    gen_ref, score_ref = gan_forward_ref(z, params)
    assert gen.shape == (batch, 2) and score.shape == (batch, 1)
    assert jnp.allclose(gen, gen_ref, atol=5e-3, rtol=5e-3), \
        float(jnp.max(jnp.abs(gen - gen_ref)))
    assert jnp.allclose(score, score_ref, atol=5e-3, rtol=5e-3), \
        float(jnp.max(jnp.abs(score - score_ref)))
    # TODO(synk): Dropout(0.3) layers are identity here (eval-mode forward);
    # training-time stochastic masking would need pltpu.prng_seed/prng_random_bits.
    print("KERNEL_OK")
</pallas_src>

<mosaic_0001>
module attributes {stable_mosaic.version = 11 : i64} {
  func.func @gan_forward_kernel(%arg0: i32, %arg1: memref<504x2xf32, #tpu.memory_space<vmem>>, %arg2: memref<2x128xf32, #tpu.memory_space<vmem>>, %arg3: memref<1x128xf32, #tpu.memory_space<vmem>>, %arg4: memref<128x128xbf16, #tpu.memory_space<vmem>>, %arg5: memref<1x128xf32, #tpu.memory_space<vmem>>, %arg6: memref<128x128xbf16, #tpu.memory_space<vmem>>, %arg7: memref<1x128xf32, #tpu.memory_space<vmem>>, %arg8: memref<2x512xf32, #tpu.memory_space<vmem>>, %arg9: memref<1x512xf32, #tpu.memory_space<vmem>>, %arg10: memref<512x256xbf16, #tpu.memory_space<vmem>>, %arg11: memref<1x256xf32, #tpu.memory_space<vmem>>, %arg12: memref<256x128xbf16, #tpu.memory_space<vmem>>, %arg13: memref<1x128xf32, #tpu.memory_space<vmem>>, %arg14: memref<1x128xf32, #tpu.memory_space<vmem>>, %arg15: memref<1x1xf32, #tpu.memory_space<smem>>, %arg16: memref<504x128xf32, #tpu.memory_space<vmem>>) attributes {dimension_semantics = [#tpu.dimension_semantics<parallel>], iteration_bounds = array<i64: 2>, scalar_prefetch = 0 : i64, scratch_operands = 0 : i64, tpu.core_type = #tpu.core_type<tc>, window_params = [{transform_indices = @transform_0, window_bounds = array<i64: 504, 2>}, {pipeline_mode = #tpu.pipeline_mode<synchronous>, transform_indices = @transform_1, window_bounds = array<i64: 2, 128>}, {pipeline_mode = #tpu.pipeline_mode<synchronous>, transform_indices = @transform_2, window_bounds = array<i64: 1, 128>}, {pipeline_mode = #tpu.pipeline_mode<synchronous>, transform_indices = @transform_3, window_bounds = array<i64: 128, 128>}, {pipeline_mode = #tpu.pipeline_mode<synchronous>, transform_indices = @transform_4, window_bounds = array<i64: 1, 128>}, {pipeline_mode = #tpu.pipeline_mode<synchronous>, transform_indices = @transform_5, window_bounds = array<i64: 128, 128>}, {pipeline_mode = #tpu.pipeline_mode<synchronous>, transform_indices = @transform_6, window_bounds = array<i64: 1, 128>}, {pipeline_mode = #tpu.pipeline_mode<synchronous>, transform_indices = @transform_7, window_bounds = array<i64: 2, 512>}, {pipeline_mode = #tpu.pipeline_mode<synchronous>, transform_indices = @transform_8, window_bounds = array<i64: 1, 512>}, {pipeline_mode = #tpu.pipeline_mode<synchronous>, transform_indices = @transform_9, window_bounds = array<i64: 512, 256>}, {pipeline_mode = #tpu.pipeline_mode<synchronous>, transform_indices = @transform_10, window_bounds = array<i64: 1, 256>}, {pipeline_mode = #tpu.pipeline_mode<synchronous>, transform_indices = @transform_11, window_bounds = array<i64: 256, 128>}, {pipeline_mode = #tpu.pipeline_mode<synchronous>, transform_indices = @transform_12, window_bounds = array<i64: 1, 128>}, {pipeline_mode = #tpu.pipeline_mode<synchronous>, transform_indices = @transform_13, window_bounds = array<i64: 1, 128>}, {transform_indices = @transform_14, window_bounds = array<i64: 1, 1>}, {transform_indices = @transform_15, window_bounds = array<i64: 504, 128>}]} {
    %c0 = arith.constant 0 : index
    %c0_0 = arith.constant 0 : index
    %0 = vector.load %arg1[%c0, %c0_0] : memref<504x2xf32, #tpu.memory_space<vmem>>, vector<504x2xf32>
    %c0_1 = arith.constant 0 : index
    %c0_2 = arith.constant 0 : index
    %1 = vector.load %arg2[%c0_1, %c0_2] : memref<2x128xf32, #tpu.memory_space<vmem>>, vector<2x128xf32>
    %2 = vector.extract_strided_slice %0 {offsets = [0, 0], sizes = [504, 1], strides = [1, 1]} : vector<504x2xf32> to vector<504x1xf32>
    %3 = vector.extract_strided_slice %1 {offsets = [0, 0], sizes = [1, 128], strides = [1, 1]} : vector<2x128xf32> to vector<1x128xf32>
    %4 = vector.broadcast %2 : vector<504x1xf32> to vector<504x128xf32>
    %5 = vector.broadcast %3 : vector<1x128xf32> to vector<504x128xf32>
    %6 = arith.mulf %4, %5 : vector<504x128xf32>
    %7 = vector.extract_strided_slice %0 {offsets = [0, 1], sizes = [504, 1], strides = [1, 1]} : vector<504x2xf32> to vector<504x1xf32>
    %8 = vector.extract_strided_slice %1 {offsets = [1, 0], sizes = [1, 128], strides = [1, 1]} : vector<2x128xf32> to vector<1x128xf32>
    %9 = vector.broadcast %7 : vector<504x1xf32> to vector<504x128xf32>
    %10 = vector.broadcast %8 : vector<1x128xf32> to vector<504x128xf32>
    %11 = arith.mulf %9, %10 : vector<504x128xf32>
    %12 = arith.addf %6, %11 : vector<504x128xf32>
    %c0_3 = arith.constant 0 : index
    %c0_4 = arith.constant 0 : index
    %13 = vector.load %arg3[%c0_3, %c0_4] : memref<1x128xf32, #tpu.memory_space<vmem>>, vector<1x128xf32>
    %14 = vector.broadcast %13 : vector<1x128xf32> to vector<504x128xf32>
    %15 = arith.addf %12, %14 : vector<504x128xf32>
    %cst = arith.constant 0.000000e+00 : f32
    %16 = vector.broadcast %cst : f32 to vector<504x128xf32>
    %17 = arith.maximumf %15, %16 : vector<504x128xf32>
    %18 = arith.truncf %17 : vector<504x128xf32> to vector<504x128xbf16>
    %c0_5 = arith.constant 0 : index
    %c0_6 = arith.constant 0 : index
    %19 = vector.load %arg4[%c0_5, %c0_6] : memref<128x128xbf16, #tpu.memory_space<vmem>>, vector<128x128xbf16>
    %cst_7 = arith.constant dense<0.000000e+00> : vector<504x128xf32>
    %20 = tpu.matmul %18, %19, %cst_7 {dimension_numbers = #tpu.dot_dimension_numbers<[1], [0], [0], [1], [0, 0, 1, 1], [], []>} : vector<504x128xbf16>, vector<128x128xbf16>, vector<504x128xf32> -> vector<504x128xf32>
    %c0_8 = arith.constant 0 : index
    %c0_9 = arith.constant 0 : index
    %21 = vector.load %arg5[%c0_8, %c0_9] : memref<1x128xf32, #tpu.memory_space<vmem>>, vector<1x128xf32>
    %22 = vector.broadcast %21 : vector<1x128xf32> to vector<504x128xf32>
    %23 = arith.addf %20, %22 : vector<504x128xf32>
    %cst_10 = arith.constant 0.000000e+00 : f32
    %24 = vector.broadcast %cst_10 : f32 to vector<504x128xf32>
    %25 = arith.maximumf %23, %24 : vector<504x128xf32>
    %26 = arith.truncf %25 : vector<504x128xf32> to vector<504x128xbf16>
    %c0_11 = arith.constant 0 : index
    %c0_12 = arith.constant 0 : index
    %27 = vector.load %arg6[%c0_11, %c0_12] : memref<128x128xbf16, #tpu.memory_space<vmem>>, vector<128x128xbf16>
    %cst_13 = arith.constant dense<0.000000e+00> : vector<504x128xf32>
    %28 = tpu.matmul %26, %27, %cst_13 {dimension_numbers = #tpu.dot_dimension_numbers<[1], [0], [0], [1], [0, 0, 1, 1], [], []>} : vector<504x128xbf16>, vector<128x128xbf16>, vector<504x128xf32> -> vector<504x128xf32>
    %c0_14 = arith.constant 0 : index
    %c0_15 = arith.constant 0 : index
    %29 = vector.load %arg7[%c0_14, %c0_15] : memref<1x128xf32, #tpu.memory_space<vmem>>, vector<1x128xf32>
    %30 = vector.broadcast %29 : vector<1x128xf32> to vector<504x128xf32>
    %31 = arith.addf %28, %30 : vector<504x128xf32>
    %c0_16 = arith.constant 0 : index
    %c0_17 = arith.constant 0 : index
    %32 = vector.load %arg8[%c0_16, %c0_17] : memref<2x512xf32, #tpu.memory_space<vmem>>, vector<2x512xf32>
    %33 = vector.extract_strided_slice %31 {offsets = [0, 0], sizes = [504, 1], strides = [1, 1]} : vector<504x128xf32> to vector<504x1xf32>
    %34 = vector.extract_strided_slice %32 {offsets = [0, 0], sizes = [1, 512], strides = [1, 1]} : vector<2x512xf32> to vector<1x512xf32>
    %35 = vector.broadcast %33 : vector<504x1xf32> to vector<504x512xf32>
    %36 = vector.broadcast %34 : vector<1x512xf32> to vector<504x512xf32>
    %37 = arith.mulf %35, %36 : vector<504x512xf32>
    %38 = vector.extract_strided_slice %31 {offsets = [0, 1], sizes = [504, 1], strides = [1, 1]} : vector<504x128xf32> to vector<504x1xf32>
    %39 = vector.extract_strided_slice %32 {offsets = [1, 0], sizes = [1, 512], strides = [1, 1]} : vector<2x512xf32> to vector<1x512xf32>
    %40 = vector.broadcast %38 : vector<504x1xf32> to vector<504x512xf32>
    %41 = vector.broadcast %39 : vector<1x512xf32> to vector<504x512xf32>
    %42 = arith.mulf %40, %41 : vector<504x512xf32>
    %43 = arith.addf %37, %42 : vector<504x512xf32>
    %c0_18 = arith.constant 0 : index
    %c0_19 = arith.constant 0 : index
    %44 = vector.load %arg9[%c0_18, %c0_19] : memref<1x512xf32, #tpu.memory_space<vmem>>, vector<1x512xf32>
    %45 = vector.broadcast %44 : vector<1x512xf32> to vector<504x512xf32>
    %46 = arith.addf %43, %45 : vector<504x512xf32>
    %cst_20 = arith.constant 0.000000e+00 : f32
    %47 = vector.broadcast %cst_20 : f32 to vector<504x512xf32>
    %48 = arith.maximumf %46, %47 : vector<504x512xf32>
    %49 = arith.truncf %48 : vector<504x512xf32> to vector<504x512xbf16>
    %c0_21 = arith.constant 0 : index
    %c0_22 = arith.constant 0 : index
    %50 = vector.load %arg10[%c0_21, %c0_22] : memref<512x256xbf16, #tpu.memory_space<vmem>>, vector<512x256xbf16>
    %cst_23 = arith.constant dense<0.000000e+00> : vector<504x256xf32>
    %51 = tpu.matmul %49, %50, %cst_23 {dimension_numbers = #tpu.dot_dimension_numbers<[1], [0], [0], [1], [0, 0, 1, 1], [], []>} : vector<504x512xbf16>, vector<512x256xbf16>, vector<504x256xf32> -> vector<504x256xf32>
    %c0_24 = arith.constant 0 : index
    %c0_25 = arith.constant 0 : index
    %52 = vector.load %arg11[%c0_24, %c0_25] : memref<1x256xf32, #tpu.memory_space<vmem>>, vector<1x256xf32>
    %53 = vector.broadcast %52 : vector<1x256xf32> to vector<504x256xf32>
    %54 = arith.addf %51, %53 : vector<504x256xf32>
    %cst_26 = arith.constant 0.000000e+00 : f32
    %55 = vector.broadcast %cst_26 : f32 to vector<504x256xf32>
    %56 = arith.maximumf %54, %55 : vector<504x256xf32>
    %57 = arith.truncf %56 : vector<504x256xf32> to vector<504x256xbf16>
    %c0_27 = arith.constant 0 : index
    %c0_28 = arith.constant 0 : index
    %58 = vector.load %arg12[%c0_27, %c0_28] : memref<256x128xbf16, #tpu.memory_space<vmem>>, vector<256x128xbf16>
    %cst_29 = arith.constant dense<0.000000e+00> : vector<504x128xf32>
    %59 = tpu.matmul %57, %58, %cst_29 {dimension_numbers = #tpu.dot_dimension_numbers<[1], [0], [0], [1], [0, 0, 1, 1], [], []>} : vector<504x256xbf16>, vector<256x128xbf16>, vector<504x128xf32> -> vector<504x128xf32>
    %c0_30 = arith.constant 0 : index
    %c0_31 = arith.constant 0 : index
    %60 = vector.load %arg13[%c0_30, %c0_31] : memref<1x128xf32, #tpu.memory_space<vmem>>, vector<1x128xf32>
    %61 = vector.broadcast %60 : vector<1x128xf32> to vector<504x128xf32>
    %62 = arith.addf %59, %61 : vector<504x128xf32>
    %cst_32 = arith.constant 0.000000e+00 : f32
    %63 = vector.broadcast %cst_32 : f32 to vector<504x128xf32>
    %64 = arith.maximumf %62, %63 : vector<504x128xf32>
    %c0_33 = arith.constant 0 : index
    %c0_34 = arith.constant 0 : index
    %65 = vector.load %arg14[%c0_33, %c0_34] : memref<1x128xf32, #tpu.memory_space<vmem>>, vector<1x128xf32>
    %66 = vector.broadcast %65 : vector<1x128xf32> to vector<504x128xf32>
    %67 = arith.mulf %64, %66 : vector<504x128xf32>
    %cst_35 = arith.constant dense<0.000000e+00> : vector<504xf32>
    %68 = vector.multi_reduction <add>, %67, %cst_35 [1] : vector<504x128xf32> to vector<504xf32>
    %69 = vector.shape_cast %68 : vector<504xf32> to vector<504x1xf32>
    %c0_36 = arith.constant 0 : index
    %c0_37 = arith.constant 0 : index
    %70 = memref.load %arg15[%c0_36, %c0_37] : memref<1x1xf32, #tpu.memory_space<smem>>
    %71 = vector.broadcast %70 : f32 to vector<504x1xf32>
    %72 = arith.addf %69, %71 : vector<504x1xf32>
    %cst_38 = arith.constant 5.000000e-01 : f32
    %73 = vector.broadcast %cst_38 : f32 to vector<504x1xf32>
    %74 = arith.mulf %73, %72 : vector<504x1xf32>
    %75 = math.tanh %74 : vector<504x1xf32>
    %cst_39 = arith.constant 1.000000e+00 : f32
    %76 = vector.broadcast %cst_39 : f32 to vector<504x1xf32>
    %77 = arith.addf %76, %75 : vector<504x1xf32>
    %cst_40 = arith.constant 5.000000e-01 : f32
    %78 = vector.broadcast %cst_40 : f32 to vector<504x1xf32>
    %79 = arith.mulf %78, %77 : vector<504x1xf32>
    %80 = tpu.iota {dimensions = array<i32: 1>} : vector<1x128xi32>
    %c2_i32 = arith.constant 2 : i32
    %81 = vector.broadcast %c2_i32 : i32 to vector<1x128xi32>
    %82 = arith.cmpi eq, %80, %81 : vector<1x128xi32>
    %83 = vector.shape_cast %82 : vector<1x128xi1> to vector<1x128xi1>
    %84 = vector.broadcast %83 : vector<1x128xi1> to vector<504x128xi1>
    %85 = vector.shape_cast %79 : vector<504x1xf32> to vector<504x1xf32>
    %86 = vector.broadcast %85 : vector<504x1xf32> to vector<504x128xf32>
    %87 = arith.select %84, %86, %31 : vector<504x128xi1>, vector<504x128xf32>
    %c0_41 = arith.constant 0 : index
    %c0_42 = arith.constant 0 : index
    %88 = vector.load %arg16[%c0_41, %c0_42] : memref<504x128xf32, #tpu.memory_space<vmem>>, vector<504x128xf32>
    tpu.vector_store %arg16[%c0_41, %c0_42], %87 {strides = array<i32>} : memref<504x128xf32, #tpu.memory_space<vmem>>, vector<504x128xf32>,
    return
  }
  func.func @transform_0(%arg0: i32) -> (i32, i32) {
    %c0_i32 = arith.constant 0 : i32
    %c0_i32_0 = arith.constant 0 : i32
    return %arg0, %c0_i32 : i32, i32
  }
  func.func @transform_1(%arg0: i32) -> (i32, i32) {
    %c0_i32 = arith.constant 0 : i32
    %c0_i32_0 = arith.constant 0 : i32
    %c0_i32_1 = arith.constant 0 : i32
    return %c0_i32, %c0_i32_0 : i32, i32
  }
  func.func @transform_2(%arg0: i32) -> (i32, i32) {
    %c0_i32 = arith.constant 0 : i32
    %c0_i32_0 = arith.constant 0 : i32
    %c0_i32_1 = arith.constant 0 : i32
    return %c0_i32, %c0_i32_0 : i32, i32
  }
  func.func @transform_3(%arg0: i32) -> (i32, i32) {
    %c0_i32 = arith.constant 0 : i32
    %c0_i32_0 = arith.constant 0 : i32
    %c0_i32_1 = arith.constant 0 : i32
    return %c0_i32, %c0_i32_0 : i32, i32
  }
  func.func @transform_4(%arg0: i32) -> (i32, i32) {
    %c0_i32 = arith.constant 0 : i32
    %c0_i32_0 = arith.constant 0 : i32
    %c0_i32_1 = arith.constant 0 : i32
    return %c0_i32, %c0_i32_0 : i32, i32
  }
  func.func @transform_5(%arg0: i32) -> (i32, i32) {
    %c0_i32 = arith.constant 0 : i32
    %c0_i32_0 = arith.constant 0 : i32
    %c0_i32_1 = arith.constant 0 : i32
    return %c0_i32, %c0_i32_0 : i32, i32
  }
  func.func @transform_6(%arg0: i32) -> (i32, i32) {
    %c0_i32 = arith.constant 0 : i32
    %c0_i32_0 = arith.constant 0 : i32
    %c0_i32_1 = arith.constant 0 : i32
    return %c0_i32, %c0_i32_0 : i32, i32
  }
  func.func @transform_7(%arg0: i32) -> (i32, i32) {
    %c0_i32 = arith.constant 0 : i32
    %c0_i32_0 = arith.constant 0 : i32
    %c0_i32_1 = arith.constant 0 : i32
    return %c0_i32, %c0_i32_0 : i32, i32
  }
  func.func @transform_8(%arg0: i32) -> (i32, i32) {
    %c0_i32 = arith.constant 0 : i32
    %c0_i32_0 = arith.constant 0 : i32
    %c0_i32_1 = arith.constant 0 : i32
    return %c0_i32, %c0_i32_0 : i32, i32
  }
  func.func @transform_9(%arg0: i32) -> (i32, i32) {
    %c0_i32 = arith.constant 0 : i32
    %c0_i32_0 = arith.constant 0 : i32
    %c0_i32_1 = arith.constant 0 : i32
    return %c0_i32, %c0_i32_0 : i32, i32
  }
  func.func @transform_10(%arg0: i32) -> (i32, i32) {
    %c0_i32 = arith.constant 0 : i32
    %c0_i32_0 = arith.constant 0 : i32
    %c0_i32_1 = arith.constant 0 : i32
    return %c0_i32, %c0_i32_0 : i32, i32
  }
  func.func @transform_11(%arg0: i32) -> (i32, i32) {
    %c0_i32 = arith.constant 0 : i32
    %c0_i32_0 = arith.constant 0 : i32
    %c0_i32_1 = arith.constant 0 : i32
    return %c0_i32, %c0_i32_0 : i32, i32
  }
  func.func @transform_12(%arg0: i32) -> (i32, i32) {
    %c0_i32 = arith.constant 0 : i32
    %c0_i32_0 = arith.constant 0 : i32
    %c0_i32_1 = arith.constant 0 : i32
    return %c0_i32, %c0_i32_0 : i32, i32
  }
  func.func @transform_13(%arg0: i32) -> (i32, i32) {
    %c0_i32 = arith.constant 0 : i32
    %c0_i32_0 = arith.constant 0 : i32
    %c0_i32_1 = arith.constant 0 : i32
    return %c0_i32, %c0_i32_0 : i32, i32
  }
  func.func @transform_14(%arg0: i32) -> (i32, i32) {
    %c0_i32 = arith.constant 0 : i32
    %c0_i32_0 = arith.constant 0 : i32
    %c0_i32_1 = arith.constant 0 : i32
    return %c0_i32, %c0_i32_0 : i32, i32
  }
  func.func @transform_15(%arg0: i32) -> (i32, i32) {
    %c0_i32 = arith.constant 0 : i32
    %c0_i32_0 = arith.constant 0 : i32
    return %arg0, %c0_i32 : i32, i32
  }
}

</mosaic_0001>

<bundles_post_ra>
// kernel: tpu_custom_call.1
= control target key start
LH: loop header
LB: loop body
LE: loop exit
PB: predicated region body
PF: predicated region fallthrough
CT: control target
= control target key end

     0   :  { %s12205_s0 = inlined_call_operand.vmem [shape: f32[1008,2], index: 0, kind: input, shape index: {}]   ;;  %s12206_s1 = inlined_call_operand.vmem [shape: f32[2,128], index: 1, kind: input, shape index: {}]   ;;  %s12207_s2 = inlined_call_operand.vmem [shape: f32[1,128], index: 2, kind: input, shape index: {}]   ;;  %s12208_s3 = inlined_call_operand.vmem [shape: bf16[128,128], index: 3, kind: input, shape index: {}]   ;;  %s12209_s4 = inlined_call_operand.vmem [shape: f32[1,128], index: 4, kind: input, shape index: {}]   ;;  %s12210_s5 = inlined_call_operand.vmem [shape: bf16[128,128], index: 5, kind: input, shape index: {}]   ;;  %s12211_s6 = inlined_call_operand.vmem [shape: f32[1,128], index: 6, kind: input, shape index: {}]   ;;  %s12212_s7 = inlined_call_operand.vmem [shape: f32[2,512], index: 7, kind: input, shape index: {}]   ;;  %s12213_s8 = inlined_call_operand.vmem [shape: f32[1,512], index: 8, kind: input, shape index: {}]   ;;  %s12214_s9 = inlined_call_operand.vmem [shape: bf16[512,256], index: 9, kind: input, shape index: {}]   ;;  %s12215_s10 = inlined_call_operand.vmem [shape: f32[1,256], index: 10, kind: input, shape index: {}]   ;;  %s12216_s11 = inlined_call_operand.vmem [shape: bf16[256,128], index: 11, kind: input, shape index: {}]   ;;  %s12217_s12 = inlined_call_operand.vmem [shape: f32[1,128], index: 12, kind: input, shape index: {}]   ;;  %s12218_s13 = inlined_call_operand.vmem [shape: f32[1,128], index: 13, kind: input, shape index: {}]   ;;  %s12219_s14 = inlined_call_operand.<no memory space> [shape: f32[1,1], index: 14, kind: input, shape index: {}]   ;;  %s12220_s15 = inlined_call_operand.hbm [shape: f32[1008,128], index: 15, kind: output, shape index: {}]  }
   0x1   :  { %12306 = sst [smem:[#allocation93_spill]] %s12205_s0 }
   0x2   :  { %20 = sst [smem:[#allocation2]] %s12219_s14 }
   0x3   :  { %21 = vsyncpa [#allocation4], 0 }
   0x4   :  { %23 = vsyncpa [#allocation4 + $0x1], 0  ;;  %s8109_s20 = smov 0   ;;  %s8111_s21 = smov 0  }
   0x5   :  { %s8113_s22 = smov 0   ;;  %s8115_s23 = smov 0  }
   0x6 LB: > { %12307 = sst [smem:[#allocation6_spill]] %s8015_s22  ;;  %s8130_s14 = sadd.s32 4294967295, %s8019_s23   ;;  %s8019_s23 = sphi %s8115_s23, %s12551_s23   ;;  %s8015_s22 = sphi %s8113_s22, %s12550_s22   ;;  %s8011_s21 = sphi %s8111_s21, %s12549_s21   ;;  %s8007_s20 = sphi %s8109_s20, %s12548_s20  }
   0x7   : > { %s6849_s24 = sadd.s32 4294967294, %s8019_s23   ;;  %s8134_s25 = sadd.s32 1, %s8019_s23  }
   0x8   : > { %s356_s26 = sadd.s32 1, %s8015_s22  ;;  %s353_s27 = ssub.s32 %s8019_s23, %s8134_s25 }
   0x9   : > { %p366_p0 = scmp.ne.s32.totalorder %s8015_s22, %s8011_s21  ;;  %p354_p1 = scmp.eq.s32.totalorder %s353_s27, 0 }
   0xa   : > { %p367_p2 = scmp.eq.s32.totalorder %s8130_s14, 1  ;;  %p372_p3 = scmp.ne.s32.totalorder %s8011_s21, %s8007_s20 }
   0xb   : > { %p373_p4 = scmp.eq.s32.totalorder %s6849_s24, 1  ;;  %p6852_p7 = scmp.ge.s32.totalorder %s8019_s23, 1 }
   0xc   : > { %s8145_s28 = scalar_select %p354_p1, %s8015_s22, %s356_s26  }
   0xd   : > { %p8147_p5 = por %p367_p2, %p366_p0  ;;  %p8151_p6 = por %p373_p4, %p372_p3 }
   0xe   : > { %12308 = sst [smem:[#allocation7_spill]] %s8145_s28  ;;  %p442_p8 = scmp.lt.s32.totalorder %s8019_s23, 3 }
  0x10   : > { %p443_p9 = pnand %p6852_p7, %p442_p8 }
  0x12   : > { %446 = sbr.rel (%p443_p9) target bundleno = 1824 (0x720), region = 80 }
  0x19   : > { %s490_s16 = smul.u32 63, %s8130_s14  ;;  %v7697_v0 = vld [vmem:[%s12208_s3] sm:$0xff]   ;;  %v12225_v1 = vmov 1   ;;  %v12223_v2 = vmov 0   ;;  %v7698_v3 = vld [vmem:[%s12208_s3 + $0x8] sm:$0xff]   ;;  %s12311_s0 = sld [smem:[#allocation93_spill]]  ;;  %v12222_v39 = vlaneseq }
  0x1a   : > { %7528 = vset.pattern.permute.xlu1 %v12225_v1  ;;  %7527 = vset.pattern.permute.xlu0 %v12223_v2  ;;  %v7699_v4 = vld [vmem:[%s12208_s3 + $0x10] sm:$0xff]   ;;  %v7700_v9 = vld [vmem:[%s12208_s3 + $0x18] sm:$0xff]   ;;  %v7701_v10 = vld [vmem:[%s12208_s3 + $0x20] sm:$0xff]   ;;  %s6325_s18 = sld [smem:[#allocation2]]  ;;  %s487_s28 = sand.u32 1, %s8011_s21  }
  0x1b   : > { %p491_p10 = scmp.lt.s32.totalorder %s490_s16, 125  ;;  %7039 = vmatprep.subr.bf16.mxu0 %v7697_v0  ;;  %v7702_v11 = vld [vmem:[%s12208_s3 + $0x28] sm:$0xff]   ;;  %v7703_v14 = vld [vmem:[%s12208_s3 + $0x30] sm:$0xff]   ;;  %v7704_v16 = vld [vmem:[%s12208_s3 + $0x38] sm:$0xff]   ;;  %v8259_v40 = vshrl.u32 %v12222_v39, 7  ;;  %s6958_s27 = smul.u32 8064, %s8130_s14 }
  0x1c   : > { %7040 = vmatpush3.bf16.msra.mxu0 %v7697_v0  ;;  %v561_v44 = vld [vmem:[%s12206_s1] sm:$0x3]  ;;  %s12164_s14 = scalar_lea.sflag [#allocation4], %s487_s28 }
  0x1d   : > { %s12553_s16 = smov (!%p491_p10, %s490_s16), 125  ;;  %7041 = vmatprep.subr.bf16.mxu0 %v7698_v3  ;;  %v8263_v42 = vsub.s32 1, %v8259_v40  ;;  %v8266_v43 = vsub.s32 0, %v8259_v40  ;;  %v8295_v60 = vld [vmem:[%s12207_s2] ss:$0 sm:$0xff]  ;;  %s12154_s24 = scalar_lea.hbm %s12220_s15, %s6958_s27 }
  0x1e   : > { %s6853_s26 = sshll.u32 %s12553_s16, 3  ;;  %s7483_s16 = smul.u32 504, %s487_s28 }
  0x1f   : > { %s8169_s17 = scalar_lea.vmem %s12311_s0, %s6853_s26  ;;  %12312 = vst [vmem:[#allocation8_spill] sm:$0xff] %v8263_v42  ;;  %12313 = vst [vmem:[#allocation9_spill] sm:$0xff] %v8266_v43  ;;  %v8277_v49 = vrot.slane %v561_v44, %v8263_v42  ;;  %v8280_v50 = vrot.slane %v561_v44, %v8266_v43 }
  0x20   : > { %7042 = vmatpush3.bf16.msra.mxu0 %v7698_v3  ;;  %v498_v5 = vld [vmem:[%s8169_s17] sm:$0xff]  ;;  %v499_v6 = vld [vmem:[%s8169_s17 + $0x8] sm:$0xff]  ;;  %v500_v7 = vld [vmem:[%s8169_s17 + $0x10] sm:$0xff]  ;;  %s11793_s22 = scalar_lea.vmem [#allocation3], %s7483_s16 }
  0x21   : > { %945 = vperm.xlu1 %7528, %v498_v5   ;;  %564 = vperm.xlu0 %7527, %v498_v5   ;;  %v501_v8 = vld [vmem:[%s8169_s17 + $0x18] sm:$0xff]  ;;  %v503_v12 = vld [vmem:[%s8169_s17 + $0x28] sm:$0xff]  ;;  %v502_v13 = vld [vmem:[%s8169_s17 + $0x20] sm:$0xff] }
  0x22   : > { %7043 = vmatprep.subr.bf16.mxu0 %v7699_v4  ;;  %v504_v15 = vld [vmem:[%s8169_s17 + $0x30] sm:$0xff]  ;;  %v505_v18 = vld [vmem:[%s8169_s17 + $0x38] sm:$0xff]  ;;  %v507_v19 = vld [vmem:[%s8169_s17 + $0x48] sm:$0xff] }
  0x23   : > { %v508_v17 = vld [vmem:[%s8169_s17 + $0x50] sm:$0xff]  ;;  %v506_v20 = vld [vmem:[%s8169_s17 + $0x40] sm:$0xff]  ;;  %v511_v21 = vld [vmem:[%s8169_s17 + $0x68] sm:$0xff] }
  0x24   : > { %7044 = vmatpush3.bf16.msra.mxu0 %v7699_v4  ;;  %v512_v22 = vld [vmem:[%s8169_s17 + $0x70] sm:$0xff]  ;;  %v509_v23 = vld [vmem:[%s8169_s17 + $0x58] sm:$0xff]  ;;  %v515_v25 = vld [vmem:[%s8169_s17 + $0x88] sm:$0xff] }
  0x25   : > { %949 = vperm.xlu1 %7528, %v499_v6   ;;  %7530 = vset.pattern.permute.xlu0 %v12225_v1  ;;  %v516_v24 = vld [vmem:[%s8169_s17 + $0x90] sm:$0xff]  ;;  %v510_v26 = vld [vmem:[%s8169_s17 + $0x60] sm:$0xff]  ;;  %v519_v27 = vld [vmem:[%s8169_s17 + $0xa8] sm:$0xff] }
  0x26   : > { %953 = vperm.xlu0 %7530, %v500_v7   ;;  %7045 = vmatprep.subr.bf16.mxu0 %v7700_v9  ;;  %v520_v28 = vld [vmem:[%s8169_s17 + $0xb0] sm:$0xff]  ;;  %v513_v29 = vld [vmem:[%s8169_s17 + $0x78] sm:$0xff]  ;;  %v8232_v31 = vld [vmem:[%s8169_s17 + $0xc8] sm:$0xff] }
  0x27   : > { %v524_v30 = vld [vmem:[%s8169_s17 + $0xd0] sm:$0xff]  ;;  %v514_v32 = vld [vmem:[%s8169_s17 + $0x80] sm:$0xff]  ;;  %v8239_v33 = vld [vmem:[%s8169_s17 + $0xe8] sm:$0xff] }
  0x28   : > { %7046 = vmatpush3.bf16.msra.mxu0 %v7700_v9  ;;  %v528_v34 = vld [vmem:[%s8169_s17 + $0xf0] sm:$0xff]  ;;  %v517_v35 = vld [vmem:[%s8169_s17 + $0x98] sm:$0xff]  ;;  %v8248_v36 = vld [vmem:[%s8169_s17 + $0x108] sm:$0xff] }
  0x29   : > { %7529 = vset.pattern.permute.xlu1 %v12223_v2  ;;  %7047 = vmatprep.subr.bf16.mxu0 %v7701_v10  ;;  %v532_v37 = vld [vmem:[%s8169_s17 + $0x110] sm:$0xff]  ;;  %v518_v38 = vld [vmem:[%s8169_s17 + $0xa0] sm:$0xff]  ;;  %v521_v45 = vld [vmem:[%s8169_s17 + $0xb8] sm:$0xff] }
  0x2a   : > { %579 = vperm.xlu1 %7529, %v501_v8   ;;  %7531 = vset.pattern.permute.xlu0 %v12223_v2  ;;  %v536_v41 = vld [vmem:[%s8169_s17 + $0x130] sm:$0xff]  ;;  %v8273_v48 = vld [vmem:[%s8169_s17 + $0x128] sm:$0xff]  ;;  %v522_v58 = vld [vmem:[%s8169_s17 + $0xc0] sm:$0xff] }
  0x2b   : > { %569 = vperm.xlu0 %7531, %v499_v6   ;;  %v8288_v55 = vld [vmem:[%s8169_s17 + $0x148] sm:$0xff]  ;;  %v540_v61 = vld [vmem:[%s8169_s17 + $0x150] sm:$0xff] }
  0x2c   : > { %7048 = vmatpush3.bf16.msra.mxu0 %v7701_v10 }
  0x2d   : > { %7049 = vmatprep.subr.bf16.mxu0 %v7702_v11 }
  0x2e   : > { %7532 = vset.pattern.permute.xlu1 %v12225_v1 }
  0x2f   : > { %957 = vperm.xlu1 %7532, %v501_v8   ;;  %574 = vperm.xlu0 %7531, %v500_v7  }
  0x30   : > { %7050 = vmatpush3.bf16.msra.mxu0 %v7702_v11 }
  0x31   : > { %7051 = vmatprep.subr.bf16.mxu0 %v7703_v14 }
  0x33   : > { %7533 = vset.pattern.permute.xlu1 %v12223_v2  ;;  %589 = vperm.xlu0 %7531, %v503_v12  }
  0x34   : > { %584 = vperm.xlu1 %7533, %v502_v13   ;;  %7052 = vmatpush3.bf16.msra.mxu0 %v7703_v14 }
  0x35   : > { %7053 = vmatprep.subr.bf16.mxu0 %v7704_v16 }
  0x37   : > { %594 = vperm.xlu0 %7531, %v504_v15  }
  0x38   : > { %7534 = vset.pattern.permute.xlu1 %v12225_v1  ;;  %7054 = vmatpush3.bf16.msra.mxu0 %v7704_v16 }
  0x39   : > { %961 = vperm.xlu1 %7534, %v502_v13  }
  0x3b   : > { %7536 = vset.pattern.permute.xlu0 %v12225_v1 }
  0x3c   : > { %969 = vperm.xlu0 %7536, %v504_v15  }
  0x3d   : > { %965 = vperm.xlu1 %7534, %v503_v12  }
  0x40   : > { %985 = vperm.xlu0 %7536, %v508_v17  }
  0x41   : > { %7535 = vset.pattern.permute.xlu1 %v12223_v2 }
  0x42   : > { %599 = vperm.xlu1 %7535, %v505_v18  }
  0x44   : > { %7541 = vset.pattern.permute.xlu0 %v12223_v2 }
  0x45   : > { %609 = vperm.xlu0 %7541, %v507_v19  }
  0x46   : > { %7537 = vset.pattern.permute.xlu1 %v12225_v1 }
  0x47   : > { %973 = vperm.xlu1 %7537, %v505_v18  }
  0x49   : > { %614 = vperm.xlu0 %7541, %v508_v17  }
  0x4b   : > { %7538 = vset.pattern.permute.xlu1 %v12223_v2 }
  0x4c   : > { %604 = vperm.xlu1 %7538, %v506_v20  }
  0x4d   : > { %629 = vperm.xlu0 %7541, %v511_v21  }
  0x50   : > { %7539 = vset.pattern.permute.xlu1 %v12225_v1 }
  0x51   : > { %977 = vperm.xlu1 %7539, %v506_v20   ;;  %634 = vperm.xlu0 %7541, %v512_v22   ;;  %v544_v20 = vld [vmem:[%s8169_s17 + $0x170] sm:$0xff] }
  0x55   : > { %981 = vperm.xlu1 %7539, %v507_v19   ;;  %7546 = vset.pattern.permute.xlu0 %v12225_v1 }
  0x56   : > { %1001 = vperm.xlu0 %7546, %v512_v22  }
  0x59   : > { %7540 = vset.pattern.permute.xlu1 %v12223_v2 }
  0x5a   : > { %619 = vperm.xlu1 %7540, %v509_v23   ;;  %1017 = vperm.xlu0 %7546, %v516_v24  }
  0x5e   : > { %7542 = vset.pattern.permute.xlu1 %v12225_v1  ;;  %7551 = vset.pattern.permute.xlu0 %v12223_v2 }
  0x5f   : > { %989 = vperm.xlu1 %7542, %v509_v23   ;;  %649 = vperm.xlu0 %7551, %v515_v25  }
  0x63   : > { %7543 = vset.pattern.permute.xlu1 %v12223_v2  ;;  %654 = vperm.xlu0 %7551, %v516_v24   ;;  %v525_v24 = vld [vmem:[%s8169_s17 + $0xd8] sm:$0xff] }
  0x64   : > { %624 = vperm.xlu1 %7543, %v510_v26  }
  0x67   : > { %669 = vperm.xlu0 %7551, %v519_v27  }
  0x68   : > { %7544 = vset.pattern.permute.xlu1 %v12225_v1 }
  0x69   : > { %993 = vperm.xlu1 %7544, %v510_v26  }
  0x6b   : > { %674 = vperm.xlu0 %7551, %v520_v28  }
  0x6d   : > { %997 = vperm.xlu1 %7544, %v511_v21  }
  0x6f   : > { %7556 = vset.pattern.permute.xlu0 %v12225_v1 }
  0x70   : > { %1033 = vperm.xlu0 %7556, %v520_v28  }
  0x71   : > { %7545 = vset.pattern.permute.xlu1 %v12223_v2 }
  0x72   : > { %639 = vperm.xlu1 %7545, %v513_v29  }
  0x74   : > { %1049 = vperm.xlu0 %7556, %v524_v30  }
  0x76   : > { %7547 = vset.pattern.permute.xlu1 %v12225_v1 }
  0x77   : > { %1005 = vperm.xlu1 %7547, %v513_v29   ;;  %v8318_v29 = vld [vmem:[%s8169_s17 + $0x168] sm:$0xff] }
  0x78   : > { %7561 = vset.pattern.permute.xlu0 %v12223_v2 }
  0x79   : > { %689 = vperm.xlu0 %7561, %v8232_v31  }
  0x7b   : > { %7548 = vset.pattern.permute.xlu1 %v12223_v2 }
  0x7c   : > { %644 = vperm.xlu1 %7548, %v514_v32  }
  0x7d   : > { %694 = vperm.xlu0 %7561, %v524_v30  }
  0x80   : > { %7549 = vset.pattern.permute.xlu1 %v12225_v1 }
  0x81   : > { %1009 = vperm.xlu1 %7549, %v514_v32   ;;  %709 = vperm.xlu0 %7561, %v8239_v33  }
  0x85   : > { %1013 = vperm.xlu1 %7549, %v515_v25   ;;  %714 = vperm.xlu0 %7561, %v528_v34  }
  0x89   : > { %7550 = vset.pattern.permute.xlu1 %v12223_v2  ;;  %7566 = vset.pattern.permute.xlu0 %v12225_v1 }
  0x8a   : > { %659 = vperm.xlu1 %7550, %v517_v35   ;;  %1065 = vperm.xlu0 %7566, %v528_v34  }
  0x8e   : > { %7552 = vset.pattern.permute.xlu1 %v12225_v1  ;;  %7569 = vset.pattern.permute.xlu0 %v12223_v2 }
  0x8f   : > { %1021 = vperm.xlu1 %7552, %v517_v35   ;;  %729 = vperm.xlu0 %7569, %v8248_v36  }
  0x93   : > { %7553 = vset.pattern.permute.xlu1 %v12223_v2  ;;  %734 = vperm.xlu0 %7569, %v532_v37  }
  0x94   : > { %664 = vperm.xlu1 %7553, %v518_v38  }
  0x97   : > { %7572 = vset.pattern.permute.xlu0 %v12225_v1 }
  0x98   : > { %7554 = vset.pattern.permute.xlu1 %v12225_v1  ;;  %1081 = vperm.xlu0 %7572, %v532_v37  }
  0x99   : > { %1025 = vperm.xlu1 %7554, %v518_v38  }
  0x9c   : > { %1097 = vperm.xlu0 %7572, %v536_v41  }
  0x9d   : > { %1029 = vperm.xlu1 %7554, %v519_v27  }
  0xa0   : > { %v946_v46 = vpop.permute.xlu1 %945  ;;  %v565_v47 = vpop.permute.xlu0 %564  ;;  %7577 = vset.pattern.permute.xlu0 %v12223_v2 }
  0xa1   : > { %7555 = vset.pattern.permute.xlu1 %v12223_v2  ;;  %749 = vperm.xlu0 %7577, %v8273_v48   ;;  %v1200_v52 = vmul.f32 %v8277_v49, %v946_v46  ;;  %v881_v53 = vmul.f32 %v8280_v50, %v565_v47  ;;  %v526_v46 = vld [vmem:[%s8169_s17 + $0xe0] sm:$0xff] }
  0xa2   : > { %679 = vperm.xlu1 %7555, %v521_v45  }
  0xa3   : > { %v1263_v56 = vadd.f32 %v1200_v52, %v881_v53  ;;  %v8332_v53 = vld [vmem:[%s8169_s17 + $0x188] sm:$0xff] }
  0xa4   : > { %v950_v51 = vpop.permute.xlu1 %949 }
  0xa5   : > { %v954_v54 = vpop.permute.xlu0 %953  ;;  %754 = vperm.xlu0 %7577, %v536_v41   ;;  %v1201_v62 = vmul.f32 %v8277_v49, %v950_v51  ;;  %v1333_v3 = vadd.f32 %v8295_v60, %v1263_v56 }
  0xa6   : > { %7557 = vset.pattern.permute.xlu1 %v12225_v1  ;;  %v1202_v4 = vmul.f32 %v8277_v49, %v954_v54 }
  0xa7   : > { %1037 = vperm.xlu1 %7557, %v521_v45   ;;  %v1396_v13 = vmax.f32 %v1333_v3, 0.0 }
  0xa9   : > { %v580_v57 = vpop.permute.xlu1 %579  ;;  %769 = vperm.xlu0 %7577, %v8288_v55  }
  0xaa   : > { %v570_v59 = vpop.permute.xlu0 %569  ;;  %v884_v7 = vmul.f32 %v8280_v50, %v580_v57 }
  0xab   : > { %v882_v63 = vmul.f32 %v8280_v50, %v570_v59  ;;  %7558 = vset.pattern.permute.xlu1 %v12223_v2 }
  0xac   : > { %684 = vperm.xlu1 %7558, %v522_v58  }
  0xad   : > { %v1264_v0 = vadd.f32 %v1201_v62, %v882_v63  ;;  %774 = vperm.xlu0 %7577, %v540_v61   ;;  %v548_v63 = vld [vmem:[%s8169_s17 + $0x190] sm:$0xff] }
  0xae   : > { %v958_v5 = vpop.permute.xlu1 %957  ;;  %v575_v6 = vpop.permute.xlu0 %574 }
  0xaf   : > { %v1203_v8 = vmul.f32 %v8277_v49, %v958_v5  ;;  %v883_v9 = vmul.f32 %v8280_v50, %v575_v6  ;;  %v1334_v10 = vadd.f32 %v8295_v60, %v1264_v0 }
  0xb0   : > { %7559 = vset.pattern.permute.xlu1 %v12225_v1 }
  0xb1   : > { %v1266_v11 = vadd.f32 %v1203_v8, %v884_v7  ;;  %v1265_v12 = vadd.f32 %v1202_v4, %v883_v9  ;;  %1041 = vperm.xlu1 %7559, %v522_v58   ;;  %v1397_v14 = vmax.f32 %v1334_v10, 0.0  ;;  %7582 = vset.pattern.permute.xlu0 %v12225_v1  ;;  %v529_v8 = vld [vmem:[%s8169_s17 + $0xf8] sm:$0xff] }
  0xb2   : > { %v590_v15 = vpop.permute.xlu0 %589  ;;  %1113 = vperm.xlu0 %7582, %v540_v61  }
  0xb3   : > { %v1336_v16 = vadd.f32 %v8295_v60, %v1266_v11  ;;  %v1335_v17 = vadd.f32 %v8295_v60, %v1265_v12  ;;  %v585_v18 = vpop.permute.xlu1 %584  ;;  %v1459_v19 = vpack.c.bf16 %v1397_v14, %v1396_v13  ;;  %v886_v32 = vmul.f32 %v8280_v50, %v590_v15 }
  0xb4   : > { %v885_v27 = vmul.f32 %v8280_v50, %v585_v18 }
  0xb5   : > { %1045 = vperm.xlu1 %7559, %v8232_v31   ;;  %7055 = vmatprep.mubr.bf16.mxu0 %v1459_v19  ;;  %v1398_v21 = vmax.f32 %v1335_v17, 0.0  ;;  %v1399_v22 = vmax.f32 %v1336_v16, 0.0 }
  0xb6   : > { %1129 = vperm.xlu0 %7582, %v544_v20   ;;  %v595_v25 = vpop.permute.xlu0 %594 }
  0xb7   : > { %v1460_v23 = vpack.c.bf16 %v1399_v22, %v1398_v21  ;;  %v887_v47 = vmul.f32 %v8280_v50, %v595_v25  ;;  %v530_v22 = vld [vmem:[%s8169_s17 + $0x100] sm:$0xff] }
  0xb8   : > { %v962_v26 = vpop.permute.xlu1 %961 }
  0xb9   : > { %v1204_v28 = vmul.f32 %v8277_v49, %v962_v26  ;;  %7560 = vset.pattern.permute.xlu1 %v12223_v2  ;;  %7056 = vmatmul.mubr.bf16.vlgmr.msra.gmra.mrb[0].mxu0 %v1460_v23 }
  0xba   : > { %699 = vperm.xlu1 %7560, %v525_v24   ;;  %7587 = vset.pattern.permute.xlu0 %v12223_v2 }
  0xbb   : > { %v1267_v30 = vadd.f32 %v1204_v28, %v885_v27  ;;  %789 = vperm.xlu0 %7587, %v8318_v29   ;;  %v970_v35 = vpop.permute.xlu0 %969  ;;  %v552_v28 = vld [vmem:[%s8169_s17 + $0x1b0] sm:$0xff] }
  0xbc   : > { %v966_v31 = vpop.permute.xlu1 %965  ;;  %v1206_v41 = vmul.f32 %v8277_v49, %v970_v35 }
  0xbd   : > { %v1205_v34 = vmul.f32 %v8277_v49, %v966_v31  ;;  %v1337_v37 = vadd.f32 %v8295_v60, %v1267_v30 }
  0xbe   : > { %7562 = vset.pattern.permute.xlu1 %v12225_v1  ;;  %v1269_v54 = vadd.f32 %v1206_v41, %v887_v47 }
  0xbf   : > { %v1268_v38 = vadd.f32 %v1205_v34, %v886_v32  ;;  %1053 = vperm.xlu1 %7562, %v525_v24   ;;  %794 = vperm.xlu0 %7587, %v544_v20   ;;  %v1400_v51 = vmax.f32 %v1337_v37, 0.0  ;;  %v986_v0 = vpop.permute.xlu0 %985 }
  0xc0   : > { %v1339_v61 = vadd.f32 %v8295_v60, %v1269_v54  ;;  %v1210_v23 = vmul.f32 %v8277_v49, %v986_v0 }
  0xc1   : > { %v1338_v44 = vadd.f32 %v8295_v60, %v1268_v38  ;;  %v600_v45 = vpop.permute.xlu1 %599  ;;  %v8362_v38 = vld [vmem:[%s8169_s17 + $0x1a8] sm:$0xff] }
  0xc2   : > { %v888_v58 = vmul.f32 %v8280_v50, %v600_v45  ;;  %v1402_v5 = vmax.f32 %v1339_v61, 0.0 }
  0xc3   : > { %7563 = vset.pattern.permute.xlu1 %v12223_v2  ;;  %v1401_v52 = vmax.f32 %v1338_v44, 0.0  ;;  %809 = vperm.xlu0 %7587, %v8332_v53  }
  0xc4   : > { %704 = vperm.xlu1 %7563, %v526_v46   ;;  %v610_v9 = vpop.permute.xlu0 %609 }
  0xc5   : > { %v1461_v56 = vpack.c.bf16 %v1401_v52, %v1400_v51  ;;  %v533_v51 = vld [vmem:[%s8169_s17 + $0x118] sm:$0xff] }
  0xc6   : > { %v974_v57 = vpop.permute.xlu1 %973 }
  0xc7   : > { %v1207_v59 = vmul.f32 %v8277_v49, %v974_v57  ;;  %7059 = vmatprep.mubr.bf16.mxu0 %v1461_v56  ;;  %814 = vperm.xlu0 %7587, %v548_v63  }
  0xc8   : > { %7564 = vset.pattern.permute.xlu1 %v12225_v1  ;;  %v615_v16 = vpop.permute.xlu0 %614 }
  0xc9   : > { %v1270_v62 = vadd.f32 %v1207_v59, %v888_v58  ;;  %1057 = vperm.xlu1 %7564, %v526_v46   ;;  %v891_v19 = vmul.f32 %v8280_v50, %v615_v16 }
  0xcb   : > { %v1340_v3 = vadd.f32 %v8295_v60, %v1270_v62  ;;  %v605_v4 = vpop.permute.xlu1 %604  ;;  %7592 = vset.pattern.permute.xlu0 %v12225_v1  ;;  %v1273_v26 = vadd.f32 %v1210_v23, %v891_v19  ;;  %v7706_v19 = vld [vmem:[%s12210_s5 + $0x8] sm:$0xff]  }
  0xcc   : > { %1145 = vperm.xlu0 %7592, %v548_v63   ;;  %v889_v11 = vmul.f32 %v8280_v50, %v605_v4  ;;  %v630_v37 = vpop.permute.xlu0 %629 }
  0xcd   : > { %1061 = vperm.xlu1 %7564, %v8239_v33   ;;  %v1403_v6 = vmax.f32 %v1340_v3, 0.0  ;;  %v890_v33 = vmul.f32 %v8280_v50, %v610_v9  ;;  %v1343_v34 = vadd.f32 %v8295_v60, %v1273_v26 }
  0xcf   : > { %v1462_v7 = vpack.c.bf16 %v1403_v6, %v1402_v5  ;;  %v1406_v45 = vmax.f32 %v1343_v34, 0.0 }
  0xd0   : > { %v978_v10 = vpop.permute.xlu1 %977  ;;  %1161 = vperm.xlu0 %7592, %v552_v28   ;;  %v635_v52 = vpop.permute.xlu0 %634 }
  0xd1   : > { %v1208_v12 = vmul.f32 %v8277_v49, %v978_v10  ;;  %7565 = vset.pattern.permute.xlu1 %v12223_v2  ;;  %7060 = vmatmul.mubr.bf16.gmra.mrb[4].mxu0 %v1462_v7  ;;  %v895_v3 = vmul.f32 %v8280_v50, %v635_v52  ;;  %v534_v7 = vld [vmem:[%s8169_s17 + $0x120] sm:$0xff]  ;;  %v8382_v10 = vld [vmem:[%s8169_s17 + $0x1c8] sm:$0xff] }
  0xd2   : > { %719 = vperm.xlu1 %7565, %v529_v8  }
  0xd3   : > { %v1271_v13 = vadd.f32 %v1208_v12, %v889_v11 }
  0xd4   : > { %v982_v14 = vpop.permute.xlu1 %981  ;;  %7597 = vset.pattern.permute.xlu0 %v12223_v2 }
  0xd5   : > { %v1209_v15 = vmul.f32 %v8277_v49, %v982_v14  ;;  %v1341_v17 = vadd.f32 %v8295_v60, %v1271_v13  ;;  %829 = vperm.xlu0 %7597, %v8362_v38   ;;  %v1002_v62 = vpop.permute.xlu0 %1001 }
  0xd6   : > { %7567 = vset.pattern.permute.xlu1 %v12225_v1  ;;  %v1214_v4 = vmul.f32 %v8277_v49, %v1002_v62 }
  0xd7   : > { %v1272_v18 = vadd.f32 %v1209_v15, %v890_v33  ;;  %1069 = vperm.xlu1 %7567, %v529_v8   ;;  %v1404_v24 = vmax.f32 %v1341_v17, 0.0  ;;  %v7705_v33 = vld [vmem:[%s12210_s5] sm:$0xff]  }
  0xd8   : > { %v1277_v11 = vadd.f32 %v1214_v4, %v895_v3  ;;  %7119 = vmatprep.subr.bf16.mxu1 %v7705_v33 }
  0xd9   : > { %v1342_v20 = vadd.f32 %v8295_v60, %v1272_v18  ;;  %v620_v21 = vpop.permute.xlu1 %619  ;;  %834 = vperm.xlu0 %7597, %v552_v28   ;;  %7120 = vmatpush3.bf16.msra.mxu1 %v7705_v33  ;;  %v556_v18 = vld [vmem:[%s8169_s17 + $0x1d0] sm:$0xff] }
  0xda   : > { %v892_v31 = vmul.f32 %v8280_v50, %v620_v21  ;;  %v1347_v16 = vadd.f32 %v8295_v60, %v1277_v11  ;;  %7121 = vmatprep.subr.bf16.mxu1 %v7706_v19 }
  0xdb   : > { %7568 = vset.pattern.permute.xlu1 %v12223_v2  ;;  %v1405_v25 = vmax.f32 %v1342_v20, 0.0  ;;  %v1018_v20 = vpop.permute.xlu0 %1017 }
  0xdc   : > { %724 = vperm.xlu1 %7568, %v530_v22   ;;  %v1410_v23 = vmax.f32 %v1347_v16, 0.0  ;;  %v541_v16 = vld [vmem:[%s8169_s17 + $0x158] sm:$0xff] }
  0xdd   : > { %v1463_v27 = vpack.c.bf16 %v1405_v25, %v1404_v24  ;;  %849 = vperm.xlu0 %7597, %v8382_v10   ;;  %7122 = vmatpush3.bf16.msra.mxu1 %v7706_v19  ;;  %v7707_v25 = vld [vmem:[%s12210_s5 + $0x10] sm:$0xff]  }
  0xde   : > { %v990_v30 = vpop.permute.xlu1 %989  ;;  %7123 = vmatprep.subr.bf16.mxu1 %v7707_v25 }
  0xdf   : > { %v1211_v32 = vmul.f32 %v8277_v49, %v990_v30  ;;  %7063 = vmatprep.mubr.bf16.mxu0 %v1463_v27  ;;  %v537_v27 = vld [vmem:[%s8169_s17 + $0x138] sm:$0xff]  ;;  %v650_v28 = vpop.permute.xlu0 %649 }
  0xe0   : > { %7570 = vset.pattern.permute.xlu1 %v12225_v1  ;;  %v898_v34 = vmul.f32 %v8280_v50, %v650_v28 }
  0xe1   : > { %v1274_v35 = vadd.f32 %v1211_v32, %v892_v31  ;;  %1073 = vperm.xlu1 %7570, %v530_v22   ;;  %854 = vperm.xlu0 %7597, %v556_v18  }
  0xe2   : > { %7124 = vmatpush3.bf16.msra.mxu1 %v7707_v25 }
  0xe3   : > { %v1344_v41 = vadd.f32 %v8295_v60, %v1274_v35  ;;  %v625_v44 = vpop.permute.xlu1 %624 }
  0xe4   : > { %v893_v56 = vmul.f32 %v8280_v50, %v625_v44  ;;  %v7709_v44 = vld [vmem:[%s12210_s5 + $0x20] sm:$0xff]  }
  0xe5   : > { %1077 = vperm.xlu1 %7570, %v8248_v36   ;;  %v1407_v46 = vmax.f32 %v1344_v41, 0.0  ;;  %v894_v36 = vmul.f32 %v8280_v50, %v630_v37  ;;  %7602 = vset.pattern.permute.xlu0 %v12225_v1 }
  0xe6   : > { %1177 = vperm.xlu0 %7602, %v556_v18  }
  0xe7   : > { %v1464_v47 = vpack.c.bf16 %v1407_v46, %v1406_v45  ;;  %v655_v45 = vpop.permute.xlu0 %654 }
  0xe8   : > { %v994_v54 = vpop.permute.xlu1 %993  ;;  %v899_v52 = vmul.f32 %v8280_v50, %v655_v45 }
  0xe9   : > { %v1212_v57 = vmul.f32 %v8277_v49, %v994_v54  ;;  %7571 = vset.pattern.permute.xlu1 %v12223_v2  ;;  %7064 = vmatmul.mubr.bf16.gmra.mrb[8].mxu0 %v1464_v47 }
  0xea   : > { %739 = vperm.xlu1 %7571, %v533_v51   ;;  %7605 = vset.pattern.permute.xlu0 %v12223_v2 }
  0xeb   : > { %v1275_v58 = vadd.f32 %v1212_v57, %v893_v56  ;;  %v538_v57 = vld [vmem:[%s8169_s17 + $0x140] sm:$0xff] }
  0xec   : > { %v998_v59 = vpop.permute.xlu1 %997 }
  0xed   : > { %v1213_v61 = vmul.f32 %v8277_v49, %v998_v59  ;;  %v1345_v63 = vadd.f32 %v8295_v60, %v1275_v58  ;;  %v7710_v58 = vld [vmem:[%s12210_s5 + $0x28] sm:$0xff]  }
  0xee   : > { %7573 = vset.pattern.permute.xlu1 %v12225_v1 }
  0xef   : > { %v1276_v0 = vadd.f32 %v1213_v61, %v894_v36  ;;  %1085 = vperm.xlu1 %7573, %v533_v51   ;;  %v1408_v8 = vmax.f32 %v1345_v63, 0.0  ;;  %v1218_v51 = vmul.f32 %v8277_v49, %v1018_v20  ;;  %v7711_v63 = vld [vmem:[%s12210_s5 + $0x30] sm:$0xff]  }
  0xf1   : > { %v1346_v5 = vadd.f32 %v8295_v60, %v1276_v0  ;;  %v640_v6 = vpop.permute.xlu1 %639  ;;  %v1281_v61 = vadd.f32 %v1218_v51, %v899_v52 }
  0xf2   : > { %v896_v14 = vmul.f32 %v8280_v50, %v640_v6 }
  0xf3   : > { %7574 = vset.pattern.permute.xlu1 %v12223_v2  ;;  %v1409_v9 = vmax.f32 %v1346_v5, 0.0  ;;  %v1351_v5 = vadd.f32 %v8295_v60, %v1281_v61 }
  0xf4   : > { %744 = vperm.xlu1 %7574, %v534_v7  }
  0xf5   : > { %v1465_v12 = vpack.c.bf16 %v1409_v9, %v1408_v8  ;;  %v7712_v8 = vld [vmem:[%s12210_s5 + $0x38] sm:$0xff]   ;;  %v670_v9 = vpop.permute.xlu0 %669  ;;  %v1414_v33 = vmax.f32 %v1351_v5, 0.0 }
  0xf6   : > { %v1006_v13 = vpop.permute.xlu1 %1005 }
  0xf7   : > { %v1215_v15 = vmul.f32 %v8277_v49, %v1006_v13  ;;  %7067 = vmatprep.mubr.bf16.mxu0 %v1465_v12 }
  0xf8   : > { %7575 = vset.pattern.permute.xlu1 %v12225_v1 }
  0xf9   : > { %v1278_v17 = vadd.f32 %v1215_v15, %v896_v14  ;;  %1089 = vperm.xlu1 %7575, %v534_v7   ;;  %v8433_v7 = vld [vmem:[%s8169_s17 + $0x1e8] sm:$0xff]  ;;  %v8442_v14 = vld [vmem:[%s8169_s17 + $0x1f0] sm:$0xff] }
  0xfa   : > { %869 = vperm.xlu0 %7605, %v8433_v7  }
  0xfb   : > { %v1348_v21 = vadd.f32 %v8295_v60, %v1278_v17  ;;  %v645_v22 = vpop.permute.xlu1 %644  ;;  %v675_v17 = vpop.permute.xlu0 %674 }
  0xfc   : > { %v897_v31 = vmul.f32 %v8280_v50, %v645_v22  ;;  %v902_v22 = vmul.f32 %v8280_v50, %v670_v9 }
  0xfd   : > { %1093 = vperm.xlu1 %7575, %v8273_v48   ;;  %v1411_v24 = vmax.f32 %v1348_v21, 0.0  ;;  %v7708_v48 = vld [vmem:[%s12210_s5 + $0x18] sm:$0xff]  }
  0xfe   : > { %7125 = vmatprep.subr.bf16.mxu1 %v7708_v48  ;;  %874 = vperm.xlu0 %7605, %v8442_v14  }
  0xff   : > { %v1466_v26 = vpack.c.bf16 %v1411_v24, %v1410_v23  ;;  %7126 = vmatpush3.bf16.msra.mxu1 %v7708_v48  ;;  %v1034_v24 = vpop.permute.xlu0 %1033 }
 0x100   : > { %v1010_v30 = vpop.permute.xlu1 %1009  ;;  %7127 = vmatprep.subr.bf16.mxu1 %v7709_v44  ;;  %v1222_v28 = vmul.f32 %v8277_v49, %v1034_v24 }
 0x101   : > { %v1216_v32 = vmul.f32 %v8277_v49, %v1010_v30  ;;  %7576 = vset.pattern.permute.xlu1 %v12223_v2  ;;  %7068 = vmatmul.mubr.bf16.gmra.mrb[12].mxu0 %v1466_v26 }
 0x102   : > { %759 = vperm.xlu1 %7576, %v537_v27  }
 0x103   : > { %v1279_v35 = vadd.f32 %v1216_v32, %v897_v31  ;;  %7128 = vmatpush3.bf16.msra.mxu1 %v7709_v44  ;;  %v542_v32 = vld [vmem:[%s8169_s17 + $0x160] sm:$0xff]  ;;  %v1050_v51 = vpop.permute.xlu0 %1049 }
 0x104   : > { %v1014_v37 = vpop.permute.xlu1 %1013  ;;  %7129 = vmatprep.subr.bf16.mxu1 %v7710_v58  ;;  %v1226_v9 = vmul.f32 %v8277_v49, %v1050_v51 }
 0x105   : > { %v1217_v41 = vmul.f32 %v8277_v49, %v1014_v37  ;;  %v1349_v46 = vadd.f32 %v8295_v60, %v1279_v35 }
 0x106   : > { %7578 = vset.pattern.permute.xlu1 %v12225_v1 }
 0x107   : > { %v1280_v47 = vadd.f32 %v1217_v41, %v898_v34  ;;  %1101 = vperm.xlu1 %7578, %v537_v27   ;;  %v1412_v59 = vmax.f32 %v1349_v46, 0.0  ;;  %7130 = vmatpush3.bf16.msra.mxu1 %v7710_v58  ;;  %v903_v27 = vmul.f32 %v8280_v50, %v675_v17 }
 0x108   : > { %7131 = vmatprep.subr.bf16.mxu1 %v7711_v63 }
 0x109   : > { %v1350_v54 = vadd.f32 %v8295_v60, %v1280_v47  ;;  %v660_v56 = vpop.permute.xlu1 %659  ;;  %v1285_v35 = vadd.f32 %v1222_v28, %v903_v27 }
 0x10a   : > { %v900_v3 = vmul.f32 %v8280_v50, %v660_v56 }
 0x10b   : > { %7579 = vset.pattern.permute.xlu1 %v12223_v2  ;;  %v1413_v36 = vmax.f32 %v1350_v54, 0.0  ;;  %7132 = vmatpush3.bf16.msra.mxu1 %v7711_v63  ;;  %v1355_v46 = vadd.f32 %v8295_v60, %v1285_v35 }
 0x10c   : > { %764 = vperm.xlu1 %7579, %v538_v57   ;;  %7133 = vmatprep.subr.bf16.mxu1 %v7712_v8 }
 0x10d   : > { %v1467_v62 = vpack.c.bf16 %v1413_v36, %v1412_v59  ;;  %v1418_v56 = vmax.f32 %v1355_v46, 0.0  ;;  %v545_v59 = vld [vmem:[%s8169_s17 + $0x178] sm:$0xff]  ;;  %v690_v36 = vpop.permute.xlu0 %689 }
 0x10e   : > { %v1022_v0 = vpop.permute.xlu1 %1021 }
 0x10f   : > { %v1219_v4 = vmul.f32 %v8277_v49, %v1022_v0  ;;  %7071 = vmatprep.mubr.bf16.mxu0 %v1467_v62  ;;  %7134 = vmatpush3.bf16.msra.mxu1 %v7712_v8  ;;  %v906_v0 = vmul.f32 %v8280_v50, %v690_v36 }
 0x110   : > { %7580 = vset.pattern.permute.xlu1 %v12225_v1 }
 0x111   : > { %v1282_v6 = vadd.f32 %v1219_v4, %v900_v3  ;;  %1105 = vperm.xlu1 %7580, %v538_v57   ;;  %v695_v5 = vpop.permute.xlu0 %694 }
 0x113   : > { %v1352_v11 = vadd.f32 %v8295_v60, %v1282_v6  ;;  %v665_v12 = vpop.permute.xlu1 %664 }
 0x114   : > { %v901_v19 = vmul.f32 %v8280_v50, %v665_v12 }
 0x115   : > { %1109 = vperm.xlu1 %7580, %v8288_v55   ;;  %v1415_v13 = vmax.f32 %v1352_v11, 0.0  ;;  %v907_v11 = vmul.f32 %v8280_v50, %v695_v5 }
 0x117   : > { %v1468_v15 = vpack.c.bf16 %v1415_v13, %v1414_v33  ;;  %v546_v13 = vld [vmem:[%s8169_s17 + $0x180] sm:$0xff]  ;;  %v1289_v17 = vadd.f32 %v1226_v9, %v907_v11 }
 0x118   : > { %v1026_v18 = vpop.permute.xlu1 %1025 }
 0x119   : > { %v1220_v20 = vmul.f32 %v8277_v49, %v1026_v18  ;;  %7581 = vset.pattern.permute.xlu1 %v12223_v2  ;;  %7072 = vmatmul.mubr.bf16.gmra.mrb[16].mxu0 %v1468_v15 }
 0x11a   : > { %779 = vperm.xlu1 %7581, %v541_v16  }
 0x11b   : > { %v1283_v55 = vadd.f32 %v1220_v20, %v901_v19 }
 0x11c   : > { %v1030_v21 = vpop.permute.xlu1 %1029 }
 0x11d   : > { %v1221_v23 = vmul.f32 %v8277_v49, %v1030_v21  ;;  %v1353_v25 = vadd.f32 %v8295_v60, %v1283_v55  ;;  %v1359_v21 = vadd.f32 %v8295_v60, %v1289_v17 }
 0x11e   : > { %7583 = vset.pattern.permute.xlu1 %v12225_v1 }
 0x11f   : > { %v1284_v26 = vadd.f32 %v1221_v23, %v902_v22  ;;  %1117 = vperm.xlu1 %7583, %v541_v16   ;;  %v1416_v48 = vmax.f32 %v1353_v25, 0.0  ;;  %v710_v23 = vpop.permute.xlu0 %709 }
 0x121   : > { %v1354_v30 = vadd.f32 %v8295_v60, %v1284_v26  ;;  %v680_v31 = vpop.permute.xlu1 %679  ;;  %v1422_v26 = vmax.f32 %v1359_v21, 0.0 }
 0x122   : > { %v904_v44 = vmul.f32 %v8280_v50, %v680_v31 }
 0x123   : > { %7584 = vset.pattern.permute.xlu1 %v12223_v2  ;;  %v1417_v34 = vmax.f32 %v1354_v30, 0.0  ;;  %v549_v30 = vld [vmem:[%s8169_s17 + $0x198] sm:$0xff]  ;;  %v715_v31 = vpop.permute.xlu0 %714 }
 0x124   : > { %784 = vperm.xlu1 %7584, %v542_v32  }
 0x125   : > { %v1469_v37 = vpack.c.bf16 %v1417_v34, %v1416_v48 }
 0x126   : > { %v1038_v41 = vpop.permute.xlu1 %1037 }
 0x127   : > { %v1223_v45 = vmul.f32 %v8277_v49, %v1038_v41  ;;  %7075 = vmatprep.mubr.bf16.mxu0 %v1469_v37  ;;  %v910_v41 = vmul.f32 %v8280_v50, %v710_v23 }
 0x128   : > { %7585 = vset.pattern.permute.xlu1 %v12225_v1 }
 0x129   : > { %v1286_v47 = vadd.f32 %v1223_v45, %v904_v44  ;;  %1121 = vperm.xlu1 %7585, %v542_v32   ;;  %v1066_v44 = vpop.permute.xlu0 %1065 }
 0x12a   : > { %v1230_v51 = vmul.f32 %v8277_v49, %v1066_v44 }
 0x12b   : > { %v1356_v52 = vadd.f32 %v8295_v60, %v1286_v47  ;;  %v685_v54 = vpop.permute.xlu1 %684  ;;  %v911_v47 = vmul.f32 %v8280_v50, %v715_v31 }
 0x12c   : > { %v905_v62 = vmul.f32 %v8280_v50, %v685_v54 }
 0x12d   : > { %1125 = vperm.xlu1 %7585, %v8318_v29   ;;  %v1419_v57 = vmax.f32 %v1356_v52, 0.0 }
 0x12f   : > { %v1470_v58 = vpack.c.bf16 %v1419_v57, %v1418_v56  ;;  %v550_v56 = vld [vmem:[%s8169_s17 + $0x1a0] sm:$0xff] }
 0x130   : > { %v1042_v61 = vpop.permute.xlu1 %1041 }
 0x131   : > { %v1224_v63 = vmul.f32 %v8277_v49, %v1042_v61  ;;  %7586 = vset.pattern.permute.xlu1 %v12223_v2  ;;  %7076 = vmatmul.mubr.bf16.gmra.mrb[20].mxu0 %v1470_v58 }
 0x132   : > { %799 = vperm.xlu1 %7586, %v545_v59  }
 0x133   : > { %v1287_v3 = vadd.f32 %v1224_v63, %v905_v62 }
 0x134   : > { %v1046_v4 = vpop.permute.xlu1 %1045 }
 0x135   : > { %v1225_v29 = vmul.f32 %v8277_v49, %v1046_v4  ;;  %v1357_v6 = vadd.f32 %v8295_v60, %v1287_v3 }
 0x136   : > { %7588 = vset.pattern.permute.xlu1 %v12225_v1 }
 0x137   : > { %v1288_v8 = vadd.f32 %v1225_v29, %v906_v0  ;;  %1133 = vperm.xlu1 %7588, %v545_v59   ;;  %v1420_v15 = vmax.f32 %v1357_v6, 0.0  ;;  %v1293_v59 = vadd.f32 %v1230_v51, %v911_v47  ;;  %v730_v0 = vpop.permute.xlu0 %729 }
 0x138   : > { %v914_v17 = vmul.f32 %v8280_v50, %v730_v0 }
 0x139   : > { %v1358_v12 = vadd.f32 %v8295_v60, %v1288_v8  ;;  %v700_v33 = vpop.permute.xlu1 %699  ;;  %v1363_v3 = vadd.f32 %v8295_v60, %v1293_v59 }
 0x13a   : > { %v908_v20 = vmul.f32 %v8280_v50, %v700_v33  ;;  %v553_v33 = vld [vmem:[%s8169_s17 + $0x1b8] sm:$0xff] }
 0x13b   : > { %7589 = vset.pattern.permute.xlu1 %v12223_v2  ;;  %v1421_v16 = vmax.f32 %v1358_v12, 0.0  ;;  %v1426_v6 = vmax.f32 %v1363_v3, 0.0  ;;  %v735_v9 = vpop.permute.xlu0 %734 }
 0x13c   : > { %804 = vperm.xlu1 %7589, %v546_v13   ;;  %v915_v21 = vmul.f32 %v8280_v50, %v735_v9 }
 0x13d   : > { %v1471_v18 = vpack.c.bf16 %v1421_v16, %v1420_v15 }
 0x13e   : > { %v1054_v19 = vpop.permute.xlu1 %1053 }
 0x13f   : > { %v1227_v55 = vmul.f32 %v8277_v49, %v1054_v19  ;;  %7079 = vmatprep.mubr.bf16.mxu0 %v1471_v18 }
 0x140   : > { %7590 = vset.pattern.permute.xlu1 %v12225_v1 }
 0x141   : > { %v1290_v22 = vadd.f32 %v1227_v55, %v908_v20  ;;  %1137 = vperm.xlu1 %7590, %v546_v13  }
 0x143   : > { %v1360_v24 = vadd.f32 %v8295_v60, %v1290_v22  ;;  %v705_v25 = vpop.permute.xlu1 %704 }
 0x144   : > { %v909_v48 = vmul.f32 %v8280_v50, %v705_v25  ;;  %v554_v25 = vld [vmem:[%s8169_s17 + $0x1c0] sm:$0xff] }
 0x145   : > { %1141 = vperm.xlu1 %7590, %v8332_v53   ;;  %v1423_v27 = vmax.f32 %v1360_v24, 0.0 }
 0x147   : > { %v1472_v28 = vpack.c.bf16 %v1423_v27, %v1422_v26 }
 0x148   : > { %v1058_v32 = vpop.permute.xlu1 %1057 }
 0x149   : > { %v1228_v34 = vmul.f32 %v8277_v49, %v1058_v32  ;;  %7591 = vset.pattern.permute.xlu1 %v12223_v2  ;;  %7080 = vmatmul.mubr.bf16.gmra.mrb[24].mxu0 %v1472_v28 }
 0x14a   : > { %819 = vperm.xlu1 %7591, %v549_v30  }
 0x14b   : > { %v1291_v35 = vadd.f32 %v1228_v34, %v909_v48 }
 0x14c   : > { %v1062_v37 = vpop.permute.xlu1 %1061 }
 0x14d   : > { %v1229_v53 = vmul.f32 %v8277_v49, %v1062_v37  ;;  %v1361_v45 = vadd.f32 %v8295_v60, %v1291_v35 }
 0x14e   : > { %7593 = vset.pattern.permute.xlu1 %v12225_v1 }
 0x14f   : > { %v1292_v46 = vadd.f32 %v1229_v53, %v910_v41  ;;  %1149 = vperm.xlu1 %7593, %v549_v30   ;;  %v1424_v57 = vmax.f32 %v1361_v45, 0.0 }
 0x151   : > { %v1362_v52 = vadd.f32 %v8295_v60, %v1292_v46  ;;  %v720_v54 = vpop.permute.xlu1 %719 }
 0x152   : > { %v912_v62 = vmul.f32 %v8280_v50, %v720_v54 }
 0x153   : > { %7594 = vset.pattern.permute.xlu1 %v12223_v2  ;;  %v1425_v58 = vmax.f32 %v1362_v52, 0.0  ;;  %v557_v52 = vld [vmem:[%s8169_s17 + $0x1d8] sm:$0xff] }
 0x154   : > { %824 = vperm.xlu1 %7594, %v550_v56  }
 0x155   : > { %v1473_v36 = vpack.c.bf16 %v1425_v58, %v1424_v57 }
 0x156   : > { %v1070_v61 = vpop.permute.xlu1 %1069 }
 0x157   : > { %v1231_v63 = vmul.f32 %v8277_v49, %v1070_v61  ;;  %7083 = vmatprep.mubr.bf16.mxu0 %v1473_v36 }
 0x158   : > { %7595 = vset.pattern.permute.xlu1 %v12225_v1 }
 0x159   : > { %v1294_v4 = vadd.f32 %v1231_v63, %v912_v62  ;;  %1153 = vperm.xlu1 %7595, %v550_v56  }
 0x15b   : > { %v1364_v29 = vadd.f32 %v8295_v60, %v1294_v4  ;;  %v725_v5 = vpop.permute.xlu1 %724 }
 0x15c   : > { %v913_v11 = vmul.f32 %v8280_v50, %v725_v5 }
 0x15d   : > { %1157 = vperm.xlu1 %7595, %v8362_v38   ;;  %v1427_v8 = vmax.f32 %v1364_v29, 0.0  ;;  %v1082_v38 = vpop.permute.xlu0 %1081  ;;  %v558_v29 = vld [vmem:[%s8169_s17 + $0x1e0] sm:$0xff]  ;;  %s8023_s17 = smov [#allocation3]  }
 0x15e   : > { %v1234_v22 = vmul.f32 %v8277_v49, %v1082_v38  ;;  %s7961_s27 = sshll.u32 %s8023_s17, 4  ;;  %s7962_s27 = int_to_ptr.vmem [resolvable:$false] %s7961_s27 }
 0x15f   : > { %v1474_v12 = vpack.c.bf16 %v1427_v8, %v1426_v6  ;;  %s7963_s16 = scalar_lea.vmem %s7962_s27, 16128 }
 0x160   : > { %v1074_v13 = vpop.permute.xlu1 %1073  ;;  %v1297_v27 = vadd.f32 %v1234_v22, %v915_v21 }
 0x161   : > { %7596 = vset.pattern.permute.xlu1 %v12223_v2  ;;  %7084 = vmatmul.mubr.bf16.gmra.mrb[28].mxu0 %v1474_v12  ;;  %v1232_v15 = vmul.f32 %v8277_v49, %v1074_v13  ;;  %v1098_v35 = vpop.permute.xlu0 %1097 }
 0x162   : > { %839 = vperm.xlu1 %7596, %v553_v33   ;;  %v1367_v34 = vadd.f32 %v8295_v60, %v1297_v27  ;;  %v1238_v62 = vmul.f32 %v8277_v49, %v1098_v35 }
 0x163   : > { %v1295_v16 = vadd.f32 %v1232_v15, %v913_v11 }
 0x164   : > { %v1078_v18 = vpop.permute.xlu1 %1077  ;;  %v1430_v44 = vmax.f32 %v1367_v34, 0.0 }
 0x165   : > { %v1365_v19 = vadd.f32 %v8295_v60, %v1295_v16  ;;  %v1233_v20 = vmul.f32 %v8277_v49, %v1078_v18  ;;  %v750_v46 = vpop.permute.xlu0 %749 }
 0x166   : > { %7598 = vset.pattern.permute.xlu1 %v12225_v1  ;;  %v918_v58 = vmul.f32 %v8280_v50, %v750_v46 }
 0x167   : > { %v1296_v55 = vadd.f32 %v1233_v20, %v914_v17  ;;  %1165 = vperm.xlu1 %7598, %v553_v33   ;;  %v1428_v26 = vmax.f32 %v1365_v19, 0.0  ;;  %v8541_v17 = vld [vmem:[%s12209_s4] ss:$0 sm:$0xff] }
 0x169   : > { %v1366_v23 = vadd.f32 %v8295_v60, %v1296_v55  ;;  %v740_v24 = vpop.permute.xlu1 %739  ;;  %v755_v36 = vpop.permute.xlu0 %754 }
 0x16a   : > { %v916_v30 = vmul.f32 %v8280_v50, %v740_v24  ;;  %v919_v0 = vmul.f32 %v8280_v50, %v755_v36 }
 0x16b   : > { %7599 = vset.pattern.permute.xlu1 %v12223_v2  ;;  %v1429_v28 = vmax.f32 %v1366_v23, 0.0 }
 0x16c   : > { %844 = vperm.xlu1 %7599, %v554_v25   ;;  %v1301_v6 = vadd.f32 %v1238_v62, %v919_v0 }
 0x16d   : > { %v1475_v31 = vpack.c.bf16 %v1429_v28, %v1428_v26  ;;  %v770_v15 = vpop.permute.xlu0 %769 }
 0x16e   : > { %v1086_v32 = vpop.permute.xlu1 %1085  ;;  %v1371_v13 = vadd.f32 %v8295_v60, %v1301_v6 }
 0x16f   : > { %v1235_v48 = vmul.f32 %v8277_v49, %v1086_v32  ;;  %7087 = vmatprep.mubr.bf16.mxu0 %v1475_v31 }
 0x170   : > { %7600 = vset.pattern.permute.xlu1 %v12225_v1  ;;  %v1434_v19 = vmax.f32 %v1371_v13, 0.0 }
 0x171   : > { %v1298_v37 = vadd.f32 %v1235_v48, %v916_v30  ;;  %1169 = vperm.xlu1 %7600, %v554_v25   ;;  %v775_v25 = vpop.permute.xlu0 %774 }
 0x173   : > { %v1368_v41 = vadd.f32 %v8295_v60, %v1298_v37  ;;  %v745_v53 = vpop.permute.xlu1 %744 }
 0x174   : > { %v917_v47 = vmul.f32 %v8280_v50, %v745_v53 }
 0x175   : > { %1173 = vperm.xlu1 %7600, %v8382_v10   ;;  %v1431_v45 = vmax.f32 %v1368_v41, 0.0 }
 0x177   : > { %v1476_v51 = vpack.c.bf16 %v1431_v45, %v1430_v44  ;;  %v922_v44 = vmul.f32 %v8280_v50, %v770_v15 }
 0x178   : > { %v1090_v54 = vpop.permute.xlu1 %1089 }
 0x179   : > { %7601 = vset.pattern.permute.xlu1 %v12223_v2  ;;  %7088 = vmatmul.mubr.bf16.gmra.mrb[32].mxu0 %v1476_v51  ;;  %v1236_v56 = vmul.f32 %v8277_v49, %v1090_v54 }
 0x17a   : > { %859 = vperm.xlu1 %7601, %v557_v52  }
 0x17b   : > { %v1299_v57 = vadd.f32 %v1236_v56, %v917_v47  ;;  %v1114_v47 = vpop.permute.xlu0 %1113 }
 0x17c   : > { %v1094_v59 = vpop.permute.xlu1 %1093  ;;  %v1242_v56 = vmul.f32 %v8277_v49, %v1114_v47 }
 0x17d   : > { %v1369_v10 = vadd.f32 %v8295_v60, %v1299_v57  ;;  %v1237_v61 = vmul.f32 %v8277_v49, %v1094_v59 }
 0x17e   : > { %7603 = vset.pattern.permute.xlu1 %v12225_v1 }
 0x17f   : > { %1181 = vperm.xlu1 %7603, %v557_v52   ;;  %v1300_v63 = vadd.f32 %v1237_v61, %v918_v58  ;;  %v1432_v5 = vmax.f32 %v1369_v10, 0.0 }
 0x181   : > { %v760_v3 = vpop.permute.xlu1 %759  ;;  %v1370_v4 = vadd.f32 %v8295_v60, %v1300_v63 }
 0x182   : > { %v920_v9 = vmul.f32 %v8280_v50, %v760_v3  ;;  %v8564_v3 = vld [vmem:[%s12207_s2] ss:$0 sm:$0xff] }
 0x183   : > { %7604 = vset.pattern.permute.xlu1 %v12223_v2  ;;  %v1433_v8 = vmax.f32 %v1370_v4, 0.0 }
 0x184   : > { %864 = vperm.xlu1 %7604, %v558_v29  }
 0x185   : > { %v1477_v11 = vpack.c.bf16 %v1433_v8, %v1432_v5 }
 0x186   : > { %v1102_v12 = vpop.permute.xlu1 %1101 }
 0x187   : > { %v1239_v33 = vmul.f32 %v8277_v49, %v1102_v12  ;;  %7091 = vmatprep.mubr.bf16.mxu0 %v1477_v11 }
 0x188   : > { %7606 = vset.pattern.permute.xlu1 %v12225_v1 }
 0x189   : > { %v1302_v16 = vadd.f32 %v1239_v33, %v920_v9  ;;  %1185 = vperm.xlu1 %7606, %v558_v29   ;;  %v1130_v29 = vpop.permute.xlu0 %1129 }
 0x18b   : > { %v1372_v18 = vadd.f32 %v8295_v60, %v1302_v16  ;;  %v765_v38 = vpop.permute.xlu1 %764 }
 0x18c   : > { %v7057_v20 = vpop.f32.mrb[0].mxu0  ;;  %v921_v26 = vmul.f32 %v8280_v50, %v765_v38 }
 0x18d   : > { %v1605_v55 = vadd.f32 %v7057_v20, %v8541_v17  ;;  %v1596_v21 = vpop.f32.mrb[1].mxu0  ;;  %v1435_v22 = vmax.f32 %v1372_v18, 0.0  ;;  %1189 = vperm.xlu1 %7606, %v8433_v7   ;;  %v790_v16 = vpop.permute.xlu0 %789 }
 0x18e   : > { %v1597_v23 = vadd.f32 %v8541_v17, %v1596_v21  ;;  %v7058_v24 = vpop.f32.mrb[2].mxu0 }
 0x18f   : > { %v1608_v27 = vadd.f32 %v7058_v24, %v8541_v17  ;;  %v1599_v28 = vpop.f32.mrb[3].mxu0  ;;  %v1478_v30 = vpack.c.bf16 %v1435_v22, %v1434_v19  ;;  %v1852_v48 = vmax.f32 %v1605_v55, 0.0 }
 0x190   : > { %v1600_v31 = vadd.f32 %v8541_v17, %v1599_v28  ;;  %v1106_v32 = vpop.permute.xlu1 %1105  ;;  %v1850_v7 = vmax.f32 %v1597_v23, 0.0 }
 0x191   : > { %v1853_v34 = vmax.f32 %v1608_v27, 0.0  ;;  %7092 = vmatmul.mubr.bf16.gmra.mrb[36].mxu0 %v1478_v30  ;;  %v1240_v35 = vmul.f32 %v8277_v49, %v1106_v32  ;;  %1193 = vperm.xlu1 %7606, %v8442_v14   ;;  %v923_v14 = vmul.f32 %v8280_v50, %v775_v25  ;;  %v926_v30 = vmul.f32 %v8280_v50, %v790_v16 }
 0x192   : > { %v1851_v37 = vmax.f32 %v1600_v31, 0.0 }
 0x193   : > { %v1914_v41 = vpack.c.bf16 %v1853_v34, %v1852_v48  ;;  %v1303_v53 = vadd.f32 %v1240_v35, %v921_v26  ;;  %v1305_v36 = vadd.f32 %v1242_v56, %v923_v14  ;;  %v795_v48 = vpop.permute.xlu0 %794 }
 0x194   : > { %v1110_v45 = vpop.permute.xlu1 %1109  ;;  %v1913_v46 = vpack.c.bf16 %v1851_v37, %v1850_v7  ;;  %v1246_v7 = vmul.f32 %v8277_v49, %v1130_v29 }
 0x195   : > { %v1373_v51 = vadd.f32 %v8295_v60, %v1303_v53  ;;  %v1241_v52 = vmul.f32 %v8277_v49, %v1110_v45  ;;  %7607 = vset.pattern.permute.xlu1 %v12223_v2  ;;  %v1375_v4 = vadd.f32 %v8564_v3, %v1305_v36 }
 0x196   : > { %7135 = vmatprep.mubr.bf16.mxu1 %v1913_v46 }
 0x197   : > { %v1304_v54 = vadd.f32 %v1241_v52, %v922_v44  ;;  %7136 = vmatmul.mubr.bf16.vlgmr.msra.gmra.mrb[0].mxu1 %v1914_v41  ;;  %v1436_v59 = vmax.f32 %v1373_v51, 0.0  ;;  %v1438_v8 = vmax.f32 %v1375_v4, 0.0  ;;  %v927_v41 = vmul.f32 %v8280_v50, %v795_v48 }
 0x199   : > { %v1374_v57 = vadd.f32 %v8295_v60, %v1304_v54  ;;  %v780_v58 = vpop.permute.xlu1 %779  ;;  %v1309_v46 = vadd.f32 %v1246_v7, %v927_v41 }
 0x19a   : > { %v924_v61 = vmul.f32 %v8280_v50, %v780_v58 }
 0x19b   : > { %v1437_v10 = vmax.f32 %v1374_v57, 0.0  ;;  %v1379_v56 = vadd.f32 %v8564_v3, %v1309_v46  ;;  %v810_v57 = vpop.permute.xlu0 %809 }
 0x19d   : > { %v1479_v62 = vpack.c.bf16 %v1437_v10, %v1436_v59  ;;  %v1442_v10 = vmax.f32 %v1379_v56, 0.0 }
 0x19e   : > { %v1118_v63 = vpop.permute.xlu1 %1117 }
 0x19f   : > { %v1243_v0 = vmul.f32 %v8277_v49, %v1118_v63  ;;  %7095 = vmatprep.mubr.bf16.mxu0 %v1479_v62 }
 0x1a1   : > { %v1306_v60 = vadd.f32 %v1243_v0, %v924_v61 }
 0x1a3   : > { %v1376_v5 = vadd.f32 %v8564_v3, %v1306_v60  ;;  %v785_v6 = vpop.permute.xlu1 %784  ;;  %v815_v60 = vpop.permute.xlu0 %814 }
 0x1a4   : > { %v7061_v9 = vpop.f32.mrb[4].mxu0  ;;  %v925_v18 = vmul.f32 %v8280_v50, %v785_v6 }
 0x1a5   : > { %v1621_v11 = vadd.f32 %v7061_v9, %v8541_v17  ;;  %v1612_v12 = vpop.f32.mrb[5].mxu0  ;;  %v1439_v33 = vmax.f32 %v1376_v5, 0.0 }
 0x1a6   : > { %v1613_v13 = vadd.f32 %v8541_v17, %v1612_v12  ;;  %v7062_v15 = vpop.f32.mrb[6].mxu0 }
 0x1a7   : > { %v1624_v38 = vadd.f32 %v7062_v15, %v8541_v17  ;;  %v1615_v19 = vpop.f32.mrb[7].mxu0  ;;  %v1480_v20 = vpack.c.bf16 %v1439_v33, %v1438_v8  ;;  %v1856_v22 = vmax.f32 %v1621_v11, 0.0 }
 0x1a8   : > { %v1616_v55 = vadd.f32 %v8541_v17, %v1615_v19  ;;  %v1122_v21 = vpop.permute.xlu1 %1121  ;;  %v1854_v25 = vmax.f32 %v1613_v13, 0.0 }
 0x1a9   : > { %v1857_v23 = vmax.f32 %v1624_v38, 0.0  ;;  %7096 = vmatmul.mubr.bf16.gmra.mrb[40].mxu0 %v1480_v20  ;;  %v1244_v24 = vmul.f32 %v8277_v49, %v1122_v21  ;;  %v930_v20 = vmul.f32 %v8280_v50, %v810_v57 }
 0x1aa   : > { %v1855_v26 = vmax.f32 %v1616_v55, 0.0 }
 0x1ab   : > { %v1916_v27 = vpack.c.bf16 %v1857_v23, %v1856_v22  ;;  %v1307_v28 = vadd.f32 %v1244_v24, %v925_v18  ;;  %v1146_v22 = vpop.permute.xlu0 %1145 }
 0x1ac   : > { %v1915_v31 = vpack.c.bf16 %v1855_v26, %v1854_v25  ;;  %v1126_v32 = vpop.permute.xlu1 %1125  ;;  %v931_v26 = vmul.f32 %v8280_v50, %v815_v60 }
 0x1ad   : > { %v1377_v34 = vadd.f32 %v8564_v3, %v1307_v28  ;;  %v1245_v35 = vmul.f32 %v8277_v49, %v1126_v32 }
 0x1ae   : > { %7139 = vmatprep.mubr.bf16.mxu1 %v1915_v31 }
 0x1af   : > { %7140 = vmatmul.mubr.bf16.gmra.mrb[4].mxu1 %v1916_v27  ;;  %v1308_v37 = vadd.f32 %v1245_v35, %v926_v30  ;;  %v1440_v45 = vmax.f32 %v1377_v34, 0.0  ;;  %v1250_v27 = vmul.f32 %v8277_v49, %v1146_v22 }
 0x1b1   : > { %v800_v53 = vpop.permute.xlu1 %799  ;;  %v1378_v44 = vadd.f32 %v8564_v3, %v1308_v37  ;;  %v1313_v32 = vadd.f32 %v1250_v27, %v931_v26 }
 0x1b2   : > { %v928_v51 = vmul.f32 %v8280_v50, %v800_v53  ;;  %v1162_v53 = vpop.permute.xlu0 %1161 }
 0x1b3   : > { %v1441_v47 = vmax.f32 %v1378_v44, 0.0  ;;  %v1383_v41 = vadd.f32 %v8564_v3, %v1313_v32 }
 0x1b5   : > { %v1481_v52 = vpack.c.bf16 %v1441_v47, %v1440_v45  ;;  %v1446_v47 = vmax.f32 %v1383_v41, 0.0 }
 0x1b6   : > { %v1134_v54 = vpop.permute.xlu1 %1133 }
 0x1b7   : > { %v1247_v14 = vmul.f32 %v8277_v49, %v1134_v54  ;;  %7099 = vmatprep.mubr.bf16.mxu0 %v1481_v52 }
 0x1b9   : > { %v1310_v58 = vadd.f32 %v1247_v14, %v928_v51 }
 0x1bb   : > { %v1380_v59 = vadd.f32 %v8564_v3, %v1310_v58  ;;  %v805_v36 = vpop.permute.xlu1 %804  ;;  %v830_v58 = vpop.permute.xlu0 %829 }
 0x1bc   : > { %v7065_v61 = vpop.f32.mrb[8].mxu0  ;;  %v929_v5 = vmul.f32 %v8280_v50, %v805_v36 }
 0x1bd   : > { %v1637_v62 = vadd.f32 %v7065_v61, %v8541_v17  ;;  %v1628_v63 = vpop.f32.mrb[9].mxu0  ;;  %v1443_v0 = vmax.f32 %v1380_v59, 0.0 }
 0x1be   : > { %v1629_v4 = vadd.f32 %v8541_v17, %v1628_v63  ;;  %v7066_v29 = vpop.f32.mrb[10].mxu0 }
 0x1bf   : > { %v1640_v6 = vadd.f32 %v7066_v29, %v8541_v17  ;;  %v1631_v8 = vpop.f32.mrb[11].mxu0  ;;  %v1482_v9 = vpack.c.bf16 %v1443_v0, %v1442_v10  ;;  %v1860_v33 = vmax.f32 %v1637_v62, 0.0 }
 0x1c0   : > { %v1632_v11 = vadd.f32 %v8541_v17, %v1631_v8  ;;  %v1138_v12 = vpop.permute.xlu1 %1137  ;;  %v1858_v16 = vmax.f32 %v1629_v4, 0.0 }
 0x1c1   : > { %v1861_v13 = vmax.f32 %v1640_v6, 0.0  ;;  %7100 = vmatmul.mubr.bf16.gmra.mrb[44].mxu0 %v1482_v9  ;;  %v1248_v15 = vmul.f32 %v8277_v49, %v1138_v12  ;;  %v934_v9 = vmul.f32 %v8280_v50, %v830_v58 }
 0x1c2   : > { %v1859_v18 = vmax.f32 %v1632_v11, 0.0 }
 0x1c3   : > { %v1918_v38 = vpack.c.bf16 %v1861_v13, %v1860_v33  ;;  %v1311_v19 = vadd.f32 %v1248_v15, %v929_v5  ;;  %v835_v33 = vpop.permute.xlu0 %834 }
 0x1c4   : > { %v1917_v55 = vpack.c.bf16 %v1859_v18, %v1858_v16  ;;  %v1142_v21 = vpop.permute.xlu1 %1141  ;;  %v1254_v16 = vmul.f32 %v8277_v49, %v1162_v53 }
 0x1c5   : > { %v1381_v23 = vadd.f32 %v8564_v3, %v1311_v19  ;;  %v1249_v24 = vmul.f32 %v8277_v49, %v1142_v21 }
 0x1c6   : > { %7143 = vmatprep.mubr.bf16.mxu1 %v1917_v55 }
 0x1c7   : > { %v1312_v25 = vadd.f32 %v1249_v24, %v930_v20  ;;  %7144 = vmatmul.mubr.bf16.gmra.mrb[8].mxu1 %v1918_v38  ;;  %v1444_v31 = vmax.f32 %v1381_v23, 0.0  ;;  %v935_v38 = vmul.f32 %v8280_v50, %v835_v33 }
 0x1c9   : > { %v1382_v28 = vadd.f32 %v8564_v3, %v1312_v25  ;;  %v820_v30 = vpop.permute.xlu1 %819  ;;  %v1317_v21 = vadd.f32 %v1254_v16, %v935_v38 }
 0x1ca   : > { %v932_v34 = vmul.f32 %v8280_v50, %v820_v30 }
 0x1cb   : > { %v1445_v48 = vmax.f32 %v1382_v28, 0.0  ;;  %v1387_v27 = vadd.f32 %v8564_v3, %v1317_v21  ;;  %v850_v28 = vpop.permute.xlu0 %849 }
 0x1cd   : > { %v1483_v35 = vpack.c.bf16 %v1445_v48, %v1444_v31  ;;  %v1450_v48 = vmax.f32 %v1387_v27, 0.0 }
 0x1ce   : > { %v1150_v7 = vpop.permute.xlu1 %1149 }
 0x1cf   : > { %v1251_v37 = vmul.f32 %v8277_v49, %v1150_v7  ;;  %7103 = vmatprep.mubr.bf16.mxu0 %v1483_v35 }
 0x1d1   : > { %v1314_v44 = vadd.f32 %v1251_v37, %v932_v34 }
 0x1d3   : > { %v1384_v45 = vadd.f32 %v8564_v3, %v1314_v44  ;;  %v825_v46 = vpop.permute.xlu1 %824  ;;  %v855_v44 = vpop.permute.xlu0 %854 }
 0x1d4   : > { %v7069_v51 = vpop.f32.mrb[12].mxu0  ;;  %v933_v59 = vmul.f32 %v8280_v50, %v825_v46 }
 0x1d5   : > { %v1653_v52 = vadd.f32 %v7069_v51, %v8541_v17  ;;  %v1644_v54 = vpop.f32.mrb[13].mxu0  ;;  %v1447_v14 = vmax.f32 %v1384_v45, 0.0 }
 0x1d6   : > { %v1645_v56 = vadd.f32 %v8541_v17, %v1644_v54  ;;  %v7070_v57 = vpop.f32.mrb[14].mxu0 }
 0x1d7   : > { %v1656_v36 = vadd.f32 %v7070_v57, %v8541_v17  ;;  %v1647_v10 = vpop.f32.mrb[15].mxu0  ;;  %v1484_v61 = vpack.c.bf16 %v1447_v14, %v1446_v47  ;;  %v1864_v0 = vmax.f32 %v1653_v52, 0.0 }
 0x1d8   : > { %v1648_v62 = vadd.f32 %v8541_v17, %v1647_v10  ;;  %v1154_v63 = vpop.permute.xlu1 %1153  ;;  %v1862_v60 = vmax.f32 %v1645_v56, 0.0 }
 0x1d9   : > { %v1865_v4 = vmax.f32 %v1656_v36, 0.0  ;;  %7104 = vmatmul.mubr.bf16.gmra.mrb[48].mxu0 %v1484_v61  ;;  %v1252_v29 = vmul.f32 %v8277_v49, %v1154_v63  ;;  %v938_v61 = vmul.f32 %v8280_v50, %v850_v28 }
 0x1da   : > { %v1863_v5 = vmax.f32 %v1648_v62, 0.0 }
 0x1db   : > { %v1920_v6 = vpack.c.bf16 %v1865_v4, %v1864_v0  ;;  %v1315_v8 = vadd.f32 %v1252_v29, %v933_v59  ;;  %v1178_v0 = vpop.permute.xlu0 %1177 }
 0x1dc   : > { %v1919_v11 = vpack.c.bf16 %v1863_v5, %v1862_v60  ;;  %v1158_v12 = vpop.permute.xlu1 %1157  ;;  %v939_v5 = vmul.f32 %v8280_v50, %v855_v44 }
 0x1dd   : > { %v1385_v13 = vadd.f32 %v8564_v3, %v1315_v8  ;;  %v1253_v15 = vmul.f32 %v8277_v49, %v1158_v12 }
 0x1de   : > { %7147 = vmatprep.mubr.bf16.mxu1 %v1919_v11 }
 0x1df   : > { %7148 = vmatmul.mubr.bf16.gmra.mrb[12].mxu1 %v1920_v6  ;;  %v1316_v18 = vadd.f32 %v1253_v15, %v934_v9  ;;  %v1448_v55 = vmax.f32 %v1385_v13, 0.0  ;;  %v1258_v6 = vmul.f32 %v8277_v49, %v1178_v0  ;;  %v870_v28 = vpop.permute.xlu0 %869 }
 0x1e1   : > { %v840_v19 = vpop.permute.xlu1 %839  ;;  %v1386_v20 = vadd.f32 %v8564_v3, %v1316_v18  ;;  %v1321_v12 = vadd.f32 %v1258_v6, %v939_v5 }
 0x1e2   : > { %v936_v23 = vmul.f32 %v8280_v50, %v840_v19 }
 0x1e3   : > { %v1449_v22 = vmax.f32 %v1386_v20, 0.0  ;;  %v1391_v38 = vadd.f32 %v8564_v3, %v1321_v12 }
 0x1e5   : > { %v1485_v24 = vpack.c.bf16 %v1449_v22, %v1448_v55  ;;  %v1454_v21 = vmax.f32 %v1391_v38, 0.0 }
 0x1e6   : > { %v1166_v25 = vpop.permute.xlu1 %1165 }
 0x1e7   : > { %v1255_v26 = vmul.f32 %v8277_v49, %v1166_v25  ;;  %7107 = vmatprep.mubr.bf16.mxu0 %v1485_v24 }
 0x1e9   : > { %v1318_v30 = vadd.f32 %v1255_v26, %v936_v23 }
 0x1eb   : > { %v1388_v31 = vadd.f32 %v8564_v3, %v1318_v30  ;;  %v845_v32 = vpop.permute.xlu1 %844 }
 0x1ec   : > { %v7073_v34 = vpop.f32.mrb[16].mxu0  ;;  %v937_v45 = vmul.f32 %v8280_v50, %v845_v32 }
 0x1ed   : > { %v1669_v35 = vadd.f32 %v7073_v34, %v8541_v17  ;;  %v1660_v7 = vpop.f32.mrb[17].mxu0  ;;  %v1451_v37 = vmax.f32 %v1388_v31, 0.0 }
 0x1ee   : > { %v1661_v41 = vadd.f32 %v8541_v17, %v1660_v7  ;;  %v7074_v53 = vpop.f32.mrb[18].mxu0 }
 0x1ef   : > { %v1672_v46 = vadd.f32 %v7074_v53, %v8541_v17  ;;  %v1663_v47 = vpop.f32.mrb[19].mxu0  ;;  %v1486_v51 = vpack.c.bf16 %v1451_v37, %v1450_v48  ;;  %v1868_v14 = vmax.f32 %v1669_v35, 0.0 }
 0x1f0   : > { %v1664_v52 = vadd.f32 %v8541_v17, %v1663_v47  ;;  %v1170_v54 = vpop.permute.xlu1 %1169  ;;  %v1866_v58 = vmax.f32 %v1661_v41, 0.0  ;;  %v942_v47 = vmul.f32 %v8280_v50, %v870_v28 }
 0x1f1   : > { %v1869_v56 = vmax.f32 %v1672_v46, 0.0  ;;  %7108 = vmatmul.mubr.bf16.gmra.mrb[52].mxu0 %v1486_v51  ;;  %v1256_v57 = vmul.f32 %v8277_v49, %v1170_v54  ;;  %v875_v54 = vpop.permute.xlu0 %874 }
 0x1f2   : > { %v1867_v59 = vmax.f32 %v1664_v52, 0.0 }
 0x1f3   : > { %v1922_v36 = vpack.c.bf16 %v1869_v56, %v1868_v14  ;;  %v1319_v10 = vadd.f32 %v1256_v57, %v937_v45 }
 0x1f4   : > { %v1921_v62 = vpack.c.bf16 %v1867_v59, %v1866_v58  ;;  %v1174_v63 = vpop.permute.xlu1 %1173  ;;  %v943_v58 = vmul.f32 %v8280_v50, %v875_v54  ;;  %v7722_v54 = vld [vmem:[%s12214_s9 + $0x30] ss:$8 sps:$4 sm:$0xff]  }
 0x1f5   : > { %v1389_v4 = vadd.f32 %v8564_v3, %v1319_v10  ;;  %v1257_v29 = vmul.f32 %v8277_v49, %v1174_v63 }
 0x1f6   : > { %7151 = vmatprep.mubr.bf16.mxu1 %v1921_v62 }
 0x1f7   : > { %v1320_v60 = vadd.f32 %v1257_v29, %v938_v61  ;;  %7152 = vmatmul.mubr.bf16.gmra.mrb[16].mxu1 %v1922_v36  ;;  %v1452_v11 = vmax.f32 %v1389_v4, 0.0 }
 0x1f9   : > { %v1390_v8 = vadd.f32 %v8564_v3, %v1320_v60  ;;  %v860_v9 = vpop.permute.xlu1 %859 }
 0x1fa   : > { %v940_v13 = vmul.f32 %v8280_v50, %v860_v9 }
 0x1fb   : > { %v1453_v33 = vmax.f32 %v1390_v8, 0.0 }
 0x1fd   : > { %v1487_v15 = vpack.c.bf16 %v1453_v33, %v1452_v11 }
 0x1fe   : > { %v1182_v16 = vpop.permute.xlu1 %1181 }
 0x1ff   : > { %v1259_v18 = vmul.f32 %v8277_v49, %v1182_v16  ;;  %7111 = vmatprep.mubr.bf16.mxu0 %v1487_v15 }
 0x201   : > { %v1322_v19 = vadd.f32 %v1259_v18, %v940_v13 }
 0x203   : > { %v1392_v20 = vadd.f32 %v8564_v3, %v1322_v19  ;;  %v865_v55 = vpop.permute.xlu1 %864 }
 0x204   : > { %v7077_v22 = vpop.f32.mrb[20].mxu0  ;;  %v941_v32 = vmul.f32 %v8280_v50, %v865_v55 }
 0x205   : > { %v1685_v23 = vadd.f32 %v7077_v22, %v8541_v17  ;;  %v1676_v24 = vpop.f32.mrb[21].mxu0  ;;  %v1455_v25 = vmax.f32 %v1392_v20, 0.0 }
 0x206   : > { %v1677_v26 = vadd.f32 %v8541_v17, %v1676_v24  ;;  %v7078_v27 = vpop.f32.mrb[22].mxu0  ;;  %v7713_v24 = vld [vmem:[%s12214_s9] ss:$8 sps:$4 sm:$0xff]  }
 0x207   : > { %v1688_v30 = vadd.f32 %v7078_v27, %v8541_v17  ;;  %v1679_v31 = vpop.f32.mrb[23].mxu0  ;;  %v1488_v48 = vpack.c.bf16 %v1455_v25, %v1454_v21  ;;  %v1872_v7 = vmax.f32 %v1685_v23, 0.0  ;;  %v7715_v25 = vld [vmem:[%s12214_s9 + $0x4] ss:$8 sps:$4 sm:$0xff]  }
 0x208   : > { %v1680_v34 = vadd.f32 %v8541_v17, %v1679_v31  ;;  %v1186_v35 = vpop.permute.xlu1 %1185  ;;  %v1870_v53 = vmax.f32 %v1677_v26, 0.0  ;;  %4751 = vmatprep.subr.bf16.mxu0 %v7715_v25  ;;  %7199 = vmatprep.subr.bf16.mxu1 %v7715_v25 }
 0x209   : > { %v1873_v37 = vmax.f32 %v1688_v30, 0.0  ;;  %7112 = vmatmul.mubr.bf16.gmra.mrb[56].mxu0 %v1488_v48  ;;  %v1260_v41 = vmul.f32 %v8277_v49, %v1186_v35  ;;  %7215 = vmatpush1.bf16.msra.mxu1 %v7713_v24  ;;  %v7718_v35 = vld [vmem:[%s12214_s9 + $0x14] ss:$8 sps:$4 sm:$0xff]  }
 0x20a   : > { %v1871_v44 = vmax.f32 %v1680_v34, 0.0  ;;  %4752 = vmatpush1.bf16.msra.mxu0 %v7713_v24  ;;  %v7716_v34 = vld [vmem:[%s12214_s9 + $0x10] ss:$8 sps:$4 sm:$0xff]   ;;  %7200 = vmatprep.subr.bf16.mxu1 %v7718_v35 }
 0x20b   : > { %v1924_v45 = vpack.c.bf16 %v1873_v37, %v1872_v7  ;;  %v1323_v46 = vadd.f32 %v1260_v41, %v941_v32  ;;  %4753 = vmatprep.subr.bf16.mxu0 %v7718_v35  ;;  %v7719_v37 = vld [vmem:[%s12214_s9 + $0x20] ss:$8 sps:$4 sm:$0xff]   ;;  %v7721_v41 = vld [vmem:[%s12214_s9 + $0x24] ss:$8 sps:$4 sm:$0xff]  }
 0x20c   : > { %v1923_v51 = vpack.c.bf16 %v1871_v44, %v1870_v53  ;;  %v1190_v52 = vpop.permute.xlu1 %1189 }
 0x20d   : > { %v1393_v14 = vadd.f32 %v8564_v3, %v1323_v46  ;;  %v1261_v56 = vmul.f32 %v8277_v49, %v1190_v52  ;;  %7216 = vmatpush1.bf16.msra.mxu1 %v7716_v34 }
 0x20e   : > { %7155 = vmatprep.mubr.bf16.mxu1 %v1923_v51  ;;  %4754 = vmatpush1.bf16.msra.mxu0 %v7716_v34 }
 0x20f   : > { %7156 = vmatmul.mubr.bf16.gmra.mrb[20].mxu1 %v1924_v45  ;;  %v1324_v57 = vadd.f32 %v1261_v56, %v942_v47  ;;  %v1456_v61 = vmax.f32 %v1393_v14, 0.0  ;;  %4755 = vmatprep.subr.bf16.mxu0 %v7721_v41  ;;  %v7724_v14 = vld [vmem:[%s12214_s9 + $0x34] ss:$8 sps:$4 sm:$0xff]  }
 0x210   : > { %v1194_v59 = vpop.permute.xlu1 %1193  ;;  %7201 = vmatprep.subr.bf16.mxu1 %v7721_v41 }
 0x211   : > { %v1394_v36 = vadd.f32 %v8564_v3, %v1324_v57  ;;  %v1262_v10 = vmul.f32 %v8277_v49, %v1194_v59  ;;  %7217 = vmatpush1.bf16.msra.mxu1 %v7719_v37 }
 0x212   : > { %4756 = vmatpush1.bf16.msra.mxu0 %v7719_v37  ;;  %7202 = vmatprep.subr.bf16.mxu1 %v7724_v14  ;;  %v7746_v37 = vld [vmem:[%s12214_s9 + $0xb0] ss:$8 sps:$4 sm:$0xff]  }
 0x213   : > { %v1325_v62 = vadd.f32 %v1262_v10, %v943_v58  ;;  %v1457_v63 = vmax.f32 %v1394_v36, 0.0  ;;  %4757 = vmatprep.subr.bf16.mxu0 %v7724_v14 }
 0x215   : > { %v1489_v0 = vpack.c.bf16 %v1457_v63, %v1456_v61  ;;  %v1395_v4 = vadd.f32 %v8564_v3, %v1325_v62  ;;  %7218 = vmatpush1.bf16.msra.mxu1 %v7722_v54  ;;  %v7725_v61 = vld [vmem:[%s12214_s9 + $0x40] ss:$8 sps:$4 sm:$0xff]   ;;  %v7727_v62 = vld [vmem:[%s12214_s9 + $0x44] ss:$8 sps:$4 sm:$0xff]   ;;  %v7730_v63 = vld [vmem:[%s12214_s9 + $0x54] ss:$8 sps:$4 sm:$0xff]  }
 0x216   : > { %4758 = vmatpush1.bf16.msra.mxu0 %v7722_v54  ;;  %7203 = vmatprep.subr.bf16.mxu1 %v7727_v62 }
 0x217   : > { %7115 = vmatprep.mubr.bf16.mxu0 %v1489_v0  ;;  %v1458_v29 = vmax.f32 %v1395_v4, 0.0  ;;  %4759 = vmatprep.subr.bf16.mxu0 %v7727_v62  ;;  %v7728_v0 = vld [vmem:[%s12214_s9 + $0x50] ss:$8 sps:$4 sm:$0xff]   ;;  %v7733_v4 = vld [vmem:[%s12214_s9 + $0x64] ss:$8 sps:$4 sm:$0xff]  }
 0x219   : > { %v1490_v60 = vpack.c.bf16 %v1458_v29, %v1458_v29  ;;  %7219 = vmatpush1.bf16.msra.mxu1 %v7725_v61  ;;  %v7731_v29 = vld [vmem:[%s12214_s9 + $0x60] ss:$8 sps:$4 sm:$0xff]  }
 0x21a   : > { %4760 = vmatpush1.bf16.msra.mxu0 %v7725_v61  ;;  %7204 = vmatprep.subr.bf16.mxu1 %v7730_v63 }
 0x21b   : > { %7116 = vmatmul.mubr.bf16.gmra.mrb[60].mxu0 %v1490_v60  ;;  %4761 = vmatprep.subr.bf16.mxu0 %v7730_v63 }
 0x21c   : > { %v7081_v5 = vpop.f32.mrb[24].mxu0 }
 0x21d   : > { %v1701_v6 = vadd.f32 %v7081_v5, %v8541_v17  ;;  %v1692_v8 = vpop.f32.mrb[25].mxu0  ;;  %7220 = vmatpush1.bf16.msra.mxu1 %v7728_v0 }
 0x21e   : > { %v1693_v50 = vadd.f32 %v8541_v17, %v1692_v8  ;;  %v7082_v9 = vpop.f32.mrb[26].mxu0  ;;  %4762 = vmatpush1.bf16.msra.mxu0 %v7728_v0  ;;  %7205 = vmatprep.subr.bf16.mxu1 %v7733_v4  ;;  %v7736_v8 = vld [vmem:[%s12214_s9 + $0x74] ss:$8 sps:$4 sm:$0xff]  }
 0x21f   : > { %v1704_v11 = vadd.f32 %v7082_v9, %v8541_v17  ;;  %v1695_v49 = vpop.f32.mrb[27].mxu0  ;;  %v1876_v33 = vmax.f32 %v1701_v6, 0.0  ;;  %4763 = vmatprep.subr.bf16.mxu0 %v7733_v4  ;;  %v7757_v4 = vld [vmem:[%s12214_s9 + $0xe4] ss:$8 sps:$4 sm:$0xff]  }
 0x220   : > { %v1696_v12 = vadd.f32 %v8541_v17, %v1695_v49  ;;  %v1874_v15 = vmax.f32 %v1693_v50, 0.0 }
 0x221   : > { %v1877_v13 = vmax.f32 %v1704_v11, 0.0  ;;  %7221 = vmatpush1.bf16.msra.mxu1 %v7731_v29  ;;  %v7734_v11 = vld [vmem:[%s12214_s9 + $0x70] ss:$8 sps:$4 sm:$0xff]  }
 0x222   : > { %v1875_v3 = vmax.f32 %v1696_v12, 0.0  ;;  %4764 = vmatpush1.bf16.msra.mxu0 %v7731_v29  ;;  %7206 = vmatprep.subr.bf16.mxu1 %v7736_v8 }
 0x223   : > { %v1926_v16 = vpack.c.bf16 %v1877_v13, %v1876_v33  ;;  %4765 = vmatprep.subr.bf16.mxu0 %v7736_v8 }
 0x224   : > { %v1925_v18 = vpack.c.bf16 %v1875_v3, %v1874_v15  ;;  %v8712_v3 = vld [vmem:[%s12211_s6] ss:$0 sm:$0xff] }
 0x225   : > { %7222 = vmatpush1.bf16.msra.mxu1 %v7734_v11 }
 0x226   : > { %7159 = vmatprep.mubr.bf16.mxu1 %v1925_v18  ;;  %4766 = vmatpush1.bf16.msra.mxu0 %v7734_v11  ;;  %v7739_v18 = vld [vmem:[%s12214_s9 + $0x84] ss:$8 sps:$4 sm:$0xff]   ;;  %v7760_v11 = vld [vmem:[%s12214_s9 + $0xf4] ss:$8 sps:$4 sm:$0xff]  }
 0x227   : > { %7160 = vmatmul.mubr.bf16.gmra.mrb[24].mxu1 %v1926_v16  ;;  %4767 = vmatprep.subr.bf16.mxu0 %v7739_v18 }
 0x228   : > { %7207 = vmatprep.subr.bf16.mxu1 %v7739_v18 }
 0x234   : > { %v7085_v38 = vpop.f32.mrb[28].mxu0 }
 0x235   : > { %v1717_v19 = vadd.f32 %v7085_v38, %v8541_v17  ;;  %v1708_v20 = vpop.f32.mrb[29].mxu0 }
 0x236   : > { %v1709_v55 = vadd.f32 %v8541_v17, %v1708_v20  ;;  %v7086_v21 = vpop.f32.mrb[30].mxu0  ;;  %v7737_v20 = vld [vmem:[%s12214_s9 + $0x80] ss:$8 sps:$4 sm:$0xff]  }
 0x237   : > { %v1720_v22 = vadd.f32 %v7086_v21, %v8541_v17  ;;  %v1711_v23 = vpop.f32.mrb[31].mxu0  ;;  %v1880_v27 = vmax.f32 %v1717_v19, 0.0  ;;  %4768 = vmatpush1.bf16.msra.mxu0 %v7737_v20  ;;  %7223 = vmatpush1.bf16.msra.mxu1 %v7737_v20 }
 0x238   : > { %v1712_v26 = vadd.f32 %v8541_v17, %v1711_v23  ;;  %v1878_v30 = vmax.f32 %v1709_v55, 0.0 }
 0x239   : > { %v1881_v28 = vmax.f32 %v1720_v22, 0.0 }
 0x23a   : > { %v1879_v31 = vmax.f32 %v1712_v26, 0.0 }
 0x23b   : > { %v1928_v32 = vpack.c.bf16 %v1881_v28, %v1880_v27  ;;  %v7742_v27 = vld [vmem:[%s12214_s9 + $0x94] ss:$8 sps:$4 sm:$0xff]   ;;  %v7740_v28 = vld [vmem:[%s12214_s9 + $0x90] ss:$8 sps:$4 sm:$0xff]  }
 0x23c   : > { %v1927_v48 = vpack.c.bf16 %v1879_v31, %v1878_v30  ;;  %4769 = vmatprep.subr.bf16.mxu0 %v7742_v27  ;;  %v2627_v30 = vsub.s32 2, %v8259_v40  ;;  %v7745_v31 = vld [vmem:[%s12214_s9 + $0xa4] ss:$8 sps:$4 sm:$0xff]   ;;  %7208 = vmatprep.subr.bf16.mxu1 %v7742_v27 }
 0x23d   : > { %4770 = vmatpush1.bf16.msra.mxu0 %v7740_v28  ;;  %7224 = vmatpush1.bf16.msra.mxu1 %v7740_v28 }
 0x23e   : > { %7163 = vmatprep.mubr.bf16.mxu1 %v1927_v48  ;;  %v7743_v48 = vld [vmem:[%s12214_s9 + $0xa0] ss:$8 sps:$4 sm:$0xff]   ;;  %4771 = vmatprep.subr.bf16.mxu0 %v7745_v31 }
 0x23f   : > { %7164 = vmatmul.mubr.bf16.gmra.mrb[28].mxu1 %v1928_v32  ;;  %v8744_v32 = vld [vmem:[%s12213_s8] sm:$0xf]  ;;  %7209 = vmatprep.subr.bf16.mxu1 %v7745_v31 }
 0x240   : > { %v8753_v34 = vrot.slane %v8744_v32, %v2627_v30  ;;  %v9042_v39 = vrot.slane %v8744_v32, %v8263_v42 }
 0x241   : > { %4772 = vmatpush1.bf16.msra.mxu0 %v7743_v48  ;;  %7225 = vmatpush1.bf16.msra.mxu1 %v7743_v48 }
 0x24c   : > { %v7089_v7 = vpop.f32.mrb[32].mxu0 }
 0x24d   : > { %v1733_v53 = vadd.f32 %v7089_v7, %v8541_v17  ;;  %v1724_v44 = vpop.f32.mrb[33].mxu0  ;;  %v7748_v7 = vld [vmem:[%s12214_s9 + $0xb4] ss:$8 sps:$4 sm:$0xff]  }
 0x24e   : > { %v1725_v45 = vadd.f32 %v8541_v17, %v1724_v44  ;;  %v7090_v46 = vpop.f32.mrb[34].mxu0  ;;  %4773 = vmatprep.subr.bf16.mxu0 %v7748_v7  ;;  %v7751_v44 = vld [vmem:[%s12214_s9 + $0xc4] ss:$8 sps:$4 sm:$0xff]   ;;  %7210 = vmatprep.subr.bf16.mxu1 %v7748_v7 }
 0x24f   : > { %v1884_v47 = vmax.f32 %v1733_v53, 0.0  ;;  %v1736_v51 = vadd.f32 %v7090_v46, %v8541_v17  ;;  %v1727_v52 = vpop.f32.mrb[35].mxu0  ;;  %4774 = vmatpush1.bf16.msra.mxu0 %v7746_v37  ;;  %v3167_v53 = vsub.s32 3, %v8259_v40  ;;  %7226 = vmatpush1.bf16.msra.mxu1 %v7746_v37 }
 0x250   : > { %v1882_v56 = vmax.f32 %v1725_v45, 0.0  ;;  %v1728_v57 = vadd.f32 %v8541_v17, %v1727_v52  ;;  %v7749_v45 = vld [vmem:[%s12214_s9 + $0xc0] ss:$8 sps:$4 sm:$0xff]   ;;  %4775 = vmatprep.subr.bf16.mxu0 %v7751_v44  ;;  %7211 = vmatprep.subr.bf16.mxu1 %v7751_v44 }
 0x251   : > { %v1885_v58 = vmax.f32 %v1736_v51, 0.0 }
 0x252   : > { %v1883_v59 = vmax.f32 %v1728_v57, 0.0  ;;  %v7754_v57 = vld [vmem:[%s12214_s9 + $0xd4] ss:$8 sps:$4 sm:$0xff]  }
 0x253   : > { %v1930_v36 = vpack.c.bf16 %v1885_v58, %v1884_v47  ;;  %v8782_v47 = vrot.slane %v8744_v32, %v3167_v53  ;;  %4776 = vmatpush1.bf16.msra.mxu0 %v7749_v45  ;;  %7227 = vmatpush1.bf16.msra.mxu1 %v7749_v45 }
 0x254   : > { %v1929_v10 = vpack.c.bf16 %v1883_v59, %v1882_v56  ;;  %v7752_v56 = vld [vmem:[%s12214_s9 + $0xd0] ss:$8 sps:$4 sm:$0xff]   ;;  %4777 = vmatprep.subr.bf16.mxu0 %v7754_v57  ;;  %7212 = vmatprep.subr.bf16.mxu1 %v7754_v57 }
 0x256   : > { %7167 = vmatprep.mubr.bf16.mxu1 %v1929_v10 }
 0x257   : > { %7168 = vmatmul.mubr.bf16.gmra.mrb[32].mxu1 %v1930_v36  ;;  %4778 = vmatpush1.bf16.msra.mxu0 %v7752_v56 }
 0x258   : > { %4779 = vmatprep.subr.bf16.mxu0 %v7757_v4  ;;  %7228 = vmatpush1.bf16.msra.mxu1 %v7752_v56 }
 0x259   : > { %7213 = vmatprep.subr.bf16.mxu1 %v7757_v4 }
 0x264   : > { %v7093_v60 = vpop.f32.mrb[36].mxu0 }
 0x265   : > { %v1749_v5 = vadd.f32 %v7093_v60, %v8541_v17  ;;  %v1740_v6 = vpop.f32.mrb[37].mxu0 }
 0x266   : > { %v1741_v50 = vadd.f32 %v8541_v17, %v1740_v6  ;;  %v7094_v9 = vpop.f32.mrb[38].mxu0 }
 0x267   : > { %v1888_v49 = vmax.f32 %v1749_v5, 0.0  ;;  %v1752_v12 = vadd.f32 %v7094_v9, %v8541_v17  ;;  %v1743_v33 = vpop.f32.mrb[39].mxu0 }
 0x268   : > { %v1886_v13 = vmax.f32 %v1741_v50, 0.0  ;;  %v1744_v15 = vadd.f32 %v8541_v17, %v1743_v33 }
 0x269   : > { %v1889_v16 = vmax.f32 %v1752_v12, 0.0 }
 0x26a   : > { %v1887_v38 = vmax.f32 %v1744_v15, 0.0  ;;  %v7137_v19 = vpop.f32.mrb[0].mxu1  ;;  %v8836_v15 = vld [vmem:[%s12209_s4] ss:$0 sm:$0xff] }
 0x26b   : > { %v1932_v55 = vpack.c.bf16 %v1889_v16, %v1888_v49  ;;  %v8721_v21 = vadd.f32 %v7137_v19, %v8712_v3  ;;  %v2050_v22 = vpop.f32.mrb[1].mxu1  ;;  %v7758_v49 = vld [vmem:[%s12214_s9 + $0xf0] ss:$8 sps:$4 sm:$0xff]  }
 0x26c   : > { %v1931_v23 = vpack.c.bf16 %v1887_v38, %v1886_v13  ;;  %v8724_v24 = vadd.f32 %v8712_v3, %v2050_v22  ;;  %v7138_v25 = vpop.f32.mrb[2].mxu1 }
 0x26d   : > { %12314 = vst [vmem:[#allocation10_spill] sm:$0xff] %v8721_v21  ;;  %2317 = vperm.xlu1 %7607, %v8721_v21   ;;  %v2053_v26 = vpop.f32.mrb[3].mxu1  ;;  %v8756_v35 = vadd.f32 %v7138_v25, %v8712_v3 }
 0x26e   : > { %12315 = vst [vmem:[#allocation11_spill] sm:$0xff] %v8724_v24  ;;  %2307 = vperm.xlu0 %7605, %v8724_v24   ;;  %7171 = vmatprep.mubr.bf16.mxu1 %v1931_v23  ;;  %v8768_v41 = vadd.f32 %v8712_v3, %v2053_v26 }
 0x26f   : > { %7172 = vmatmul.mubr.bf16.gmra.mrb[36].mxu1 %v1932_v55  ;;  %12316 = vst [vmem:[#allocation12_spill] sm:$0xff] %v8756_v35 }
 0x270   : > { %12317 = vst [vmem:[#allocation13_spill] sm:$0xff] %v8768_v41 }
 0x271   : > { %7608 = vset.pattern.permute.xlu1 %v12225_v1 }
 0x272   : > { %2918 = vperm.xlu1 %7608, %v8721_v21   ;;  %7609 = vset.pattern.permute.xlu0 %v12225_v1 }
 0x273   : > { %2910 = vperm.xlu0 %7609, %v8724_v24  }
 0x276   : > { %2922 = vperm.xlu1 %7608, %v8756_v35  }
 0x277   : > { %7610 = vset.pattern.permute.xlu0 %v12223_v2 }
 0x278   : > { %2322 = vperm.xlu0 %7610, %v8756_v35  }
 0x27a   : > { %7611 = vset.pattern.permute.xlu1 %v12223_v2 }
 0x27b   : > { %2312 = vperm.xlu1 %7611, %v8768_v41  }
 0x27c   : > { %v7097_v46 = vpop.f32.mrb[40].mxu0 }
 0x27d   : > { %v1765_v51 = vadd.f32 %v7097_v46, %v8541_v17  ;;  %v1756_v52 = vpop.f32.mrb[41].mxu0 }
 0x27e   : > { %v1757_v54 = vadd.f32 %v8541_v17, %v1756_v52  ;;  %v7098_v14 = vpop.f32.mrb[42].mxu0 }
 0x27f   : > { %v1892_v58 = vmax.f32 %v1765_v51, 0.0  ;;  %v1768_v59 = vadd.f32 %v7098_v14, %v8541_v17  ;;  %7612 = vset.pattern.permute.xlu1 %v12225_v1  ;;  %v1759_v36 = vpop.f32.mrb[43].mxu0 }
 0x280   : > { %v1890_v10 = vmax.f32 %v1757_v54, 0.0  ;;  %v1760_v61 = vadd.f32 %v8541_v17, %v1759_v36  ;;  %2914 = vperm.xlu1 %7612, %v8768_v41   ;;  %v7755_v17 = vld [vmem:[%s12214_s9 + $0xe0] ss:$8 sps:$4 sm:$0xff]  }
 0x281   : > { %v1893_v62 = vmax.f32 %v1768_v59, 0.0  ;;  %4780 = vmatpush1.bf16.msra.mxu0 %v7755_v17  ;;  %7229 = vmatpush1.bf16.msra.mxu1 %v7755_v17 }
 0x282   : > { %v1891_v63 = vmax.f32 %v1760_v61, 0.0  ;;  %v7141_v0 = vpop.f32.mrb[4].mxu1  ;;  %4781 = vmatprep.subr.bf16.mxu0 %v7760_v11  ;;  %7214 = vmatprep.subr.bf16.mxu1 %v7760_v11 }
 0x283   : > { %v1934_v29 = vpack.c.bf16 %v1893_v62, %v1892_v58  ;;  %v8800_v60 = vadd.f32 %v7141_v0, %v8712_v3  ;;  %v2066_v5 = vpop.f32.mrb[5].mxu1 }
 0x284   : > { %v1933_v6 = vpack.c.bf16 %v1891_v63, %v1890_v10  ;;  %v8806_v8 = vadd.f32 %v8712_v3, %v2066_v5  ;;  %7613 = vset.pattern.permute.xlu1 %v12223_v2  ;;  %v7142_v50 = vpop.f32.mrb[6].mxu1 }
 0x285   : > { %12318 = vst [vmem:[#allocation14_spill] sm:$0xff] %v8800_v60  ;;  %2337 = vperm.xlu1 %7613, %v8800_v60   ;;  %v2069_v9 = vpop.f32.mrb[7].mxu1  ;;  %4782 = vmatpush1.bf16.msra.mxu0 %v7758_v49  ;;  %v8822_v12 = vadd.f32 %v7142_v50, %v8712_v3 }
 0x286   : > { %12319 = vst [vmem:[#allocation15_spill] sm:$0xff] %v8806_v8  ;;  %2327 = vperm.xlu0 %7610, %v8806_v8   ;;  %7175 = vmatprep.mubr.bf16.mxu1 %v1933_v6  ;;  %v8828_v33 = vadd.f32 %v8712_v3, %v2069_v9 }
 0x287   : > { %7176 = vmatmul.mubr.bf16.gmra.mrb[40].mxu1 %v1934_v29  ;;  %12320 = vst [vmem:[#allocation16_spill] sm:$0xff] %v8822_v12 }
 0x288   : > { %7230 = vmatpush1.bf16.msra.mxu1 %v7758_v49  ;;  %12321 = vst [vmem:[#allocation17_spill] sm:$0xff] %v8828_v33  ;;  %v7763_v49 = vld [vmem:[%s12214_s9 + $0x104] ss:$8 sps:$4 sm:$0xff]  }
 0x289   : > { %7614 = vset.pattern.permute.xlu1 %v12225_v1  ;;  %5778 = vmatprep.subr.bf16.mxu1 %v12223_v2 }
 0x28a   : > { %2934 = vperm.xlu1 %7614, %v8800_v60   ;;  %7615 = vset.pattern.permute.xlu0 %v12225_v1 }
 0x28b   : > { %2926 = vperm.xlu0 %7615, %v8806_v8   ;;  %5102 = vmatprep.subr.bf16.mxu0 %v7763_v49 }
 0x28e   : > { %2938 = vperm.xlu1 %7614, %v8822_v12  }
 0x28f   : > { %7616 = vset.pattern.permute.xlu0 %v12223_v2 }
 0x290   : > { %2342 = vperm.xlu0 %7616, %v8822_v12  }
 0x292   : > { %7617 = vset.pattern.permute.xlu1 %v12223_v2 }
 0x293   : > { %2332 = vperm.xlu1 %7617, %v8828_v33  }
 0x294   : > { %v7101_v13 = vpop.f32.mrb[44].mxu0 }
 0x295   : > { %v1781_v16 = vadd.f32 %v8836_v15, %v7101_v13  ;;  %v1772_v18 = vpop.f32.mrb[45].mxu0 }
 0x296   : > { %v1773_v38 = vadd.f32 %v8836_v15, %v1772_v18  ;;  %v7102_v19 = vpop.f32.mrb[46].mxu0 }
 0x297   : > { %v1896_v20 = vmax.f32 %v1781_v16, 0.0  ;;  %v1784_v55 = vadd.f32 %v8836_v15, %v7102_v19  ;;  %7618 = vset.pattern.permute.xlu1 %v12225_v1  ;;  %v1775_v22 = vpop.f32.mrb[47].mxu0 }
 0x298   : > { %v1894_v23 = vmax.f32 %v1773_v38, 0.0  ;;  %v1776_v25 = vadd.f32 %v8836_v15, %v1775_v22  ;;  %2930 = vperm.xlu1 %7618, %v8828_v33  }
 0x299   : > { %v1897_v26 = vmax.f32 %v1784_v55, 0.0 }
 0x29a   : > { %v1895_v27 = vmax.f32 %v1776_v25, 0.0  ;;  %v7145_v28 = vpop.f32.mrb[8].mxu1 }
 0x29b   : > { %v1936_v31 = vpack.c.bf16 %v1897_v26, %v1896_v20  ;;  %v8845_v48 = vadd.f32 %v7145_v28, %v8712_v3  ;;  %v2082_v7 = vpop.f32.mrb[9].mxu1 }
 0x29c   : > { %v1935_v37 = vpack.c.bf16 %v1895_v27, %v1894_v23  ;;  %v8848_v44 = vadd.f32 %v8712_v3, %v2082_v7  ;;  %7619 = vset.pattern.permute.xlu1 %v12223_v2  ;;  %v7146_v45 = vpop.f32.mrb[10].mxu1 }
 0x29d   : > { %12322 = vst [vmem:[#allocation18_spill] sm:$0xff] %v8845_v48  ;;  %2357 = vperm.xlu1 %7619, %v8845_v48   ;;  %v2085_v46 = vpop.f32.mrb[11].mxu1  ;;  %v8858_v51 = vadd.f32 %v7146_v45, %v8712_v3 }
 0x29e   : > { %12323 = vst [vmem:[#allocation19_spill] sm:$0xff] %v8848_v44  ;;  %2347 = vperm.xlu0 %7616, %v8848_v44   ;;  %7179 = vmatprep.mubr.bf16.mxu1 %v1935_v37  ;;  %v8864_v52 = vadd.f32 %v8712_v3, %v2085_v46 }
 0x29f   : > { %7180 = vmatmul.mubr.bf16.gmra.mrb[44].mxu1 %v1936_v31  ;;  %12324 = vst [vmem:[#allocation20_spill] sm:$0xff] %v8858_v51 }
 0x2a0   : > { %12325 = vst [vmem:[#allocation21_spill] sm:$0xff] %v8864_v52 }
 0x2a1   : > { %7620 = vset.pattern.permute.xlu1 %v12225_v1 }
 0x2a2   : > { %2950 = vperm.xlu1 %7620, %v8845_v48   ;;  %7621 = vset.pattern.permute.xlu0 %v12225_v1 }
 0x2a3   : > { %2942 = vperm.xlu0 %7621, %v8848_v44  }
 0x2a6   : > { %2954 = vperm.xlu1 %7620, %v8858_v51  }
 0x2a7   : > { %7622 = vset.pattern.permute.xlu0 %v12223_v2 }
 0x2a8   : > { %2362 = vperm.xlu0 %7622, %v8858_v51  }
 0x2aa   : > { %7623 = vset.pattern.permute.xlu1 %v12223_v2 }
 0x2ab   : > { %2352 = vperm.xlu1 %7623, %v8864_v52  }
 0x2ac   : > { %v7105_v54 = vpop.f32.mrb[48].mxu0 }
 0x2ad   : > { %v1797_v14 = vadd.f32 %v8836_v15, %v7105_v54  ;;  %v1788_v56 = vpop.f32.mrb[49].mxu0 }
 0x2ae   : > { %v1789_v57 = vadd.f32 %v8836_v15, %v1788_v56  ;;  %v7106_v58 = vpop.f32.mrb[50].mxu0 }
 0x2af   : > { %v1900_v59 = vmax.f32 %v1797_v14, 0.0  ;;  %v1800_v36 = vadd.f32 %v8836_v15, %v7106_v58  ;;  %7624 = vset.pattern.permute.xlu1 %v12225_v1  ;;  %v1791_v10 = vpop.f32.mrb[51].mxu0 }
 0x2b0   : > { %v1898_v61 = vmax.f32 %v1789_v57, 0.0  ;;  %v1792_v62 = vadd.f32 %v8836_v15, %v1791_v10  ;;  %2946 = vperm.xlu1 %7624, %v8864_v52  }
 0x2b1   : > { %v1901_v63 = vmax.f32 %v1800_v36, 0.0 }
 0x2b2   : > { %v1899_v0 = vmax.f32 %v1792_v62, 0.0  ;;  %v7149_v4 = vpop.f32.mrb[12].mxu1 }
 0x2b3   : > { %v1938_v29 = vpack.c.bf16 %v1901_v63, %v1900_v59  ;;  %v8875_v5 = vadd.f32 %v7149_v4, %v8712_v3  ;;  %v2098_v17 = vpop.f32.mrb[13].mxu1 }
 0x2b4   : > { %v1937_v6 = vpack.c.bf16 %v1899_v0, %v1898_v61  ;;  %v8878_v50 = vadd.f32 %v8712_v3, %v2098_v17  ;;  %7625 = vset.pattern.permute.xlu1 %v12223_v2  ;;  %v7150_v9 = vpop.f32.mrb[14].mxu1 }
 0x2b5   : > { %12326 = vst [vmem:[#allocation22_spill] sm:$0xff] %v8875_v5  ;;  %2377 = vperm.xlu1 %7625, %v8875_v5   ;;  %v2101_v11 = vpop.f32.mrb[15].mxu1  ;;  %v8891_v13 = vadd.f32 %v7150_v9, %v8712_v3 }
 0x2b6   : > { %12327 = vst [vmem:[#allocation23_spill] sm:$0xff] %v8878_v50  ;;  %2367 = vperm.xlu0 %7622, %v8878_v50   ;;  %7183 = vmatprep.mubr.bf16.mxu1 %v1937_v6  ;;  %v8897_v16 = vadd.f32 %v8712_v3, %v2101_v11 }
 0x2b7   : > { %7184 = vmatmul.mubr.bf16.gmra.mrb[48].mxu1 %v1938_v29  ;;  %12328 = vst [vmem:[#allocation24_spill] sm:$0xff] %v8891_v13 }
 0x2b8   : > { %12329 = vst [vmem:[#allocation25_spill] sm:$0xff] %v8897_v16 }
 0x2b9   : > { %7626 = vset.pattern.permute.xlu1 %v12225_v1 }
 0x2ba   : > { %2966 = vperm.xlu1 %7626, %v8875_v5   ;;  %7627 = vset.pattern.permute.xlu0 %v12225_v1 }
 0x2bb   : > { %2958 = vperm.xlu0 %7627, %v8878_v50  }
 0x2be   : > { %2970 = vperm.xlu1 %7626, %v8891_v13  }
 0x2bf   : > { %7628 = vset.pattern.permute.xlu0 %v12223_v2 }
 0x2c0   : > { %2382 = vperm.xlu0 %7628, %v8891_v13  }
 0x2c2   : > { %7629 = vset.pattern.permute.xlu1 %v12223_v2 }
 0x2c3   : > { %2372 = vperm.xlu1 %7629, %v8897_v16  }
 0x2c4   : > { %v7109_v18 = vpop.f32.mrb[52].mxu0 }
 0x2c5   : > { %v1813_v38 = vadd.f32 %v8836_v15, %v7109_v18  ;;  %v1804_v19 = vpop.f32.mrb[53].mxu0 }
 0x2c6   : > { %v1805_v20 = vadd.f32 %v8836_v15, %v1804_v19  ;;  %v7110_v55 = vpop.f32.mrb[54].mxu0 }
 0x2c7   : > { %v1904_v22 = vmax.f32 %v1813_v38, 0.0  ;;  %v1816_v23 = vadd.f32 %v8836_v15, %v7110_v55  ;;  %7630 = vset.pattern.permute.xlu1 %v12225_v1  ;;  %v1807_v25 = vpop.f32.mrb[55].mxu0 }
 0x2c8   : > { %v1902_v26 = vmax.f32 %v1805_v20, 0.0  ;;  %v1808_v27 = vadd.f32 %v8836_v15, %v1807_v25  ;;  %2962 = vperm.xlu1 %7630, %v8897_v16   ;;  %v7772_v16 = vld [vmem:[%s12214_s9 + $0x134] ss:$8 sps:$4 sm:$0xff]  }
 0x2c9   : > { %v1905_v28 = vmax.f32 %v1816_v23, 0.0 }
 0x2ca   : > { %v1903_v31 = vmax.f32 %v1808_v27, 0.0  ;;  %v7153_v7 = vpop.f32.mrb[16].mxu1 }
 0x2cb   : > { %v1940_v37 = vpack.c.bf16 %v1905_v28, %v1904_v22  ;;  %v8908_v45 = vadd.f32 %v7153_v7, %v8712_v3  ;;  %v2114_v46 = vpop.f32.mrb[17].mxu1  ;;  %v8962_v7 = vld [vmem:[%s12212_s7] sm:$0xff] }
 0x2cc   : > { %v1939_v54 = vpack.c.bf16 %v1903_v31, %v1902_v26  ;;  %v8911_v14 = vadd.f32 %v8712_v3, %v2114_v46  ;;  %7631 = vset.pattern.permute.xlu1 %v12223_v2  ;;  %v7154_v56 = vpop.f32.mrb[18].mxu1 }
 0x2cd   : > { %12330 = vst [vmem:[#allocation26_spill] sm:$0xff] %v8908_v45  ;;  %2397 = vperm.xlu1 %7631, %v8908_v45   ;;  %v2117_v57 = vpop.f32.mrb[19].mxu1  ;;  %v8921_v58 = vadd.f32 %v7154_v56, %v8712_v3  ;;  %v3164_v56 = vrot.slane %v8962_v7, %v8263_v42 }
 0x2ce   : > { %12331 = vst [vmem:[#allocation27_spill] sm:$0xff] %v8911_v14  ;;  %2387 = vperm.xlu0 %7628, %v8911_v14   ;;  %7187 = vmatprep.mubr.bf16.mxu1 %v1939_v54  ;;  %v8927_v59 = vadd.f32 %v8712_v3, %v2117_v57 }
 0x2cf   : > { %7188 = vmatmul.mubr.bf16.gmra.mrb[52].mxu1 %v1940_v37  ;;  %12332 = vst [vmem:[#allocation28_spill] sm:$0xff] %v8921_v58 }
 0x2d0   : > { %12333 = vst [vmem:[#allocation29_spill] sm:$0xff] %v8927_v59 }
 0x2d1   : > { %7632 = vset.pattern.permute.xlu1 %v12225_v1 }
 0x2d2   : > { %2982 = vperm.xlu1 %7632, %v8908_v45   ;;  %7633 = vset.pattern.permute.xlu0 %v12225_v1 }
 0x2d3   : > { %2974 = vperm.xlu0 %7633, %v8911_v14   ;;  %v12347_v14 = vmov 0  }
 0x2d6   : > { %2986 = vperm.xlu1 %7632, %v8921_v58  }
 0x2d7   : > { %7634 = vset.pattern.permute.xlu0 %v12223_v2 }
 0x2d8   : > { %2402 = vperm.xlu0 %7634, %v8921_v58  }
 0x2da   : > { %7635 = vset.pattern.permute.xlu1 %v12223_v2 }
 0x2db   : > { %2392 = vperm.xlu1 %7635, %v8927_v59  }
 0x2dc   : > { %v7113_v36 = vpop.f32.mrb[56].mxu0 }
 0x2dd   : > { %v1829_v10 = vadd.f32 %v8836_v15, %v7113_v36  ;;  %v1820_v61 = vpop.f32.mrb[57].mxu0 }
 0x2de   : > { %v1821_v62 = vadd.f32 %v8836_v15, %v1820_v61  ;;  %v7114_v63 = vpop.f32.mrb[58].mxu0 }
 0x2df   : > { %v1908_v0 = vmax.f32 %v1829_v10, 0.0  ;;  %v1832_v4 = vadd.f32 %v8836_v15, %v7114_v63  ;;  %7636 = vset.pattern.permute.xlu1 %v12225_v1  ;;  %v1823_v29 = vpop.f32.mrb[59].mxu0  ;;  %v3168_v63 = vrot.slane %v8962_v7, %v3167_v53 }
 0x2e0   : > { %v1906_v17 = vmax.f32 %v1821_v62, 0.0  ;;  %v1824_v6 = vadd.f32 %v8836_v15, %v1823_v29  ;;  %2978 = vperm.xlu1 %7636, %v8927_v59   ;;  %v2624_v62 = vrot.slane %v8962_v7, %v8266_v43  ;;  %v2628_v29 = vrot.slane %v8962_v7, %v2627_v30 }
 0x2e1   : > { %v1909_v9 = vmax.f32 %v1832_v4, 0.0  ;;  %v8996_v53 = vrot.slane %v3168_v63, %v8263_v42 }
 0x2e2   : > { %v1907_v11 = vmax.f32 %v1824_v6, 0.0  ;;  %v7157_v49 = vpop.f32.mrb[20].mxu1  ;;  %v9003_v30 = vrot.slane %v2628_v29, %v8266_v43 }
 0x2e3   : > { %v1942_v18 = vpack.c.bf16 %v1909_v9, %v1908_v0  ;;  %v8938_v38 = vadd.f32 %v7157_v49, %v8712_v3  ;;  %v2130_v19 = vpop.f32.mrb[21].mxu1  ;;  %12340 = vst [vmem:[#allocation36_spill] sm:$0xff] %v8996_v53 }
 0x2e4   : > { %v1941_v20 = vpack.c.bf16 %v1907_v11, %v1906_v17  ;;  %v8941_v55 = vadd.f32 %v8712_v3, %v2130_v19  ;;  %7637 = vset.pattern.permute.xlu1 %v12223_v2  ;;  %v7158_v22 = vpop.f32.mrb[22].mxu1  ;;  %v8988_v17 = vrot.slane %v3164_v56, %v8263_v42  ;;  %v8993_v11 = vrot.slane %v2624_v62, %v8266_v43 }
 0x2e5   : > { %12334 = vst [vmem:[#allocation30_spill] sm:$0xff] %v8938_v38  ;;  %2417 = vperm.xlu1 %7637, %v8938_v38   ;;  %v2133_v23 = vpop.f32.mrb[23].mxu1  ;;  %v8951_v25 = vadd.f32 %v7158_v22, %v8712_v3  ;;  %12341 = vst [vmem:[#allocation37_spill] sm:$0xff] %v9003_v30  ;;  %v2631_v56 = vsub.s32 4, %v8259_v40 }
 0x2e6   : > { %12335 = vst [vmem:[#allocation31_spill] sm:$0xff] %v8941_v55  ;;  %2407 = vperm.xlu0 %7634, %v8941_v55   ;;  %7191 = vmatprep.mubr.bf16.mxu1 %v1941_v20  ;;  %v8967_v54 = vadd.f32 %v8712_v3, %v2133_v23  ;;  %12338 = vst [vmem:[#allocation34_spill] sm:$0xff] %v8988_v17 }
 0x2e7   : > { %7192 = vmatmul.mubr.bf16.gmra.mrb[56].mxu1 %v1942_v18  ;;  %12336 = vst [vmem:[#allocation32_spill] sm:$0xff] %v8951_v25  ;;  %12339 = vst [vmem:[#allocation35_spill] sm:$0xff] %v8993_v11 }
 0x2e8   : > { %12337 = vst [vmem:[#allocation33_spill] sm:$0xff] %v8967_v54 }
 0x2e9   : > { %7638 = vset.pattern.permute.xlu1 %v12225_v1 }
 0x2ea   : > { %2998 = vperm.xlu1 %7638, %v8938_v38   ;;  %7639 = vset.pattern.permute.xlu0 %v12225_v1  ;;  %v2632_v38 = vrot.slane %v8962_v7, %v2631_v56 }
 0x2eb   : > { %2990 = vperm.xlu0 %7639, %v8941_v55   ;;  %v2635_v55 = vsub.s32 6, %v8259_v40 }
 0x2ec   : > { %v8953_v26 = vpop.permute.xlu1 %2317  ;;  %v9095_v5 = vrot.slane %v2632_v38, %v8266_v43 }
 0x2ed   : > { %v8955_v27 = vpop.permute.xlu0 %2307 }
 0x2ee   : > { %3002 = vperm.xlu1 %7638, %v8951_v25   ;;  %v7117_v28 = vpop.f32.mrb[60].mxu0 }
 0x2ef   : > { %7640 = vset.pattern.permute.xlu0 %v12223_v2  ;;  %v1836_v31 = vpop.f32.mrb[61].mxu0  ;;  %v1845_v37 = vadd.f32 %v8836_v15, %v7117_v28  ;;  %v2657_v28 = vmul.f32 %v8993_v11, %v8955_v27 }
 0x2f0   : > { %2422 = vperm.xlu0 %7640, %v8951_v25   ;;  %v7118_v46 = vpop.f32.mrb[62].mxu0  ;;  %v1837_v36 = vadd.f32 %v8836_v15, %v1836_v31 }
 0x2f1   : > { %v8971_v57 = vpop.permute.xlu1 %2918  ;;  %v1839_v10 = vpop.f32.mrb[63].mxu0  ;;  %v1912_v0 = vmax.f32 %v1845_v37, 0.0 }
 0x2f2   : > { %7641 = vset.pattern.permute.xlu1 %v12223_v2  ;;  %v8975_v61 = vpop.permute.xlu0 %2910  ;;  %v1840_v4 = vadd.f32 %v8836_v15, %v1839_v10  ;;  %v1910_v6 = vmax.f32 %v1837_v36, 0.0  ;;  %v9018_v36 = vrot.slane %v8744_v32, %v8266_v43 }
 0x2f3   : > { %2412 = vperm.xlu1 %7641, %v8967_v54   ;;  %v1944_v15 = vpack.c.bf16 %v1912_v0, %v1912_v0  ;;  %v3197_v19 = vmul.f32 %v8988_v17, %v8975_v61  ;;  %v3198_v31 = vmul.f32 %v8996_v53, %v8975_v61  ;;  %v2658_v0 = vmul.f32 %v9003_v30, %v8955_v27 }
 0x2f4   : > { %v1911_v49 = vmax.f32 %v1840_v4, 0.0  ;;  %v3206_v4 = vmul.f32 %v8996_v53, %v8971_v57 }
 0x2f5   : > { %v8990_v9 = vpop.permute.xlu1 %2922  ;;  %v3449_v29 = vadd.f32 %v3197_v19, %v2657_v28 }
 0x2f6   : > { %v1943_v20 = vpack.c.bf16 %v1911_v49, %v1910_v6  ;;  %v3210_v6 = vmul.f32 %v8996_v53, %v8990_v9 }
 0x2f7   : > { %7642 = vset.pattern.permute.xlu1 %v12225_v1  ;;  %v8999_v18 = vpop.permute.xlu0 %2322 }
 0x2f8   : > { %2994 = vperm.xlu1 %7642, %v8967_v54   ;;  %v2670_v37 = vmul.f32 %v9003_v30, %v8999_v18  ;;  %7195 = vmatprep.mubr.bf16.mxu1 %v1943_v20  ;;  %v3171_v20 = vsub.s32 5, %v8259_v40  ;;  %v2669_v32 = vmul.f32 %v8993_v11, %v8999_v18 }
 0x2f9   : > { %7196 = vmatmul.mubr.bf16.gmra.mrb[60].mxu1 %v1944_v15  ;;  %v2666_v15 = vmul.f32 %v9003_v30, %v8953_v26 }
 0x2fa   : > { %v9007_v22 = vpop.permute.xlu1 %2312  ;;  %v7161_v23 = vpop.f32.mrb[24].mxu1  ;;  %v3462_v19 = vadd.f32 %v3210_v6, %v2670_v37  ;;  %v12344_v6 = vmov 1   ;;  %v3172_v58 = vrot.slane %v8962_v7, %v3171_v20 }
 0x2fb   : > { %v2146_v46 = vpop.f32.mrb[25].mxu1  ;;  %v9021_v10 = vadd.f32 %v7161_v23, %v8712_v3  ;;  %v2661_v28 = vmul.f32 %v8993_v11, %v9007_v22 }
 0x2fc   : > { %v9024_v62 = vadd.f32 %v8712_v3, %v2146_v46  ;;  %7643 = vset.pattern.permute.xlu1 %v12223_v2  ;;  %v7162_v63 = vpop.f32.mrb[26].mxu1  ;;  %v3450_v46 = vadd.f32 %v3198_v31, %v2658_v0  ;;  %v2662_v2 = vmul.f32 %v9003_v30, %v9007_v22  ;;  %v3723_v31 = vadd.f32 %v9018_v36, %v3449_v29 }
 0x2fd   : > { %12342 = vst [vmem:[#allocation38_spill] sm:$0xff] %v9021_v10  ;;  %v2149_v49 = vpop.f32.mrb[27].mxu1  ;;  %2437 = vperm.xlu1 %7643, %v9021_v10   ;;  %v3458_v0 = vadd.f32 %v3206_v4, %v2666_v15  ;;  %v3736_v4 = vadd.f32 %v9042_v39, %v3462_v19  ;;  %v3209_v29 = vmul.f32 %v8988_v17, %v8990_v9 }
 0x2fe   : > { %12343 = vst [vmem:[#allocation39_spill] sm:$0xff] %v9024_v62  ;;  %2427 = vperm.xlu0 %7640, %v9024_v62   ;;  %v3724_v56 = vadd.f32 %v9042_v39, %v3450_v46  ;;  %v2665_v15 = vmul.f32 %v8993_v11, %v8953_v26  ;;  %v3975_v46 = vmax.f32 %v3723_v31, 0.0  ;;  %v9082_v45 = vadd.f32 %v8712_v3, %v2149_v49 }
 0x2ff   : > { %v9038_v23 = vpop.permute.xlu1 %2914  ;;  %v3732_v19 = vadd.f32 %v9042_v39, %v3458_v0  ;;  %v3461_v59 = vadd.f32 %v3209_v29, %v2669_v32  ;;  %v9087_v31 = vrot.slane %v3172_v58, %v8263_v42  ;;  %v2636_v49 = vrot.slane %v8962_v7, %v2635_v55 }
 0x300   : > { %v3201_v1 = vmul.f32 %v8988_v17, %v9038_v23  ;;  %v3202_v25 = vmul.f32 %v8996_v53, %v9038_v23  ;;  %12346 = vst [vmem:[#allocation41_spill] sm:$0xff] %v9082_v45 }
 0x301   : > { %7644 = vset.pattern.permute.xlu1 %v12344_v6  ;;  %v3984_v29 = vmax.f32 %v3732_v19, 0.0  ;;  %v3735_v58 = vadd.f32 %v9018_v36, %v3461_v59  ;;  %v3199_v38 = vmul.f32 %v9087_v31, %v8975_v61  ;;  %v9112_v59 = vrot.slane %v2636_v49, %v8266_v43  ;;  %v7764_v19 = vld [vmem:[%s12214_s9 + $0x110] ss:$8 sps:$4 sm:$0xff]  }
 0x302   : > { %v3453_v37 = vadd.f32 %v3201_v1, %v2661_v28  ;;  %7645 = vset.pattern.permute.xlu0 %v12344_v6  ;;  %v3454_v54 = vadd.f32 %v3202_v25, %v2662_v2  ;;  %3014 = vperm.xlu1 %7644, %v9021_v10   ;;  %v3205_v1 = vmul.f32 %v8988_v17, %v8971_v57  ;;  %v3175_v28 = vsub.s32 7, %v8259_v40 }
 0x303   : > { %3006 = vperm.xlu0 %7645, %v9024_v62   ;;  %v9079_v62 = vadd.f32 %v7162_v63, %v8712_v3  ;;  %v3988_v40 = vmax.f32 %v3736_v4, 0.0  ;;  %v9136_v49 = vmul.f32 %v9112_v59, %v8953_v26  ;;  %v2672_v50 = vmul.f32 %v9112_v59, %v8999_v18 }
 0x304   : > { %v3727_v2 = vadd.f32 %v9018_v36, %v3453_v37  ;;  %v9069_v25 = vpop.permute.xlu1 %2337  ;;  %v3728_v20 = vadd.f32 %v9042_v39, %v3454_v54  ;;  %v3976_v54 = vmax.f32 %v3724_v56, 0.0  ;;  %v3457_v0 = vadd.f32 %v3205_v1, %v2665_v15 }
 0x305   : > { %v9075_v10 = vpop.permute.xlu0 %2327  ;;  %12345 = vst [vmem:[#allocation40_spill] sm:$0xff] %v9079_v62  ;;  %v3176_v56 = vrot.slane %v8962_v7, %v3175_v28  ;;  %v4232_v1 = vpack.c.bf16 %v3988_v40, %v3984_v29  ;;  %v2659_v15 = vmul.f32 %v9095_v5, %v8955_v27  ;;  %v3203_v48 = vmul.f32 %v9087_v31, %v9038_v23 }
 0x306   : > { %v3979_v37 = vmax.f32 %v3727_v2, 0.0  ;;  %7647 = vset.pattern.permute.xlu1 %v12347_v14  ;;  %v3980_v13 = vmax.f32 %v3728_v20, 0.0  ;;  %v7761_v20 = vld [vmem:[%s12214_s9 + $0x100] ss:$8 sps:$4 sm:$0xff]   ;;  %v3731_v55 = vadd.f32 %v9018_v36, %v3457_v0  ;;  %v9132_v0 = vmul.f32 %v9095_v5, %v8953_v26 }
 0x307   : > { %7646 = vset.pattern.permute.xlu0 %v12347_v14  ;;  %2432 = vperm.xlu1 %7647, %v9082_v45   ;;  %v9120_v28 = vrot.slane %v3176_v56, %v8263_v42  ;;  %v9147_v56 = vmul.f32 %v9087_v31, %v8971_v57 }
 0x308   : > { %2442 = vperm.xlu0 %7646, %v9079_v62   ;;  %v4227_v63 = vpack.c.bf16 %v3979_v37, %v3975_v46  ;;  %v4228_v32 = vpack.c.bf16 %v3980_v13, %v3976_v54  ;;  %v7766_v13 = vld [vmem:[%s12214_s9 + $0x114] ss:$8 sps:$4 sm:$0xff]   ;;  %v3987_v46 = vmax.f32 %v3735_v58, 0.0  ;;  %v7769_v37 = vld [vmem:[%s12214_s9 + $0x124] ss:$8 sps:$4 sm:$0xff]   ;;  %v3451_v54 = vadd.f32 %v3199_v38, %v2659_v15 }
 0x309   : > { %v9092_v2 = vpop.permute.xlu1 %2934  ;;  %12348 = vst [vmem:[#allocation42_spill] sm:$0xff] %v9120_v28  ;;  %v9151_v58 = vmul.f32 %v9120_v28, %v8971_v57  ;;  %v9155_v26 = vmul.f32 %v9120_v28, %v8975_v61  ;;  %v2674_v38 = vmul.f32 %v9003_v30, %v9075_v10  ;;  %v7767_v15 = vld [vmem:[%s12214_s9 + $0x120] ss:$8 sps:$4 sm:$0xff]  }
 0x30a   : > { %v9098_v4 = vpop.permute.xlu0 %2926  ;;  %4783 = vmatprep.mubr.bf16.mxu0 %v4228_v32  ;;  %v9140_v32 = vmul.f32 %v9112_v59, %v8955_v27 }
 0x30b   : > { %7648 = vset.pattern.permute.xlu1 %v12344_v6  ;;  %4784 = vmatmul.mubr.bf16.vlgmr.msra.gmra.mrb[64].mxu0 %v4227_v63  ;;  %v3983_v63 = vmax.f32 %v3731_v55, 0.0  ;;  %v3214_v29 = vmul.f32 %v8996_v53, %v9098_v4  ;;  %v3213_v57 = vmul.f32 %v8988_v17, %v9098_v4 }
 0x30c   : > { %3010 = vperm.xlu1 %7648, %v9082_v45   ;;  %4793 = vmatprep.mubr.bf16.mxu0 %v4232_v1 }
 0x30d   : > { %v9115_v7 = vpop.permute.xlu1 %2938  ;;  %5103 = vmatpush1.bf16.msra.mxu0 %v7761_v20  ;;  %v4231_v1 = vpack.c.bf16 %v3987_v46, %v3983_v63  ;;  %v9173_v46 = vadd.f32 %v8753_v34, %v3451_v54  ;;  %v3222_v54 = vmul.f32 %v8996_v53, %v9092_v2 }
 0x30e   : > { %5104 = vmatprep.subr.bf16.mxu0 %v7766_v13  ;;  %v9161_v13 = vmul.f32 %v9087_v31, %v8990_v9 }
 0x30f   : > { %v9128_v40 = vpop.permute.xlu0 %2342 }
 0x310   : > { %3018 = vperm.xlu1 %7648, %v9079_v62   ;;  %v2686_v55 = vmul.f32 %v9003_v30, %v9128_v40  ;;  %v2685_v8 = vmul.f32 %v8993_v11, %v9128_v40 }
 0x311   : > { %5105 = vmatpush1.bf16.msra.mxu0 %v7764_v19  ;;  %v3212_v19 = vmul.f32 %v9120_v28, %v8990_v9  ;;  %v3226_v9 = vmul.f32 %v8996_v53, %v9115_v7 }
 0x312   : > { %v9157_v20 = vpop.permute.xlu1 %2332  ;;  %v7165_v27 = vpop.f32.mrb[28].mxu1  ;;  %5106 = vmatprep.subr.bf16.mxu0 %v7769_v37  ;;  %v2673_v37 = vmul.f32 %v8993_v11, %v9075_v10 }
 0x313   : > { %v2162_v61 = vpop.f32.mrb[29].mxu1  ;;  %v9178_v63 = vadd.f32 %v7165_v27, %v8712_v3  ;;  %4794 = vmatmul.mubr.bf16.gmra.mrb[68].mxu0 %v4231_v1  ;;  %v9195_v1 = vmul.f32 %v9095_v5, %v8999_v18  ;;  %v3478_v44 = vadd.f32 %v3226_v9, %v2686_v55  ;;  %v7770_v18 = vld [vmem:[%s12214_s9 + $0x130] ss:$8 sps:$4 sm:$0xff]   ;;  %v2678_v12 = vmul.f32 %v9003_v30, %v9157_v20 }
 0x314   : > { %v9181_v62 = vadd.f32 %v8712_v3, %v2162_v61  ;;  %v7166_v45 = vpop.f32.mrb[30].mxu1  ;;  %7649 = vset.pattern.permute.xlu1 %v12347_v14  ;;  %v3466_v61 = vadd.f32 %v3214_v29, %v2674_v38  ;;  %v2682_v29 = vmul.f32 %v9003_v30, %v9069_v25  ;;  %v3465_v52 = vadd.f32 %v3213_v57, %v2673_v37  ;;  %v7775_v57 = vld [vmem:[%s12214_s9 + $0x144] ss:$8 sps:$4 sm:$0xff]  }
 0x315   : > { %12349 = vst [vmem:[#allocation43_spill] sm:$0xff] %v9178_v63  ;;  %v2165_v27 = vpop.f32.mrb[31].mxu1  ;;  %2457 = vperm.xlu1 %7649, %v9178_v63   ;;  %5107 = vmatpush1.bf16.msra.mxu0 %v7767_v15  ;;  %v2663_v55 = vmul.f32 %v9095_v5, %v9007_v22  ;;  %v2664_v15 = vmul.f32 %v9112_v59, %v9007_v22 }
 0x316   : > { %12350 = vst [vmem:[#allocation44_spill] sm:$0xff] %v9181_v62  ;;  %v9201_v51 = vadd.f32 %v8712_v3, %v2165_v27  ;;  %2447 = vperm.xlu0 %7646, %v9181_v62   ;;  %v2677_v27 = vmul.f32 %v8993_v11, %v9157_v20  ;;  %5108 = vmatprep.subr.bf16.mxu0 %v7772_v16 }
 0x317   : > { %v9208_v38 = vpop.permute.xlu1 %2930  ;;  %v3740_v37 = vadd.f32 %v9042_v39, %v3466_v61  ;;  %v3474_v9 = vadd.f32 %v3222_v54, %v2682_v29  ;;  %v3455_v21 = vadd.f32 %v3203_v48, %v2663_v55  ;;  %v3739_v41 = vadd.f32 %v9018_v36, %v3465_v52 }
 0x318   : > { %12351 = vst [vmem:[#allocation45_spill] sm:$0xff] %v9201_v51  ;;  %v3217_v60 = vmul.f32 %v8988_v17, %v9208_v38  ;;  %v3218_v33 = vmul.f32 %v8996_v53, %v9208_v38  ;;  %v3752_v24 = vadd.f32 %v9042_v39, %v3478_v44  ;;  %v3221_v22 = vmul.f32 %v8988_v17, %v9092_v2  ;;  %v7778_v44 = vld [vmem:[%s12214_s9 + $0x154] ss:$8 sps:$4 sm:$0xff]  }
 0x319   : > { %2452 = vperm.xlu1 %7649, %v9201_v51   ;;  %5109 = vmatpush1.bf16.msra.mxu0 %v7770_v18  ;;  %v3225_v54 = vmul.f32 %v8988_v17, %v9115_v7  ;;  %v3748_v48 = vadd.f32 %v9042_v39, %v3474_v9  ;;  %v3452_v52 = vadd.f32 %v9155_v26, %v9140_v32  ;;  %v3992_v55 = vmax.f32 %v3740_v37, 0.0  ;;  %v7781_v37 = vld [vmem:[%s12214_s9 + $0x164] ss:$8 sps:$4 sm:$0xff]  }
 0x31a   : > { %7650 = vset.pattern.permute.xlu0 %v12344_v6  ;;  %v3470_v16 = vadd.f32 %v3218_v33, %v2678_v12  ;;  %v3469_v35 = vadd.f32 %v3217_v60, %v2677_v27  ;;  %v7773_v12 = vld [vmem:[%s12214_s9 + $0x140] ss:$8 sps:$4 sm:$0xff]   ;;  %5110 = vmatprep.subr.bf16.mxu0 %v7775_v57  ;;  %v3460_v18 = vadd.f32 %v9151_v58, %v9136_v49  ;;  %v3991_v32 = vmax.f32 %v3739_v41, 0.0  ;;  %v7776_v41 = vld [vmem:[%s12214_s9 + $0x150] ss:$8 sps:$4 sm:$0xff]  }
 0x31b   : > { %3022 = vperm.xlu0 %7650, %v9181_v62   ;;  %v2681_v27 = vmul.f32 %v8993_v11, %v9069_v25  ;;  %v9260_v57 = vadd.f32 %v7166_v45, %v8712_v3  ;;  %v3477_v9 = vadd.f32 %v3225_v54, %v2685_v8  ;;  %v4004_v62 = vmax.f32 %v3752_v24, 0.0 }
 0x31c   : > { %v9240_v61 = vpop.permute.xlu1 %2357  ;;  %v3744_v29 = vadd.f32 %v9042_v39, %v3470_v16  ;;  %v3743_v60 = vadd.f32 %v9018_v36, %v3469_v35  ;;  %v3464_v35 = vadd.f32 %v3212_v19, %v2672_v50  ;;  %v3204_v50 = vmul.f32 %v9120_v28, %v9038_v23 }
 0x31d   : > { %v9247_v33 = vpop.permute.xlu0 %2347  ;;  %12352 = vst [vmem:[#allocation46_spill] sm:$0xff] %v9260_v57  ;;  %7652 = vset.pattern.permute.xlu1 %v12344_v6  ;;  %v3729_v49 = vadd.f32 %v8753_v34, %v3455_v21  ;;  %v3473_v3 = vadd.f32 %v3221_v22, %v2681_v27  ;;  %5111 = vmatpush1.bf16.msra.mxu0 %v7773_v12  ;;  %v4000_v19 = vmax.f32 %v3748_v48, 0.0 }
 0x31e   : > { %3026 = vperm.xlu1 %7652, %v9201_v51   ;;  %v3996_v16 = vmax.f32 %v3744_v29, 0.0  ;;  %v3995_v26 = vmax.f32 %v3743_v60, 0.0  ;;  %5112 = vmatprep.subr.bf16.mxu0 %v7778_v44  ;;  %v9275_v24 = vadd.f32 %v8782_v47, %v3452_v52  ;;  %v3751_v21 = vadd.f32 %v9018_v36, %v3477_v9 }
 0x31f   : > { %7651 = vset.pattern.permute.xlu0 %v12347_v14  ;;  %v9284_v22 = vadd.f32 %v8782_v47, %v3460_v18  ;;  %v3459_v54 = vadd.f32 %v9147_v56, %v9132_v0  ;;  %v3463_v29 = vadd.f32 %v9161_v13, %v9195_v1  ;;  %v4240_v60 = vpack.c.bf16 %v4004_v62, %v4000_v19  ;;  %v7779_v0 = vld [vmem:[%s12214_s9 + $0x160] ss:$8 sps:$4 sm:$0xff]   ;;  %v7784_v13 = vld [vmem:[%s12214_s9 + $0x174] ss:$8 sps:$4 sm:$0xff]   ;;  %v7782_v19 = vld [vmem:[%s12214_s9 + $0x170] ss:$8 sps:$4 sm:$0xff]  }
 0x320   : > { %2462 = vperm.xlu0 %7651, %v9260_v57   ;;  %v4236_v8 = vpack.c.bf16 %v3996_v16, %v3992_v55  ;;  %v4235_v58 = vpack.c.bf16 %v3995_v26, %v3991_v32  ;;  %v3981_v12 = vmax.f32 %v3729_v49, 0.0  ;;  %v3747_v48 = vadd.f32 %v9018_v36, %v3473_v3 }
 0x321   : > { %v9269_v45 = vpop.permute.xlu1 %2950  ;;  %v3456_v44 = vadd.f32 %v3204_v50, %v2664_v15  ;;  %v9293_v52 = vadd.f32 %v8782_v47, %v3464_v35  ;;  %v3977_v18 = vmax.f32 %v9173_v46, 0.0  ;;  %5113 = vmatpush1.bf16.msra.mxu0 %v7776_v41  ;;  %v4003_v56 = vmax.f32 %v3751_v21, 0.0 }
 0x322   : > { %v9277_v23 = vpop.permute.xlu0 %2942  ;;  %3030 = vperm.xlu1 %7652, %v9178_v63   ;;  %4803 = vmatprep.mubr.bf16.mxu0 %v4236_v8  ;;  %v9307_v46 = vadd.f32 %v8753_v34, %v3459_v54  ;;  %v9310_v15 = vadd.f32 %v8753_v34, %v3463_v29  ;;  %v9314_v35 = vmul.f32 %v9095_v5, %v9069_v25  ;;  %v3999_v26 = vmax.f32 %v3747_v48, 0.0 }
 0x323   : > { %12353 = vst [vmem:[#allocation47_spill] sm:$0xff] %v9277_v23  ;;  %4804 = vmatmul.mubr.bf16.gmra.mrb[72].mxu0 %v4235_v58  ;;  %5114 = vmatprep.subr.bf16.mxu0 %v7781_v37  ;;  %v2684_v55 = vmul.f32 %v9112_v59, %v9069_v25  ;;  %v9320_v9 = vmul.f32 %v9095_v5, %v9075_v10 }
 0x324   : > { %4813 = vmatprep.mubr.bf16.mxu0 %v4240_v60  ;;  %v2676_v16 = vmul.f32 %v9112_v59, %v9075_v10  ;;  %v9328_v50 = vadd.f32 %v8782_v47, %v3456_v44  ;;  %v9330_v49 = vpack.c.bf16 %v3981_v12, %v3977_v18  ;;  %v9335_v25 = vmul.f32 %v9087_v31, %v9092_v2 }
 0x325   : > { %v9296_v27 = vpop.permute.xlu1 %2954  ;;  %v3224_v8 = vmul.f32 %v9120_v28, %v9092_v2  ;;  %v9341_v10 = vmul.f32 %v9087_v31, %v9098_v4  ;;  %v3230_v58 = vmul.f32 %v8996_v53, %v9277_v23  ;;  %5115 = vmatpush1.bf16.msra.mxu0 %v7779_v0  ;;  %v3216_v41 = vmul.f32 %v9120_v28, %v9098_v4 }
 0x326   : > { %3034 = vperm.xlu1 %7652, %v9260_v57   ;;  %12354 = vst [vmem:[#allocation48_spill] sm:$0xff] %v9330_v49  ;;  %v9352_v21 = vmul.f32 %v9087_v31, %v9115_v7  ;;  %v3228_v2 = vmul.f32 %v9120_v28, %v9115_v7  ;;  %v4239_v29 = vpack.c.bf16 %v4003_v56, %v3999_v26  ;;  %v7787_v7 = vld [vmem:[%s12214_s9 + $0x184] ss:$8 sps:$4 sm:$0xff]   ;;  %v9379_v56 = vld [vmem:[%s12211_s6] ss:$0 sm:$0xff] }
 0x327   : > { %v9325_v32 = vpop.permute.xlu0 %2362  ;;  %5116 = vmatprep.subr.bf16.mxu0 %v7784_v13  ;;  %v9360_v60 = vmul.f32 %v9095_v5, %v9128_v40  ;;  %v2690_v12 = vmul.f32 %v9003_v30, %v9247_v33  ;;  %v3229_v4 = vmul.f32 %v8988_v17, %v9277_v23  ;;  %v2688_v18 = vmul.f32 %v9112_v59, %v9128_v40 }
 0x328   : > { %v2702_v48 = vmul.f32 %v9003_v30, %v9325_v32  ;;  %v3220_v0 = vmul.f32 %v9120_v28, %v9208_v38  ;;  %v2689_v1 = vmul.f32 %v8993_v11, %v9247_v33  ;;  %v3238_v40 = vmul.f32 %v8996_v53, %v9269_v45 }
 0x329   : > { %v3242_v62 = vmul.f32 %v8996_v53, %v9296_v27  ;;  %v3482_v63 = vadd.f32 %v3230_v58, %v2690_v12  ;;  %5117 = vmatpush1.bf16.msra.mxu0 %v7782_v19  ;;  %v3468_v42 = vadd.f32 %v3216_v41, %v2676_v16  ;;  %v2698_v58 = vmul.f32 %v9003_v30, %v9240_v61  ;;  %v7790_v41 = vld [vmem:[%s12214_s9 + $0x194] ss:$8 sps:$4 sm:$0xff]  }
 0x32a   : > { %v9356_v37 = vpop.permute.xlu1 %2352  ;;  %v7169_v54 = vpop.f32.mrb[32].mxu1  ;;  %7653 = vset.pattern.permute.xlu1 %v12347_v14  ;;  %v3481_v12 = vadd.f32 %v3229_v4, %v2689_v1  ;;  %5118 = vmatprep.subr.bf16.mxu0 %v7787_v7  ;;  %v3476_v49 = vadd.f32 %v3224_v8, %v2684_v55  ;;  %v7788_v55 = vld [vmem:[%s12214_s9 + $0x190] ss:$8 sps:$4 sm:$0xff]   ;;  %v3480_v4 = vadd.f32 %v3228_v2, %v2688_v18 }
 0x32b   : > { %v2178_v44 = vpop.f32.mrb[33].mxu1  ;;  %v9382_v13 = vadd.f32 %v9379_v56, %v7169_v54  ;;  %4814 = vmatmul.mubr.bf16.gmra.mrb[76].mxu0 %v4239_v29  ;;  %v7785_v54 = vld [vmem:[%s12214_s9 + $0x180] ss:$8 sps:$4 sm:$0xff]   ;;  %v9400_v29 = vmul.f32 %v9095_v5, %v9157_v20  ;;  %v3494_v43 = vadd.f32 %v3242_v62, %v2702_v48  ;;  %v2693_v28 = vmul.f32 %v8993_v11, %v9356_v37 }
 0x32c   : > { %v9385_v26 = vadd.f32 %v9379_v56, %v2178_v44  ;;  %v7170_v3 = vpop.f32.mrb[34].mxu1  ;;  %v2680_v44 = vmul.f32 %v9112_v59, %v9157_v20  ;;  %v2694_v20 = vmul.f32 %v9003_v30, %v9356_v37  ;;  %v3756_v62 = vadd.f32 %v9042_v39, %v3482_v63  ;;  %v7793_v63 = vld [vmem:[%s12214_s9 + $0x1a4] ss:$8 sps:$4 sm:$0xff]  }
 0x32d   : > { %12355 = vst [vmem:[#allocation49_spill] sm:$0xff] %v9382_v13  ;;  %v9393_v57 = vpop.f32.mrb[35].mxu1  ;;  %2477 = vperm.xlu1 %7653, %v9382_v13   ;;  %v3490_v1 = vadd.f32 %v3238_v40, %v2698_v58  ;;  %5119 = vmatpush1.bf16.msra.mxu0 %v7785_v54  ;;  %v2701_v48 = vmul.f32 %v8993_v11, %v9325_v32  ;;  %v3982_v40 = vmax.f32 %v9328_v50, 0.0  ;;  %v3989_v54 = vmax.f32 %v9310_v15, 0.0  ;;  %v7791_v15 = vld [vmem:[%s12214_s9 + $0x1a0] ss:$8 sps:$4 sm:$0xff]  }
 0x32e   : > { %12356 = vst [vmem:[#allocation50_spill] sm:$0xff] %v9385_v26  ;;  %2467 = vperm.xlu0 %7651, %v9385_v26   ;;  %v3472_v8 = vadd.f32 %v3220_v0, %v2680_v44  ;;  %v9436_v0 = vadd.f32 %v9379_v56, %v7170_v3  ;;  %v3755_v2 = vadd.f32 %v9018_v36, %v3481_v12 }
 0x32f   : > { %v9409_v19 = vpop.permute.xlu1 %2946  ;;  %v3768_v18 = vadd.f32 %v9042_v39, %v3494_v43  ;;  %5120 = vmatprep.subr.bf16.mxu0 %v7790_v41  ;;  %v3219_v58 = vmul.f32 %v9087_v31, %v9208_v38  ;;  %v3764_v43 = vadd.f32 %v9042_v39, %v3490_v1  ;;  %v4008_v41 = vmax.f32 %v3756_v62, 0.0  ;;  %v7796_v1 = vld [vmem:[%s12214_s9 + $0x1b4] ss:$8 sps:$4 sm:$0xff]  }
 0x330   : > { %v3233_v23 = vmul.f32 %v8988_v17, %v9409_v19  ;;  %v3234_v16 = vmul.f32 %v8996_v53, %v9409_v19  ;;  %12357 = vst [vmem:[#allocation51_spill] sm:$0xff] %v9436_v0  ;;  %v3746_v62 = vadd.f32 %v8782_v47, %v3472_v8 }
 0x331   : > { %7654 = vset.pattern.permute.xlu1 %v12344_v6  ;;  %5121 = vmatpush1.bf16.msra.mxu0 %v7788_v55  ;;  %v3754_v55 = vadd.f32 %v8782_v47, %v3480_v4 }
 0x332   : > { %7655 = vset.pattern.permute.xlu0 %v12344_v6  ;;  %v3486_v7 = vadd.f32 %v3234_v16, %v2694_v20  ;;  %v3485_v51 = vadd.f32 %v3233_v23, %v2693_v28  ;;  %3046 = vperm.xlu1 %7654, %v9382_v13   ;;  %v3237_v28 = vmul.f32 %v8988_v17, %v9269_v45 }
 0x333   : > { %3038 = vperm.xlu0 %7655, %v9385_v26   ;;  %v3241_v23 = vmul.f32 %v8988_v17, %v9296_v27  ;;  %v9459_v20 = vadd.f32 %v8782_v47, %v3468_v42  ;;  %v3467_v16 = vadd.f32 %v9341_v10, %v9320_v9  ;;  %5122 = vmatprep.subr.bf16.mxu0 %v7793_v63  ;;  %v4007_v42 = vmax.f32 %v3755_v2, 0.0 }
 0x334   : > { %v9446_v50 = vpop.permute.xlu1 %2377  ;;  %v3760_v44 = vadd.f32 %v9042_v39, %v3486_v7  ;;  %v3759_v3 = vadd.f32 %v9018_v36, %v3485_v51  ;;  %v2697_v51 = vmul.f32 %v8993_v11, %v9240_v61  ;;  %v4020_v26 = vmax.f32 %v3768_v18, 0.0  ;;  %v7794_v18 = vld [vmem:[%s12214_s9 + $0x1b0] ss:$8 sps:$4 sm:$0xff]  }
 0x335   : > { %v9452_v12 = vpop.permute.xlu0 %2367  ;;  %v3493_v38 = vadd.f32 %v3241_v23, %v2701_v48  ;;  %v9473_v9 = vadd.f32 %v9379_v56, %v9393_v57  ;;  %v3750_v48 = vadd.f32 %v8782_v47, %v3476_v49  ;;  %v4016_v2 = vmax.f32 %v3764_v43, 0.0  ;;  %5123 = vmatpush1.bf16.msra.mxu0 %v7791_v15  ;;  %v7799_v49 = vld [vmem:[%s12214_s9 + $0x1c4] ss:$8 sps:$4 sm:$0xff]  }
 0x336   : > { %3050 = vperm.xlu1 %7654, %v9436_v0   ;;  %v4012_v7 = vmax.f32 %v3760_v44, 0.0  ;;  %v4011_v13 = vmax.f32 %v3759_v3, 0.0  ;;  %v3489_v10 = vadd.f32 %v3237_v28, %v2697_v51  ;;  %v3475_v57 = vadd.f32 %v9335_v25, %v9314_v35  ;;  %5124 = vmatprep.subr.bf16.mxu0 %v7796_v1 }
 0x337   : > { %7656 = vset.pattern.permute.xlu0 %v12347_v14  ;;  %12358 = vst [vmem:[#allocation52_spill] sm:$0xff] %v9473_v9  ;;  %v3767_v28 = vadd.f32 %v9018_v36, %v3493_v38  ;;  %v12360_v3 = vmax.f32 %v9284_v22, 0.0  ;;  %v12361_v43 = vmax.f32 %v9293_v52, 0.0  ;;  %v12363_v35 = vmax.f32 %v9307_v46, 0.0 }
 0x338   : > { %2482 = vperm.xlu0 %7656, %v9436_v0   ;;  %v4244_v63 = vpack.c.bf16 %v4012_v7, %v4008_v41  ;;  %v4243_v23 = vpack.c.bf16 %v4011_v13, %v4007_v42  ;;  %v12359_v13 = vmax.f32 %v9275_v24, 0.0  ;;  %v4248_v51 = vpack.c.bf16 %v4020_v26, %v4016_v2  ;;  %v7802_v42 = vld [vmem:[%s12214_s9 + $0x1d4] ss:$8 sps:$4 sm:$0xff]  }
 0x339   : > { %v9478_v4 = vpop.permute.xlu1 %2966  ;;  %v9499_v15 = vpack.c.bf16 %v12361_v43, %v12360_v3  ;;  %v9503_v25 = vpack.c.bf16 %v3989_v54, %v12363_v35  ;;  %v3471_v41 = vadd.f32 %v3219_v58, %v9400_v29  ;;  %v4006_v38 = vmax.f32 %v3754_v55, 0.0  ;;  %5125 = vmatpush1.bf16.msra.mxu0 %v7794_v18 }
 0x33a   : > { %v9485_v44 = vpop.permute.xlu0 %2958  ;;  %v9493_v8 = vpack.c.bf16 %v3982_v40, %v12359_v13  ;;  %7657 = vset.pattern.permute.xlu1 %v12347_v14  ;;  %4823 = vmatprep.mubr.bf16.mxu0 %v4244_v63  ;;  %v3479_v24 = vadd.f32 %v9352_v21, %v9360_v60  ;;  %v3763_v22 = vadd.f32 %v9018_v36, %v3489_v10  ;;  %v3994_v52 = vmax.f32 %v9459_v20, 0.0  ;;  %v7797_v60 = vld [vmem:[%s12214_s9 + $0x1c0] ss:$8 sps:$4 sm:$0xff]  }
 0x33b   : > { %12362 = vst [vmem:[#allocation53_spill] sm:$0xff] %v9499_v15  ;;  %12364 = vst [vmem:[#allocation54_spill] sm:$0xff] %v9503_v25  ;;  %2472 = vperm.xlu1 %7657, %v9473_v9   ;;  %4824 = vmatmul.mubr.bf16.gmra.mrb[80].mxu0 %v4243_v23  ;;  %v3998_v46 = vmax.f32 %v3746_v62, 0.0  ;;  %v9513_v40 = vadd.f32 %v8753_v34, %v3467_v16  ;;  %v9517_v26 = vmul.f32 %v9095_v5, %v9240_v61  ;;  %v12365_v16 = vld [vmem:[#allocation47_spill] sm:$0xff] }
 0x33c   : > { %v2700_v29 = vmul.f32 %v9112_v59, %v9240_v61  ;;  %4833 = vmatprep.mubr.bf16.mxu0 %v4248_v51  ;;  %v4002_v54 = vmax.f32 %v3750_v48, 0.0  ;;  %v9527_v58 = vadd.f32 %v8753_v34, %v3475_v57  ;;  %v2691_v20 = vmul.f32 %v9095_v5, %v9247_v33  ;;  %v12366_v61 = vld [vmem:[#allocation42_spill] sm:$0xff]  ;;  %5126 = vmatprep.subr.bf16.mxu0 %v7799_v49 }
 0x33d   : > { %v9521_v21 = vpop.permute.xlu1 %2970  ;;  %v3231_v1 = vmul.f32 %v9087_v31, %v12365_v16  ;;  %v3232_v55 = vmul.f32 %v12366_v61, %v12365_v16  ;;  %v4019_v7 = vmax.f32 %v3767_v28, 0.0  ;;  %v2692_v10 = vmul.f32 %v9112_v59, %v9247_v33  ;;  %5127 = vmatpush1.bf16.msra.mxu0 %v7797_v60  ;;  %v7805_v60 = vld [vmem:[%s12214_s9 + $0x1e4] ss:$8 sps:$4 sm:$0xff]  }
 0x33e   : > { %v9541_v62 = vadd.f32 %v8753_v34, %v3471_v41  ;;  %v9543_v48 = vpack.c.bf16 %v4006_v38, %v4002_v54  ;;  %v9546_v63 = vadd.f32 %v8753_v34, %v3479_v24  ;;  %v9550_v23 = vmul.f32 %v9087_v31, %v9269_v45  ;;  %5128 = vmatprep.subr.bf16.mxu0 %v7802_v42 }
 0x33f   : > { %v3240_v2 = vmul.f32 %v12366_v61, %v9269_v45  ;;  %7658 = vset.pattern.permute.xlu1 %v12344_v6  ;;  %v9555_v18 = vpop.permute.xlu0 %2382  ;;  %v4015_v33 = vmax.f32 %v3763_v22, 0.0  ;;  %v9557_v57 = vpack.c.bf16 %v3998_v46, %v3994_v52  ;;  %v9561_v28 = vmul.f32 %v9087_v31, %v9296_v27  ;;  %v7800_v45 = vld [vmem:[%s12214_s9 + $0x1d0] ss:$8 sps:$4 sm:$0xff]  }
 0x340   : > { %12367 = vst [vmem:[#allocation47_spill] sm:$0xff] %v9543_v48  ;;  %v3244_v49 = vmul.f32 %v12366_v61, %v9296_v27  ;;  %v3246_v13 = vmul.f32 %v8996_v53, %v9485_v44  ;;  %3042 = vperm.xlu1 %7658, %v9473_v9   ;;  %v2704_v3 = vmul.f32 %v9112_v59, %v9325_v32  ;;  %v3997_v15 = vmax.f32 %v9541_v62, 0.0 }
 0x341   : > { %12368 = vst [vmem:[#allocation42_spill] sm:$0xff] %v9557_v57  ;;  %v4247_v51 = vpack.c.bf16 %v4019_v7, %v4015_v33  ;;  %v9575_v41 = vadd.f32 %v3232_v55, %v2692_v10  ;;  %v9577_v27 = vadd.f32 %v3231_v1, %v2691_v20  ;;  %v3235_v38 = vmul.f32 %v9087_v31, %v9409_v19  ;;  %v7803_v33 = vld [vmem:[%s12214_s9 + $0x1e0] ss:$8 sps:$4 sm:$0xff]  }
 0x342   : > { %v9573_v43 = vpop.permute.xlu1 %2372  ;;  %v7173_v35 = vpop.f32.mrb[36].mxu1  ;;  %v2706_v24 = vmul.f32 %v9003_v30, %v9452_v12  ;;  %v3245_v22 = vmul.f32 %v8988_v17, %v9485_v44  ;;  %v2718_v52 = vmul.f32 %v9003_v30, %v9555_v18  ;;  %v3236_v54 = vmul.f32 %v12366_v61, %v9409_v19  ;;  %5129 = vmatpush1.bf16.msra.mxu0 %v7800_v45 }
 0x343   : > { %v2194_v46 = vpop.f32.mrb[37].mxu1  ;;  %v2705_v20 = vmul.f32 %v8993_v11, %v9452_v12  ;;  %v9595_v16 = vadd.f32 %v9379_v56, %v7173_v35  ;;  %4834 = vmatmul.mubr.bf16.gmra.mrb[84].mxu0 %v4247_v51  ;;  %v3254_v7 = vmul.f32 %v8996_v53, %v9478_v4  ;;  %v3258_v42 = vmul.f32 %v8996_v53, %v9521_v21 }
 0x344   : > { %v9598_v1 = vadd.f32 %v9379_v56, %v2194_v46  ;;  %v7174_v55 = vpop.f32.mrb[38].mxu1  ;;  %7659 = vset.pattern.permute.xlu1 %v12347_v14  ;;  %v3498_v10 = vadd.f32 %v3246_v13, %v2706_v24  ;;  %v2695_v51 = vmul.f32 %v9095_v5, %v9356_v37  ;;  %v2696_v46 = vmul.f32 %v9112_v59, %v9356_v37 }
 0x345   : > { %12369 = vst [vmem:[#allocation55_spill] sm:$0xff] %v9595_v16  ;;  %v9605_v19 = vpop.f32.mrb[39].mxu1  ;;  %2497 = vperm.xlu1 %7659, %v9595_v16   ;;  %v3492_v13 = vadd.f32 %v3240_v2, %v2700_v29  ;;  %v2714_v45 = vmul.f32 %v9003_v30, %v9446_v50  ;;  %v3497_v9 = vadd.f32 %v3245_v22, %v2705_v20  ;;  %v7808_v2 = vld [vmem:[%s12214_s9 + $0x1f4] ss:$8 sps:$4 sm:$0xff]  }
 0x346   : > { %12370 = vst [vmem:[#allocation56_spill] sm:$0xff] %v9598_v1  ;;  %2487 = vperm.xlu0 %7656, %v9598_v1   ;;  %v3510_v35 = vadd.f32 %v3258_v42, %v2718_v52  ;;  %5130 = vmatprep.subr.bf16.mxu0 %v7805_v60  ;;  %v3496_v48 = vadd.f32 %v3244_v49, %v2704_v3  ;;  %v7806_v49 = vld [vmem:[%s12214_s9 + $0x1f0] ss:$8 sps:$4 sm:$0xff]  }
 0x347   : > { %v9620_v24 = vpop.permute.xlu1 %2962  ;;  %v2709_v57 = vmul.f32 %v8993_v11, %v9573_v43  ;;  %v2710_v37 = vmul.f32 %v9003_v30, %v9573_v43  ;;  %v3772_v22 = vadd.f32 %v9042_v39, %v3498_v10  ;;  %v3506_v52 = vadd.f32 %v3254_v7, %v2714_v45  ;;  %5131 = vmatpush1.bf16.msra.mxu0 %v7803_v33 }
 0x348   : > { %v3249_v25 = vmul.f32 %v8988_v17, %v9620_v24  ;;  %v3250_v29 = vmul.f32 %v8996_v53, %v9620_v24  ;;  %v3488_v3 = vadd.f32 %v3236_v54, %v2696_v46  ;;  %v3487_v60 = vadd.f32 %v3235_v38, %v2695_v51  ;;  %5132 = vmatprep.subr.bf16.mxu0 %v7808_v2 }
 0x349   : > { %v2717_v20 = vmul.f32 %v8993_v11, %v9555_v18  ;;  %7660 = vset.pattern.permute.xlu1 %v12344_v6  ;;  %v9643_v7 = vadd.f32 %v9379_v56, %v7174_v55  ;;  %v3771_v38 = vadd.f32 %v9018_v36, %v3497_v9  ;;  %v3784_v54 = vadd.f32 %v9042_v39, %v3510_v35 }
 0x34a   : > { %7661 = vset.pattern.permute.xlu0 %v12344_v6  ;;  %v3502_v42 = vadd.f32 %v3250_v29, %v2710_v37  ;;  %v3501_v0 = vadd.f32 %v3249_v25, %v2709_v57  ;;  %3062 = vperm.xlu1 %7660, %v9595_v16   ;;  %v4005_v10 = vmax.f32 %v9546_v63, 0.0  ;;  %v3253_v33 = vmul.f32 %v8988_v17, %v9478_v4 }
 0x34b   : > { %12371 = vst [vmem:[#allocation57_spill] sm:$0xff] %v9643_v7  ;;  %3054 = vperm.xlu0 %7661, %v9598_v1   ;;  %v3257_v25 = vmul.f32 %v8988_v17, %v9521_v21  ;;  %v2703_v9 = vmul.f32 %v9095_v5, %v9325_v32  ;;  %v3780_v63 = vadd.f32 %v9042_v39, %v3506_v52  ;;  %v4024_v37 = vmax.f32 %v3772_v22, 0.0 }
 0x34c   : > { %v9654_v62 = vpop.permute.xlu1 %2397  ;;  %v3776_v57 = vadd.f32 %v9042_v39, %v3502_v42  ;;  %v3775_v55 = vadd.f32 %v9018_v36, %v3501_v0  ;;  %5133 = vmatpush1.bf16.msra.mxu0 %v7806_v49  ;;  %v3758_v35 = vadd.f32 %v8782_v47, %v9575_v41  ;;  %v3770_v46 = vadd.f32 %v8782_v47, %v3496_v48 }
 0x34d   : > { %v9660_v51 = vpop.permute.xlu0 %2387  ;;  %v2713_v45 = vmul.f32 %v8993_v11, %v9446_v50  ;;  %v3509_v29 = vadd.f32 %v3257_v25, %v2717_v20  ;;  %v3762_v0 = vadd.f32 %v8782_v47, %v3488_v3  ;;  %v4023_v2 = vmax.f32 %v3771_v38, 0.0 }
 0x34e   : > { %3066 = vperm.xlu1 %7660, %v9643_v7   ;;  %v4028_v32 = vmax.f32 %v3776_v57, 0.0  ;;  %v4027_v52 = vmax.f32 %v3775_v55, 0.0  ;;  %v4036_v49 = vmax.f32 %v3784_v54, 0.0  ;;  %v3757_v48 = vadd.f32 %v8753_v34, %v9577_v27 }
 0x34f   : > { %7662 = vset.pattern.permute.xlu0 %v12347_v14  ;;  %v3505_v41 = vadd.f32 %v3253_v33, %v2713_v45  ;;  %v3761_v42 = vadd.f32 %v8753_v34, %v3487_v60  ;;  %v3766_v22 = vadd.f32 %v8782_v47, %v3492_v13  ;;  %v4032_v16 = vmax.f32 %v3780_v63, 0.0 }
 0x350   : > { %2502 = vperm.xlu0 %7662, %v9643_v7   ;;  %v4252_v3 = vpack.c.bf16 %v4028_v32, %v4024_v37  ;;  %v4251_v25 = vpack.c.bf16 %v4027_v52, %v4023_v2  ;;  %v3491_v38 = vadd.f32 %v9550_v23, %v9517_v26  ;;  %v9682_v54 = vadd.f32 %v9379_v56, %v9605_v19 }
 0x351   : > { %v9676_v20 = vpop.permute.xlu1 %2982  ;;  %v3783_v27 = vadd.f32 %v9018_v36, %v3509_v29  ;;  %v12373_v60 = vmax.f32 %v9513_v40, 0.0  ;;  %v12375_v13 = vmax.f32 %v9527_v58, 0.0  ;;  %v4256_v26 = vpack.c.bf16 %v4036_v49, %v4032_v16 }
 0x352   : > { %12372 = vst [vmem:[#allocation58_spill] sm:$0xff] %v9682_v54  ;;  %v9684_v33 = vpop.permute.xlu0 %2974  ;;  %7663 = vset.pattern.permute.xlu1 %v12347_v14  ;;  %4843 = vmatprep.mubr.bf16.mxu0 %v4252_v3  ;;  %v4014_v23 = vmax.f32 %v3762_v0, 0.0  ;;  %v4022_v63 = vmax.f32 %v3770_v46, 0.0  ;;  %v3495_v19 = vadd.f32 %v9561_v28, %v2703_v9  ;;  %v3779_v45 = vadd.f32 %v9018_v36, %v3505_v41 }
 0x353   : > { %v9689_v57 = vpack.c.bf16 %v3997_v15, %v12373_v60  ;;  %v9693_v55 = vpack.c.bf16 %v4005_v10, %v12375_v13  ;;  %2492 = vperm.xlu1 %7663, %v9682_v54   ;;  %4844 = vmatmul.mubr.bf16.gmra.mrb[88].mxu0 %v4251_v25  ;;  %v4010_v40 = vmax.f32 %v3758_v35, 0.0  ;;  %v4009_v15 = vmax.f32 %v3757_v48, 0.0 }
 0x354   : > { %v4013_v37 = vmax.f32 %v3761_v42, 0.0  ;;  %v9701_v58 = vmul.f32 %v9095_v5, %v9446_v50  ;;  %v2716_v10 = vmul.f32 %v9112_v59, %v9446_v50  ;;  %4853 = vmatprep.mubr.bf16.mxu0 %v4256_v26  ;;  %v4018_v46 = vmax.f32 %v3766_v22, 0.0 }
 0x355   : > { %12374 = vst [vmem:[#allocation59_spill] sm:$0xff] %v9689_v57  ;;  %12376 = vst [vmem:[#allocation60_spill] sm:$0xff] %v9693_v55  ;;  %v9705_v16 = vpop.permute.xlu1 %2986  ;;  %v9708_v28 = vadd.f32 %v8753_v34, %v3491_v38  ;;  %v2707_v9 = vmul.f32 %v9095_v5, %v9452_v12  ;;  %v3247_v35 = vmul.f32 %v9087_v31, %v9485_v44  ;;  %v4035_v0 = vmax.f32 %v3783_v27, 0.0 }
 0x356   : > { %v3248_v29 = vmul.f32 %v12366_v61, %v9485_v44  ;;  %v2708_v50 = vmul.f32 %v9112_v59, %v9452_v12  ;;  %v9718_v32 = vpack.c.bf16 %v4014_v23, %v4010_v40  ;;  %v9720_v2 = vpack.c.bf16 %v4022_v63, %v4018_v46 }
 0x357   : > { %v9723_v52 = vadd.f32 %v8753_v34, %v3495_v19  ;;  %v9727_v49 = vmul.f32 %v9087_v31, %v9478_v4  ;;  %v3256_v41 = vmul.f32 %v12366_v61, %v9478_v4  ;;  %7664 = vset.pattern.permute.xlu1 %v12344_v6  ;;  %v9732_v44 = vpop.permute.xlu0 %2402  ;;  %v4031_v48 = vmax.f32 %v3779_v45, 0.0 }
 0x358   : > { %12377 = vst [vmem:[#allocation61_spill] sm:$0xff] %v9718_v32  ;;  %12378 = vst [vmem:[#allocation62_spill] sm:$0xff] %v9720_v2  ;;  %v9734_v12 = vpack.c.bf16 %v4013_v37, %v4009_v15  ;;  %v9738_v42 = vmul.f32 %v9087_v31, %v9521_v21  ;;  %v3260_v22 = vmul.f32 %v12366_v61, %v9521_v21  ;;  %3058 = vperm.xlu1 %7664, %v9682_v54  }
 0x359   : > { %v9744_v3 = vmul.f32 %v9095_v5, %v9555_v18  ;;  %v3262_v4 = vmul.f32 %v8996_v53, %v9684_v33  ;;  %v2720_v25 = vmul.f32 %v9112_v59, %v9555_v18  ;;  %v4255_v60 = vpack.c.bf16 %v4035_v0, %v4031_v48 }
 0x35a   : > { %12379 = vst [vmem:[#allocation63_spill] sm:$0xff] %v9734_v12  ;;  %v9751_v38 = vpop.permute.xlu1 %2392  ;;  %v7177_v27 = vpop.f32.mrb[40].mxu1  ;;  %v3500_v13 = vadd.f32 %v3248_v29, %v2708_v50  ;;  %v3499_v26 = vadd.f32 %v3247_v35, %v2707_v9  ;;  %v2711_v21 = vmul.f32 %v9095_v5, %v9573_v43  ;;  %v2722_v23 = vmul.f32 %v9003_v30, %v9660_v51 }
 0x35b   : > { %v3261_v63 = vmul.f32 %v8988_v17, %v9684_v33  ;;  %v2734_v19 = vmul.f32 %v9003_v30, %v9732_v44  ;;  %v2210_v45 = vpop.f32.mrb[41].mxu1  ;;  %v2712_v18 = vmul.f32 %v9112_v59, %v9573_v43  ;;  %v3252_v40 = vmul.f32 %v12366_v61, %v9620_v24  ;;  %4854 = vmatmul.mubr.bf16.gmra.mrb[92].mxu0 %v4255_v60 }
 0x35c   : > { %v9766_v15 = vadd.f32 %v9379_v56, %v7177_v27  ;;  %v9769_v37 = vadd.f32 %v9379_v56, %v2210_v45  ;;  %v7178_v46 = vpop.f32.mrb[42].mxu1  ;;  %v2721_v9 = vmul.f32 %v8993_v11, %v9660_v51  ;;  %v3270_v35 = vmul.f32 %v8996_v53, %v9676_v20  ;;  %7665 = vset.pattern.permute.xlu1 %v12347_v14 }
 0x35d   : > { %v3274_v43 = vmul.f32 %v8996_v53, %v9705_v16  ;;  %v2213_v29 = vpop.f32.mrb[43].mxu1  ;;  %v3514_v0 = vadd.f32 %v3262_v4, %v2722_v23  ;;  %v9781_v50 = vadd.f32 %v8782_v47, %v3500_v13  ;;  %v9784_v48 = vadd.f32 %v8753_v34, %v3499_v26 }
 0x35e   : > { %12380 = vst [vmem:[#allocation64_spill] sm:$0xff] %v9766_v15  ;;  %12381 = vst [vmem:[#allocation65_spill] sm:$0xff] %v9769_v37  ;;  %2517 = vperm.xlu1 %7665, %v9766_v15   ;;  %2507 = vperm.xlu0 %7662, %v9769_v37   ;;  %v3508_v27 = vadd.f32 %v3256_v41, %v2716_v10  ;;  %v3251_v60 = vmul.f32 %v9087_v31, %v9620_v24 }
 0x35f   : > { %v2730_v45 = vmul.f32 %v9003_v30, %v9654_v62  ;;  %v9790_v7 = vpop.permute.xlu1 %2978  ;;  %v3513_v4 = vadd.f32 %v3261_v63, %v2721_v9  ;;  %v3526_v23 = vadd.f32 %v3274_v43, %v2734_v19  ;;  %v2725_v54 = vmul.f32 %v8993_v11, %v9751_v38 }
 0x360   : > { %v2726_v13 = vmul.f32 %v9003_v30, %v9751_v38  ;;  %v3265_v26 = vmul.f32 %v8988_v17, %v9790_v7  ;;  %v3266_v10 = vmul.f32 %v8996_v53, %v9790_v7  ;;  %v3788_v24 = vadd.f32 %v9042_v39, %v3514_v0 }
 0x361   : > { %v3522_v41 = vadd.f32 %v3270_v35, %v2730_v45  ;;  %v3504_v1 = vadd.f32 %v3252_v40, %v2712_v18  ;;  %v3512_v2 = vadd.f32 %v3260_v22, %v2720_v25  ;;  %v2733_v63 = vmul.f32 %v8993_v11, %v9732_v44 }
 0x362   : > { %7666 = vset.pattern.permute.xlu1 %v12344_v6  ;;  %7667 = vset.pattern.permute.xlu0 %v12344_v6  ;;  %v3518_v19 = vadd.f32 %v3266_v10, %v2726_v13  ;;  %v3517_v9 = vadd.f32 %v3265_v26, %v2725_v54  ;;  %v4017_v43 = vmax.f32 %v9708_v28, 0.0  ;;  %v3787_v0 = vadd.f32 %v9018_v36, %v3513_v4 }
 0x363   : > { %3078 = vperm.xlu1 %7666, %v9766_v15   ;;  %3070 = vperm.xlu0 %7667, %v9769_v37   ;;  %v3800_v18 = vadd.f32 %v9042_v39, %v3526_v23  ;;  %v4021_v22 = vmax.f32 %v9723_v52, 0.0  ;;  %v3503_v25 = vadd.f32 %v3251_v60, %v2711_v21  ;;  %v3269_v40 = vmul.f32 %v8988_v17, %v9676_v20 }
 0x364   : > { %v3273_v35 = vmul.f32 %v8988_v17, %v9705_v16  ;;  %v9815_v54 = vpop.permute.xlu1 %2417  ;;  %v3792_v28 = vadd.f32 %v9042_v39, %v3518_v19  ;;  %v3791_v45 = vadd.f32 %v9018_v36, %v3517_v9  ;;  %v9820_v13 = vadd.f32 %v9379_v56, %v7178_v46 }
 0x365   : > { %v9822_v4 = vpop.permute.xlu0 %2407  ;;  %v3796_v52 = vadd.f32 %v9042_v39, %v3522_v41  ;;  %v3507_v21 = vadd.f32 %v9727_v49, %v9701_v58  ;;  %v3511_v60 = vadd.f32 %v9738_v42, %v9744_v3  ;;  %v2729_v23 = vmul.f32 %v8993_v11, %v9654_v62 }
 0x366   : > { %12382 = vst [vmem:[#allocation66_spill] sm:$0xff] %v9820_v13  ;;  %v4040_v26 = vmax.f32 %v3788_v24, 0.0  ;;  %v3525_v10 = vadd.f32 %v3273_v35, %v2733_v63  ;;  %v3778_v19 = vadd.f32 %v8782_v47, %v3504_v1  ;;  %v4044_v46 = vmax.f32 %v3792_v28, 0.0 }
 0x367   : > { %3082 = vperm.xlu1 %7666, %v9820_v13   ;;  %7668 = vset.pattern.permute.xlu0 %v12347_v14  ;;  %v4039_v9 = vmax.f32 %v3787_v0, 0.0  ;;  %v4043_v41 = vmax.f32 %v3791_v45, 0.0  ;;  %v4052_v15 = vmax.f32 %v3800_v18, 0.0  ;;  %v3521_v58 = vadd.f32 %v3269_v40, %v2729_v23 }
 0x368   : > { %2522 = vperm.xlu0 %7668, %v9820_v13   ;;  %v3777_v49 = vadd.f32 %v8753_v34, %v3503_v25  ;;  %v3782_v42 = vadd.f32 %v8782_v47, %v3508_v27  ;;  %v3786_v3 = vadd.f32 %v8782_v47, %v3512_v2  ;;  %v4260_v1 = vpack.c.bf16 %v4044_v46, %v4040_v26 }
 0x369   : > { %v9838_v24 = vpop.permute.xlu1 %2998  ;;  %v4259_v63 = vpack.c.bf16 %v4043_v41, %v4039_v9  ;;  %v4048_v35 = vmax.f32 %v3796_v52, 0.0  ;;  %v3785_v37 = vadd.f32 %v8753_v34, %v3511_v60  ;;  %v9842_v0 = vadd.f32 %v9379_v56, %v2213_v29 }
 0x36a   : > { %v9844_v18 = vpop.permute.xlu0 %2990  ;;  %v3799_v40 = vadd.f32 %v9018_v36, %v3525_v10  ;;  %v9847_v28 = vpack.c.bf16 %v4021_v22, %v4017_v43  ;;  %v3781_v27 = vadd.f32 %v8753_v34, %v3507_v21  ;;  %4863 = vmatprep.mubr.bf16.mxu0 %v4260_v1  ;;  %v4026_v25 = vmax.f32 %v9781_v50, 0.0 }
 0x36b   : > { %12383 = vst [vmem:[#allocation67_spill] sm:$0xff] %v9842_v0  ;;  %7669 = vset.pattern.permute.xlu1 %v12347_v14  ;;  %v4264_v2 = vpack.c.bf16 %v4052_v15, %v4048_v35  ;;  %v4030_v45 = vmax.f32 %v3778_v19, 0.0  ;;  %v4025_v52 = vmax.f32 %v9784_v48, 0.0  ;;  %4864 = vmatmul.mubr.bf16.gmra.mrb[96].mxu0 %v4259_v63  ;;  %v3795_v29 = vadd.f32 %v9018_v36, %v3521_v58 }
 0x36c   : > { %12384 = vst [vmem:[#allocation68_spill] sm:$0xff] %v9847_v28  ;;  %2512 = vperm.xlu1 %7669, %v9842_v0   ;;  %v4029_v60 = vmax.f32 %v3777_v49, 0.0  ;;  %v4034_v23 = vmax.f32 %v3782_v42, 0.0  ;;  %v4038_v43 = vmax.f32 %v3786_v3, 0.0  ;;  %v9857_v22 = vmul.f32 %v9095_v5, %v9654_v62 }
 0x36d   : > { %v2732_v15 = vmul.f32 %v9112_v59, %v9654_v62  ;;  %v2723_v50 = vmul.f32 %v9095_v5, %v9660_v51  ;;  %4873 = vmatprep.mubr.bf16.mxu0 %v4264_v2  ;;  %v9863_v48 = vpop.permute.xlu1 %3002  ;;  %v4037_v21 = vmax.f32 %v3785_v37, 0.0  ;;  %v2724_v26 = vmul.f32 %v9112_v59, %v9660_v51 }
 0x36e   : > { %v3264_v10 = vmul.f32 %v12366_v61, %v9684_v33  ;;  %v4051_v19 = vmax.f32 %v3799_v40, 0.0  ;;  %v4033_v46 = vmax.f32 %v3781_v27, 0.0  ;;  %v9871_v9 = vmul.f32 %v9087_v31, %v9676_v20 }
 0x36f   : > { %v3272_v62 = vmul.f32 %v12366_v61, %v9676_v20  ;;  %v3263_v41 = vmul.f32 %v9087_v31, %v9684_v33  ;;  %v9877_v58 = vpack.c.bf16 %v4030_v45, %v4026_v25  ;;  %v2736_v51 = vmul.f32 %v9112_v59, %v9732_v44  ;;  %v9882_v37 = vpop.permute.xlu0 %2422 }
 0x370   : > { %7670 = vset.pattern.permute.xlu1 %v12344_v6  ;;  %v4047_v49 = vmax.f32 %v3795_v29, 0.0  ;;  %v9884_v42 = vpack.c.bf16 %v4029_v60, %v4025_v52  ;;  %v9886_v3 = vpack.c.bf16 %v4038_v43, %v4034_v23  ;;  %v9890_v20 = vmul.f32 %v9087_v31, %v9705_v16 }
 0x371   : > { %12385 = vst [vmem:[#allocation69_spill] sm:$0xff] %v9877_v58  ;;  %v3276_v33 = vmul.f32 %v12366_v61, %v9705_v16  ;;  %v9896_v1 = vmul.f32 %v9095_v5, %v9732_v44  ;;  %3074 = vperm.xlu1 %7670, %v9842_v0   ;;  %v9899_v63 = vpack.c.bf16 %v4037_v21, %v4033_v46 }
 0x372   : > { %12386 = vst [vmem:[#allocation70_spill] sm:$0xff] %v9884_v42  ;;  %12387 = vst [vmem:[#allocation71_spill] sm:$0xff] %v9886_v3  ;;  %v2727_v35 = vmul.f32 %v9095_v5, %v9751_v38  ;;  %v2728_v40 = vmul.f32 %v9112_v59, %v9751_v38  ;;  %v9905_v27 = vpop.permute.xlu1 %2412  ;;  %v7181_v2 = vpop.f32.mrb[44].mxu1  ;;  %v4263_v25 = vpack.c.bf16 %v4051_v19, %v4047_v49 }
 0x373   : > { %12388 = vst [vmem:[#allocation72_spill] sm:$0xff] %v9899_v63  ;;  %v3516_v45 = vadd.f32 %v3264_v10, %v2724_v26  ;;  %v3277_v16 = vmul.f32 %v8988_v17, %v9844_v18  ;;  %v3278_v44 = vmul.f32 %v8996_v53, %v9844_v18  ;;  %v2750_v52 = vmul.f32 %v9003_v30, %v9882_v37  ;;  %v2226_v29 = vpop.f32.mrb[45].mxu1 }
 0x374   : > { %v3524_v60 = vadd.f32 %v3272_v62, %v2732_v15  ;;  %v3267_v23 = vmul.f32 %v9087_v31, %v9790_v7  ;;  %v9916_v38 = vadd.f32 %v9379_v56, %v7181_v2  ;;  %v9919_v43 = vadd.f32 %v9379_v56, %v2226_v29  ;;  %4874 = vmatmul.mubr.bf16.gmra.mrb[100].mxu0 %v4263_v25  ;;  %v7182_v21 = vpop.f32.mrb[46].mxu1 }
 0x375   : > { %v3528_v26 = vadd.f32 %v3276_v33, %v2736_v51  ;;  %v3268_v10 = vmul.f32 %v12366_v61, %v9790_v7  ;;  %v2737_v19 = vmul.f32 %v8993_v11, %v9822_v4  ;;  %v2738_v15 = vmul.f32 %v9003_v30, %v9822_v4  ;;  %7671 = vset.pattern.permute.xlu1 %v12347_v14  ;;  %v9930_v62 = vpop.f32.mrb[47].mxu1 }
 0x376   : > { %12389 = vst [vmem:[#allocation73_spill] sm:$0xff] %v9916_v38  ;;  %12390 = vst [vmem:[#allocation74_spill] sm:$0xff] %v9919_v43  ;;  %v3290_v46 = vmul.f32 %v8996_v53, %v9863_v48  ;;  %v3286_v49 = vmul.f32 %v8996_v53, %v9838_v24  ;;  %2537 = vperm.xlu1 %7671, %v9916_v38   ;;  %2527 = vperm.xlu0 %7668, %v9919_v43  }
 0x377   : > { %v9937_v7 = vadd.f32 %v8782_v47, %v3516_v45  ;;  %v3515_v51 = vadd.f32 %v3263_v41, %v2723_v50  ;;  %v2746_v33 = vmul.f32 %v9003_v30, %v9815_v54  ;;  %v9941_v2 = vpop.permute.xlu1 %2994  ;;  %v3530_v25 = vadd.f32 %v3278_v44, %v2738_v15 }
 0x378   : > { %v3529_v29 = vadd.f32 %v3277_v16, %v2737_v19  ;;  %v3542_v13 = vadd.f32 %v3290_v46, %v2750_v52  ;;  %v2741_v0 = vmul.f32 %v8993_v11, %v9905_v27  ;;  %v2742_v63 = vmul.f32 %v9003_v30, %v9905_v27 }
 0x379   : > { %v3281_v3 = vmul.f32 %v8988_v17, %v9941_v2  ;;  %v3282_v50 = vmul.f32 %v8996_v53, %v9941_v2  ;;  %v3520_v41 = vadd.f32 %v3268_v10, %v2728_v40  ;;  %v3519_v45 = vadd.f32 %v3267_v23, %v2727_v35 }
 0x37a   : > { %v9952_v42 = vadd.f32 %v8782_v47, %v3524_v60  ;;  %v9955_v16 = vadd.f32 %v8782_v47, %v3528_v26  ;;  %7672 = vset.pattern.permute.xlu1 %v12344_v6  ;;  %7673 = vset.pattern.permute.xlu0 %v12344_v6  ;;  %v3538_v19 = vadd.f32 %v3286_v49, %v2746_v33  ;;  %v4042_v40 = vmax.f32 %v9937_v7, 0.0 }
 0x37b   : > { %v3534_v44 = vadd.f32 %v3282_v50, %v2742_v63  ;;  %v3533_v52 = vadd.f32 %v3281_v3, %v2741_v0  ;;  %v2749_v15 = vmul.f32 %v8993_v11, %v9882_v37  ;;  %v9962_v46 = vadd.f32 %v9379_v56, %v7182_v21  ;;  %3094 = vperm.xlu1 %7672, %v9916_v38  }
 0x37c   : > { %3086 = vperm.xlu0 %7673, %v9919_v43   ;;  %v3804_v35 = vadd.f32 %v9042_v39, %v3530_v25  ;;  %v3803_v63 = vadd.f32 %v9018_v36, %v3529_v29  ;;  %v3816_v3 = vadd.f32 %v9042_v39, %v3542_v13  ;;  %v3285_v23 = vmul.f32 %v8988_v17, %v9838_v24  ;;  %v9976_v26 = vpop.permute.xlu1 %2437 }
 0x37d   : > { %12391 = vst [vmem:[#allocation75_spill] sm:$0xff] %v9962_v46  ;;  %v3808_v60 = vadd.f32 %v9042_v39, %v3534_v44  ;;  %v3807_v0 = vadd.f32 %v9018_v36, %v3533_v52  ;;  %v3289_v21 = vmul.f32 %v8988_v17, %v9863_v48  ;;  %v3789_v10 = vadd.f32 %v8753_v34, %v3515_v51 }
 0x37e   : > { %v3523_v49 = vadd.f32 %v9871_v9, %v9857_v22  ;;  %v3812_v7 = vadd.f32 %v9042_v39, %v3538_v19  ;;  %v3794_v33 = vadd.f32 %v8782_v47, %v3520_v41  ;;  %v4050_v25 = vmax.f32 %v9952_v42, 0.0  ;;  %v9992_v41 = vpop.permute.xlu0 %2427 }
 0x37f   : > { %v4054_v13 = vmax.f32 %v9955_v16, 0.0  ;;  %v2745_v29 = vmul.f32 %v8993_v11, %v9815_v54  ;;  %3098 = vperm.xlu1 %7672, %v9962_v46   ;;  %v4056_v50 = vmax.f32 %v3804_v35, 0.0  ;;  %v3541_v44 = vadd.f32 %v3289_v21, %v2749_v15 }
 0x380   : > { %v3793_v51 = vadd.f32 %v8753_v34, %v3519_v45  ;;  %7674 = vset.pattern.permute.xlu0 %v12347_v14  ;;  %v4060_v22 = vmax.f32 %v3808_v60, 0.0  ;;  %v4055_v9 = vmax.f32 %v3803_v63, 0.0  ;;  %v4059_v52 = vmax.f32 %v3807_v0, 0.0 }
 0x381   : > { %v4068_v19 = vmax.f32 %v3816_v3, 0.0  ;;  %v3280_v42 = vmul.f32 %v12366_v61, %v9844_v18  ;;  %2542 = vperm.xlu0 %7674, %v9962_v46   ;;  %v3537_v16 = vadd.f32 %v3285_v23, %v2745_v29  ;;  %v3527_v35 = vadd.f32 %v9890_v20, %v9896_v1  ;;  %v10002_v60 = vpop.permute.xlu1 %3014 }
 0x382   : > { %v9998_v15 = vadd.f32 %v8753_v34, %v3523_v49  ;;  %v3279_v45 = vmul.f32 %v9087_v31, %v9844_v18  ;;  %v4268_v63 = vpack.c.bf16 %v4060_v22, %v4056_v50  ;;  %v4267_v0 = vpack.c.bf16 %v4059_v52, %v4055_v9  ;;  %v10033_v52 = vpop.permute.xlu0 %3006 }
 0x383   : > { %v4064_v3 = vmax.f32 %v3812_v7, 0.0  ;;  %v2740_v21 = vmul.f32 %v9112_v59, %v9822_v4  ;;  %v10008_v23 = vadd.f32 %v9379_v56, %v9930_v62  ;;  %7675 = vset.pattern.permute.xlu1 %v12347_v14  ;;  %v3815_v20 = vadd.f32 %v9018_v36, %v3541_v44 }
 0x384   : > { %v4046_v1 = vmax.f32 %v3794_v33, 0.0  ;;  %v10014_v18 = vmul.f32 %v9095_v5, %v9815_v54  ;;  %v2739_v49 = vmul.f32 %v9095_v5, %v9822_v4  ;;  %4883 = vmatprep.mubr.bf16.mxu0 %v4268_v63  ;;  %v4045_v29 = vmax.f32 %v3793_v51, 0.0 }
 0x385   : > { %12392 = vst [vmem:[#allocation76_spill] sm:$0xff] %v10008_v23  ;;  %v4272_v7 = vpack.c.bf16 %v4068_v19, %v4064_v3  ;;  %v2748_v50 = vmul.f32 %v9112_v59, %v9815_v54  ;;  %2532 = vperm.xlu1 %7675, %v10008_v23   ;;  %4884 = vmatmul.mubr.bf16.gmra.mrb[104].mxu0 %v4267_v0  ;;  %v4041_v62 = vmax.f32 %v3789_v10, 0.0  ;;  %v4067_v19 = vmax.f32 %v3815_v20, 0.0  ;;  %v10072_v20 = vld [vmem:[%s12211_s6] ss:$0 sm:$0xff] }
 0x386   : > { %v3811_v56 = vadd.f32 %v9018_v36, %v3537_v16  ;;  %v3532_v33 = vadd.f32 %v3280_v42, %v2740_v21  ;;  %v3288_v44 = vmul.f32 %v12366_v61, %v9838_v24  ;;  %v10024_v22 = vpack.c.bf16 %v4054_v13, %v4050_v25  ;;  %v10035_v10 = vpop.permute.xlu1 %2432 }
 0x387   : > { %4893 = vmatprep.mubr.bf16.mxu0 %v4272_v7  ;;  %v10027_v4 = vadd.f32 %v8753_v34, %v3527_v35  ;;  %v3531_v51 = vadd.f32 %v3279_v45, %v2739_v49  ;;  %v3287_v54 = vmul.f32 %v9087_v31, %v9838_v24  ;;  %v2752_v9 = vmul.f32 %v9112_v59, %v9882_v37  ;;  %v10098_v46 = vpop.permute.xlu0 %2442 }
 0x388   : > { %12393 = vst [vmem:[#allocation77_spill] sm:$0xff] %v10024_v22  ;;  %v10037_v42 = vpack.c.bf16 %v4046_v1, %v4042_v40  ;;  %v10041_v25 = vmul.f32 %v9087_v31, %v9863_v48  ;;  %v3292_v13 = vmul.f32 %v12366_v61, %v9863_v48  ;;  %v10047_v24 = vmul.f32 %v9095_v5, %v9882_v37 }
 0x389   : > { %v10049_v16 = vpack.c.bf16 %v4045_v29, %v4041_v62  ;;  %v2743_v35 = vmul.f32 %v9095_v5, %v9905_v27  ;;  %v2744_v40 = vmul.f32 %v9112_v59, %v9905_v27  ;;  %7676 = vset.pattern.permute.xlu1 %v12344_v6  ;;  %v4063_v45 = vmax.f32 %v3811_v56, 0.0 }
 0x38a   : > { %12394 = vst [vmem:[#allocation78_spill] sm:$0xff] %v10037_v42  ;;  %v10057_v63 = vadd.f32 %v8782_v47, %v3532_v33  ;;  %v3293_v48 = vmul.f32 %v8988_v17, %v10033_v52  ;;  %v3294_v37 = vmul.f32 %v8996_v53, %v10033_v52  ;;  %3090 = vperm.xlu1 %7676, %v10008_v23   ;;  %v7185_v0 = vpop.f32.mrb[48].mxu1  ;;  %v4049_v23 = vmax.f32 %v9998_v15, 0.0 }
 0x38b   : > { %12395 = vst [vmem:[#allocation79_spill] sm:$0xff] %v10049_v16  ;;  %v10065_v3 = vadd.f32 %v8753_v34, %v3531_v51  ;;  %v3540_v21 = vadd.f32 %v3288_v44, %v2748_v50  ;;  %v3284_v27 = vmul.f32 %v12366_v61, %v9941_v2  ;;  %v10075_v1 = vadd.f32 %v10072_v20, %v7185_v0  ;;  %v2242_v49 = vpop.f32.mrb[49].mxu1  ;;  %v10083_v33 = vpop.permute.xlu1 %3010 }
 0x38c   : > { %v4271_v7 = vpack.c.bf16 %v4067_v19, %v4063_v45  ;;  %v3544_v29 = vadd.f32 %v3292_v13, %v2752_v9  ;;  %v2753_v56 = vmul.f32 %v8993_v11, %v9992_v41  ;;  %v2754_v50 = vmul.f32 %v9003_v30, %v9992_v41  ;;  %v7186_v51 = vpop.f32.mrb[50].mxu1 }
 0x38d   : > { %12396 = vst [vmem:[#allocation80_spill] sm:$0xff] %v10075_v1  ;;  %v3302_v62 = vmul.f32 %v8996_v53, %v10002_v60  ;;  %v10086_v44 = vadd.f32 %v10072_v20, %v2242_v49  ;;  %v2757_v0 = vmul.f32 %v8993_v11, %v10035_v10  ;;  %v2758_v9 = vmul.f32 %v9003_v30, %v10035_v10  ;;  %v10096_v45 = vpop.f32.mrb[51].mxu1 }
 0x38e   : > { %v3297_v19 = vmul.f32 %v8988_v17, %v10083_v33  ;;  %v3298_v13 = vmul.f32 %v8996_v53, %v10083_v33  ;;  %4894 = vmatmul.mubr.bf16.gmra.mrb[108].mxu0 %v4271_v7  ;;  %7677 = vset.pattern.permute.xlu1 %v12347_v14  ;;  %v3546_v49 = vadd.f32 %v3294_v37, %v2754_v50 }
 0x38f   : > { %12397 = vst [vmem:[#allocation81_spill] sm:$0xff] %v10086_v44  ;;  %2547 = vperm.xlu0 %7674, %v10086_v44   ;;  %v3545_v38 = vadd.f32 %v3293_v48, %v2753_v56  ;;  %v3814_v43 = vadd.f32 %v8782_v47, %v3540_v21  ;;  %v3283_v22 = vmul.f32 %v9087_v31, %v9941_v2  ;;  %v10111_v28 = vpop.permute.xlu1 %3018 }
 0x390   : > { %v2762_v7 = vmul.f32 %v9003_v30, %v9976_v26  ;;  %2557 = vperm.xlu1 %7677, %v10075_v1   ;;  %v3550_v16 = vadd.f32 %v3298_v13, %v2758_v9  ;;  %v3549_v42 = vadd.f32 %v3297_v19, %v2757_v0  ;;  %v3301_v58 = vmul.f32 %v8988_v17, %v10002_v60 }
 0x391   : > { %v3536_v48 = vadd.f32 %v3284_v27, %v2744_v40  ;;  %v3818_v15 = vadd.f32 %v8782_v47, %v3544_v29  ;;  %v3539_v37 = vadd.f32 %v3287_v54, %v10014_v18  ;;  %v2766_v2 = vmul.f32 %v9003_v30, %v10098_v46 }
 0x392   : > { %v3305_v21 = vmul.f32 %v8988_v17, %v10111_v28  ;;  %v3306_v56 = vmul.f32 %v8996_v53, %v10111_v28  ;;  %v3554_v50 = vadd.f32 %v3302_v62, %v2762_v7  ;;  %v3820_v0 = vadd.f32 %v9042_v39, %v3546_v49 }
 0x393   : > { %7679 = vset.pattern.permute.xlu0 %v12344_v6  ;;  %v3824_v40 = vadd.f32 %v9042_v39, %v3550_v16  ;;  %v3819_v27 = vadd.f32 %v9018_v36, %v3545_v38  ;;  %v3823_v18 = vadd.f32 %v9018_v36, %v3549_v42  ;;  %v2765_v54 = vmul.f32 %v8993_v11, %v10098_v46 }
 0x394   : > { %7678 = vset.pattern.permute.xlu1 %v12344_v6  ;;  %3102 = vperm.xlu0 %7679, %v10086_v44   ;;  %v3558_v29 = vadd.f32 %v3306_v56, %v2766_v2  ;;  %v4053_v62 = vmax.f32 %v10027_v4, 0.0  ;;  %v3535_v9 = vadd.f32 %v3283_v22, %v2743_v35  ;;  %v2761_v19 = vmul.f32 %v8993_v11, %v9976_v26  ;;  %v10134_v42 = vpop.permute.xlu1 %2457 }
 0x395   : > { %3110 = vperm.xlu1 %7678, %v10075_v1   ;;  %v4076_v16 = vmax.f32 %v3824_v40, 0.0  ;;  %v4075_v38 = vmax.f32 %v3823_v18, 0.0  ;;  %v4070_v13 = vmax.f32 %v3818_v15, 0.0  ;;  %v10136_v49 = vpop.permute.xlu0 %2447  ;;  %v3828_v7 = vadd.f32 %v9042_v39, %v3554_v50 }
 0x396   : > { %v3832_v44 = vadd.f32 %v9042_v39, %v3558_v29  ;;  %v3557_v2 = vadd.f32 %v3305_v21, %v2765_v54  ;;  %v3543_v22 = vadd.f32 %v10041_v25, %v10047_v24  ;;  %v10143_v4 = vadd.f32 %v10072_v20, %v7186_v51 }
 0x397   : > { %v4072_v35 = vmax.f32 %v3820_v0, 0.0  ;;  %v4071_v56 = vmax.f32 %v3819_v27, 0.0  ;;  %v3553_v40 = vadd.f32 %v3301_v58, %v2761_v19  ;;  %v10146_v15 = vpack.c.bf16 %v4053_v62, %v4049_v23 }
 0x398   : > { %12398 = vst [vmem:[#allocation82_spill] sm:$0xff] %v10143_v4  ;;  %7680 = vset.pattern.permute.xlu0 %v12347_v14  ;;  %v4066_v1 = vmax.f32 %v3814_v43, 0.0  ;;  %v4084_v25 = vmax.f32 %v3832_v44, 0.0  ;;  %v10153_v24 = vadd.f32 %v8753_v34, %v3539_v37  ;;  %v10155_v58 = vpop.permute.xlu1 %2452  ;;  %v4080_v51 = vmax.f32 %v3828_v7, 0.0 }
 0x399   : > { %12399 = vst [vmem:[#allocation83_spill] sm:$0xff] %v10146_v15  ;;  %3114 = vperm.xlu1 %7678, %v10143_v4   ;;  %v4276_v21 = vpack.c.bf16 %v4076_v16, %v4072_v35  ;;  %v4275_v54 = vpack.c.bf16 %v4075_v38, %v4071_v56  ;;  %2562 = vperm.xlu0 %7680, %v10143_v4  }
 0x39a   : > { %v3831_v23 = vadd.f32 %v9018_v36, %v3557_v2  ;;  %v10159_v0 = vadd.f32 %v8782_v47, %v3536_v48  ;;  %v10162_v43 = vadd.f32 %v8753_v34, %v3535_v9  ;;  %v10166_v27 = vmul.f32 %v9095_v5, %v9976_v26  ;;  %v10168_v44 = vpop.permute.xlu0 %3022 }
 0x39b   : > { %4903 = vmatprep.mubr.bf16.mxu0 %v4276_v21  ;;  %v3827_v37 = vadd.f32 %v9018_v36, %v3553_v40  ;;  %v10171_v29 = vpack.c.bf16 %v4070_v13, %v4066_v1  ;;  %v10174_v62 = vadd.f32 %v8753_v34, %v3543_v22  ;;  %v3304_v48 = vmul.f32 %v12366_v61, %v10002_v60 }
 0x39c   : > { %v10180_v9 = vadd.f32 %v10072_v20, %v10096_v45  ;;  %4904 = vmatmul.mubr.bf16.gmra.mrb[112].mxu0 %v4275_v54  ;;  %v4280_v19 = vpack.c.bf16 %v4084_v25, %v4080_v51  ;;  %v3310_v16 = vmul.f32 %v8996_v53, %v10168_v44  ;;  %v3295_v38 = vmul.f32 %v9087_v31, %v10033_v52 }
 0x39d   : > { %12400 = vst [vmem:[#allocation84_spill] sm:$0xff] %v10171_v29  ;;  %v3296_v1 = vmul.f32 %v12366_v61, %v10033_v52  ;;  %v2770_v13 = vmul.f32 %v9003_v30, %v10136_v49  ;;  %7681 = vset.pattern.permute.xlu1 %v12347_v14  ;;  %v3309_v45 = vmul.f32 %v8988_v17, %v10168_v44  ;;  %v4083_v52 = vmax.f32 %v3831_v23, 0.0  ;;  %v10206_v40 = vpop.permute.xlu1 %3026 }
 0x39e   : > { %12401 = vst [vmem:[#allocation85_spill] sm:$0xff] %v10180_v9  ;;  %v2764_v7 = vmul.f32 %v9112_v59, %v9976_v26  ;;  %v2755_v2 = vmul.f32 %v9095_v5, %v9992_v41  ;;  %v2756_v22 = vmul.f32 %v9112_v59, %v9992_v41  ;;  %4913 = vmatprep.mubr.bf16.mxu0 %v4280_v19  ;;  %v4079_v26 = vmax.f32 %v3827_v37, 0.0 }
 0x39f   : > { %2552 = vperm.xlu1 %7681, %v10180_v9   ;;  %v10202_v35 = vmul.f32 %v9087_v31, %v10002_v60  ;;  %v2769_v56 = vmul.f32 %v8993_v11, %v10136_v49  ;;  %v3562_v21 = vadd.f32 %v3310_v16, %v2770_v13  ;;  %v2773_v54 = vmul.f32 %v8993_v11, %v10155_v58 }
 0x3a0   : > { %v2774_v41 = vmul.f32 %v9003_v30, %v10155_v58  ;;  %v3313_v25 = vmul.f32 %v8988_v17, %v10206_v40  ;;  %v3314_v60 = vmul.f32 %v8996_v53, %v10206_v40  ;;  %v10216_v23 = vadd.f32 %v3296_v1, %v2756_v22 }
 0x3a1   : > { %v3561_v51 = vadd.f32 %v3309_v45, %v2769_v56  ;;  %v10218_v19 = vadd.f32 %v3295_v38, %v2755_v2  ;;  %v10220_v50 = vadd.f32 %v3304_v48, %v2764_v7  ;;  %v2759_v37 = vmul.f32 %v9095_v5, %v10035_v10  ;;  %v10232_v48 = vpop.permute.xlu1 %3030  ;;  %v10243_v56 = vpop.permute.xlu0 %2462 }
 0x3a2   : > { %v4279_v16 = vpack.c.bf16 %v4083_v52, %v4079_v26  ;;  %v3566_v13 = vadd.f32 %v3314_v60, %v2774_v41  ;;  %v3565_v18 = vadd.f32 %v3313_v25, %v2773_v54  ;;  %v2760_v4 = vmul.f32 %v9112_v59, %v10035_v10  ;;  %v7189_v1 = vpop.f32.mrb[52].mxu1 }
 0x3a3   : > { %7682 = vset.pattern.permute.xlu1 %v12344_v6  ;;  %v2767_v45 = vmul.f32 %v9095_v5, %v10098_v46  ;;  %v2768_v38 = vmul.f32 %v9112_v59, %v10098_v46  ;;  %v3836_v7 = vadd.f32 %v9042_v39, %v3562_v21  ;;  %v2777_v2 = vmul.f32 %v8993_v11, %v10134_v42  ;;  %v2258_v52 = vpop.f32.mrb[53].mxu1 }
 0x3a4   : > { %3106 = vperm.xlu1 %7682, %v10180_v9   ;;  %v2778_v22 = vmul.f32 %v9003_v30, %v10134_v42  ;;  %4914 = vmatmul.mubr.bf16.gmra.mrb[116].mxu0 %v4279_v16  ;;  %v3317_v10 = vmul.f32 %v8988_v17, %v10232_v48  ;;  %v3318_v46 = vmul.f32 %v8996_v53, %v10232_v48  ;;  %v7190_v41 = vpop.f32.mrb[54].mxu1 }
 0x3a5   : > { %v10246_v26 = vadd.f32 %v10072_v20, %v7189_v1  ;;  %v10249_v21 = vadd.f32 %v10072_v20, %v2258_v52  ;;  %v3840_v54 = vadd.f32 %v9042_v39, %v3566_v13  ;;  %v3835_v25 = vadd.f32 %v9018_v36, %v3561_v51  ;;  %v2261_v29 = vpop.f32.mrb[55].mxu1  ;;  %v10261_v52 = vpop.permute.xlu1 %3034 }
 0x3a6   : > { %v3299_v60 = vmul.f32 %v9087_v31, %v10083_v33  ;;  %v3300_v16 = vmul.f32 %v12366_v61, %v10083_v33  ;;  %v3308_v9 = vmul.f32 %v12366_v61, %v10111_v28  ;;  %v3839_v1 = vadd.f32 %v9018_v36, %v3565_v18  ;;  %12404 = vst [vmem:[#allocation88_spill] sm:$0xff] %v10261_v52 }
 0x3a7   : > { %12402 = vst [vmem:[#allocation86_spill] sm:$0xff] %v10246_v26  ;;  %12403 = vst [vmem:[#allocation87_spill] sm:$0xff] %v10249_v21  ;;  %2567 = vperm.xlu0 %7680, %v10249_v21   ;;  %v4088_v13 = vmax.f32 %v3836_v7, 0.0  ;;  %v4092_v51 = vmax.f32 %v3840_v54, 0.0  ;;  %v3570_v15 = vadd.f32 %v3318_v46, %v2778_v22  ;;  %v3569_v12 = vadd.f32 %v3317_v10, %v2777_v2 }
 0x3a8   : > { %7683 = vset.pattern.permute.xlu1 %v12347_v14  ;;  %v2781_v32 = vmul.f32 %v8993_v11, %v10243_v56  ;;  %v2782_v33 = vmul.f32 %v9003_v30, %v10243_v56  ;;  %v3321_v18 = vmul.f32 %v8988_v17, %v10261_v52  ;;  %v3322_v55 = vmul.f32 %v8996_v53, %v10261_v52 }
 0x3a9   : > { %2577 = vperm.xlu1 %7683, %v10246_v26   ;;  %v3307_v7 = vmul.f32 %v9087_v31, %v10111_v28  ;;  %v4284_v54 = vpack.c.bf16 %v4092_v51, %v4088_v13  ;;  %v4087_v22 = vmax.f32 %v3835_v25, 0.0  ;;  %v4091_v2 = vmax.f32 %v3839_v1, 0.0 }
 0x3aa   : > { %v3574_v10 = vadd.f32 %v3322_v55, %v2782_v33  ;;  %v3573_v46 = vadd.f32 %v3321_v18, %v2781_v32  ;;  %v3552_v57 = vadd.f32 %v3300_v16, %v2760_v4  ;;  %v3551_v11 = vadd.f32 %v3299_v60, %v2759_v37 }
 0x3ab   : > { %4923 = vmatprep.mubr.bf16.mxu0 %v4284_v54  ;;  %v4283_v30 = vpack.c.bf16 %v4091_v2, %v4087_v22  ;;  %7685 = vset.pattern.permute.xlu0 %v12344_v6  ;;  %v3844_v17 = vadd.f32 %v9042_v39, %v3570_v15  ;;  %v3843_v53 = vadd.f32 %v9018_v36, %v3569_v12  ;;  %v4062_v52 = vmax.f32 %v10159_v0, 0.0 }
 0x3ac   : > { %3118 = vperm.xlu0 %7685, %v10249_v21   ;;  %v3848_v28 = vadd.f32 %v9042_v39, %v3574_v10  ;;  %v3847_v55 = vadd.f32 %v9018_v36, %v3573_v46  ;;  %v4061_v32 = vmax.f32 %v10162_v43, 0.0  ;;  %v3560_v4 = vadd.f32 %v3308_v9, %v2768_v38  ;;  %v10292_v60 = vpop.permute.xlu1 %2477  ;;  %v12421_v21 = vld [vmem:[#allocation54_spill] sm:$0xff] }
 0x3ad   : > { %7684 = vset.pattern.permute.xlu1 %v12344_v6  ;;  %4924 = vmatmul.mubr.bf16.gmra.mrb[120].mxu0 %v4283_v30  ;;  %v4069_v15 = vmax.f32 %v10174_v62, 0.0  ;;  %v3822_v12 = vadd.f32 %v8782_v47, %v10216_v23  ;;  %v3555_v0 = vadd.f32 %v10202_v35, %v10166_v27  ;;  %v3559_v37 = vadd.f32 %v3307_v7, %v2767_v45  ;;  %v10290_v25 = vpop.permute.xlu0 %2467 }
 0x3ae   : > { %3126 = vperm.xlu1 %7684, %v10246_v26   ;;  %v4100_v16 = vmax.f32 %v3848_v28, 0.0  ;;  %v4099_v1 = vmax.f32 %v3847_v55, 0.0  ;;  %v3826_v43 = vadd.f32 %v8782_v47, %v3552_v57  ;;  %v3821_v30 = vadd.f32 %v8753_v34, %v10218_v19 }
 0x3af   : > { %v10298_v62 = vadd.f32 %v10072_v20, %v7190_v41  ;;  %v4096_v9 = vmax.f32 %v3844_v17, 0.0  ;;  %v4095_v23 = vmax.f32 %v3843_v53, 0.0  ;;  %v3825_v38 = vadd.f32 %v8753_v34, %v3551_v11 }
 0x3b0   : > { %v3312_v27 = vmul.f32 %v12366_v61, %v10168_v44  ;;  %v10304_v35 = vadd.f32 %v10072_v20, %v2261_v29  ;;  %7686 = vset.pattern.permute.xlu0 %v12347_v14  ;;  %v3830_v57 = vadd.f32 %v8782_v47, %v10220_v50  ;;  %v3834_v19 = vadd.f32 %v8782_v47, %v3560_v4 }
 0x3b1   : > { %12405 = vst [vmem:[#allocation89_spill] sm:$0xff] %v10298_v62  ;;  %2582 = vperm.xlu0 %7686, %v10298_v62   ;;  %v4288_v17 = vpack.c.bf16 %v4100_v16, %v4096_v9  ;;  %v4287_v53 = vpack.c.bf16 %v4099_v1, %v4095_v23  ;;  %v4065_v11 = vmax.f32 %v10153_v24, 0.0  ;;  %v3833_v45 = vadd.f32 %v8753_v34, %v3559_v37  ;;  %v10326_v18 = vpop.permute.xlu1 %3046 }
 0x3b2   : > { %12406 = vst [vmem:[#allocation90_spill] sm:$0xff] %v10304_v35  ;;  %7687 = vset.pattern.permute.xlu1 %v12347_v14  ;;  %v2772_v29 = vmul.f32 %v9112_v59, %v10136_v49  ;;  %v12407_v41 = vmax.f32 %v10057_v63, 0.0  ;;  %v12408_v13 = vmax.f32 %v10065_v3, 0.0  ;;  %v3829_v33 = vadd.f32 %v8753_v34, %v3555_v0 }
 0x3b3   : > { %2572 = vperm.xlu1 %7687, %v10304_v35   ;;  %4933 = vmatprep.mubr.bf16.mxu0 %v4288_v17  ;;  %v10328_v24 = vpack.c.bf16 %v4069_v15, %v4065_v11  ;;  %v4074_v7 = vmax.f32 %v3822_v12, 0.0  ;;  %v4078_v54 = vmax.f32 %v3826_v43, 0.0  ;;  %v4077_v22 = vmax.f32 %v3825_v38, 0.0  ;;  %v12412_v11 = vld [vmem:[#allocation37_spill] sm:$0xff] }
 0x3b4   : > { %v10319_v50 = vpack.c.bf16 %v4062_v52, %v12407_v41  ;;  %v10323_v51 = vpack.c.bf16 %v4061_v32, %v12408_v13  ;;  %v3311_v2 = vmul.f32 %v9087_v31, %v10168_v44  ;;  %v3316_v63 = vmul.f32 %v12366_v61, %v10206_v40  ;;  %v10334_v52 = vpop.permute.xlu0 %3038 }
 0x3b5   : > { %v4086_v3 = vmax.f32 %v3834_v19, 0.0  ;;  %v3564_v10 = vadd.f32 %v3312_v27, %v2772_v29  ;;  %v3315_v46 = vmul.f32 %v9087_v31, %v10206_v40  ;;  %4934 = vmatmul.mubr.bf16.gmra.mrb[124].mxu0 %v4287_v53  ;;  %v4073_v28 = vmax.f32 %v3821_v30, 0.0  ;;  %v10351_v37 = vpop.permute.xlu1 %3050  ;;  %v12411_v19 = vld [vmem:[#allocation88_spill] sm:$0xff] }
 0x3b6   : > { %v4082_v55 = vmax.f32 %v3830_v57, 0.0  ;;  %v4085_v32 = vmax.f32 %v3833_v45, 0.0  ;;  %v2779_v4 = vmul.f32 %v9095_v5, %v10134_v42  ;;  %v2771_v44 = vmul.f32 %v9095_v5, %v10136_v49  ;;  %5134 = vmatprep.mubr.bf16.mxu0 %v9493_v8  ;;  %v12413_v29 = vld [vmem:[#allocation36_spill] sm:$0xff] }
 0x3b7   : > { %v2776_v15 = vmul.f32 %v9112_v59, %v10155_v58  ;;  %7688 = vset.pattern.permute.xlu1 %v12344_v6  ;;  %v4081_v12 = vmax.f32 %v3829_v33, 0.0  ;;  %v2780_v40 = vmul.f32 %v9112_v59, %v10134_v42  ;;  %v2775_v0 = vmul.f32 %v9095_v5, %v10155_v58 }
 0x3b8   : > { %3122 = vperm.xlu1 %7688, %v10304_v35   ;;  %v10353_v16 = vpack.c.bf16 %v4078_v54, %v4074_v7  ;;  %v10355_v49 = vpack.c.bf16 %v4077_v22, %v4073_v28  ;;  %v10357_v1 = vpop.permute.xlu0 %2482  ;;  %v10359_v8 = vpack.c.bf16 %v4086_v3, %v4082_v55  ;;  %v10362_v30 = vadd.f32 %v8782_v47, %v3564_v10  ;;  %v12415_v3 = vld [vmem:[#allocation34_spill] sm:$0xff]  ;;  %v12416_v28 = vld [vmem:[#allocation48_spill] sm:$0xff] }
 0x3b9   : > { %v3568_v43 = vadd.f32 %v3316_v63, %v2776_v15  ;;  %v3563_v42 = vadd.f32 %v3311_v2, %v2771_v44  ;;  %v2783_v58 = vmul.f32 %v9095_v5, %v10243_v56  ;;  %v3320_v9 = vmul.f32 %v12366_v61, %v10232_v48  ;;  %v12417_v15 = vld [vmem:[#allocation53_spill] sm:$0xff] }
 0x3ba   : > { %12409 = vst [vmem:[#allocation91_spill] sm:$0xff] %v10359_v8  ;;  %v10368_v23 = vpack.c.bf16 %v4085_v32, %v4081_v12  ;;  %v3567_v38 = vadd.f32 %v3315_v46, %v2775_v0  ;;  %v2784_v27 = vmul.f32 %v9112_v59, %v10243_v56  ;;  %v3319_v57 = vmul.f32 %v9087_v31, %v10232_v48  ;;  %v7193_v56 = vpop.f32.mrb[56].mxu1  ;;  %v10390_v7 = vpop.permute.xlu1 %2472 }
 0x3bb   : > { %v3323_v17 = vmul.f32 %v9087_v31, %v12411_v19  ;;  %v3324_v53 = vmul.f32 %v12366_v61, %v12411_v19  ;;  %v2794_v45 = vmul.f32 %v12412_v11, %v10292_v60  ;;  %v3334_v41 = vmul.f32 %v12413_v29, %v10326_v18  ;;  %v2274_v54 = vpop.f32.mrb[57].mxu1 }
 0x3bc   : > { %12410 = vst [vmem:[#allocation92_spill] sm:$0xff] %v10368_v23  ;;  %v3338_v13 = vmul.f32 %v12413_v29, %v10351_v37  ;;  %3130 = vperm.xlu1 %7688, %v10298_v62   ;;  %v2798_v48 = vmul.f32 %v12412_v11, %v10357_v1  ;;  %v10388_v33 = vadd.f32 %v10072_v20, %v7193_v56  ;;  %v7194_v55 = vpop.f32.mrb[58].mxu1  ;;  %v12419_v56 = vld [vmem:[#allocation35_spill] sm:$0xff] }
 0x3bd   : > { %v10393_v22 = vadd.f32 %v8782_v47, %v3568_v43  ;;  %v10397_v63 = vadd.f32 %v8753_v34, %v3563_v42  ;;  %v3325_v10 = vmul.f32 %v12415_v3, %v10334_v52  ;;  %v3326_v46 = vmul.f32 %v12413_v29, %v10334_v52  ;;  %5135 = vmatmul.mubr.bf16.vlgmr.msra.gmra.mrb[64].mxu0 %v12416_v28  ;;  %v2277_v0 = vpop.f32.mrb[59].mxu1 }
 0x3be   : > { %12414 = vst [vmem:[#allocation88_spill] sm:$0xff] %v10388_v33  ;;  %v10405_v32 = vadd.f32 %v8753_v34, %v3567_v38  ;;  %v3572_v44 = vadd.f32 %v3320_v9, %v2780_v40  ;;  %5144 = vmatprep.mubr.bf16.mxu0 %v12417_v15  ;;  %v10409_v12 = vadd.f32 %v10072_v20, %v2274_v54 }
 0x3bf   : > { %v3576_v43 = vadd.f32 %v3324_v53, %v2784_v27  ;;  %v10411_v42 = vadd.f32 %v3319_v57, %v2779_v4  ;;  %v3575_v19 = vadd.f32 %v3323_v17, %v2783_v58  ;;  %v2785_v2 = vmul.f32 %v12419_v56, %v10290_v25  ;;  %v10436_v53 = vpop.permute.xlu1 %3042 }
 0x3c0   : > { %12418 = vst [vmem:[#allocation37_spill] sm:$0xff] %v10409_v12  ;;  %v2786_v28 = vmul.f32 %v12412_v11, %v10290_v25  ;;  %7689 = vset.pattern.permute.xlu1 %v12347_v14  ;;  %v3586_v38 = vadd.f32 %v3334_v41, %v2794_v45  ;;  %v3590_v40 = vadd.f32 %v3338_v13, %v2798_v48  ;;  %v4089_v62 = vmax.f32 %v10397_v63, 0.0 }
 0x3c1   : > { %v2789_v9 = vmul.f32 %v12419_v56, %v10390_v7  ;;  %v2790_v54 = vmul.f32 %v12412_v11, %v10390_v7  ;;  %2597 = vperm.xlu1 %7689, %v10388_v33   ;;  %v10424_v4 = vadd.f32 %v10072_v20, %v2277_v0  ;;  %2587 = vperm.xlu0 %7686, %v10409_v12  }
 0x3c2   : > { %v10430_v27 = vmul.f32 %v9095_v5, %v10290_v25  ;;  %v10434_v57 = vmul.f32 %v9112_v59, %v10290_v25  ;;  %v3577_v17 = vadd.f32 %v3325_v10, %v2785_v2  ;;  %v3578_v45 = vadd.f32 %v3326_v46, %v2786_v28 }
 0x3c3   : > { %12420 = vst [vmem:[#allocation36_spill] sm:$0xff] %v10424_v4  ;;  %v2793_v41 = vmul.f32 %v12419_v56, %v10292_v60  ;;  %v10442_v13 = vmul.f32 %v9095_v5, %v10292_v60  ;;  %v3329_v48 = vmul.f32 %v12415_v3, %v10436_v53  ;;  %v3330_v15 = vmul.f32 %v12413_v29, %v10436_v53 }
 0x3c4   : > { %v3333_v25 = vmul.f32 %v12415_v3, %v10326_v18  ;;  %v3337_v2 = vmul.f32 %v12415_v3, %v10351_v37  ;;  %v2797_v10 = vmul.f32 %v12419_v56, %v10357_v1  ;;  %v3860_v46 = vadd.f32 %v9042_v39, %v3586_v38 }
 0x3c5   : > { %v3581_v0 = vadd.f32 %v3329_v48, %v2789_v9  ;;  %2592 = vperm.xlu1 %7689, %v10424_v4   ;;  %7690 = vset.pattern.permute.xlu0 %v12344_v6  ;;  %v3582_v28 = vadd.f32 %v3330_v15, %v2790_v54  ;;  %v3864_v58 = vadd.f32 %v9042_v39, %v3590_v40  ;;  %v4093_v9 = vmax.f32 %v10405_v32, 0.0  ;;  %v12422_v48 = vld [vmem:[#allocation42_spill] sm:$0xff]  ;;  %v10470_v40 = vpop.permute.xlu1 %2497  ;;  %v10472_v63 = vpop.permute.xlu0 %2487 }
 0x3c6   : > { %v10461_v26 = vmul.f32 %v9112_v59, %v10292_v60  ;;  %v3851_v35 = vadd.f32 %v9018_v36, %v3577_v17  ;;  %5145 = vmatmul.mubr.bf16.gmra.mrb[68].mxu0 %v12421_v21  ;;  %3134 = vperm.xlu0 %7690, %v10409_v12   ;;  %v3852_v38 = vadd.f32 %v9042_v39, %v3578_v45  ;;  %v4112_v23 = vmax.f32 %v3860_v46, 0.0 }
 0x3c7   : > { %v3855_v54 = vadd.f32 %v9018_v36, %v3581_v0  ;;  %5154 = vmatprep.mubr.bf16.mxu0 %v12422_v48  ;;  %v3856_v60 = vadd.f32 %v9042_v39, %v3582_v28  ;;  %v3846_v17 = vadd.f32 %v8782_v47, %v3572_v44  ;;  %v3850_v21 = vadd.f32 %v8782_v47, %v3576_v43 }
 0x3c8   : > { %v3327_v15 = vmul.f32 %v9087_v31, %v10334_v52  ;;  %v3585_v45 = vadd.f32 %v3333_v25, %v2793_v41  ;;  %v3589_v12 = vadd.f32 %v3337_v2, %v2797_v10  ;;  %v3849_v32 = vadd.f32 %v8753_v34, %v3575_v19 }
 0x3c9   : > { %v10481_v0 = vadd.f32 %v10072_v20, %v7194_v55  ;;  %v4107_v48 = vmax.f32 %v3855_v54, 0.0  ;;  %7692 = vset.pattern.permute.xlu1 %v12344_v6  ;;  %v4116_v8 = vmax.f32 %v3864_v58, 0.0  ;;  %v3328_v44 = vmul.f32 %v12366_v61, %v10334_v52  ;;  %v10495_v52 = vpop.permute.xlu1 %3062 }
 0x3ca   : > { %v4103_v28 = vmax.f32 %v3851_v35, 0.0  ;;  %3138 = vperm.xlu1 %7692, %v10424_v4   ;;  %7691 = vset.pattern.permute.xlu0 %v12347_v14  ;;  %v4104_v43 = vmax.f32 %v3852_v38, 0.0  ;;  %v4108_v41 = vmax.f32 %v3856_v60, 0.0  ;;  %v3335_v19 = vmul.f32 %v9087_v31, %v10326_v18  ;;  %v10503_v54 = vpop.permute.xlu0 %3054  ;;  %v12424_v4 = vld [vmem:[#allocation59_spill] sm:$0xff] }
 0x3cb   : > { %12423 = vst [vmem:[#allocation34_spill] sm:$0xff] %v10481_v0  ;;  %v3336_v55 = vmul.f32 %v12366_v61, %v10326_v18  ;;  %2602 = vperm.xlu0 %7691, %v10481_v0   ;;  %v4102_v25 = vmax.f32 %v3850_v21, 0.0  ;;  %v3845_v58 = vadd.f32 %v8753_v34, %v10411_v42  ;;  %v3859_v10 = vadd.f32 %v9018_v36, %v3585_v45 }
 0x3cc   : > { %v4292_v35 = vpack.c.bf16 %v4108_v41, %v4104_v43  ;;  %v4291_v2 = vpack.c.bf16 %v4107_v48, %v4103_v28  ;;  %v3863_v46 = vadd.f32 %v9018_v36, %v3589_v12  ;;  %v3339_v38 = vmul.f32 %v9087_v31, %v10351_v37 }
 0x3cd   : > { %v3340_v18 = vmul.f32 %v12366_v61, %v10351_v37  ;;  %v4296_v60 = vpack.c.bf16 %v4116_v8, %v4112_v23  ;;  %v4101_v21 = vmax.f32 %v3849_v32, 0.0  ;;  %v2800_v42 = vmul.f32 %v9112_v59, %v10357_v1  ;;  %v12425_v23 = vld [vmem:[#allocation47_spill] sm:$0xff] }
 0x3ce   : > { %5155 = vmatmul.mubr.bf16.gmra.mrb[72].mxu0 %v12424_v4  ;;  %3142 = vperm.xlu1 %7692, %v10388_v33   ;;  %v4098_v45 = vmax.f32 %v3846_v17, 0.0  ;;  %v3580_v12 = vadd.f32 %v3328_v44, %v10434_v57  ;;  %v3579_v48 = vadd.f32 %v3327_v15, %v10430_v27  ;;  %v2792_v28 = vmul.f32 %v9112_v59, %v10390_v7  ;;  %v7809_v4 = vld [vmem:[%s12216_s11] sm:$0xff]   ;;  %v10521_v57 = vpop.permute.xlu1 %3066 }
 0x3cf   : > { %v3332_v37 = vmul.f32 %v12366_v61, %v10436_v53  ;;  %v2799_v8 = vmul.f32 %v9095_v5, %v10357_v1  ;;  %4943 = vmatprep.mubr.bf16.mxu1 %v4292_v35  ;;  %5164 = vmatprep.mubr.bf16.mxu0 %v12425_v23  ;;  %v4097_v17 = vmax.f32 %v3845_v58, 0.0  ;;  %v4111_v27 = vmax.f32 %v3859_v10, 0.0  ;;  %v7197_v35 = vpop.f32.mrb[60].mxu1  ;;  %v10547_v10 = vpop.permute.xlu0 %2502 }
 0x3d0   : > { %4944 = vmatmul.mubr.bf16.vlgmr.msra.gmra.mrb[64].mxu1 %v4291_v2  ;;  %v4115_v15 = vmax.f32 %v3863_v46, 0.0  ;;  %v12426_v32 = vmax.f32 %v10362_v30, 0.0  ;;  %v12427_v44 = vmax.f32 %v10393_v22, 0.0  ;;  %v10529_v1 = vpack.c.bf16 %v4093_v9, %v4089_v62  ;;  %v2290_v22 = vpop.f32.mrb[61].mxu1 }
 0x3d1   : > { %v2791_v41 = vmul.f32 %v9095_v5, %v10390_v7  ;;  %4953 = vmatprep.mubr.bf16.mxu1 %v4296_v60  ;;  %v10533_v23 = vpack.c.bf16 %v4102_v25, %v4098_v45  ;;  %v10535_v58 = vpack.c.bf16 %v4101_v21, %v4097_v17  ;;  %v3588_v2 = vadd.f32 %v3336_v55, %v10461_v26  ;;  %v7198_v46 = vpop.f32.mrb[62].mxu1 }
 0x3d2   : > { %v10527_v43 = vpack.c.bf16 %v12427_v44, %v12426_v32  ;;  %v3331_v30 = vmul.f32 %v9087_v31, %v10436_v53  ;;  %3146 = vperm.xlu1 %7692, %v10481_v0   ;;  %v10542_v62 = vadd.f32 %v8782_v47, %v3580_v12  ;;  %v10545_v9 = vadd.f32 %v8753_v34, %v3579_v48  ;;  %v2293_v45 = vpop.f32.mrb[63].mxu1  ;;  %v12432_v32 = vld [vmem:[#allocation61_spill] sm:$0xff] }
 0x3d3   : > { %12428 = vst [vmem:[#allocation48_spill] sm:$0xff] %v10535_v58  ;;  %v3592_v7 = vadd.f32 %v3340_v18, %v2800_v42  ;;  %v10550_v25 = vadd.f32 %v10072_v20, %v2290_v22  ;;  %5779 = vmatpush1.bf16.msra.mxu1 %v7809_v4  ;;  %v3584_v26 = vadd.f32 %v3332_v37, %v2792_v28  ;;  %v7810_v28 = vld [vmem:[%s12216_s11 + $0x8] sm:$0xff]  }
 0x3d4   : > { %v3587_v53 = vadd.f32 %v3335_v19, %v10442_v13  ;;  %v10553_v55 = vadd.f32 %v3339_v38, %v2799_v8  ;;  %v2810_v60 = vmul.f32 %v12412_v11, %v10470_v40  ;;  %v2801_v21 = vmul.f32 %v12419_v56, %v10472_v63  ;;  %5780 = vmatprep.subr.bf16.mxu1 %v12347_v14  ;;  %v10568_v38 = vpop.permute.xlu1 %2492  ;;  %v12431_v8 = vld [vmem:[#allocation60_spill] sm:$0xff] }
 0x3d5   : > { %12429 = vst [vmem:[#allocation53_spill] sm:$0xff] %v10550_v25  ;;  %v2802_v18 = vmul.f32 %v12412_v11, %v10472_v63  ;;  %v4295_v42 = vpack.c.bf16 %v4115_v15, %v4111_v27  ;;  %v3350_v12 = vmul.f32 %v12413_v29, %v10495_v52  ;;  %v3341_v13 = vmul.f32 %v12415_v3, %v10503_v54 }
 0x3d6   : > { %v3342_v19 = vmul.f32 %v12413_v29, %v10503_v54  ;;  %v10571_v48 = vadd.f32 %v10072_v20, %v2293_v45  ;;  %2607 = vperm.xlu0 %7691, %v10550_v25   ;;  %v2814_v37 = vmul.f32 %v12412_v11, %v10547_v10  ;;  %5165 = vmatmul.mubr.bf16.gmra.mrb[76].mxu0 %v12431_v8 }
 0x3d7   : > { %v3583_v4 = vadd.f32 %v3331_v30, %v2791_v41  ;;  %v10581_v17 = vadd.f32 %v8782_v47, %v3588_v2  ;;  %v10584_v27 = vadd.f32 %v8782_v47, %v3592_v7  ;;  %v2809_v15 = vmul.f32 %v12419_v56, %v10470_v40  ;;  %5174 = vmatprep.mubr.bf16.mxu0 %v12432_v32 }
 0x3d8   : > { %12430 = vst [vmem:[#allocation35_spill] sm:$0xff] %v10571_v48  ;;  %7694 = vset.pattern.permute.xlu1 %v12347_v14  ;;  %v10591_v44 = vadd.f32 %v8782_v47, %v3584_v26  ;;  %v10594_v22 = vadd.f32 %v8753_v34, %v3587_v53  ;;  %v10598_v41 = vmul.f32 %v9095_v5, %v10470_v40  ;;  %v7811_v53 = vld [vmem:[%s12216_s11 + $0x10] sm:$0xff]   ;;  %v10616_v8 = vpop.permute.xlu1 %3058 }
 0x3d9   : > { %v10602_v2 = vmul.f32 %v9112_v59, %v10470_v40  ;;  %v3354_v30 = vmul.f32 %v12413_v29, %v10521_v57  ;;  %4954 = vmatmul.mubr.bf16.gmra.mrb[68].mxu1 %v4295_v42  ;;  %2612 = vperm.xlu1 %7694, %v10571_v48   ;;  %v3594_v7 = vadd.f32 %v3342_v19, %v2802_v18 }
 0x3da   : > { %7693 = vset.pattern.permute.xlu0 %v12344_v6  ;;  %v3593_v46 = vadd.f32 %v3341_v13, %v2801_v21  ;;  %v3602_v26 = vadd.f32 %v3350_v12, %v2810_v60  ;;  %5781 = vmatpush1.bf16.msra.mxu1 %v7810_v28  ;;  %v2813_v40 = vmul.f32 %v12419_v56, %v10547_v10 }
 0x3db   : > { %v10614_v45 = vadd.f32 %v10072_v20, %v7197_v35  ;;  %3150 = vperm.xlu0 %7693, %v10550_v25   ;;  %v3606_v42 = vadd.f32 %v3354_v30, %v2814_v37  ;;  %5782 = vmatprep.subr.bf16.mxu1 %v12347_v14  ;;  %v2805_v60 = vmul.f32 %v12419_v56, %v10568_v38  ;;  %v12434_v30 = vld [vmem:[#allocation63_spill] sm:$0xff] }
 0x3dc   : > { %v2806_v21 = vmul.f32 %v12412_v11, %v10568_v38  ;;  %v3345_v18 = vmul.f32 %v12415_v3, %v10616_v8  ;;  %v3346_v20 = vmul.f32 %v12413_v29, %v10616_v8  ;;  %v2803_v35 = vmul.f32 %v9095_v5, %v10472_v63 }
 0x3dd   : > { %12433 = vst [vmem:[#allocation54_spill] sm:$0xff] %v10614_v45  ;;  %v2804_v12 = vmul.f32 %v9112_v59, %v10472_v63  ;;  %v3349_v13 = vmul.f32 %v12415_v3, %v10495_v52  ;;  %v3353_v19 = vmul.f32 %v12415_v3, %v10521_v57  ;;  %7695 = vset.pattern.permute.xlu1 %v12344_v6  ;;  %v7812_v6 = vld [vmem:[%s12216_s11 + $0x18] sm:$0xff]  }
 0x3de   : > { %3154 = vperm.xlu1 %7695, %v10571_v48   ;;  %v3598_v28 = vadd.f32 %v3346_v20, %v2806_v21  ;;  %v3868_v37 = vadd.f32 %v9042_v39, %v3594_v7  ;;  %v3597_v32 = vadd.f32 %v3345_v18, %v2805_v60  ;;  %5783 = vmatpush1.bf16.msra.mxu1 %v7811_v53  ;;  %v4106_v21 = vmax.f32 %v10542_v62, 0.0  ;;  %v12435_v20 = vld [vmem:[#allocation62_spill] sm:$0xff]  ;;  %v10649_v7 = vpop.permute.xlu1 %2517  ;;  %v10651_v53 = vpop.permute.xlu0 %2507 }
 0x3df   : > { %5175 = vmatmul.mubr.bf16.gmra.mrb[80].mxu0 %v12434_v30  ;;  %v3867_v25 = vadd.f32 %v9018_v36, %v3593_v46  ;;  %3158 = vperm.xlu0 %7693, %v10614_v45   ;;  %v3876_v63 = vadd.f32 %v9042_v39, %v3602_v26  ;;  %v3880_v0 = vadd.f32 %v9042_v39, %v3606_v42  ;;  %v4110_v26 = vmax.f32 %v10591_v44, 0.0 }
 0x3e0   : > { %5184 = vmatprep.mubr.bf16.mxu0 %v12435_v20  ;;  %v3872_v46 = vadd.f32 %v9042_v39, %v3598_v28  ;;  %v3871_v60 = vadd.f32 %v9018_v36, %v3597_v32  ;;  %v3605_v18 = vadd.f32 %v3353_v19, %v2813_v40  ;;  %5784 = vmatprep.subr.bf16.mxu1 %v12347_v14  ;;  %v4114_v20 = vmax.f32 %v10581_v17, 0.0 }
 0x3e1   : > { %v3343_v42 = vmul.f32 %v9087_v31, %v10503_v54  ;;  %v3344_v62 = vmul.f32 %v12366_v61, %v10503_v54  ;;  %v3857_v30 = vadd.f32 %v8753_v34, %v3583_v4  ;;  %v4120_v48 = vmax.f32 %v3868_v37, 0.0 }
 0x3e2   : > { %7696 = vset.pattern.permute.xlu1 %v12347_v14  ;;  %v3601_v28 = vadd.f32 %v3349_v13, %v2809_v15  ;;  %v4118_v40 = vmax.f32 %v10584_v27, 0.0  ;;  %v3865_v19 = vadd.f32 %v8753_v34, %v10553_v55  ;;  %v4124_v44 = vmax.f32 %v3872_v46, 0.0  ;;  %5785 = vmatpush1.bf16.msra.mxu1 %v7812_v6  ;;  %v10674_v27 = vpop.permute.xlu1 %3078  ;;  %v10683_v46 = vpop.permute.xlu0 %3070 }
 0x3e3   : > { %v4119_v32 = vmax.f32 %v3867_v25, 0.0  ;;  %v4123_v33 = vmax.f32 %v3871_v60, 0.0  ;;  %2617 = vperm.xlu1 %7696, %v10614_v45   ;;  %v4132_v58 = vmax.f32 %v3880_v0, 0.0  ;;  %v3352_v54 = vmul.f32 %v12366_v61, %v10495_v52  ;;  %5786 = vmatprep.subr.bf16.mxu1 %v12347_v14  ;;  %v7813_v0 = vld [vmem:[%s12216_s11 + $0x20] sm:$0xff]   ;;  %v12443_v45 = vld [vmem:[#allocation72_spill] sm:$0xff] }
 0x3e4   : > { %v2816_v4 = vmul.f32 %v9112_v59, %v10547_v10  ;;  %v4128_v17 = vmax.f32 %v3876_v63, 0.0  ;;  %v3879_v15 = vadd.f32 %v9018_v36, %v3605_v18  ;;  %v4300_v55 = vpack.c.bf16 %v4124_v44, %v4120_v48  ;;  %v12436_v48 = vld [vmem:[#allocation68_spill] sm:$0xff] }
 0x3e5   : > { %v4299_v25 = vpack.c.bf16 %v4123_v33, %v4119_v32  ;;  %v3596_v13 = vadd.f32 %v3344_v62, %v2804_v12  ;;  %v3595_v37 = vadd.f32 %v3343_v42, %v2803_v35  ;;  %v3356_v6 = vmul.f32 %v12366_v61, %v10521_v57  ;;  %v12437_v62 = vld [vmem:[#allocation69_spill] sm:$0xff] }
 0x3e6   : > { %v3348_v63 = vmul.f32 %v12366_v61, %v10616_v8  ;;  %v3875_v60 = vadd.f32 %v9018_v36, %v3601_v28  ;;  %v4109_v18 = vmax.f32 %v3857_v30, 0.0  ;;  %v3351_v33 = vmul.f32 %v9087_v31, %v10495_v52  ;;  %4963 = vmatprep.mubr.bf16.mxu1 %v4300_v55  ;;  %5787 = vmatpush1.bf16.msra.mxu1 %v7813_v0 }
 0x3e7   : > { %5185 = vmatmul.mubr.bf16.gmra.mrb[84].mxu0 %v12436_v48  ;;  %v4304_v44 = vpack.c.bf16 %v4132_v58, %v4128_v17  ;;  %v4113_v35 = vmax.f32 %v10594_v22, 0.0  ;;  %v4117_v12 = vmax.f32 %v3865_v19, 0.0  ;;  %v2808_v42 = vmul.f32 %v9112_v59, %v10568_v38  ;;  %4964 = vmatmul.mubr.bf16.gmra.mrb[72].mxu1 %v4299_v25  ;;  %v10696_v48 = vpop.permute.xlu1 %3082  ;;  %v7814_v22 = vld [vmem:[%s12216_s11 + $0x28] sm:$0xff]   ;;  %v10721_v0 = vpop.permute.xlu0 %2522 }
 0x3e8   : > { %5194 = vmatprep.mubr.bf16.mxu0 %v12437_v62  ;;  %v4131_v32 = vmax.f32 %v3879_v15, 0.0  ;;  %v3604_v28 = vadd.f32 %v3352_v54, %v10602_v2  ;;  %v3608_v30 = vadd.f32 %v3356_v6, %v2816_v4  ;;  %v3347_v52 = vmul.f32 %v9087_v31, %v10616_v8  ;;  %5788 = vmatprep.subr.bf16.mxu1 %v12347_v14 }
 0x3e9   : > { %4973 = vmatprep.mubr.bf16.mxu1 %v4304_v44  ;;  %v4105_v58 = vmax.f32 %v10545_v9, 0.0  ;;  %v10703_v19 = vadd.f32 %v8782_v47, %v3596_v13  ;;  %v10706_v17 = vadd.f32 %v8753_v34, %v3595_v37  ;;  %v2815_v2 = vmul.f32 %v9095_v5, %v10547_v10 }
 0x3ea   : > { %v4127_v8 = vmax.f32 %v3875_v60, 0.0  ;;  %v10710_v54 = vpack.c.bf16 %v4110_v26, %v4106_v21  ;;  %v3600_v4 = vadd.f32 %v3348_v63, %v2808_v42  ;;  %v3355_v9 = vmul.f32 %v9087_v31, %v10521_v57  ;;  %5789 = vmatpush1.bf16.msra.mxu1 %v7814_v22  ;;  %v12441_v42 = vld [vmem:[#allocation70_spill] sm:$0xff] }
 0x3eb   : > { %v2807_v15 = vmul.f32 %v9095_v5, %v10568_v38  ;;  %v10717_v55 = vpack.c.bf16 %v4109_v18, %v4105_v58  ;;  %v10719_v25 = vpack.c.bf16 %v4118_v40, %v4114_v20  ;;  %v10723_v10 = vpack.c.bf16 %v4117_v12, %v4113_v35  ;;  %v7815_v38 = vld [vmem:[%s12216_s11 + $0x30] sm:$0xff]   ;;  %5790 = vmatprep.subr.bf16.mxu1 %v12347_v14 }
 0x3ec   : > { %v4303_v13 = vpack.c.bf16 %v4131_v32, %v4127_v8  ;;  %v10726_v21 = vadd.f32 %v8782_v47, %v3604_v28  ;;  %v3603_v26 = vadd.f32 %v3351_v33, %v10598_v41  ;;  %v4122_v57 = vmax.f32 %v10703_v19, 0.0  ;;  %v10741_v41 = vpop.permute.xlu1 %2512 }
 0x3ed   : > { %12438 = vst [vmem:[#allocation42_spill] sm:$0xff] %v10717_v55  ;;  %12439 = vst [vmem:[#allocation59_spill] sm:$0xff] %v10719_v25  ;;  %v3599_v37 = vadd.f32 %v3347_v52, %v2807_v15  ;;  %v10735_v40 = vadd.f32 %v8782_v47, %v3608_v30  ;;  %v2825_v6 = vmul.f32 %v12419_v56, %v10649_v7  ;;  %v12442_v30 = vld [vmem:[#allocation71_spill] sm:$0xff]  ;;  %v12445_v55 = vld [vmem:[#allocation78_spill] sm:$0xff] }
 0x3ee   : > { %12440 = vst [vmem:[#allocation47_spill] sm:$0xff] %v10723_v10  ;;  %v3358_v63 = vmul.f32 %v12413_v29, %v10683_v46  ;;  %v3874_v60 = vadd.f32 %v8782_v47, %v3600_v4  ;;  %v3607_v18 = vadd.f32 %v3355_v9, %v2815_v2  ;;  %v2826_v33 = vmul.f32 %v12412_v11, %v10649_v7  ;;  %v7816_v2 = vld [vmem:[%s12216_s11 + $0x38] sm:$0xff]  }
 0x3ef   : > { %v3366_v44 = vmul.f32 %v12413_v29, %v10674_v27  ;;  %v3357_v35 = vmul.f32 %v12415_v3, %v10683_v46  ;;  %v2830_v12 = vmul.f32 %v12412_v11, %v10721_v0  ;;  %5195 = vmatmul.mubr.bf16.gmra.mrb[88].mxu0 %v12441_v42  ;;  %v10756_v62 = vmul.f32 %v9095_v5, %v10649_v7 }
 0x3f0   : > { %v10760_v32 = vmul.f32 %v9112_v59, %v10649_v7  ;;  %v2818_v28 = vmul.f32 %v12412_v11, %v10651_v53  ;;  %5204 = vmatprep.mubr.bf16.mxu0 %v12442_v30  ;;  %4974 = vmatmul.mubr.bf16.gmra.mrb[76].mxu1 %v4303_v13  ;;  %v2817_v58 = vmul.f32 %v12419_v56, %v10651_v53  ;;  %v4126_v4 = vmax.f32 %v3874_v60, 0.0  ;;  %v10784_v30 = vpop.permute.xlu1 %3074 }
 0x3f1   : > { %v2819_v22 = vmul.f32 %v9095_v5, %v10651_v53  ;;  %v2820_v19 = vmul.f32 %v9112_v59, %v10651_v53  ;;  %v3370_v7 = vmul.f32 %v12413_v29, %v10696_v48  ;;  %5791 = vmatpush1.bf16.msra.mxu1 %v7815_v38  ;;  %v10778_v9 = vadd.f32 %v8753_v34, %v3599_v37 }
 0x3f2   : > { %v3610_v8 = vadd.f32 %v3358_v63, %v2818_v28  ;;  %5792 = vmatprep.subr.bf16.mxu1 %v12347_v14  ;;  %v3609_v13 = vadd.f32 %v3357_v35, %v2817_v58  ;;  %v2829_v53 = vmul.f32 %v12419_v56, %v10721_v0  ;;  %v3618_v38 = vadd.f32 %v3366_v44, %v2826_v33  ;;  %v7817_v28 = vld [vmem:[%s12216_s11 + $0x40] sm:$0xff]  }
 0x3f3   : > { %v3622_v42 = vadd.f32 %v3370_v7, %v2830_v12  ;;  %v2821_v52 = vmul.f32 %v12419_v56, %v10741_v41  ;;  %v2822_v63 = vmul.f32 %v12412_v11, %v10741_v41  ;;  %v3361_v37 = vmul.f32 %v12415_v3, %v10784_v30 }
 0x3f4   : > { %v3362_v60 = vmul.f32 %v12413_v29, %v10784_v30  ;;  %v3365_v35 = vmul.f32 %v12415_v3, %v10674_v27  ;;  %v3359_v12 = vmul.f32 %v9087_v31, %v10683_v46  ;;  %v3360_v33 = vmul.f32 %v12366_v61, %v10683_v46 }
 0x3f5   : > { %5793 = vmatpush1.bf16.msra.mxu1 %v7816_v2  ;;  %v10801_v44 = vadd.f32 %v8753_v34, %v3603_v26  ;;  %v3369_v58 = vmul.f32 %v12415_v3, %v10696_v48  ;;  %v3884_v15 = vadd.f32 %v9042_v39, %v3610_v8  ;;  %v3613_v20 = vadd.f32 %v3361_v37, %v2821_v52  ;;  %v10821_v8 = vpop.permute.xlu0 %2527 }
 0x3f6   : > { %v3614_v7 = vadd.f32 %v3362_v60, %v2822_v63  ;;  %5794 = vmatprep.subr.bf16.mxu1 %v12347_v14  ;;  %v3883_v46 = vadd.f32 %v9018_v36, %v3609_v13  ;;  %v3896_v26 = vadd.f32 %v9042_v39, %v3622_v42  ;;  %v10813_v2 = vpack.c.bf16 %v4126_v4, %v4122_v57  ;;  %v10819_v63 = vpop.permute.xlu1 %2537 }
 0x3f7   : > { %5205 = vmatmul.mubr.bf16.gmra.mrb[92].mxu0 %v12443_v45  ;;  %v10816_v10 = vadd.f32 %v8753_v34, %v3607_v18  ;;  %v3621_v25 = vadd.f32 %v3369_v58, %v2829_v53  ;;  %v3887_v45 = vadd.f32 %v9018_v36, %v3613_v20  ;;  %v3892_v13 = vadd.f32 %v9042_v39, %v3618_v38  ;;  %v7818_v53 = vld [vmem:[%s12216_s11 + $0x48] sm:$0xff]  }
 0x3f8   : > { %12444 = vst [vmem:[#allocation60_spill] sm:$0xff] %v10813_v2  ;;  %5214 = vmatprep.mubr.bf16.mxu0 %v12445_v55  ;;  %v3888_v52 = vadd.f32 %v9042_v39, %v3614_v7  ;;  %v10828_v57 = vmul.f32 %v9087_v31, %v10674_v27  ;;  %v3368_v18 = vmul.f32 %v12366_v61, %v10674_v27  ;;  %v4125_v55 = vmax.f32 %v10778_v9, 0.0 }
 0x3f9   : > { %v3617_v4 = vadd.f32 %v3365_v35, %v2825_v6  ;;  %5795 = vmatpush1.bf16.msra.mxu1 %v7817_v28  ;;  %v3611_v42 = vadd.f32 %v3359_v12, %v2819_v22  ;;  %v3612_v37 = vadd.f32 %v3360_v33, %v2820_v19  ;;  %v2831_v20 = vmul.f32 %v9095_v5, %v10721_v0 }
 0x3fa   : > { %v4136_v38 = vmax.f32 %v3884_v15, 0.0  ;;  %5796 = vmatprep.subr.bf16.mxu1 %v12347_v14  ;;  %v4140_v60 = vmax.f32 %v3888_v52, 0.0  ;;  %v4135_v58 = vmax.f32 %v3883_v46, 0.0  ;;  %v4139_v7 = vmax.f32 %v3887_v45, 0.0  ;;  %v10848_v12 = vpop.permute.xlu1 %3094  ;;  %v7819_v45 = vld [vmem:[%s12216_s11 + $0x50] sm:$0xff]  }
 0x3fb   : > { %v4148_v27 = vmax.f32 %v3896_v26, 0.0  ;;  %v3371_v6 = vmul.f32 %v9087_v31, %v10696_v48  ;;  %v2832_v9 = vmul.f32 %v9112_v59, %v10721_v0  ;;  %v4144_v35 = vmax.f32 %v3892_v13, 0.0  ;;  %v3087_v46 = vpop.permute.xlu0 %3086 }
 0x3fc   : > { %v3895_v22 = vadd.f32 %v9018_v36, %v3621_v25  ;;  %v3364_v19 = vmul.f32 %v12366_v61, %v10784_v30  ;;  %v2835_v15 = vmul.f32 %v9095_v5, %v10821_v8  ;;  %v4308_v33 = vpack.c.bf16 %v4140_v60, %v4136_v38  ;;  %v12446_v38 = vld [vmem:[#allocation79_spill] sm:$0xff] }
 0x3fd   : > { %v4307_v28 = vpack.c.bf16 %v4139_v7, %v4135_v58  ;;  %5797 = vmatpush1.bf16.msra.mxu1 %v7818_v53  ;;  %v3372_v26 = vmul.f32 %v12366_v61, %v10696_v48  ;;  %v3623_v52 = vadd.f32 %v3371_v6, %v2831_v20  ;;  %v2836_v0 = vmul.f32 %v9112_v59, %v10821_v8  ;;  %v12447_v58 = vld [vmem:[#allocation77_spill] sm:$0xff] }
 0x3fe   : > { %v3891_v25 = vadd.f32 %v9018_v36, %v3617_v4  ;;  %5798 = vmatprep.subr.bf16.mxu1 %v12347_v14  ;;  %v2824_v13 = vmul.f32 %v9112_v59, %v10741_v41  ;;  %4983 = vmatprep.mubr.bf16.mxu1 %v4308_v33  ;;  %v3375_v48 = vmul.f32 %v9087_v31, %v3087_v46  ;;  %v4133_v20 = vmax.f32 %v10816_v10, 0.0  ;;  %v10871_v33 = vpop.permute.xlu1 %3098 }
 0x3ff   : > { %5215 = vmatmul.mubr.bf16.gmra.mrb[96].mxu0 %v12446_v38  ;;  %v4312_v53 = vpack.c.bf16 %v4148_v27, %v4144_v35  ;;  %v3624_v60 = vadd.f32 %v3372_v26, %v2832_v9  ;;  %v3363_v4 = vmul.f32 %v9087_v31, %v10784_v30  ;;  %4984 = vmatmul.mubr.bf16.gmra.mrb[80].mxu1 %v4307_v28  ;;  %v4129_v6 = vmax.f32 %v10801_v44, 0.0  ;;  %v7820_v44 = vld [vmem:[%s12216_s11 + $0x58] sm:$0xff]  }
 0x400   : > { %5224 = vmatprep.mubr.bf16.mxu0 %v12447_v58  ;;  %v3376_v7 = vmul.f32 %v12366_v61, %v3087_v46  ;;  %v10869_v2 = vadd.f32 %v3375_v48, %v2835_v15  ;;  %v4147_v38 = vmax.f32 %v3895_v22, 0.0  ;;  %v3616_v27 = vadd.f32 %v3364_v19, %v2824_v13  ;;  %v10885_v15 = vpop.permute.xlu0 %2542 }
 0x401   : > { %4993 = vmatprep.mubr.bf16.mxu1 %v4312_v53  ;;  %v3620_v10 = vadd.f32 %v3368_v18, %v10760_v32  ;;  %v2823_v9 = vmul.f32 %v9095_v5, %v10741_v41  ;;  %v4143_v35 = vmax.f32 %v3891_v25, 0.0  ;;  %v12448_v28 = vmax.f32 %v10706_v17, 0.0  ;;  %5799 = vmatpush1.bf16.msra.mxu1 %v7819_v45 }
 0x402   : > { %v10876_v30 = vadd.f32 %v3376_v7, %v2836_v0  ;;  %v12449_v22 = vmax.f32 %v10726_v21, 0.0  ;;  %v12450_v32 = vmax.f32 %v10735_v40, 0.0  ;;  %v10893_v41 = vpack.c.bf16 %v4133_v20, %v4129_v6  ;;  %5800 = vmatprep.subr.bf16.mxu1 %v12347_v14 }
 0x403   : > { %v10880_v26 = vpack.c.bf16 %v4125_v55, %v12448_v28  ;;  %v3886_v19 = vadd.f32 %v8782_v47, %v3612_v37  ;;  %v10897_v17 = vadd.f32 %v8753_v34, %v3611_v42  ;;  %v3615_v55 = vadd.f32 %v3363_v4, %v2823_v9  ;;  %v12451_v4 = vld [vmem:[#allocation83_spill] sm:$0xff] }
 0x404   : > { %v10891_v18 = vpack.c.bf16 %v12450_v32, %v12449_v22  ;;  %v3898_v0 = vadd.f32 %v8782_v47, %v3624_v60  ;;  %v3619_v25 = vadd.f32 %v10828_v57, %v10756_v62  ;;  %v10904_v21 = vadd.f32 %v8753_v34, %v3623_v52  ;;  %v7821_v52 = vld [vmem:[%s12216_s11 + $0x60] sm:$0xff]   ;;  %v10926_v58 = vpop.permute.xlu1 %2532  ;;  %v7822_v32 = vld [vmem:[%s12216_s11 + $0x68] sm:$0xff]  }
 0x405   : > { %v2846_v40 = vmul.f32 %v12412_v11, %v10885_v15  ;;  %v4311_v45 = vpack.c.bf16 %v4147_v38, %v4143_v35  ;;  %v3890_v37 = vadd.f32 %v8782_v47, %v3616_v27  ;;  %v3894_v42 = vadd.f32 %v8782_v47, %v3620_v10  ;;  %5801 = vmatpush1.bf16.msra.mxu1 %v7820_v44 }
 0x406   : > { %v2842_v13 = vmul.f32 %v12412_v11, %v10819_v63  ;;  %v2833_v48 = vmul.f32 %v12419_v56, %v10821_v8  ;;  %v2834_v62 = vmul.f32 %v12412_v11, %v10821_v8  ;;  %v3374_v57 = vmul.f32 %v12413_v29, %v3087_v46  ;;  %5802 = vmatprep.subr.bf16.mxu1 %v12347_v14 }
 0x407   : > { %v3382_v53 = vmul.f32 %v12413_v29, %v10848_v12  ;;  %v3373_v20 = vmul.f32 %v12415_v3, %v3087_v46  ;;  %v3386_v60 = vmul.f32 %v12413_v29, %v10871_v33  ;;  %5225 = vmatmul.mubr.bf16.gmra.mrb[100].mxu0 %v12451_v4  ;;  %v4138_v8 = vmax.f32 %v3886_v19, 0.0  ;;  %4994 = vmatmul.mubr.bf16.gmra.mrb[84].mxu1 %v4311_v45 }
 0x408   : > { %v2845_v7 = vmul.f32 %v12419_v56, %v10885_v15  ;;  %5234 = vmatprep.mubr.bf16.mxu0 %v10319_v50  ;;  %v3889_v6 = vadd.f32 %v8753_v34, %v3615_v55  ;;  %v4137_v38 = vmax.f32 %v10897_v17, 0.0  ;;  %v4150_v46 = vmax.f32 %v3898_v0, 0.0 }
 0x409   : > { %v2841_v27 = vmul.f32 %v12419_v56, %v10819_v63  ;;  %v3638_v10 = vadd.f32 %v3386_v60, %v2846_v40  ;;  %v4146_v9 = vmax.f32 %v3894_v42, 0.0  ;;  %v3893_v35 = vadd.f32 %v8753_v34, %v3619_v25  ;;  %5803 = vmatpush1.bf16.msra.mxu1 %v7821_v52 }
 0x40a   : > { %v3381_v28 = vmul.f32 %v12415_v3, %v10848_v12  ;;  %v3626_v44 = vadd.f32 %v3374_v57, %v2834_v62  ;;  %v3385_v50 = vmul.f32 %v12415_v3, %v10871_v33  ;;  %v4142_v22 = vmax.f32 %v3890_v37, 0.0  ;;  %5804 = vmatprep.subr.bf16.mxu1 %v12347_v14  ;;  %v10956_v37 = vpop.permute.xlu1 %3090 }
 0x40b   : > { %v10946_v19 = vmul.f32 %v9095_v5, %v10819_v63  ;;  %v3625_v17 = vadd.f32 %v3373_v20, %v2833_v48  ;;  %v3634_v55 = vadd.f32 %v3382_v53, %v2842_v13  ;;  %v4149_v0 = vmax.f32 %v10904_v21, 0.0  ;;  %v7823_v20 = vld [vmem:[%s12216_s11 + $0x70] sm:$0xff]  }
 0x40c   : > { %v10952_v25 = vmul.f32 %v9112_v59, %v10819_v63  ;;  %v3637_v40 = vadd.f32 %v3385_v50, %v2845_v7  ;;  %v2837_v45 = vmul.f32 %v12419_v56, %v10926_v58  ;;  %v4141_v42 = vmax.f32 %v3889_v6, 0.0 }
 0x40d   : > { %12452 = vst [vmem:[#allocation61_spill] sm:$0xff] %v10946_v19  ;;  %v2838_v62 = vmul.f32 %v12412_v11, %v10926_v58  ;;  %v3377_v13 = vmul.f32 %v12415_v3, %v10956_v37  ;;  %v3378_v21 = vmul.f32 %v12413_v29, %v10956_v37  ;;  %v3912_v48 = vadd.f32 %v9042_v39, %v3638_v10 }
 0x40e   : > { %v3900_v63 = vadd.f32 %v9042_v39, %v3626_v44  ;;  %v3633_v57 = vadd.f32 %v3381_v28, %v2841_v27  ;;  %v10966_v52 = vpack.c.bf16 %v4142_v22, %v4138_v8  ;;  %v10968_v53 = vpack.c.bf16 %v4150_v46, %v4146_v9  ;;  %5805 = vmatpush1.bf16.msra.mxu1 %v7822_v32  ;;  %v12455_v46 = vld [vmem:[#allocation84_spill] sm:$0xff]  ;;  %v2548_v10 = vpop.permute.xlu0 %2547 }
 0x40f   : > { %5235 = vmatmul.mubr.bf16.gmra.mrb[104].mxu0 %v10323_v51  ;;  %v3630_v60 = vadd.f32 %v3378_v21, %v2838_v62  ;;  %v3629_v4 = vadd.f32 %v3377_v13, %v2837_v45  ;;  %v3899_v7 = vadd.f32 %v9018_v36, %v3625_v17  ;;  %v3908_v6 = vadd.f32 %v9042_v39, %v3634_v55  ;;  %v2558_v50 = vpop.permute.xlu1 %2557 }
 0x410   : > { %12453 = vst [vmem:[#allocation63_spill] sm:$0xff] %v10966_v52  ;;  %12454 = vst [vmem:[#allocation62_spill] sm:$0xff] %v10968_v53  ;;  %v2847_v27 = vmul.f32 %v9095_v5, %v10885_v15  ;;  %v2848_v8 = vmul.f32 %v9112_v59, %v10885_v15  ;;  %5244 = vmatprep.mubr.bf16.mxu0 %v12455_v46  ;;  %v10982_v9 = vadd.f32 %v9018_v36, %v3637_v40 }
 0x411   : > { %v4145_v28 = vmax.f32 %v3893_v35, 0.0  ;;  %5806 = vmatprep.subr.bf16.mxu1 %v12347_v14  ;;  %v10987_v51 = vmul.f32 %v9087_v31, %v10848_v12  ;;  %v10991_v44 = vmul.f32 %v12366_v61, %v10848_v12  ;;  %v4164_v22 = vmax.f32 %v3912_v48, 0.0 }
 0x412   : > { %v10993_v15 = vpack.c.bf16 %v4141_v42, %v4137_v38  ;;  %v3387_v32 = vmul.f32 %v9087_v31, %v10871_v33  ;;  %v3388_v35 = vmul.f32 %v12366_v61, %v10871_v33  ;;  %v4152_v17 = vmax.f32 %v3900_v63, 0.0  ;;  %5807 = vmatpush1.bf16.msra.mxu1 %v7823_v20 }
 0x413   : > { %12456 = vst [vmem:[#allocation68_spill] sm:$0xff] %v10987_v51  ;;  %v10999_v55 = vpack.c.bf16 %v4149_v0, %v4145_v28  ;;  %v3904_v40 = vadd.f32 %v9042_v39, %v3630_v60  ;;  %v3903_v45 = vadd.f32 %v9018_v36, %v3629_v4  ;;  %v4151_v12 = vmax.f32 %v3899_v7, 0.0  ;;  %5808 = vmatprep.subr.bf16.mxu1 %v12347_v14  ;;  %v3103_v63 = vpop.permute.xlu0 %3102 }
 0x414   : > { %12457 = vst [vmem:[#allocation69_spill] sm:$0xff] %v10993_v15  ;;  %v4160_v62 = vmax.f32 %v3908_v6, 0.0  ;;  %v11004_v38 = vadd.f32 %v3387_v32, %v2847_v27  ;;  %v11006_v42 = vadd.f32 %v3388_v35, %v2848_v8  ;;  %v3907_v13 = vadd.f32 %v9018_v36, %v3633_v57  ;;  %v3111_v4 = vpop.permute.xlu1 %3110 }
 0x415   : > { %12458 = vst [vmem:[#allocation70_spill] sm:$0xff] %v10999_v55  ;;  %v4163_v33 = vmax.f32 %v10982_v9, 0.0  ;;  %v2859_v0 = vmul.f32 %v9095_v5, %v2558_v50  ;;  %v2860_v21 = vmul.f32 %v9112_v59, %v2558_v50  ;;  %v4156_v48 = vmax.f32 %v3904_v40, 0.0 }
 0x416   : > { %12459 = vst [vmem:[#allocation71_spill] sm:$0xff] %v11004_v38  ;;  %v4320_v20 = vpack.c.bf16 %v4164_v22, %v4160_v62  ;;  %v2851_v60 = vmul.f32 %v9095_v5, %v2548_v10  ;;  %v3391_v14 = vmul.f32 %v9087_v31, %v3103_v63  ;;  %v3392_v7 = vmul.f32 %v12366_v61, %v3103_v63 }
 0x417   : > { %v4155_v6 = vmax.f32 %v3903_v45, 0.0  ;;  %v2850_v27 = vmul.f32 %v12412_v11, %v2548_v10  ;;  %v3399_v57 = vmul.f32 %v9087_v31, %v3111_v4  ;;  %v3400_v8 = vmul.f32 %v12366_v61, %v3111_v4  ;;  %5245 = vmatmul.mubr.bf16.gmra.mrb[108].mxu0 %v10328_v24 }
 0x418   : > { %v3390_v46 = vmul.f32 %v12413_v29, %v3103_v63  ;;  %v2858_v9 = vmul.f32 %v12412_v11, %v2558_v50  ;;  %v2852_v28 = vmul.f32 %v9112_v59, %v2548_v10  ;;  %v4316_v22 = vpack.c.bf16 %v4156_v48, %v4152_v17  ;;  %5254 = vmatprep.mubr.bf16.mxu0 %v10353_v16  ;;  %v3115_v55 = vpop.permute.xlu1 %3114  ;;  %v2563_v17 = vpop.permute.xlu0 %2562  ;;  %v7824_v16 = vld [vmem:[%s12216_s11 + $0x78] sm:$0xff]  }
 0x419   : > { %v11023_v32 = vadd.f32 %v3391_v14, %v2851_v60  ;;  %v3398_v35 = vmul.f32 %v12413_v29, %v3111_v4  ;;  %v3651_v40 = vadd.f32 %v3399_v57, %v2859_v0  ;;  %v3652_v45 = vadd.f32 %v3400_v8, %v2860_v21  ;;  %5809 = vmatpush1.bf16.msra.mxu1 %v7824_v16 }
 0x41a   : > { %v3389_v62 = vmul.f32 %v12415_v3, %v3103_v63  ;;  %v2857_v38 = vmul.f32 %v12419_v56, %v2558_v50  ;;  %v2849_v24 = vmul.f32 %v12419_v56, %v2548_v10  ;;  %5003 = vmatprep.mubr.bf16.mxu1 %v4316_v22  ;;  %v11029_v51 = vadd.f32 %v3392_v7, %v2852_v28 }
 0x41b   : > { %v4315_v19 = vpack.c.bf16 %v4155_v6, %v4151_v12  ;;  %v3397_v48 = vmul.f32 %v12415_v3, %v3111_v4  ;;  %v3642_v0 = vadd.f32 %v3390_v46, %v2850_v27  ;;  %v3402_v21 = vmul.f32 %v12413_v29, %v3115_v55 }
 0x41c   : > { %v3403_v63 = vmul.f32 %v9087_v31, %v3115_v55  ;;  %v3404_v10 = vmul.f32 %v12366_v61, %v3115_v55  ;;  %v2862_v50 = vmul.f32 %v12412_v11, %v2563_v17  ;;  %v2863_v12 = vmul.f32 %v9095_v5, %v2563_v17 }
 0x41d   : > { %5004 = vmatmul.mubr.bf16.gmra.mrb[88].mxu1 %v4315_v19  ;;  %v2864_v60 = vmul.f32 %v9112_v59, %v2563_v17  ;;  %v3650_v14 = vadd.f32 %v3398_v35, %v2858_v9  ;;  %v3641_v7 = vadd.f32 %v3389_v62, %v2849_v24  ;;  %v2861_v6 = vmul.f32 %v12419_v56, %v2563_v17  ;;  %v12461_v35 = vld [vmem:[#allocation91_spill] sm:$0xff] }
 0x41e   : > { %5013 = vmatprep.mubr.bf16.mxu1 %v4320_v20  ;;  %v3654_v4 = vadd.f32 %v3402_v21, %v2862_v50  ;;  %v3655_v27 = vadd.f32 %v3403_v63, %v2863_v12  ;;  %v4159_v8 = vmax.f32 %v3907_v13, 0.0  ;;  %v2840_v19 = vmul.f32 %v9112_v59, %v10926_v58  ;;  %v2553_v28 = vpop.permute.xlu1 %2552 }
 0x41f   : > { %v3656_v57 = vadd.f32 %v3404_v10, %v2864_v60  ;;  %v3401_v46 = vmul.f32 %v12415_v3, %v3115_v55  ;;  %5255 = vmatmul.mubr.bf16.gmra.mrb[112].mxu0 %v10355_v49  ;;  %v11048_v9 = vadd.f32 %v8782_v47, %v10876_v30  ;;  %v11052_v20 = vadd.f32 %v8753_v34, %v10869_v2 }
 0x420   : > { %v3380_v22 = vmul.f32 %v12366_v61, %v10956_v37  ;;  %v3649_v13 = vadd.f32 %v3397_v48, %v2857_v38  ;;  %5264 = vmatprep.mubr.bf16.mxu0 %v12461_v35  ;;  %v4319_v62 = vpack.c.bf16 %v4163_v33, %v4159_v8  ;;  %v11058_v55 = vadd.f32 %v9042_v39, %v3642_v0 }
 0x421   : > { %12460 = vst [vmem:[#allocation72_spill] sm:$0xff] %v11052_v20  ;;  %v3653_v49 = vadd.f32 %v3401_v46, %v2861_v6  ;;  %v11061_v24 = vadd.f32 %v9018_v36, %v3641_v7  ;;  %v3924_v30 = vadd.f32 %v9042_v39, %v3650_v14  ;;  %v3928_v17 = vadd.f32 %v9042_v39, %v3654_v4 }
 0x422   : > { %v3926_v2 = vadd.f32 %v8782_v47, %v3652_v45  ;;  %v3930_v16 = vadd.f32 %v8782_v47, %v3656_v57  ;;  %v3925_v38 = vadd.f32 %v8753_v34, %v3651_v40  ;;  %v3929_v48 = vadd.f32 %v8753_v34, %v3655_v27 }
 0x423   : > { %v2853_v33 = vmul.f32 %v12419_v56, %v2553_v28  ;;  %v2854_v0 = vmul.f32 %v12412_v11, %v2553_v28  ;;  %v2855_v21 = vmul.f32 %v9095_v5, %v2553_v28  ;;  %v2856_v63 = vmul.f32 %v9112_v59, %v2553_v28  ;;  %v3107_v10 = vpop.permute.xlu1 %3106 }
 0x424   : > { %v4178_v50 = vmax.f32 %v3926_v2, 0.0  ;;  %v4182_v12 = vmax.f32 %v3930_v16, 0.0  ;;  %v4177_v60 = vmax.f32 %v3925_v38, 0.0  ;;  %v4181_v45 = vmax.f32 %v3929_v48, 0.0  ;;  %v12464_v2 = vld [vmem:[#allocation92_spill] sm:$0xff] }
 0x425   : > { %5014 = vmatmul.mubr.bf16.gmra.mrb[92].mxu1 %v4319_v62  ;;  %v3393_v14 = vmul.f32 %v12415_v3, %v3107_v10  ;;  %v3394_v40 = vmul.f32 %v12413_v29, %v3107_v10  ;;  %v3395_v7 = vmul.f32 %v9087_v31, %v3107_v10  ;;  %v3396_v6 = vmul.f32 %v12366_v61, %v3107_v10 }
 0x426   : > { %v4180_v4 = vmax.f32 %v3928_v17, 0.0  ;;  %v11078_v27 = vadd.f32 %v9018_v36, %v3653_v49  ;;  %v11080_v57 = vpack.c.bf16 %v4182_v12, %v4178_v50  ;;  %v11082_v8 = vpack.c.bf16 %v4181_v45, %v4177_v60  ;;  %v2568_v49 = vpop.permute.xlu0 %2567 }
 0x427   : > { %v3645_v46 = vadd.f32 %v3393_v14, %v2853_v33  ;;  %v3646_v28 = vadd.f32 %v3394_v40, %v2854_v0  ;;  %v3647_v35 = vadd.f32 %v3395_v7, %v2855_v21  ;;  %v3648_v62 = vadd.f32 %v3396_v6, %v2856_v63  ;;  %5265 = vmatmul.mubr.bf16.gmra.mrb[116].mxu0 %v12464_v2 }
 0x428   : > { %12462 = vst [vmem:[#allocation78_spill] sm:$0xff] %v11080_v57  ;;  %12463 = vst [vmem:[#allocation79_spill] sm:$0xff] %v11082_v8  ;;  %v2839_v16 = vmul.f32 %v9095_v5, %v10926_v58  ;;  %v3379_v38 = vmul.f32 %v9087_v31, %v10956_v37  ;;  %5274 = vmatprep.mubr.bf16.mxu0 %v10527_v43  ;;  %v4176_v17 = vmax.f32 %v3924_v30, 0.0  ;;  %v2578_v10 = vpop.permute.xlu1 %2577  ;;  %v4168_v33 = vmax.f32 %v11058_v55, 0.0 }
 0x429   : > { %v3636_v48 = vadd.f32 %v10991_v44, %v10952_v25  ;;  %v4167_v0 = vmax.f32 %v11061_v24, 0.0  ;;  %v3923_v21 = vadd.f32 %v9018_v36, %v3649_v13  ;;  %v3632_v63 = vadd.f32 %v3380_v22, %v2840_v19 }
 0x42a   : > { %v4328_v50 = vpack.c.bf16 %v4180_v4, %v4176_v17  ;;  %v4179_v58 = vmax.f32 %v11078_v27, 0.0  ;;  %v3918_v37 = vadd.f32 %v8782_v47, %v11029_v51  ;;  %v3917_v43 = vadd.f32 %v8753_v34, %v11023_v32 }
 0x42b   : > { %v2865_v30 = vmul.f32 %v12419_v56, %v2568_v49  ;;  %v2866_v25 = vmul.f32 %v12412_v11, %v2568_v49  ;;  %v3920_v44 = vadd.f32 %v9042_v39, %v3646_v28  ;;  %v3919_v55 = vadd.f32 %v9018_v36, %v3645_v46  ;;  %v3119_v60 = vpop.permute.xlu0 %3118 }
 0x42c   : > { %v2875_v13 = vmul.f32 %v9095_v5, %v2578_v10  ;;  %v2867_v19 = vmul.f32 %v9095_v5, %v2568_v49  ;;  %v2868_v22 = vmul.f32 %v9112_v59, %v2568_v49  ;;  %v3922_v24 = vadd.f32 %v8782_v47, %v3648_v62 }
 0x42d   : > { %v2876_v51 = vmul.f32 %v9112_v59, %v2578_v10  ;;  %v4172_v12 = vmax.f32 %v3920_v44, 0.0  ;;  %v4171_v32 = vmax.f32 %v3919_v55, 0.0  ;;  %v3921_v45 = vadd.f32 %v8753_v34, %v3647_v35  ;;  %v3127_v14 = vpop.permute.xlu1 %3126 }
 0x42e   : > { %v3405_v40 = vmul.f32 %v12415_v3, %v3119_v60  ;;  %v3406_v7 = vmul.f32 %v12413_v29, %v3119_v60  ;;  %v3407_v6 = vmul.f32 %v9087_v31, %v3119_v60  ;;  %v3408_v4 = vmul.f32 %v12366_v61, %v3119_v60 }
 0x42f   : > { %v2873_v27 = vmul.f32 %v12419_v56, %v2578_v10  ;;  %v2874_v46 = vmul.f32 %v12412_v11, %v2578_v10  ;;  %5275 = vmatmul.mubr.bf16.gmra.mrb[120].mxu0 %v10529_v1  ;;  %v3415_v28 = vmul.f32 %v9087_v31, %v3127_v14  ;;  %v3416_v62 = vmul.f32 %v12366_v61, %v3127_v14 }
 0x430   : > { %v3414_v35 = vmul.f32 %v12413_v29, %v3127_v14  ;;  %v4324_v2 = vpack.c.bf16 %v4172_v12, %v4168_v33  ;;  %5284 = vmatprep.mubr.bf16.mxu0 %v10533_v23  ;;  %v4323_v49 = vpack.c.bf16 %v4171_v32, %v4167_v0  ;;  %v4174_v17 = vmax.f32 %v3922_v24, 0.0  ;;  %v2583_v15 = vpop.permute.xlu0 %2582 }
 0x431   : > { %v3413_v44 = vmul.f32 %v12415_v3, %v3127_v14  ;;  %v3667_v55 = vadd.f32 %v3415_v28, %v2875_v13  ;;  %v3668_v60 = vadd.f32 %v3416_v62, %v2876_v51  ;;  %v3658_v8 = vadd.f32 %v3406_v7, %v2866_v25 }
 0x432   : > { %5023 = vmatprep.mubr.bf16.mxu1 %v4324_v2  ;;  %v3657_v10 = vadd.f32 %v3405_v40, %v2865_v30  ;;  %v3659_v57 = vadd.f32 %v3407_v6, %v2867_v19  ;;  %v3660_v1 = vadd.f32 %v3408_v4, %v2868_v22  ;;  %v4173_v20 = vmax.f32 %v3921_v45, 0.0  ;;  %v2573_v53 = vpop.permute.xlu1 %2572 }
 0x433   : > { %5024 = vmatmul.mubr.bf16.gmra.mrb[96].mxu1 %v4323_v49  ;;  %v4175_v52 = vmax.f32 %v3923_v21, 0.0  ;;  %v4154_v33 = vmax.f32 %v11048_v9, 0.0  ;;  %v11124_v23 = vadd.f32 %v8782_v47, %v3636_v48  ;;  %v11128_v0 = vadd.f32 %v8782_v47, %v11006_v42 }
 0x434   : > { %v3666_v13 = vadd.f32 %v3414_v35, %v2874_v46  ;;  %5033 = vmatprep.mubr.bf16.mxu1 %v4328_v50  ;;  %v11130_v25 = vadd.f32 %v3379_v38, %v2839_v16  ;;  %v4170_v30 = vmax.f32 %v3918_v37, 0.0  ;;  %v4169_v19 = vmax.f32 %v3917_v43, 0.0 }
 0x435   : > { %v3665_v22 = vadd.f32 %v3413_v44, %v2873_v27  ;;  %v4327_v24 = vpack.c.bf16 %v4179_v58, %v4175_v52  ;;  %v11133_v51 = vadd.f32 %v9042_v39, %v3658_v8  ;;  %v11136_v21 = vadd.f32 %v8782_v47, %v3632_v63  ;;  %v12465_v58 = vld [vmem:[#allocation48_spill] sm:$0xff] }
 0x436   : > { %v2877_v48 = vmul.f32 %v12419_v56, %v2583_v15  ;;  %v11140_v12 = vadd.f32 %v9018_v36, %v3657_v10  ;;  %v11142_v42 = vpack.c.bf16 %v4174_v17, %v4170_v30  ;;  %v11144_v50 = vpack.c.bf16 %v4173_v20, %v4169_v19 }
 0x437   : > { %v2869_v16 = vmul.f32 %v12419_v56, %v2573_v53  ;;  %v2878_v38 = vmul.f32 %v12412_v11, %v2583_v15  ;;  %v2879_v52 = vmul.f32 %v9095_v5, %v2583_v15  ;;  %v2880_v8 = vmul.f32 %v9112_v59, %v2583_v15  ;;  %5285 = vmatmul.mubr.bf16.gmra.mrb[124].mxu0 %v12465_v58  ;;  %v3123_v20 = vpop.permute.xlu1 %3122 }
 0x438   : > { %v2870_v63 = vmul.f32 %v12412_v11, %v2573_v53  ;;  %v2871_v37 = vmul.f32 %v9095_v5, %v2573_v53  ;;  %v2872_v43 = vmul.f32 %v9112_v59, %v2573_v53  ;;  %5294 = vmatprep.mubr.bf16.mxu0 %v10710_v54  ;;  %v11156_v32 = vadd.f32 %v9042_v39, %v3666_v13 }
 0x439   : > { %v3409_v45 = vmul.f32 %v12415_v3, %v3123_v20  ;;  %v3410_v14 = vmul.f32 %v12413_v29, %v3123_v20  ;;  %v3411_v15 = vmul.f32 %v9087_v31, %v3123_v20  ;;  %v3412_v40 = vmul.f32 %v12366_v61, %v3123_v20 }
 0x43a   : > { %v4184_v7 = vmax.f32 %v11133_v51, 0.0  ;;  %v4183_v6 = vmax.f32 %v11140_v12, 0.0  ;;  %v11165_v53 = vadd.f32 %v9018_v36, %v3665_v22  ;;  %v3934_v54 = vadd.f32 %v8782_v47, %v3660_v1  ;;  %v12466_v12 = vld [vmem:[#allocation42_spill] sm:$0xff] }
 0x43b   : > { %v3661_v4 = vadd.f32 %v3409_v45, %v2869_v16  ;;  %v3662_v27 = vadd.f32 %v3410_v14, %v2870_v63  ;;  %v3663_v46 = vadd.f32 %v3411_v15, %v2871_v37  ;;  %v3664_v28 = vadd.f32 %v3412_v40, %v2872_v43  ;;  %5034 = vmatmul.mubr.bf16.gmra.mrb[100].mxu1 %v4327_v24  ;;  %v3131_v62 = vpop.permute.xlu1 %3130  ;;  %v12467_v16 = vld [vmem:[#allocation59_spill] sm:$0xff] }
 0x43c   : > { %v4192_v35 = vmax.f32 %v11156_v32, 0.0  ;;  %v3933_v2 = vadd.f32 %v8753_v34, %v3659_v57  ;;  %v3942_v49 = vadd.f32 %v8782_v47, %v3668_v60  ;;  %v3941_v17 = vadd.f32 %v8753_v34, %v3667_v55 }
 0x43d   : > { %v3417_v44 = vmul.f32 %v12415_v3, %v3131_v62  ;;  %v3418_v10 = vmul.f32 %v12413_v29, %v3131_v62  ;;  %v3419_v1 = vmul.f32 %v9087_v31, %v3131_v62  ;;  %v3420_v13 = vmul.f32 %v12366_v61, %v3131_v62 }
 0x43e   : > { %v3936_v30 = vadd.f32 %v9042_v39, %v3662_v27  ;;  %v3935_v19 = vadd.f32 %v9018_v36, %v3661_v4  ;;  %v3938_v22 = vadd.f32 %v8782_v47, %v3664_v28  ;;  %v3937_v57 = vadd.f32 %v8753_v34, %v3663_v46 }
 0x43f   : > { %v3669_v24 = vadd.f32 %v3417_v44, %v2877_v48  ;;  %v3670_v60 = vadd.f32 %v3418_v10, %v2878_v38  ;;  %v3671_v51 = vadd.f32 %v3419_v1, %v2879_v52  ;;  %v3672_v55 = vadd.f32 %v3420_v13, %v2880_v8  ;;  %5295 = vmatmul.mubr.bf16.gmra.mrb[128].mxu0 %v12466_v12 }
 0x440   : > { %5304 = vmatprep.mubr.bf16.mxu0 %v12467_v16  ;;  %v4188_v58 = vmax.f32 %v3936_v30, 0.0  ;;  %v4187_v63 = vmax.f32 %v3935_v19, 0.0  ;;  %v4191_v37 = vmax.f32 %v11165_v53, 0.0  ;;  %v4190_v43 = vmax.f32 %v3938_v22, 0.0  ;;  %v2598_v20 = vpop.permute.xlu1 %2597  ;;  %v2588_v32 = vpop.permute.xlu0 %2587 }
 0x441   : > { %v3944_v45 = vadd.f32 %v9042_v39, %v3670_v60  ;;  %v4189_v14 = vmax.f32 %v3937_v57, 0.0  ;;  %v3946_v15 = vadd.f32 %v8782_v47, %v3672_v55  ;;  %v3945_v48 = vadd.f32 %v8753_v34, %v3671_v51  ;;  %v12469_v55 = vld [vmem:[#allocation60_spill] sm:$0xff] }
 0x442   : > { %v4186_v38 = vmax.f32 %v3934_v54, 0.0  ;;  %v4185_v52 = vmax.f32 %v3933_v2, 0.0  ;;  %v4194_v8 = vmax.f32 %v3942_v49, 0.0  ;;  %v4193_v40 = vmax.f32 %v3941_v17, 0.0 }
 0x443   : > { %v11187_v4 = vmul.f32 %v12419_v56, %v2598_v20  ;;  %v11190_v27 = vmul.f32 %v12412_v11, %v2598_v20  ;;  %v4332_v53 = vpack.c.bf16 %v4188_v58, %v4184_v7  ;;  %v3943_v46 = vadd.f32 %v9018_v36, %v3669_v24 }
 0x444   : > { %v11194_v28 = vmul.f32 %v9095_v5, %v2598_v20  ;;  %v11197_v62 = vmul.f32 %v9112_v59, %v2598_v20  ;;  %v4331_v44 = vpack.c.bf16 %v4187_v63, %v4183_v6  ;;  %v4196_v54 = vmax.f32 %v3944_v45, 0.0  ;;  %v2593_v2 = vpop.permute.xlu1 %2592  ;;  %v12468_v6 = vld [vmem:[#allocation47_spill] sm:$0xff] }
 0x445   : > { %5043 = vmatprep.mubr.bf16.mxu1 %v4332_v53  ;;  %v11199_v49 = vpack.c.bf16 %v4190_v43, %v4186_v38  ;;  %v11201_v17 = vpack.c.bf16 %v4189_v14, %v4185_v52  ;;  %v4198_v10 = vmax.f32 %v3946_v15, 0.0  ;;  %v4197_v1 = vmax.f32 %v3945_v48, 0.0  ;;  %v3135_v22 = vpop.permute.xlu0 %3134 }
 0x446   : > { %v2881_v7 = vmul.f32 %v12419_v56, %v2588_v32  ;;  %v2882_v13 = vmul.f32 %v12412_v11, %v2588_v32  ;;  %v2883_v30 = vmul.f32 %v9095_v5, %v2588_v32  ;;  %v2884_v19 = vmul.f32 %v9112_v59, %v2588_v32  ;;  %5044 = vmatmul.mubr.bf16.gmra.mrb[104].mxu1 %v4331_v44 }
 0x447   : > { %5305 = vmatmul.mubr.bf16.gmra.mrb[132].mxu0 %v12468_v6  ;;  %v4336_v57 = vpack.c.bf16 %v4196_v54, %v4192_v35  ;;  %v3421_v24 = vmul.f32 %v12415_v3, %v3135_v22  ;;  %v3422_v60 = vmul.f32 %v12413_v29, %v3135_v22  ;;  %v3423_v51 = vmul.f32 %v9087_v31, %v3135_v22 }
 0x448   : > { %5314 = vmatprep.mubr.bf16.mxu0 %v12469_v55  ;;  %v3424_v12 = vmul.f32 %v12366_v61, %v3135_v22  ;;  %v4195_v16 = vmax.f32 %v3943_v46, 0.0  ;;  %v11213_v58 = vpack.c.bf16 %v4198_v10, %v4194_v8  ;;  %v11215_v63 = vpack.c.bf16 %v4197_v1, %v4193_v40 }
 0x449   : > { %v2885_v43 = vmul.f32 %v12419_v56, %v2593_v2  ;;  %v2886_v20 = vmul.f32 %v12412_v11, %v2593_v2  ;;  %v2887_v35 = vmul.f32 %v9095_v5, %v2593_v2  ;;  %5053 = vmatprep.mubr.bf16.mxu1 %v4336_v57  ;;  %v3675_v32 = vadd.f32 %v3423_v51, %v2883_v30  ;;  %v3139_v38 = vpop.permute.xlu1 %3138 }
 0x44a   : > { %v2888_v45 = vmul.f32 %v9112_v59, %v2593_v2  ;;  %v3673_v14 = vadd.f32 %v3421_v24, %v2881_v7  ;;  %v3674_v15 = vadd.f32 %v3422_v60, %v2882_v13  ;;  %v3676_v48 = vadd.f32 %v3424_v12, %v2884_v19  ;;  %v2603_v46 = vpop.permute.xlu0 %2602 }
 0x44b   : > { %v3425_v52 = vmul.f32 %v12415_v3, %v3139_v38  ;;  %v3426_v8 = vmul.f32 %v12413_v29, %v3139_v38  ;;  %v3427_v40 = vmul.f32 %v9087_v31, %v3139_v38  ;;  %v3428_v53 = vmul.f32 %v12366_v61, %v3139_v38 }
 0x44c   : > { %v4335_v44 = vpack.c.bf16 %v4195_v16, %v4191_v37  ;;  %v2893_v54 = vmul.f32 %v12419_v56, %v2603_v46  ;;  %v2894_v10 = vmul.f32 %v12412_v11, %v2603_v46  ;;  %v2895_v2 = vmul.f32 %v9095_v5, %v2603_v46 }
 0x44d   : > { %v3677_v1 = vadd.f32 %v3425_v52, %v2885_v43  ;;  %v3678_v7 = vadd.f32 %v3426_v8, %v2886_v20  ;;  %v3679_v13 = vadd.f32 %v3427_v40, %v2887_v35  ;;  %v3680_v30 = vadd.f32 %v3428_v53, %v2888_v45  ;;  %v3143_v22 = vpop.permute.xlu1 %3142 }
 0x44e   : > { %5054 = vmatmul.mubr.bf16.gmra.mrb[108].mxu1 %v4335_v44  ;;  %v2896_v19 = vmul.f32 %v9112_v59, %v2603_v46  ;;  %v3948_v6 = vadd.f32 %v9042_v39, %v3674_v15  ;;  %v3947_v57 = vadd.f32 %v9018_v36, %v3673_v14  ;;  %v3950_v37 = vadd.f32 %v8782_v47, %v3676_v48 }
 0x44f   : > { %v3429_v24 = vmul.f32 %v12415_v3, %v3143_v22  ;;  %v3430_v60 = vmul.f32 %v12413_v29, %v3143_v22  ;;  %v3431_v51 = vmul.f32 %v9087_v31, %v3143_v22  ;;  %v3432_v55 = vmul.f32 %v12366_v61, %v3143_v22  ;;  %5315 = vmatmul.mubr.bf16.gmra.mrb[136].mxu0 %v10880_v26 }
 0x450   : > { %5324 = vmatprep.mubr.bf16.mxu0 %v10891_v18  ;;  %v3952_v12 = vadd.f32 %v9042_v39, %v3678_v7  ;;  %v4200_v16 = vmax.f32 %v3948_v6, 0.0  ;;  %v3951_v43 = vadd.f32 %v9018_v36, %v3677_v1  ;;  %v3949_v20 = vadd.f32 %v8753_v34, %v3675_v32 }
 0x451   : > { %v3681_v35 = vadd.f32 %v3429_v24, %v11187_v4  ;;  %v3682_v45 = vadd.f32 %v3430_v60, %v11190_v27  ;;  %v11244_v14 = vadd.f32 %v3431_v51, %v11194_v28  ;;  %v11247_v15 = vadd.f32 %v3432_v55, %v11197_v62  ;;  %v3147_v26 = vpop.permute.xlu1 %3146 }
 0x452   : > { %v4204_v48 = vmax.f32 %v3952_v12, 0.0  ;;  %v4199_v18 = vmax.f32 %v3947_v57, 0.0  ;;  %v4203_v38 = vmax.f32 %v3951_v43, 0.0  ;;  %v3954_v52 = vadd.f32 %v8782_v47, %v3680_v30 }
 0x453   : > { %v3433_v8 = vmul.f32 %v12415_v3, %v3147_v26  ;;  %v3434_v32 = vmul.f32 %v12413_v29, %v3147_v26  ;;  %v3435_v4 = vmul.f32 %v9087_v31, %v3147_v26  ;;  %v3436_v27 = vmul.f32 %v12366_v61, %v3147_v26 }
 0x454   : > { %v4340_v40 = vpack.c.bf16 %v4204_v48, %v4200_v16  ;;  %v4339_v28 = vpack.c.bf16 %v4203_v38, %v4199_v18  ;;  %v3956_v53 = vadd.f32 %v9042_v39, %v3682_v45  ;;  %v3955_v62 = vadd.f32 %v9018_v36, %v3681_v35 }
 0x455   : > { %v3685_v46 = vadd.f32 %v3433_v8, %v2893_v54  ;;  %v3686_v44 = vadd.f32 %v3434_v32, %v2894_v10  ;;  %v11256_v1 = vadd.f32 %v3435_v4, %v2895_v2  ;;  %v3688_v7 = vadd.f32 %v3436_v27, %v2896_v19  ;;  %v2608_v30 = vpop.permute.xlu0 %2607  ;;  %v12470_v19 = vld [vmem:[#allocation63_spill] sm:$0xff] }
 0x456   : > { %5063 = vmatprep.mubr.bf16.mxu1 %v4340_v40  ;;  %v2897_v22 = vmul.f32 %v12419_v56, %v2608_v30  ;;  %v2898_v6 = vmul.f32 %v12412_v11, %v2608_v30  ;;  %v2899_v57 = vmul.f32 %v9095_v5, %v2608_v30  ;;  %v4202_v24 = vmax.f32 %v3950_v37, 0.0 }
 0x457   : > { %5064 = vmatmul.mubr.bf16.gmra.mrb[112].mxu1 %v4339_v28  ;;  %5325 = vmatmul.mubr.bf16.gmra.mrb[140].mxu0 %v10893_v41  ;;  %v2900_v60 = vmul.f32 %v9112_v59, %v2608_v30  ;;  %v3960_v54 = vadd.f32 %v9042_v39, %v3686_v44  ;;  %v4208_v10 = vmax.f32 %v3956_v53, 0.0  ;;  %v3959_v2 = vadd.f32 %v9018_v36, %v3685_v46 }
 0x458   : > { %5334 = vmatprep.mubr.bf16.mxu0 %v12470_v19  ;;  %v2613_v51 = vpop.permute.xlu1 %2612  ;;  %v4207_v55 = vmax.f32 %v3955_v62, 0.0  ;;  %v4206_v12 = vmax.f32 %v3954_v52, 0.0  ;;  %v3953_v16 = vadd.f32 %v8753_v34, %v3679_v13  ;;  %v4201_v43 = vmax.f32 %v3949_v20, 0.0 }
 0x459   : > { %v2901_v37 = vmul.f32 %v12419_v56, %v2613_v51  ;;  %v2902_v35 = vmul.f32 %v12412_v11, %v2613_v51  ;;  %v2903_v41 = vmul.f32 %v9095_v5, %v2613_v51  ;;  %v2904_v45 = vmul.f32 %v9112_v59, %v2613_v51  ;;  %v12471_v51 = vld [vmem:[#allocation69_spill] sm:$0xff] }
 0x45a   : > { %v4212_v26 = vmax.f32 %v3960_v54, 0.0  ;;  %v4211_v48 = vmax.f32 %v3959_v2, 0.0  ;;  %v3151_v18 = vpop.permute.xlu0 %3150  ;;  %v11271_v38 = vpack.c.bf16 %v4206_v12, %v4202_v24  ;;  %v4205_v8 = vmax.f32 %v3953_v16, 0.0 }
 0x45b   : > { %v3437_v32 = vmul.f32 %v12415_v3, %v3151_v18  ;;  %v3438_v52 = vmul.f32 %v12413_v29, %v3151_v18  ;;  %v3439_v13 = vmul.f32 %v9087_v31, %v3151_v18  ;;  %v3440_v20 = vmul.f32 %v12366_v61, %v3151_v18 }
 0x45c   : > { %v4344_v4 = vpack.c.bf16 %v4212_v26, %v4208_v10  ;;  %v4343_v27 = vpack.c.bf16 %v4211_v48, %v4207_v55  ;;  %v11277_v40 = vpack.c.bf16 %v4205_v8, %v4201_v43  ;;  %v3962_v28 = vadd.f32 %v8782_v47, %v3688_v7 }
 0x45d   : > { %v3155_v53 = vpop.permute.xlu1 %3154  ;;  %v3689_v62 = vadd.f32 %v3437_v32, %v2897_v22  ;;  %v3690_v46 = vadd.f32 %v3438_v52, %v2898_v6  ;;  %v3691_v44 = vadd.f32 %v3439_v13, %v2899_v57  ;;  %v3692_v30 = vadd.f32 %v3440_v20, %v2900_v60  ;;  %v12472_v60 = vld [vmem:[#allocation62_spill] sm:$0xff] }
 0x45e   : > { %5073 = vmatprep.mubr.bf16.mxu1 %v4344_v4  ;;  %v3441_v24 = vmul.f32 %v12415_v3, %v3155_v53  ;;  %v3442_v54 = vmul.f32 %v12413_v29, %v3155_v53  ;;  %v3443_v2 = vmul.f32 %v9087_v31, %v3155_v53  ;;  %v3444_v19 = vmul.f32 %v12366_v61, %v3155_v53  ;;  %v11284_v10 = vpop.permute.xlu0 %3158 }
 0x45f   : > { %5074 = vmatmul.mubr.bf16.gmra.mrb[116].mxu1 %v4343_v27  ;;  %5335 = vmatmul.mubr.bf16.gmra.mrb[144].mxu0 %v12471_v51  ;;  %v4158_v7 = vmax.f32 %v11136_v21, 0.0  ;;  %v3445_v22 = vmul.f32 %v12415_v3, %v11284_v10  ;;  %v3905_v6 = vadd.f32 %v8753_v34, %v11130_v25  ;;  %v3958_v57 = vadd.f32 %v8782_v47, %v11247_v15 }
 0x460   : > { %5344 = vmatprep.mubr.bf16.mxu0 %v12472_v60  ;;  %v3693_v55 = vadd.f32 %v3441_v24, %v2901_v37  ;;  %v3694_v12 = vadd.f32 %v3442_v54, %v2902_v35  ;;  %v3695_v16 = vadd.f32 %v3443_v2, %v2903_v41  ;;  %v3696_v43 = vadd.f32 %v3444_v19, %v2904_v45  ;;  %v12474_v60 = vld [vmem:[#allocation72_spill] sm:$0xff] }
 0x461   : > { %v3446_v26 = vmul.f32 %v12413_v29, %v11284_v10  ;;  %v3964_v21 = vadd.f32 %v9042_v39, %v3690_v46  ;;  %v3963_v48 = vadd.f32 %v9018_v36, %v3689_v62  ;;  %v4214_v3 = vmax.f32 %v3962_v28, 0.0  ;;  %v12473_v62 = vld [vmem:[#allocation70_spill] sm:$0xff] }
 0x462   : > { %v11299_v18 = vpop.permute.xlu1 %2617  ;;  %v3968_v25 = vadd.f32 %v9042_v39, %v3694_v12  ;;  %v3967_v15 = vadd.f32 %v9018_v36, %v3693_v55  ;;  %v3957_v37 = vadd.f32 %v8753_v34, %v11244_v14  ;;  %v3961_v35 = vadd.f32 %v8753_v34, %v11256_v1 }
 0x463   : > { %v4318_v29 = vpack.c.bf16 %v4158_v7, %v4154_v33  ;;  %v2905_v41 = vmul.f32 %v12419_v56, %v11299_v18  ;;  %v2906_v45 = vmul.f32 %v12412_v11, %v11299_v18  ;;  %v4210_v8 = vmax.f32 %v3958_v57, 0.0 }
 0x464   : > { %v4216_v32 = vmax.f32 %v3964_v21, 0.0  ;;  %v4220_v52 = vmax.f32 %v3968_v25, 0.0  ;;  %v4215_v13 = vmax.f32 %v3963_v48, 0.0  ;;  %v4219_v20 = vmax.f32 %v3967_v15, 0.0  ;;  %v12477_v25 = vld [vmem:[#allocation71_spill] sm:$0xff] }
 0x465   : > { %v3698_v4 = vadd.f32 %v3446_v26, %v2906_v45  ;;  %v3697_v27 = vadd.f32 %v3445_v22, %v2905_v41  ;;  %v11313_v14 = vpack.c.bf16 %v4214_v3, %v4210_v8  ;;  %v4209_v28 = vmax.f32 %v3957_v37, 0.0  ;;  %v12479_v45 = vld [vmem:[#allocation79_spill] sm:$0xff]  ;;  %v4419_v8 = vld [vmem:[%s12215_s10] sm:$0x3] }
 0x466   : > { %v4348_v1 = vpack.c.bf16 %v4220_v52, %v4216_v32  ;;  %v4347_v53 = vpack.c.bf16 %v4219_v20, %v4215_v13  ;;  %v4213_v9 = vmax.f32 %v3961_v35, 0.0  ;;  %v3966_v33 = vadd.f32 %v8782_v47, %v3692_v30  ;;  %v12480_v32 = vld [vmem:[#allocation9_spill] sm:$0xff] }
 0x467   : > { %5345 = vmatmul.mubr.bf16.gmra.mrb[148].mxu0 %v12473_v62  ;;  %v3972_v56 = vadd.f32 %v9042_v39, %v3698_v4  ;;  %v3971_v11 = vadd.f32 %v9018_v36, %v3697_v27  ;;  %v3970_v46 = vadd.f32 %v8782_v47, %v3696_v43  ;;  %v3965_v24 = vadd.f32 %v8753_v34, %v3691_v44  ;;  %v12475_v44 = vld [vmem:[#allocation61_spill] sm:$0xff]  ;;  %v12476_v43 = vld [vmem:[#allocation68_spill] sm:$0xff] }
 0x468   : > { %5354 = vmatprep.mubr.bf16.mxu0 %v4318_v29  ;;  %5083 = vmatprep.mubr.bf16.mxu1 %v4348_v1  ;;  %v4157_v54 = vmax.f32 %v3905_v6, 0.0  ;;  %v11321_v2 = vpack.c.bf16 %v4213_v9, %v4209_v28  ;;  %v4218_v19 = vmax.f32 %v3966_v33, 0.0  ;;  %v3969_v51 = vadd.f32 %v8753_v34, %v3695_v16 }
 0x469   : > { %5084 = vmatmul.mubr.bf16.gmra.mrb[120].mxu1 %v4347_v53  ;;  %v4224_v30 = vmax.f32 %v3972_v56, 0.0  ;;  %v4223_v7 = vmax.f32 %v3971_v11, 0.0  ;;  %v4222_v22 = vmax.f32 %v3970_v46, 0.0  ;;  %v4217_v57 = vmax.f32 %v3965_v24, 0.0 }
 0x46a   : > { %v4166_v39 = vmax.f32 %v11128_v0, 0.0  ;;  %v4221_v36 = vmax.f32 %v3969_v51, 0.0  ;;  %v4153_v55 = vmax.f32 %v12474_v60, 0.0  ;;  %v3635_v26 = vadd.f32 %v12476_v43, %v12475_v44 }
 0x46b   : > { %v4352_v12 = vpack.c.bf16 %v4224_v30, %v4224_v30  ;;  %v11328_v6 = vpack.c.bf16 %v4222_v22, %v4218_v19  ;;  %v4162_v21 = vmax.f32 %v11124_v23, 0.0  ;;  %v4351_v3 = vpack.c.bf16 %v4223_v7, %v4223_v7  ;;  %v12478_v23 = vld [vmem:[#allocation78_spill] sm:$0xff] }
 0x46c   : > { %v11331_v48 = vpack.c.bf16 %v4221_v36, %v4217_v57  ;;  %v4317_v16 = vpack.c.bf16 %v4157_v54, %v4153_v55  ;;  %v3913_v15 = vadd.f32 %v8753_v34, %v12477_v25  ;;  %v3909_v37 = vadd.f32 %v8753_v34, %v3635_v26 }
 0x46d   : > { %5093 = vmatprep.mubr.bf16.mxu1 %v4352_v12  ;;  %v4322_v0 = vpack.c.bf16 %v4166_v39, %v4162_v21  ;;  %v11346_v52 = vrot.slane %v4419_v8, %v12480_v32 }
 0x46e   : > { %v4165_v35 = vmax.f32 %v3913_v15, 0.0  ;;  %v4161_v29 = vmax.f32 %v3909_v37, 0.0 }
 0x46f   : > { %5355 = vmatmul.mubr.bf16.gmra.mrb[152].mxu0 %v4317_v16  ;;  %v3447_v16 = vmul.f32 %v9087_v31, %v11284_v10 }
 0x470   : > { %5364 = vmatprep.mubr.bf16.mxu0 %v4322_v0  ;;  %v4321_v41 = vpack.c.bf16 %v4165_v35, %v4161_v29 }
 0x471   : > { %5094 = vmatmul.mubr.bf16.gmra.mrb[124].mxu1 %v4351_v3 }
 0x477   : > { %5365 = vmatmul.mubr.bf16.gmra.mrb[156].mxu0 %v4321_v41 }
 0x478   : > { %5374 = vmatprep.mubr.bf16.mxu0 %v11142_v42  ;;  %v12481_v42 = vld [vmem:[#allocation8_spill] sm:$0xff] }
 0x479   : > { %v11350_v13 = vrot.slane %v4419_v8, %v12481_v42 }
 0x47f   : > { %5375 = vmatmul.mubr.bf16.gmra.mrb[160].mxu0 %v11144_v50 }
 0x480   : > { %5384 = vmatprep.mubr.bf16.mxu0 %v12478_v23 }
 0x487   : > { %5385 = vmatmul.mubr.bf16.gmra.mrb[164].mxu0 %v12479_v45 }
 0x488   : > { %5394 = vmatprep.mubr.bf16.mxu0 %v11199_v49 }
 0x48f   : > { %5395 = vmatmul.mubr.bf16.gmra.mrb[168].mxu0 %v11201_v17 }
 0x490   : > { %5404 = vmatprep.mubr.bf16.mxu0 %v11213_v58  ;;  %v5136_v50 = vpop.f32.mrb[64].mxu0 }
 0x491   : > { %v7231_v20 = vadd.f32 %v5136_v50, %v11346_v52  ;;  %v5138_v4 = vpop.f32.mrb[65].mxu0 }
 0x492   : > { %v7232_v49 = vadd.f32 %v5138_v4, %v11350_v13  ;;  %v5140_v27 = vpop.f32.mrb[66].mxu0 }
 0x493   : > { %v7233_v28 = vadd.f32 %v5140_v27, %v11346_v52  ;;  %v5142_v1 = vpop.f32.mrb[67].mxu0  ;;  %v5453_v53 = vmax.f32 %v7231_v20, 0.0 }
 0x494   : > { %v7234_v17 = vadd.f32 %v5142_v1, %v11350_v13  ;;  %v5454_v58 = vmax.f32 %v7232_v49, 0.0 }
 0x495   : > { %v5455_v9 = vmax.f32 %v7233_v28, 0.0 }
 0x496   : > { %v5456_v33 = vmax.f32 %v7234_v17, 0.0 }
 0x497   : > { %5405 = vmatmul.mubr.bf16.gmra.mrb[172].mxu0 %v11215_v63  ;;  %v5579_v62 = vpack.c.bf16 %v5455_v9, %v5453_v53  ;;  %v2908_v63 = vmul.f32 %v9112_v59, %v11299_v18 }
 0x498   : > { %5414 = vmatprep.mubr.bf16.mxu0 %v11271_v38  ;;  %v5580_v56 = vpack.c.bf16 %v5456_v33, %v5454_v58  ;;  %v3448_v38 = vmul.f32 %v12366_v61, %v11284_v10 }
 0x499   : > { %v5146_v11 = vpop.f32.mrb[68].mxu0 }
 0x49a   : > { %v7235_v46 = vadd.f32 %v5146_v11, %v11346_v52  ;;  %v5148_v24 = vpop.f32.mrb[69].mxu0  ;;  %5810 = vmatprep.mubr.bf16.mxu1 %v5580_v56  ;;  %v3700_v44 = vadd.f32 %v3448_v38, %v2908_v63 }
 0x49b   : > { %v7236_v54 = vadd.f32 %v5148_v24, %v11350_v13  ;;  %v5150_v19 = vpop.f32.mrb[70].mxu0  ;;  %5811 = vmatmul.mubr.bf16.vlgmr.msra.gmra.mrb[128].mxu1 %v5579_v62 }
 0x49c   : > { %v7237_v51 = vadd.f32 %v5150_v19, %v11346_v52  ;;  %v5152_v30 = vpop.f32.mrb[71].mxu0  ;;  %v5457_v22 = vmax.f32 %v7235_v46, 0.0  ;;  %v3974_v37 = vadd.f32 %v8782_v47, %v3700_v44 }
 0x49d   : > { %v7238_v7 = vadd.f32 %v5152_v30, %v11350_v13  ;;  %v5458_v39 = vmax.f32 %v7236_v54, 0.0 }
 0x49e   : > { %v5459_v57 = vmax.f32 %v7237_v51, 0.0  ;;  %v4226_v8 = vmax.f32 %v3974_v37, 0.0 }
 0x49f   : > { %5415 = vmatmul.mubr.bf16.gmra.mrb[176].mxu0 %v11277_v40  ;;  %v5460_v36 = vmax.f32 %v7238_v7, 0.0  ;;  %v2907_v40 = vmul.f32 %v9095_v5, %v11299_v18 }
 0x4a0   : > { %5424 = vmatprep.mubr.bf16.mxu0 %v11313_v14  ;;  %v5581_v60 = vpack.c.bf16 %v5459_v57, %v5457_v22  ;;  %v4354_v1 = vpack.c.bf16 %v4226_v8, %v4226_v8 }
 0x4a1   : > { %v5582_v55 = vpack.c.bf16 %v5460_v36, %v5458_v39  ;;  %v5156_v12 = vpop.f32.mrb[72].mxu0  ;;  %v3699_v18 = vadd.f32 %v3447_v16, %v2907_v40 }
 0x4a2   : > { %v7239_v43 = vadd.f32 %v5156_v12, %v11346_v52  ;;  %v5158_v59 = vpop.f32.mrb[73].mxu0 }
 0x4a3   : > { %v7240_v26 = vadd.f32 %v5158_v59, %v11350_v13  ;;  %v11370_v61 = vpop.f32.mrb[64].mxu1  ;;  %v5160_v21 = vpop.f32.mrb[74].mxu0  ;;  %5818 = vmatprep.mubr.bf16.mxu1 %v5582_v55 }
 0x4a4   : > { %v7241_v14 = vadd.f32 %v5160_v21, %v11346_v52  ;;  %v11377_v3 = vpop.f32.mrb[65].mxu1  ;;  %v5162_v25 = vpop.f32.mrb[75].mxu0  ;;  %5819 = vmatmul.mubr.bf16.gmra.mrb[132].mxu1 %v5581_v60  ;;  %v5461_v35 = vmax.f32 %v7239_v43, 0.0 }
 0x4a5   : > { %v7242_v15 = vadd.f32 %v5162_v25, %v11350_v13  ;;  %v11380_v0 = vpop.f32.mrb[66].mxu1  ;;  %v5462_v5 = vmax.f32 %v7240_v26, 0.0 }
 0x4a6   : > { %v5463_v29 = vmax.f32 %v7241_v14, 0.0  ;;  %v11383_v41 = vpop.f32.mrb[67].mxu1 }
 0x4a7   : > { %5425 = vmatmul.mubr.bf16.gmra.mrb[180].mxu0 %v11321_v2  ;;  %v5464_v31 = vmax.f32 %v7242_v15, 0.0 }
 0x4a8   : > { %5434 = vmatprep.mubr.bf16.mxu0 %v11328_v6  ;;  %v5583_v10 = vpack.c.bf16 %v5463_v29, %v5461_v35  ;;  %v3973_v6 = vadd.f32 %v8753_v34, %v3699_v18 }
 0x4a9   : > { %v5584_v23 = vpack.c.bf16 %v5464_v31, %v5462_v5  ;;  %v5166_v45 = vpop.f32.mrb[76].mxu0 }
 0x4aa   : > { %v7243_v32 = vadd.f32 %v5166_v45, %v11346_v52  ;;  %v5168_v42 = vpop.f32.mrb[77].mxu0  ;;  %v4225_v56 = vmax.f32 %v3973_v6, 0.0 }
 0x4ab   : > { %v7244_v47 = vadd.f32 %v5168_v42, %v11350_v13  ;;  %v5170_v20 = vpop.f32.mrb[78].mxu0  ;;  %5826 = vmatprep.mubr.bf16.mxu1 %v5584_v23 }
 0x4ac   : > { %v11389_v50 = vpop.f32.mrb[68].mxu1  ;;  %v7245_v2 = vadd.f32 %v5170_v20, %v11346_v52  ;;  %v5172_v49 = vpop.f32.mrb[79].mxu0  ;;  %5827 = vmatmul.mubr.bf16.gmra.mrb[136].mxu1 %v5583_v10  ;;  %v5465_v17 = vmax.f32 %v7243_v32, 0.0  ;;  %v4353_v63 = vpack.c.bf16 %v4225_v56, %v4225_v56 }
 0x4ad   : > { %v11392_v4 = vpop.f32.mrb[69].mxu1  ;;  %v7246_v27 = vadd.f32 %v5172_v49, %v11350_v13  ;;  %v5466_v58 = vmax.f32 %v7244_v47, 0.0 }
 0x4ae   : > { %v11396_v28 = vpop.f32.mrb[70].mxu1  ;;  %v5467_v53 = vmax.f32 %v7245_v2, 0.0 }
 0x4af   : > { %v11398_v9 = vpop.f32.mrb[71].mxu1  ;;  %5435 = vmatmul.mubr.bf16.gmra.mrb[184].mxu0 %v11331_v48  ;;  %v5468_v33 = vmax.f32 %v7246_v27, 0.0 }
 0x4b0   : > { %5444 = vmatprep.mubr.bf16.mxu0 %v4354_v1  ;;  %v5585_v62 = vpack.c.bf16 %v5467_v53, %v5465_v17 }
 0x4b1   : > { %v5586_v11 = vpack.c.bf16 %v5468_v33, %v5466_v58 }
 0x4b2   : > { %v5176_v46 = vpop.f32.mrb[80].mxu0 }
 0x4b3   : > { %v7247_v34 = vadd.f32 %v5176_v46, %v11346_v52  ;;  %v5178_v24 = vpop.f32.mrb[81].mxu0  ;;  %5834 = vmatprep.mubr.bf16.mxu1 %v5586_v11 }
 0x4b4   : > { %v7248_v54 = vadd.f32 %v5178_v24, %v11350_v13  ;;  %v5180_v19 = vpop.f32.mrb[82].mxu0  ;;  %5835 = vmatmul.mubr.bf16.gmra.mrb[140].mxu1 %v5585_v62 }
 0x4b5   : > { %v7249_v51 = vadd.f32 %v5180_v19, %v11346_v52  ;;  %v5182_v30 = vpop.f32.mrb[83].mxu0  ;;  %v5469_v38 = vmax.f32 %v7247_v34, 0.0 }
 0x4b6   : > { %v7250_v48 = vadd.f32 %v5182_v30, %v11350_v13  ;;  %v5470_v22 = vmax.f32 %v7248_v54, 0.0 }
 0x4b7   : > { %v5471_v7 = vmax.f32 %v7249_v51, 0.0  ;;  %5445 = vmatmul.mubr.bf16.gmra.mrb[188].mxu0 %v4353_v63 }
 0x4b8   : > { %v5472_v57 = vmax.f32 %v7250_v48, 0.0 }
 0x4b9   : > { %v5587_v39 = vpack.c.bf16 %v5471_v7, %v5469_v38 }
 0x4ba   : > { %v5588_v36 = vpack.c.bf16 %v5472_v57, %v5470_v22  ;;  %v5186_v60 = vpop.f32.mrb[84].mxu0  ;;  %v11406_v44 = vpop.f32.mrb[72].mxu1 }
 0x4bb   : > { %v7251_v55 = vadd.f32 %v5186_v60, %v11346_v52  ;;  %v5188_v12 = vpop.f32.mrb[85].mxu0  ;;  %v11409_v26 = vpop.f32.mrb[73].mxu1 }
 0x4bc   : > { %v7252_v43 = vadd.f32 %v5188_v12, %v11350_v13  ;;  %v5190_v59 = vpop.f32.mrb[86].mxu0  ;;  %5842 = vmatprep.mubr.bf16.mxu1 %v5588_v36  ;;  %v11412_v16 = vpop.f32.mrb[74].mxu1 }
 0x4bd   : > { %v7253_v21 = vadd.f32 %v5190_v59, %v11346_v52  ;;  %v5192_v40 = vpop.f32.mrb[87].mxu0  ;;  %5843 = vmatmul.mubr.bf16.gmra.mrb[144].mxu1 %v5587_v39  ;;  %v11415_v25 = vpop.f32.mrb[75].mxu1  ;;  %v5473_v15 = vmax.f32 %v7251_v55, 0.0 }
 0x4be   : > { %v7254_v14 = vadd.f32 %v5192_v40, %v11350_v13  ;;  %v5474_v35 = vmax.f32 %v7252_v43, 0.0 }
 0x4bf   : > { %v5475_v37 = vmax.f32 %v7253_v21, 0.0 }
 0x4c0   : > { %v5476_v29 = vmax.f32 %v7254_v14, 0.0 }
 0x4c1   : > { %v5589_v5 = vpack.c.bf16 %v5475_v37, %v5473_v15 }
 0x4c2   : > { %v5590_v31 = vpack.c.bf16 %v5476_v29, %v5474_v35  ;;  %v5196_v10 = vpop.f32.mrb[88].mxu0 }
 0x4c3   : > { %v7255_v18 = vadd.f32 %v5196_v10, %v11346_v52  ;;  %v5198_v23 = vpop.f32.mrb[89].mxu0  ;;  %v11418_v45 = vpop.f32.mrb[76].mxu1 }
 0x4c4   : > { %v7256_v8 = vadd.f32 %v5198_v23, %v11350_v13  ;;  %v5200_v32 = vpop.f32.mrb[90].mxu0  ;;  %5850 = vmatprep.mubr.bf16.mxu1 %v5590_v31  ;;  %v11421_v42 = vpop.f32.mrb[77].mxu1 }
 0x4c5   : > { %v7257_v47 = vadd.f32 %v5200_v32, %v11346_v52  ;;  %v5202_v20 = vpop.f32.mrb[91].mxu0  ;;  %5851 = vmatmul.mubr.bf16.gmra.mrb[148].mxu1 %v5589_v5  ;;  %v11424_v2 = vpop.f32.mrb[78].mxu1  ;;  %v5477_v27 = vmax.f32 %v7255_v18, 0.0 }
 0x4c6   : > { %v7258_v49 = vadd.f32 %v5202_v20, %v11350_v13  ;;  %v11427_v6 = vpop.f32.mrb[79].mxu1  ;;  %v5478_v17 = vmax.f32 %v7256_v8, 0.0 }
 0x4c7   : > { %v5479_v1 = vmax.f32 %v7257_v47, 0.0 }
 0x4c8   : > { %v5480_v53 = vmax.f32 %v7258_v49, 0.0 }
 0x4c9   : > { %v5591_v58 = vpack.c.bf16 %v5479_v1, %v5477_v27 }
 0x4ca   : > { %v5592_v33 = vpack.c.bf16 %v5480_v53, %v5478_v17  ;;  %v5206_v62 = vpop.f32.mrb[92].mxu0 }
 0x4cb   : > { %v7259_v56 = vadd.f32 %v5206_v62, %v11346_v52  ;;  %v5208_v11 = vpop.f32.mrb[93].mxu0 }
 0x4cc   : > { %v7260_v46 = vadd.f32 %v5208_v11, %v11350_v13  ;;  %v5210_v34 = vpop.f32.mrb[94].mxu0  ;;  %5858 = vmatprep.mubr.bf16.mxu1 %v5592_v33 }
 0x4cd   : > { %v7261_v24 = vadd.f32 %v5210_v34, %v11346_v52  ;;  %v5212_v54 = vpop.f32.mrb[95].mxu0  ;;  %5859 = vmatmul.mubr.bf16.gmra.mrb[152].mxu1 %v5591_v58  ;;  %v5481_v51 = vmax.f32 %v7259_v56, 0.0 }
 0x4ce   : > { %v7262_v19 = vadd.f32 %v5212_v54, %v11350_v13  ;;  %v5482_v63 = vmax.f32 %v7260_v46, 0.0 }
 0x4cf   : > { %v5483_v30 = vmax.f32 %v7261_v24, 0.0 }
 0x4d0   : > { %v5484_v48 = vmax.f32 %v7262_v19, 0.0 }
 0x4d1   : > { %v5593_v38 = vpack.c.bf16 %v5483_v30, %v5481_v51 }
 0x4d2   : > { %v5594_v7 = vpack.c.bf16 %v5484_v48, %v5482_v63  ;;  %v5216_v22 = vpop.f32.mrb[96].mxu0  ;;  %v11434_v36 = vpop.f32.mrb[80].mxu1 }
 0x4d3   : > { %v7263_v57 = vadd.f32 %v5216_v22, %v11346_v52  ;;  %v5218_v39 = vpop.f32.mrb[97].mxu0  ;;  %v11437_v12 = vpop.f32.mrb[81].mxu1 }
 0x4d4   : > { %v7264_v60 = vadd.f32 %v5218_v39, %v11350_v13  ;;  %v5220_v55 = vpop.f32.mrb[98].mxu0  ;;  %5866 = vmatprep.mubr.bf16.mxu1 %v5594_v7  ;;  %v11440_v21 = vpop.f32.mrb[82].mxu1 }
 0x4d5   : > { %v7265_v43 = vadd.f32 %v5220_v55, %v11346_v52  ;;  %v5222_v59 = vpop.f32.mrb[99].mxu0  ;;  %5867 = vmatmul.mubr.bf16.gmra.mrb[156].mxu1 %v5593_v38  ;;  %v11443_v14 = vpop.f32.mrb[83].mxu1  ;;  %v5485_v15 = vmax.f32 %v7263_v57, 0.0 }
 0x4d6   : > { %v7266_v40 = vadd.f32 %v5222_v59, %v11350_v13  ;;  %v5486_v35 = vmax.f32 %v7264_v60, 0.0 }
 0x4d7   : > { %v5487_v37 = vmax.f32 %v7265_v43, 0.0 }
 0x4d8   : > { %v5488_v29 = vmax.f32 %v7266_v40, 0.0 }
 0x4d9   : > { %v5595_v5 = vpack.c.bf16 %v5487_v37, %v5485_v15 }
 0x4da   : > { %v5596_v31 = vpack.c.bf16 %v5488_v29, %v5486_v35  ;;  %v5226_v10 = vpop.f32.mrb[100].mxu0  ;;  %v11447_v32 = vpop.f32.mrb[84].mxu1 }
 0x4db   : > { %v7267_v18 = vadd.f32 %v5226_v10, %v11346_v52  ;;  %v5228_v23 = vpop.f32.mrb[101].mxu0  ;;  %v11450_v49 = vpop.f32.mrb[85].mxu1 }
 0x4dc   : > { %v7268_v8 = vadd.f32 %v5228_v23, %v11350_v13  ;;  %v5230_v47 = vpop.f32.mrb[102].mxu0  ;;  %5874 = vmatprep.mubr.bf16.mxu1 %v5596_v31  ;;  %v11453_v17 = vpop.f32.mrb[86].mxu1 }
 0x4dd   : > { %v7269_v20 = vadd.f32 %v5230_v47, %v11346_v52  ;;  %v5232_v27 = vpop.f32.mrb[103].mxu0  ;;  %5875 = vmatmul.mubr.bf16.gmra.mrb[160].mxu1 %v5595_v5  ;;  %v5489_v53 = vmax.f32 %v7267_v18, 0.0  ;;  %v11455_v33 = vpop.f32.mrb[87].mxu1 }
 0x4de   : > { %v7270_v1 = vadd.f32 %v5232_v27, %v11350_v13  ;;  %v5490_v62 = vmax.f32 %v7268_v8, 0.0 }
 0x4df   : > { %v5491_v58 = vmax.f32 %v7269_v20, 0.0 }
 0x4e0   : > { %v5492_v56 = vmax.f32 %v7270_v1, 0.0 }
 0x4e1   : > { %v5597_v11 = vpack.c.bf16 %v5491_v58, %v5489_v53 }
 0x4e2   : > { %v5598_v46 = vpack.c.bf16 %v5492_v56, %v5490_v62  ;;  %v5236_v34 = vpop.f32.mrb[104].mxu0 }
 0x4e3   : > { %v7271_v24 = vadd.f32 %v5236_v34, %v11346_v52  ;;  %v5238_v54 = vpop.f32.mrb[105].mxu0 }
 0x4e4   : > { %v7272_v19 = vadd.f32 %v5238_v54, %v11350_v13  ;;  %v5240_v51 = vpop.f32.mrb[106].mxu0  ;;  %5882 = vmatprep.mubr.bf16.mxu1 %v5598_v46 }
 0x4e5   : > { %v7273_v30 = vadd.f32 %v5240_v51, %v11346_v52  ;;  %v5242_v63 = vpop.f32.mrb[107].mxu0  ;;  %5883 = vmatmul.mubr.bf16.gmra.mrb[164].mxu1 %v5597_v11  ;;  %v5493_v38 = vmax.f32 %v7271_v24, 0.0 }
 0x4e6   : > { %v7274_v48 = vadd.f32 %v5242_v63, %v11350_v13  ;;  %v5494_v22 = vmax.f32 %v7272_v19, 0.0 }
 0x4e7   : > { %v5495_v7 = vmax.f32 %v7273_v30, 0.0 }
 0x4e8   : > { %v5496_v57 = vmax.f32 %v7274_v48, 0.0 }
 0x4e9   : > { %v5599_v39 = vpack.c.bf16 %v5495_v7, %v5493_v38 }
 0x4ea   : > { %v5600_v60 = vpack.c.bf16 %v5496_v57, %v5494_v22  ;;  %v5246_v55 = vpop.f32.mrb[108].mxu0 }
 0x4eb   : > { %v7275_v43 = vadd.f32 %v5246_v55, %v11346_v52  ;;  %v5248_v59 = vpop.f32.mrb[109].mxu0 }
 0x4ec   : > { %v7276_v40 = vadd.f32 %v5248_v59, %v11350_v13  ;;  %v5250_v15 = vpop.f32.mrb[110].mxu0  ;;  %5890 = vmatprep.mubr.bf16.mxu1 %v5600_v60 }
 0x4ed   : > { %v7277_v37 = vadd.f32 %v5250_v15, %v11346_v52  ;;  %v5252_v35 = vpop.f32.mrb[111].mxu0  ;;  %5891 = vmatmul.mubr.bf16.gmra.mrb[168].mxu1 %v5599_v39  ;;  %v5497_v5 = vmax.f32 %v7275_v43, 0.0 }
 0x4ee   : > { %v7278_v29 = vadd.f32 %v5252_v35, %v11350_v13  ;;  %v5498_v18 = vmax.f32 %v7276_v40, 0.0 }
 0x4ef   : > { %v5499_v10 = vmax.f32 %v7277_v37, 0.0 }
 0x4f0   : > { %v11465_v31 = vpop.f32.mrb[88].mxu1  ;;  %v5500_v8 = vmax.f32 %v7278_v29, 0.0 }
 0x4f1   : > { %v11467_v23 = vpop.f32.mrb[89].mxu1  ;;  %v5601_v47 = vpack.c.bf16 %v5499_v10, %v5497_v5 }
 0x4f2   : > { %v11469_v20 = vpop.f32.mrb[90].mxu1  ;;  %v5602_v27 = vpack.c.bf16 %v5500_v8, %v5498_v18  ;;  %v5256_v53 = vpop.f32.mrb[112].mxu0 }
 0x4f3   : > { %v11471_v1 = vpop.f32.mrb[91].mxu1  ;;  %v7279_v58 = vadd.f32 %v5256_v53, %v11346_v52  ;;  %v5258_v62 = vpop.f32.mrb[113].mxu0 }
 0x4f4   : > { %v7280_v56 = vadd.f32 %v5258_v62, %v11350_v13  ;;  %v5260_v11 = vpop.f32.mrb[114].mxu0  ;;  %5898 = vmatprep.mubr.bf16.mxu1 %v5602_v27 }
 0x4f5   : > { %v7281_v46 = vadd.f32 %v5260_v11, %v11346_v52  ;;  %v5262_v34 = vpop.f32.mrb[115].mxu0  ;;  %5899 = vmatmul.mubr.bf16.gmra.mrb[172].mxu1 %v5601_v47  ;;  %v5501_v54 = vmax.f32 %v7279_v58, 0.0 }
 0x4f6   : > { %v7282_v24 = vadd.f32 %v5262_v34, %v11350_v13  ;;  %v5502_v30 = vmax.f32 %v7280_v56, 0.0 }
 0x4f7   : > { %v5503_v51 = vmax.f32 %v7281_v46, 0.0 }
 0x4f8   : > { %v11477_v19 = vpop.f32.mrb[92].mxu1  ;;  %v5504_v48 = vmax.f32 %v7282_v24, 0.0 }
 0x4f9   : > { %v11479_v63 = vpop.f32.mrb[93].mxu1  ;;  %v5603_v38 = vpack.c.bf16 %v5503_v51, %v5501_v54 }
 0x4fa   : > { %v11481_v7 = vpop.f32.mrb[94].mxu1  ;;  %v5604_v22 = vpack.c.bf16 %v5504_v48, %v5502_v30  ;;  %v5266_v39 = vpop.f32.mrb[116].mxu0 }
 0x4fb   : > { %v11483_v57 = vpop.f32.mrb[95].mxu1  ;;  %v7283_v60 = vadd.f32 %v5266_v39, %v11346_v52  ;;  %v5268_v55 = vpop.f32.mrb[117].mxu0 }
 0x4fc   : > { %v7284_v43 = vadd.f32 %v5268_v55, %v11350_v13  ;;  %v5270_v59 = vpop.f32.mrb[118].mxu0  ;;  %5906 = vmatprep.mubr.bf16.mxu1 %v5604_v22 }
 0x4fd   : > { %v7285_v40 = vadd.f32 %v5270_v59, %v11346_v52  ;;  %v5272_v15 = vpop.f32.mrb[119].mxu0  ;;  %5907 = vmatmul.mubr.bf16.gmra.mrb[176].mxu1 %v5603_v38  ;;  %v5505_v35 = vmax.f32 %v7283_v60, 0.0 }
 0x4fe   : > { %v7286_v37 = vadd.f32 %v5272_v15, %v11350_v13  ;;  %v5506_v5 = vmax.f32 %v7284_v43, 0.0 }
 0x4ff   : > { %v5507_v29 = vmax.f32 %v7285_v40, 0.0 }
 0x500   : > { %v5508_v10 = vmax.f32 %v7286_v37, 0.0 }
 0x501   : > { %v5605_v18 = vpack.c.bf16 %v5507_v29, %v5505_v35 }
 0x502   : > { %v5606_v8 = vpack.c.bf16 %v5508_v10, %v5506_v5  ;;  %v5276_v47 = vpop.f32.mrb[120].mxu0 }
 0x503   : > { %v7287_v27 = vadd.f32 %v5276_v47, %v11346_v52  ;;  %v5278_v53 = vpop.f32.mrb[121].mxu0 }
 0x504   : > { %v7288_v58 = vadd.f32 %v5278_v53, %v11350_v13  ;;  %v5280_v62 = vpop.f32.mrb[122].mxu0  ;;  %5914 = vmatprep.mubr.bf16.mxu1 %v5606_v8 }
 0x505   : > { %v7289_v56 = vadd.f32 %v5280_v62, %v11346_v52  ;;  %v5282_v11 = vpop.f32.mrb[123].mxu0  ;;  %5915 = vmatmul.mubr.bf16.gmra.mrb[180].mxu1 %v5605_v18  ;;  %v5509_v24 = vmax.f32 %v7287_v27, 0.0 }
 0x506   : > { %v11492_v46 = vpop.f32.mrb[96].mxu1  ;;  %v7290_v34 = vadd.f32 %v5282_v11, %v11350_v13  ;;  %v5510_v30 = vmax.f32 %v7288_v58, 0.0  ;;  %v4946_v58 = vadd.f32 %v11370_v61, %v11346_v52  ;;  %v4948_v11 = vadd.f32 %v11377_v3, %v11350_v13 }
 0x507   : > { %v5511_v54 = vmax.f32 %v7289_v56, 0.0  ;;  %v11495_v51 = vpop.f32.mrb[97].mxu1 }
 0x508   : > { %v5512_v48 = vmax.f32 %v7290_v34, 0.0  ;;  %v11497_v38 = vpop.f32.mrb[98].mxu1 }
 0x509   : > { %v5607_v22 = vpack.c.bf16 %v5511_v54, %v5509_v24  ;;  %v11499_v39 = vpop.f32.mrb[99].mxu1  ;;  %v4950_v54 = vadd.f32 %v11380_v0, %v11346_v52 }
 0x50a   : > { %v5608_v60 = vpack.c.bf16 %v5512_v48, %v5510_v30  ;;  %v5286_v55 = vpop.f32.mrb[124].mxu0 }
 0x50b   : > { %v7291_v43 = vadd.f32 %v5286_v55, %v11346_v52  ;;  %v5288_v59 = vpop.f32.mrb[125].mxu0 }
 0x50c   : > { %v7292_v40 = vadd.f32 %v5288_v59, %v11350_v13  ;;  %v5290_v15 = vpop.f32.mrb[126].mxu0  ;;  %5922 = vmatprep.mubr.bf16.mxu1 %v5608_v60 }
 0x50d   : > { %v7293_v37 = vadd.f32 %v5290_v15, %v11346_v52  ;;  %v5292_v35 = vpop.f32.mrb[127].mxu0  ;;  %5923 = vmatmul.mubr.bf16.gmra.mrb[184].mxu1 %v5607_v22  ;;  %v5513_v10 = vmax.f32 %v7291_v43, 0.0  ;;  %v4952_v22 = vadd.f32 %v11383_v41, %v11350_v13  ;;  %v4958_v41 = vadd.f32 %v11392_v4, %v11350_v13 }
 0x50e   : > { %v11504_v29 = vpop.f32.mrb[100].mxu1  ;;  %v7294_v5 = vadd.f32 %v5292_v35, %v11350_v13  ;;  %v5514_v47 = vmax.f32 %v7292_v40, 0.0  ;;  %v4956_v35 = vadd.f32 %v11389_v50, %v11346_v52  ;;  %v4962_v50 = vadd.f32 %v11398_v9, %v11350_v13 }
 0x50f   : > { %v5515_v18 = vmax.f32 %v7293_v37, 0.0  ;;  %v11507_v8 = vpop.f32.mrb[101].mxu1  ;;  %v4968_v9 = vadd.f32 %v11409_v26, %v11350_v13 }
 0x510   : > { %v5516_v27 = vmax.f32 %v7294_v5, 0.0  ;;  %v11509_v53 = vpop.f32.mrb[102].mxu1 }
 0x511   : > { %v5609_v62 = vpack.c.bf16 %v5515_v18, %v5513_v10  ;;  %v11513_v56 = vpop.f32.mrb[103].mxu1 }
 0x512   : > { %v5610_v34 = vpack.c.bf16 %v5516_v27, %v5514_v47  ;;  %v5296_v24 = vpop.f32.mrb[128].mxu0  ;;  %v4960_v27 = vadd.f32 %v11396_v28, %v11346_v52 }
 0x513   : > { %v5297_v30 = vadd.f32 %v5296_v24, %v4946_v58  ;;  %v5298_v48 = vpop.f32.mrb[129].mxu0 }
 0x514   : > { %v5299_v60 = vadd.f32 %v5298_v48, %v4948_v11  ;;  %v5300_v55 = vpop.f32.mrb[130].mxu0  ;;  %5930 = vmatprep.mubr.bf16.mxu1 %v5610_v34 }
 0x515   : > { %v5301_v61 = vadd.f32 %v5300_v55, %v4950_v54  ;;  %v5302_v43 = vpop.f32.mrb[131].mxu0  ;;  %5931 = vmatmul.mubr.bf16.gmra.mrb[188].mxu1 %v5609_v62  ;;  %v5517_v40 = vmax.f32 %v5297_v30, 0.0 }
 0x516   : > { %v5303_v59 = vadd.f32 %v5302_v43, %v4952_v22  ;;  %v5518_v3 = vmax.f32 %v5299_v60, 0.0 }
 0x517   : > { %v5519_v15 = vmax.f32 %v5301_v61, 0.0  ;;  %v4966_v61 = vadd.f32 %v11406_v44, %v11346_v52  ;;  %v4972_v44 = vadd.f32 %v11415_v25, %v11350_v13  ;;  %v4978_v25 = vadd.f32 %v11421_v42, %v11350_v13 }
 0x518   : > { %v5520_v37 = vmax.f32 %v5303_v59, 0.0 }
 0x519   : > { %v5611_v0 = vpack.c.bf16 %v5519_v15, %v5517_v40  ;;  %v11523_v5 = vpop.f32.mrb[104].mxu1 }
 0x51a   : > { %v5612_v10 = vpack.c.bf16 %v5520_v37, %v5518_v3  ;;  %v11527_v18 = vpop.f32.mrb[105].mxu1  ;;  %v5306_v47 = vpop.f32.mrb[132].mxu0  ;;  %v4970_v37 = vadd.f32 %v11412_v16, %v11346_v52 }
 0x51b   : > { %v11531_v58 = vpop.f32.mrb[106].mxu1  ;;  %v5307_v62 = vadd.f32 %v5306_v47, %v4956_v35  ;;  %v5308_v11 = vpop.f32.mrb[133].mxu0 }
 0x51c   : > { %v11535_v34 = vpop.f32.mrb[107].mxu1  ;;  %v5309_v24 = vadd.f32 %v5308_v11, %v4958_v41  ;;  %v5310_v54 = vpop.f32.mrb[134].mxu0  ;;  %5938 = vmatprep.mubr.bf16.mxu1 %v5612_v10 }
 0x51d   : > { %v5311_v4 = vadd.f32 %v5310_v54, %v4960_v27  ;;  %v5312_v30 = vpop.f32.mrb[135].mxu0  ;;  %5939 = vmatmul.mubr.bf16.gmra.mrb[192].mxu1 %v5611_v0  ;;  %v5521_v22 = vmax.f32 %v5307_v62, 0.0 }
 0x51e   : > { %v5313_v48 = vadd.f32 %v5312_v30, %v4962_v50  ;;  %v5522_v55 = vmax.f32 %v5309_v24, 0.0 }
 0x51f   : > { %v5523_v60 = vmax.f32 %v5311_v4, 0.0  ;;  %v4976_v4 = vadd.f32 %v11418_v45, %v11346_v52 }
 0x520   : > { %v5524_v28 = vmax.f32 %v5313_v48, 0.0 }
 0x521   : > { %v5613_v43 = vpack.c.bf16 %v5523_v60, %v5521_v22  ;;  %v11539_v59 = vpop.f32.mrb[108].mxu1 }
 0x522   : > { %v5614_v40 = vpack.c.bf16 %v5524_v28, %v5522_v55  ;;  %v11543_v15 = vpop.f32.mrb[109].mxu1  ;;  %v5316_v3 = vpop.f32.mrb[136].mxu0  ;;  %v4980_v55 = vadd.f32 %v11424_v2, %v11346_v52 }
 0x523   : > { %v11547_v35 = vpop.f32.mrb[110].mxu1  ;;  %v5317_v0 = vadd.f32 %v5316_v3, %v4966_v61  ;;  %v5318_v41 = vpop.f32.mrb[137].mxu0 }
 0x524   : > { %v11551_v10 = vpop.f32.mrb[111].mxu1  ;;  %v5319_v47 = vadd.f32 %v5318_v41, %v4968_v9  ;;  %v5320_v27 = vpop.f32.mrb[138].mxu0  ;;  %5946 = vmatprep.mubr.bf16.mxu1 %v5614_v40  ;;  %v4982_v9 = vadd.f32 %v11427_v6, %v11350_v13  ;;  %v4988_v6 = vadd.f32 %v11437_v12, %v11350_v13 }
 0x525   : > { %v5321_v26 = vadd.f32 %v5320_v27, %v4970_v37  ;;  %v5322_v62 = vpop.f32.mrb[139].mxu0  ;;  %5947 = vmatmul.mubr.bf16.gmra.mrb[196].mxu1 %v5613_v43  ;;  %v5525_v50 = vmax.f32 %v5317_v0, 0.0 }
 0x526   : > { %v5323_v11 = vadd.f32 %v5322_v62, %v4972_v44  ;;  %v5526_v54 = vmax.f32 %v5319_v47, 0.0 }
 0x527   : > { %v5527_v24 = vmax.f32 %v5321_v26, 0.0  ;;  %v4986_v26 = vadd.f32 %v11434_v36, %v11346_v52 }
 0x528   : > { %v5528_v16 = vmax.f32 %v5323_v11, 0.0 }
 0x529   : > { %v5615_v30 = vpack.c.bf16 %v5527_v24, %v5525_v50 }
 0x52a   : > { %v5616_v48 = vpack.c.bf16 %v5528_v16, %v5526_v54  ;;  %v11557_v22 = vpop.f32.mrb[112].mxu1  ;;  %v5326_v60 = vpop.f32.mrb[140].mxu0  ;;  %v4990_v54 = vadd.f32 %v11440_v21, %v11346_v52 }
 0x52b   : > { %v5327_v28 = vadd.f32 %v5326_v60, %v4976_v4  ;;  %v11561_v61 = vpop.f32.mrb[113].mxu1  ;;  %v5328_v43 = vpop.f32.mrb[141].mxu0 }
 0x52c   : > { %v5329_v40 = vadd.f32 %v5328_v43, %v4978_v25  ;;  %v11565_v45 = vpop.f32.mrb[114].mxu1  ;;  %v5330_v3 = vpop.f32.mrb[142].mxu0  ;;  %5954 = vmatprep.mubr.bf16.mxu1 %v5616_v48  ;;  %v4992_v25 = vadd.f32 %v11443_v14, %v11350_v13  ;;  %v4998_v14 = vadd.f32 %v11450_v49, %v11350_v13 }
 0x52d   : > { %v5331_v42 = vadd.f32 %v5330_v3, %v4980_v55  ;;  %v11567_v37 = vpop.f32.mrb[115].mxu1  ;;  %v5332_v0 = vpop.f32.mrb[143].mxu0  ;;  %5955 = vmatmul.mubr.bf16.gmra.mrb[200].mxu1 %v5615_v30  ;;  %v5529_v44 = vmax.f32 %v5327_v28, 0.0 }
 0x52e   : > { %v5333_v41 = vadd.f32 %v5332_v0, %v4982_v9  ;;  %v5530_v47 = vmax.f32 %v5329_v40, 0.0 }
 0x52f   : > { %v5531_v2 = vmax.f32 %v5331_v42, 0.0  ;;  %v4996_v42 = vadd.f32 %v11447_v32, %v11346_v52 }
 0x530   : > { %v5532_v27 = vmax.f32 %v5333_v41, 0.0 }
 0x531   : > { %v5617_v62 = vpack.c.bf16 %v5531_v2, %v5529_v44  ;;  %v5000_v2 = vadd.f32 %v11453_v17, %v11346_v52 }
 0x532   : > { %v5618_v11 = vpack.c.bf16 %v5532_v27, %v5530_v47  ;;  %v11573_v50 = vpop.f32.mrb[116].mxu1  ;;  %v5336_v24 = vpop.f32.mrb[144].mxu0 }
 0x533   : > { %v5337_v16 = vadd.f32 %v5336_v24, %v4986_v26  ;;  %v11577_v4 = vpop.f32.mrb[117].mxu1  ;;  %v5338_v30 = vpop.f32.mrb[145].mxu0  ;;  %v5002_v26 = vadd.f32 %v11455_v33, %v11350_v13  ;;  %v5006_v33 = vadd.f32 %v11465_v31, %v11346_v52 }
 0x534   : > { %v5339_v48 = vadd.f32 %v5338_v30, %v4988_v6  ;;  %v11581_v36 = vpop.f32.mrb[118].mxu1  ;;  %v5340_v60 = vpop.f32.mrb[146].mxu0  ;;  %5962 = vmatprep.mubr.bf16.mxu1 %v5618_v11 }
 0x535   : > { %v5341_v12 = vadd.f32 %v5340_v60, %v4990_v54  ;;  %v11583_v55 = vpop.f32.mrb[119].mxu1  ;;  %v5342_v28 = vpop.f32.mrb[147].mxu0  ;;  %5963 = vmatmul.mubr.bf16.gmra.mrb[204].mxu1 %v5617_v62  ;;  %v5533_v9 = vmax.f32 %v5337_v16, 0.0 }
 0x536   : > { %v5343_v43 = vadd.f32 %v5342_v28, %v4992_v25  ;;  %v5534_v40 = vmax.f32 %v5339_v48, 0.0  ;;  %v5008_v28 = vadd.f32 %v11467_v23, %v11350_v13 }
 0x537   : > { %v5535_v21 = vmax.f32 %v5341_v12, 0.0 }
 0x538   : > { %v5536_v3 = vmax.f32 %v5343_v43, 0.0 }
 0x539   : > { %v5619_v0 = vpack.c.bf16 %v5535_v21, %v5533_v9  ;;  %v5010_v21 = vadd.f32 %v11469_v20, %v11346_v52 }
 0x53a   : > { %v5620_v41 = vpack.c.bf16 %v5536_v3, %v5534_v40  ;;  %v5346_v44 = vpop.f32.mrb[148].mxu0 }
 0x53b   : > { %v5347_v47 = vadd.f32 %v5346_v44, %v4996_v42  ;;  %v5348_v27 = vpop.f32.mrb[149].mxu0  ;;  %v5012_v42 = vadd.f32 %v11471_v1, %v11350_v13  ;;  %v5016_v1 = vadd.f32 %v11477_v19, %v11346_v52 }
 0x53c   : > { %v5349_v62 = vadd.f32 %v5348_v27, %v4998_v14  ;;  %v5350_v6 = vpop.f32.mrb[150].mxu0  ;;  %5970 = vmatprep.mubr.bf16.mxu1 %v5620_v41  ;;  %v11593_v11 = vpop.f32.mrb[120].mxu1 }
 0x53d   : > { %v5351_v32 = vadd.f32 %v5350_v6, %v5000_v2  ;;  %v5352_v24 = vpop.f32.mrb[151].mxu0  ;;  %5971 = vmatmul.mubr.bf16.gmra.mrb[208].mxu1 %v5619_v0  ;;  %v11595_v54 = vpop.f32.mrb[121].mxu1  ;;  %v5537_v30 = vmax.f32 %v5347_v47, 0.0 }
 0x53e   : > { %v5353_v49 = vadd.f32 %v5352_v24, %v5002_v26  ;;  %v11597_v16 = vpop.f32.mrb[122].mxu1  ;;  %v5538_v48 = vmax.f32 %v5349_v62, 0.0  ;;  %v5018_v24 = vadd.f32 %v11479_v63, %v11350_v13 }
 0x53f   : > { %v5539_v17 = vmax.f32 %v5351_v32, 0.0  ;;  %v11599_v25 = vpop.f32.mrb[123].mxu1 }
 0x540   : > { %v5540_v60 = vmax.f32 %v5353_v49, 0.0 }
 0x541   : > { %v5621_v12 = vpack.c.bf16 %v5539_v17, %v5537_v30  ;;  %v5020_v17 = vadd.f32 %v11481_v7, %v11346_v52 }
 0x542   : > { %v5622_v43 = vpack.c.bf16 %v5540_v60, %v5538_v48  ;;  %v5356_v9 = vpop.f32.mrb[152].mxu0 }
 0x543   : > { %v5357_v40 = vadd.f32 %v5356_v9, %v5006_v33  ;;  %v5358_v3 = vpop.f32.mrb[153].mxu0  ;;  %v5022_v33 = vadd.f32 %v11483_v57, %v11350_v13 }
 0x544   : > { %v5359_v0 = vadd.f32 %v5358_v3, %v5008_v28  ;;  %v5360_v14 = vpop.f32.mrb[154].mxu0  ;;  %5978 = vmatprep.mubr.bf16.mxu1 %v5622_v43  ;;  %v11609_v41 = vpop.f32.mrb[124].mxu1 }
 0x545   : > { %v5361_v31 = vadd.f32 %v5360_v14, %v5010_v21  ;;  %v5362_v44 = vpop.f32.mrb[155].mxu0  ;;  %5979 = vmatmul.mubr.bf16.gmra.mrb[212].mxu1 %v5621_v12  ;;  %v11611_v2 = vpop.f32.mrb[125].mxu1  ;;  %v5541_v27 = vmax.f32 %v5357_v40, 0.0 }
 0x546   : > { %v5363_v23 = vadd.f32 %v5362_v44, %v5012_v42  ;;  %v5099_v47 = vpop.f32.mrb[126].mxu1  ;;  %v5542_v62 = vmax.f32 %v5359_v0, 0.0  ;;  %v5026_v42 = vadd.f32 %v11492_v46, %v11346_v52  ;;  %v5028_v0 = vadd.f32 %v11495_v51, %v11350_v13 }
 0x547   : > { %v5543_v26 = vmax.f32 %v5361_v31, 0.0  ;;  %v5100_v20 = vpop.f32.mrb[127].mxu1  ;;  %v5030_v31 = vadd.f32 %v11497_v38, %v11346_v52  ;;  %v5032_v47 = vadd.f32 %v11499_v39, %v11350_v13 }
 0x548   : > { %v5544_v6 = vmax.f32 %v5363_v23, 0.0 }
 0x549   : > { %v5623_v32 = vpack.c.bf16 %v5543_v26, %v5541_v27 }
 0x54a   : > { %v5624_v49 = vpack.c.bf16 %v5544_v6, %v5542_v62  ;;  %v5366_v30 = vpop.f32.mrb[156].mxu0 }
 0x54b   : > { %v5367_v48 = vadd.f32 %v5366_v30, %v5016_v1  ;;  %v5368_v60 = vpop.f32.mrb[157].mxu0 }
 0x54c   : > { %v5369_v12 = vadd.f32 %v5368_v60, %v5018_v24  ;;  %v5370_v28 = vpop.f32.mrb[158].mxu0  ;;  %5986 = vmatprep.mubr.bf16.mxu1 %v5624_v49  ;;  %v5036_v24 = vadd.f32 %v11504_v29, %v11346_v52  ;;  %v5038_v49 = vadd.f32 %v11507_v8, %v11350_v13 }
 0x54d   : > { %v5371_v43 = vadd.f32 %v5370_v28, %v5020_v17  ;;  %v5372_v9 = vpop.f32.mrb[159].mxu0  ;;  %5987 = vmatmul.mubr.bf16.gmra.mrb[216].mxu1 %v5623_v32  ;;  %v5545_v21 = vmax.f32 %v5367_v48, 0.0  ;;  %v5040_v17 = vadd.f32 %v11509_v53, %v11346_v52 }
 0x54e   : > { %v5373_v19 = vadd.f32 %v5372_v9, %v5022_v33  ;;  %v5546_v63 = vmax.f32 %v5369_v12, 0.0  ;;  %v5042_v33 = vadd.f32 %v11513_v56, %v11350_v13 }
 0x54f   : > { %v5547_v40 = vmax.f32 %v5371_v43, 0.0 }
 0x550   : > { %v5548_v3 = vmax.f32 %v5373_v19, 0.0 }
 0x551   : > { %v5625_v7 = vpack.c.bf16 %v5547_v40, %v5545_v21 }
 0x552   : > { %v5626_v14 = vpack.c.bf16 %v5548_v3, %v5546_v63  ;;  %v5376_v57 = vpop.f32.mrb[160].mxu0  ;;  %v5046_v63 = vadd.f32 %v11523_v5, %v11346_v52  ;;  %v5048_v3 = vadd.f32 %v11527_v18, %v11350_v13 }
 0x553   : > { %v5377_v44 = vadd.f32 %v5376_v57, %v5026_v42  ;;  %v5378_v23 = vpop.f32.mrb[161].mxu0  ;;  %v5052_v57 = vadd.f32 %v11535_v34, %v11350_v13 }
 0x554   : > { %v5379_v27 = vadd.f32 %v5378_v23, %v5028_v0  ;;  %v5380_v26 = vpop.f32.mrb[162].mxu0  ;;  %5994 = vmatprep.mubr.bf16.mxu1 %v5626_v14 }
 0x555   : > { %v5381_v20 = vadd.f32 %v5380_v26, %v5030_v31  ;;  %v5382_v62 = vpop.f32.mrb[163].mxu0  ;;  %5995 = vmatmul.mubr.bf16.gmra.mrb[220].mxu1 %v5625_v7  ;;  %v5549_v6 = vmax.f32 %v5377_v44, 0.0  ;;  %v5050_v7 = vadd.f32 %v11531_v58, %v11346_v52 }
 0x556   : > { %v5383_v46 = vadd.f32 %v5382_v62, %v5032_v47  ;;  %v5550_v51 = vmax.f32 %v5379_v27, 0.0  ;;  %v5056_v62 = vadd.f32 %v11539_v59, %v11346_v52 }
 0x557   : > { %v5551_v1 = vmax.f32 %v5381_v20, 0.0 }
 0x558   : > { %v5552_v32 = vmax.f32 %v5383_v46, 0.0  ;;  %v5058_v46 = vadd.f32 %v11543_v15, %v11350_v13  ;;  %v11656_v15 = vld [vmem:[%s12217_s12] ss:$0 sm:$0xff] }
 0x559   : > { %v5627_v38 = vpack.c.bf16 %v5551_v1, %v5549_v6  ;;  %v5060_v1 = vadd.f32 %v11547_v35, %v11346_v52 }
 0x55a   : > { %v5628_v30 = vpack.c.bf16 %v5552_v32, %v5550_v51  ;;  %v5386_v39 = vpop.f32.mrb[164].mxu0 }
 0x55b   : > { %v5387_v48 = vadd.f32 %v5386_v39, %v5036_v24  ;;  %v5388_v60 = vpop.f32.mrb[165].mxu0  ;;  %v5062_v24 = vadd.f32 %v11551_v10, %v11350_v13  ;;  %v5066_v10 = vadd.f32 %v11557_v22, %v11346_v52 }
 0x55c   : > { %v5389_v12 = vadd.f32 %v5388_v60, %v5038_v49  ;;  %v5390_v28 = vpop.f32.mrb[166].mxu0  ;;  %6002 = vmatprep.mubr.bf16.mxu1 %v5628_v30 }
 0x55d   : > { %v5391_v43 = vadd.f32 %v5390_v28, %v5040_v17  ;;  %v5392_v9 = vpop.f32.mrb[167].mxu0  ;;  %6003 = vmatmul.mubr.bf16.gmra.mrb[224].mxu1 %v5627_v38  ;;  %v5553_v19 = vmax.f32 %v5387_v48, 0.0 }
 0x55e   : > { %v5393_v29 = vadd.f32 %v5392_v9, %v5042_v33  ;;  %v5554_v8 = vmax.f32 %v5389_v12, 0.0  ;;  %v5068_v9 = vadd.f32 %v11561_v61, %v11350_v13  ;;  %v5072_v61 = vadd.f32 %v11567_v37, %v11350_v13 }
 0x55f   : > { %v5555_v21 = vmax.f32 %v5391_v43, 0.0  ;;  %v5076_v37 = vadd.f32 %v11573_v50, %v11346_v52 }
 0x560   : > { %v5556_v40 = vmax.f32 %v5393_v29, 0.0 }
 0x561   : > { %v5629_v53 = vpack.c.bf16 %v5555_v21, %v5553_v19  ;;  %v11666_v19 = vld [vmem:[%s12218_s13] ss:$0 sm:$0xff] }
 0x562   : > { %v5630_v42 = vpack.c.bf16 %v5556_v40, %v5554_v8  ;;  %v5396_v56 = vpop.f32.mrb[168].mxu0  ;;  %v5070_v40 = vadd.f32 %v11565_v45, %v11346_v52 }
 0x563   : > { %v5397_v0 = vadd.f32 %v5396_v56, %v5046_v63  ;;  %v5398_v14 = vpop.f32.mrb[169].mxu0 }
 0x564   : > { %v5399_v31 = vadd.f32 %v5398_v14, %v5048_v3  ;;  %v5400_v44 = vpop.f32.mrb[170].mxu0  ;;  %6010 = vmatprep.mubr.bf16.mxu1 %v5630_v42 }
 0x565   : > { %v5401_v23 = vadd.f32 %v5400_v44, %v5050_v7  ;;  %v5402_v47 = vpop.f32.mrb[171].mxu0  ;;  %6011 = vmatmul.mubr.bf16.gmra.mrb[228].mxu1 %v5629_v53  ;;  %v5557_v27 = vmax.f32 %v5397_v0, 0.0 }
 0x566   : > { %v5403_v5 = vadd.f32 %v5402_v47, %v5052_v57  ;;  %v5558_v18 = vmax.f32 %v5399_v31, 0.0 }
 0x567   : > { %v5559_v26 = vmax.f32 %v5401_v23, 0.0 }
 0x568   : > { %v5560_v20 = vmax.f32 %v5403_v5, 0.0 }
 0x569   : > { %v5631_v58 = vpack.c.bf16 %v5559_v26, %v5557_v27 }
 0x56a   : > { %v5632_v6 = vpack.c.bf16 %v5560_v20, %v5558_v18  ;;  %v5406_v34 = vpop.f32.mrb[172].mxu0 }
 0x56b   : > { %v5407_v51 = vadd.f32 %v5406_v34, %v5056_v62  ;;  %v5408_v32 = vpop.f32.mrb[173].mxu0 }
 0x56c   : > { %v5409_v38 = vadd.f32 %v5408_v32, %v5058_v46  ;;  %v5410_v49 = vpop.f32.mrb[174].mxu0  ;;  %6018 = vmatprep.mubr.bf16.mxu1 %v5632_v6 }
 0x56d   : > { %v5411_v30 = vadd.f32 %v5410_v49, %v5060_v1  ;;  %v5412_v39 = vpop.f32.mrb[175].mxu0  ;;  %6019 = vmatmul.mubr.bf16.gmra.mrb[232].mxu1 %v5631_v58  ;;  %v5561_v17 = vmax.f32 %v5407_v51, 0.0  ;;  %v5078_v58 = vadd.f32 %v11577_v4, %v11350_v13  ;;  %v5080_v1 = vadd.f32 %v11581_v36, %v11346_v52 }
 0x56e   : > { %v5413_v59 = vadd.f32 %v5412_v39, %v5062_v24  ;;  %v5562_v35 = vmax.f32 %v5409_v38, 0.0  ;;  %v5812_v33 = vpop.f32.mrb[128].mxu1  ;;  %v5082_v49 = vadd.f32 %v11583_v55, %v11350_v13  ;;  %v5086_v55 = vadd.f32 %v11593_v11, %v11346_v52 }
 0x56f   : > { %v5563_v48 = vmax.f32 %v5411_v30, 0.0  ;;  %v5813_v28 = vadd.f32 %v11656_v15, %v5812_v33  ;;  %v5814_v43 = vpop.f32.mrb[129].mxu1 }
 0x570   : > { %v5564_v60 = vmax.f32 %v5413_v59, 0.0  ;;  %v5815_v8 = vpop.f32.mrb[130].mxu1 }
 0x571   : > { %v5633_v12 = vpack.c.bf16 %v5563_v48, %v5561_v17  ;;  %v6066_v63 = vmax.f32 %v5813_v28, 0.0  ;;  %v5816_v53 = vadd.f32 %v11656_v15, %v5815_v8  ;;  %v5817_v42 = vpop.f32.mrb[131].mxu1 }
 0x572   : > { %v5634_v29 = vpack.c.bf16 %v5564_v60, %v5562_v35  ;;  %v5416_v21 = vpop.f32.mrb[176].mxu0 }
 0x573   : > { %v5417_v22 = vadd.f32 %v5416_v21, %v5066_v10  ;;  %v5418_v3 = vpop.f32.mrb[177].mxu0  ;;  %v6136_v0 = vmul.f32 %v11666_v19, %v6066_v63  ;;  %v6067_v14 = vmax.f32 %v5816_v53, 0.0  ;;  %v5088_v21 = vadd.f32 %v11595_v54, %v11350_v13 }
 0x574   : > { %v5419_v56 = vadd.f32 %v5418_v3, %v5068_v9  ;;  %v5420_v7 = vpop.f32.mrb[178].mxu0  ;;  %6026 = vmatprep.mubr.bf16.mxu1 %v5634_v29 }
 0x575   : > { %v5421_v57 = vadd.f32 %v5420_v7, %v5070_v40  ;;  %v5422_v31 = vpop.f32.mrb[179].mxu0  ;;  %6027 = vmatmul.mubr.bf16.gmra.mrb[236].mxu1 %v5633_v12  ;;  %v5565_v45 = vmax.f32 %v5417_v22, 0.0  ;;  %v6137_v23 = vmul.f32 %v11666_v19, %v6067_v14  ;;  %6199 = vadd.xlane.f32.xlu1 %v6136_v0  ;;  %v5090_v22 = vadd.f32 %v11597_v16, %v11346_v52 }
 0x576   : > { %v5423_v44 = vadd.f32 %v5422_v31, %v5072_v61  ;;  %v5566_v5 = vmax.f32 %v5419_v56, 0.0  ;;  %v5092_v56 = vadd.f32 %v11599_v25, %v11350_v13  ;;  %v5096_v25 = vadd.f32 %v11609_v41, %v11346_v52 }
 0x577   : > { %v5567_v47 = vmax.f32 %v5421_v57, 0.0  ;;  %v5820_v26 = vpop.f32.mrb[132].mxu1  ;;  %6201 = vadd.xlane.f32.xlu0 %v6137_v23 }
 0x578   : > { %v5568_v27 = vmax.f32 %v5423_v44, 0.0  ;;  %v5821_v20 = vadd.f32 %v11656_v15, %v5820_v26  ;;  %v5822_v62 = vpop.f32.mrb[133].mxu1 }
 0x579   : > { %v5635_v18 = vpack.c.bf16 %v5567_v47, %v5565_v45  ;;  %v5823_v34 = vpop.f32.mrb[134].mxu1 }
 0x57a   : > { %v5636_v46 = vpack.c.bf16 %v5568_v27, %v5566_v5  ;;  %v5426_v6 = vpop.f32.mrb[180].mxu0  ;;  %v6068_v51 = vmax.f32 %v5821_v20, 0.0  ;;  %v5824_v24 = vadd.f32 %v11656_v15, %v5823_v34  ;;  %v5825_v50 = vpop.f32.mrb[135].mxu1  ;;  %v5098_v20 = vadd.f32 %v11611_v2, %v11350_v13 }
 0x57b   : > { %v5427_v32 = vadd.f32 %v5426_v6, %v5076_v37  ;;  %v5428_v38 = vpop.f32.mrb[181].mxu0 }
 0x57c   : > { %v5429_v30 = vadd.f32 %v5428_v38, %v5078_v58  ;;  %v5430_v39 = vpop.f32.mrb[182].mxu0  ;;  %6034 = vmatprep.mubr.bf16.mxu1 %v5636_v46  ;;  %v6138_v4 = vmul.f32 %v11666_v19, %v6068_v51  ;;  %v6069_v59 = vmax.f32 %v5824_v24, 0.0 }
 0x57d   : > { %v5431_v17 = vadd.f32 %v5430_v39, %v5080_v1  ;;  %v5432_v48 = vpop.f32.mrb[183].mxu0  ;;  %6035 = vmatmul.mubr.bf16.gmra.mrb[240].mxu1 %v5635_v18  ;;  %v5569_v36 = vmax.f32 %v5427_v32, 0.0 }
 0x57e   : > { %v5433_v35 = vadd.f32 %v5432_v48, %v5082_v49  ;;  %v6139_v60 = vmul.f32 %v11666_v19, %v6069_v59  ;;  %6203 = vadd.xlane.f32.xlu0 %v6138_v4  ;;  %v5570_v10 = vmax.f32 %v5429_v30, 0.0 }
 0x57f   : > { %v5571_v33 = vmax.f32 %v5431_v17, 0.0  ;;  %v5828_v28 = vpop.f32.mrb[136].mxu1 }
 0x580   : > { %v5572_v12 = vmax.f32 %v5433_v35, 0.0  ;;  %v5829_v9 = vadd.f32 %v11656_v15, %v5828_v28  ;;  %v5830_v29 = vpop.f32.mrb[137].mxu1  ;;  %6205 = vadd.xlane.f32.xlu1 %v6139_v60 }
 0x581   : > { %v5637_v43 = vpack.c.bf16 %v5571_v33, %v5569_v36  ;;  %v5831_v63 = vpop.f32.mrb[138].mxu1 }
 0x582   : > { %v5638_v8 = vpack.c.bf16 %v5572_v12, %v5570_v10  ;;  %v5436_v40 = vpop.f32.mrb[184].mxu0  ;;  %v6070_v53 = vmax.f32 %v5829_v9, 0.0  ;;  %v5832_v42 = vadd.f32 %v11656_v15, %v5831_v63  ;;  %v5833_v11 = vpop.f32.mrb[139].mxu1 }
 0x583   : > { %v5437_v3 = vadd.f32 %v5436_v40, %v5086_v55  ;;  %v5438_v61 = vpop.f32.mrb[185].mxu0 }
 0x584   : > { %v5439_v7 = vadd.f32 %v5438_v61, %v5088_v21  ;;  %v5440_v0 = vpop.f32.mrb[186].mxu0  ;;  %6042 = vmatprep.mubr.bf16.mxu1 %v5638_v8  ;;  %v6140_v54 = vmul.f32 %v11666_v19, %v6070_v53  ;;  %v6071_v14 = vmax.f32 %v5832_v42, 0.0 }
 0x585   : > { %v5441_v57 = vadd.f32 %v5440_v0, %v5090_v22  ;;  %v5442_v31 = vpop.f32.mrb[187].mxu0  ;;  %6043 = vmatmul.mubr.bf16.gmra.mrb[244].mxu1 %v5637_v43  ;;  %v5573_v16 = vmax.f32 %v5437_v3, 0.0 }
 0x586   : > { %v5443_v44 = vadd.f32 %v5442_v31, %v5092_v56  ;;  %v6141_v45 = vmul.f32 %v11666_v19, %v6071_v14  ;;  %6207 = vadd.xlane.f32.xlu0 %v6140_v54  ;;  %v5574_v47 = vmax.f32 %v5439_v7, 0.0 }
 0x587   : > { %v5575_v23 = vmax.f32 %v5441_v57, 0.0  ;;  %v5836_v27 = vpop.f32.mrb[140].mxu1 }
 0x588   : > { %v5576_v5 = vmax.f32 %v5443_v44, 0.0  ;;  %v5837_v37 = vadd.f32 %v11656_v15, %v5836_v27  ;;  %v5838_v18 = vpop.f32.mrb[141].mxu1  ;;  %6209 = vadd.xlane.f32.xlu1 %v6141_v45 }
 0x589   : > { %v5639_v26 = vpack.c.bf16 %v5575_v23, %v5573_v16  ;;  %v5839_v46 = vpop.f32.mrb[142].mxu1 }
 0x58a   : > { %v5640_v62 = vpack.c.bf16 %v5576_v5, %v5574_v47  ;;  %v5446_v58 = vpop.f32.mrb[188].mxu0  ;;  %v6072_v6 = vmax.f32 %v5837_v37, 0.0  ;;  %v5840_v1 = vadd.f32 %v11656_v15, %v5839_v46  ;;  %v5841_v32 = vpop.f32.mrb[143].mxu1 }
 0x58b   : > { %v5447_v34 = vadd.f32 %v5446_v58, %v5096_v25  ;;  %v5448_v51 = vpop.f32.mrb[189].mxu0 }
 0x58c   : > { %v5449_v24 = vadd.f32 %v5448_v51, %v5098_v20  ;;  %v5450_v38 = vpop.f32.mrb[190].mxu0  ;;  %6050 = vmatprep.mubr.bf16.mxu1 %v5640_v62  ;;  %v6142_v52 = vmul.f32 %v11666_v19, %v6072_v6  ;;  %v6073_v41 = vmax.f32 %v5840_v1, 0.0 }
 0x58d   : > { %v5451_v50 = vpop.f32.mrb[191].mxu0  ;;  %6051 = vmatmul.mubr.bf16.gmra.mrb[248].mxu1 %v5639_v26  ;;  %v5577_v30 = vmax.f32 %v5447_v34, 0.0 }
 0x58e   : > { %v5578_v49 = vmax.f32 %v5449_v24, 0.0  ;;  %v6143_v13 = vmul.f32 %v11666_v19, %v6073_v41  ;;  %6211 = vadd.xlane.f32.xlu0 %v6142_v52 }
 0x58f   : > { %v5641_v48 = vpack.c.bf16 %v5577_v30, %v5577_v30 }
 0x590   : > { %v5642_v2 = vpack.c.bf16 %v5578_v49, %v5578_v49  ;;  %v5844_v39 = vpop.f32.mrb[144].mxu1  ;;  %6213 = vadd.xlane.f32.xlu1 %v6143_v13 }
 0x591   : > { %v5845_v4 = vadd.f32 %v11656_v15, %v5844_v39  ;;  %v5846_v59 = vpop.f32.mrb[145].mxu1 }
 0x592   : > { %v5847_v17 = vpop.f32.mrb[146].mxu1  ;;  %6058 = vmatprep.mubr.bf16.mxu1 %v5642_v2 }
 0x593   : > { %v6074_v35 = vmax.f32 %v5845_v4, 0.0  ;;  %v5848_v36 = vadd.f32 %v11656_v15, %v5847_v17  ;;  %v5849_v60 = vpop.f32.mrb[147].mxu1 }
 0x595   : > { %v6144_v33 = vmul.f32 %v11666_v19, %v6074_v35  ;;  %v6075_v10 = vmax.f32 %v5848_v36, 0.0  ;;  %6059 = vmatmul.mubr.bf16.gmra.mrb[252].mxu1 %v5641_v48 }
 0x597   : > { %v6145_v12 = vmul.f32 %v11666_v19, %v6075_v10  ;;  %6215 = vadd.xlane.f32.xlu0 %v6144_v33 }
 0x598   : > { %v5852_v28 = vpop.f32.mrb[148].mxu1 }
 0x599   : > { %v5853_v55 = vadd.f32 %v11656_v15, %v5852_v28  ;;  %v5854_v43 = vpop.f32.mrb[149].mxu1  ;;  %6217 = vadd.xlane.f32.xlu1 %v6145_v12 }
 0x59a   : > { %v5855_v9 = vpop.f32.mrb[150].mxu1 }
 0x59b   : > { %v6076_v29 = vmax.f32 %v5853_v55, 0.0  ;;  %v5856_v21 = vadd.f32 %v11656_v15, %v5855_v9  ;;  %v5857_v8 = vpop.f32.mrb[151].mxu1 }
 0x59d   : > { %v6146_v40 = vmul.f32 %v11666_v19, %v6076_v29  ;;  %v6077_v63 = vmax.f32 %v5856_v21, 0.0 }
 0x59f   : > { %v6147_v22 = vmul.f32 %v11666_v19, %v6077_v63  ;;  %6219 = vadd.xlane.f32.xlu0 %v6146_v40 }
 0x5a0   : > { %v5860_v53 = vpop.f32.mrb[152].mxu1 }
 0x5a1   : > { %v5861_v3 = vadd.f32 %v11656_v15, %v5860_v53  ;;  %v5862_v42 = vpop.f32.mrb[153].mxu1  ;;  %6221 = vadd.xlane.f32.xlu1 %v6147_v22 }
 0x5a2   : > { %v5863_v61 = vpop.f32.mrb[154].mxu1 }
 0x5a3   : > { %v6078_v11 = vmax.f32 %v5861_v3, 0.0  ;;  %v5864_v56 = vadd.f32 %v11656_v15, %v5863_v61  ;;  %v5865_v7 = vpop.f32.mrb[155].mxu1 }
 0x5a5   : > { %v6148_v0 = vmul.f32 %v11666_v19, %v6078_v11  ;;  %v6079_v54 = vmax.f32 %v5864_v56, 0.0 }
 0x5a7   : > { %v6149_v14 = vmul.f32 %v11666_v19, %v6079_v54  ;;  %6223 = vadd.xlane.f32.xlu0 %v6148_v0 }
 0x5a8   : > { %v5868_v57 = vpop.f32.mrb[156].mxu1 }
 0x5a9   : > { %v5869_v31 = vadd.f32 %v11656_v15, %v5868_v57  ;;  %v5870_v44 = vpop.f32.mrb[157].mxu1  ;;  %6225 = vadd.xlane.f32.xlu1 %v6149_v14 }
 0x5aa   : > { %v5871_v16 = vpop.f32.mrb[158].mxu1 }
 0x5ab   : > { %v6080_v45 = vmax.f32 %v5869_v31, 0.0  ;;  %v5872_v23 = vadd.f32 %v11656_v15, %v5871_v16  ;;  %v5873_v47 = vpop.f32.mrb[159].mxu1 }
 0x5ad   : > { %v6150_v5 = vmul.f32 %v11666_v19, %v6080_v45  ;;  %v6081_v27 = vmax.f32 %v5872_v23, 0.0 }
 0x5af   : > { %v6151_v25 = vmul.f32 %v11666_v19, %v6081_v27  ;;  %6227 = vadd.xlane.f32.xlu0 %v6150_v5 }
 0x5b0   : > { %v5876_v26 = vpop.f32.mrb[160].mxu1 }
 0x5b1   : > { %v5877_v37 = vadd.f32 %v11656_v15, %v5876_v26  ;;  %v5878_v18 = vpop.f32.mrb[161].mxu1  ;;  %6229 = vadd.xlane.f32.xlu1 %v6151_v25 }
 0x5b2   : > { %v5879_v20 = vpop.f32.mrb[162].mxu1 }
 0x5b3   : > { %v6082_v62 = vmax.f32 %v5877_v37, 0.0  ;;  %v5880_v58 = vadd.f32 %v11656_v15, %v5879_v20  ;;  %v5881_v46 = vpop.f32.mrb[163].mxu1 }
 0x5b5   : > { %v6152_v6 = vmul.f32 %v11666_v19, %v6082_v62  ;;  %v6083_v34 = vmax.f32 %v5880_v58, 0.0 }
 0x5b7   : > { %v6153_v1 = vmul.f32 %v11666_v19, %v6083_v34  ;;  %6231 = vadd.xlane.f32.xlu0 %v6152_v6 }
 0x5b8   : > { %v5884_v51 = vpop.f32.mrb[164].mxu1 }
 0x5b9   : > { %v5885_v32 = vadd.f32 %v11656_v15, %v5884_v51  ;;  %v5886_v24 = vpop.f32.mrb[165].mxu1  ;;  %6233 = vadd.xlane.f32.xlu1 %v6153_v1 }
 0x5ba   : > { %v5887_v38 = vpop.f32.mrb[166].mxu1 }
 0x5bb   : > { %v6084_v52 = vmax.f32 %v5885_v32, 0.0  ;;  %v5888_v41 = vadd.f32 %v11656_v15, %v5887_v38  ;;  %v5889_v50 = vpop.f32.mrb[167].mxu1 }
 0x5bd   : > { %v6154_v49 = vmul.f32 %v11666_v19, %v6084_v52  ;;  %v6085_v30 = vmax.f32 %v5888_v41, 0.0 }
 0x5bf   : > { %v6155_v13 = vmul.f32 %v11666_v19, %v6085_v30  ;;  %6235 = vadd.xlane.f32.xlu0 %v6154_v49 }
 0x5c0   : > { %v5892_v2 = vpop.f32.mrb[168].mxu1 }
 0x5c1   : > { %v5893_v39 = vadd.f32 %v11656_v15, %v5892_v2  ;;  %v5894_v4 = vpop.f32.mrb[169].mxu1  ;;  %6237 = vadd.xlane.f32.xlu1 %v6155_v13 }
 0x5c2   : > { %v5895_v59 = vpop.f32.mrb[170].mxu1 }
 0x5c3   : > { %v6086_v17 = vmax.f32 %v5893_v39, 0.0  ;;  %v5896_v48 = vadd.f32 %v11656_v15, %v5895_v59  ;;  %v5897_v35 = vpop.f32.mrb[171].mxu1 }
 0x5c5   : > { %v6156_v36 = vmul.f32 %v11666_v19, %v6086_v17  ;;  %v6087_v60 = vmax.f32 %v5896_v48, 0.0 }
 0x5c7   : > { %v6157_v33 = vmul.f32 %v11666_v19, %v6087_v60  ;;  %6239 = vadd.xlane.f32.xlu0 %v6156_v36 }
 0x5c8   : > { %v5900_v10 = vpop.f32.mrb[172].mxu1 }
 0x5c9   : > { %v5901_v12 = vadd.f32 %v11656_v15, %v5900_v10  ;;  %v5902_v28 = vpop.f32.mrb[173].mxu1  ;;  %6241 = vadd.xlane.f32.xlu1 %v6157_v33 }
 0x5ca   : > { %v5903_v55 = vpop.f32.mrb[174].mxu1 }
 0x5cb   : > { %v6088_v43 = vmax.f32 %v5901_v12, 0.0  ;;  %v5904_v9 = vadd.f32 %v11656_v15, %v5903_v55  ;;  %v5905_v29 = vpop.f32.mrb[175].mxu1 }
 0x5cd   : > { %v6158_v21 = vmul.f32 %v11666_v19, %v6088_v43  ;;  %v6089_v8 = vmax.f32 %v5904_v9, 0.0 }
 0x5cf   : > { %v6159_v40 = vmul.f32 %v11666_v19, %v6089_v8  ;;  %6243 = vadd.xlane.f32.xlu0 %v6158_v21 }
 0x5d0   : > { %v5908_v63 = vpop.f32.mrb[176].mxu1 }
 0x5d1   : > { %v5909_v22 = vadd.f32 %v11656_v15, %v5908_v63  ;;  %v5910_v53 = vpop.f32.mrb[177].mxu1  ;;  %6245 = vadd.xlane.f32.xlu1 %v6159_v40 }
 0x5d2   : > { %v5911_v3 = vpop.f32.mrb[178].mxu1  ;;  %v11764_v53 = vstv %s6325_s18  ;;  %s6787_s18 = sshll.u32 %s11793_s22, 4  ;;  %s12156_s18 = int_to_ptr.vmem [resolvable:$true] %s6787_s18 }
 0x5d3   : > { %v6090_v42 = vmax.f32 %v5909_v22, 0.0  ;;  %v5912_v61 = vadd.f32 %v11656_v15, %v5911_v3  ;;  %v5913_v11 = vpop.f32.mrb[179].mxu1  ;;  %s7957_s26 = scalar_lea.vmem %s12156_s18, 8064  ;;  %p7964_p0 = scmp.lt.s32.totalorder %s12156_s18, %s7962_s27 }
 0x5d4   : > { %p7958_p11 = scmp.ne.s32.totalorder %s12156_s18, %s7957_s26  ;;  %p7965_p1 = scmp.lt.s32.totalorder %s7963_s16, %s7957_s26 }
 0x5d5   : > { %v6160_v56 = vmul.f32 %v11666_v19, %v6090_v42  ;;  %v6091_v7 = vmax.f32 %v5912_v61, 0.0 }
 0x5d6   : > { %p7959_p12 = pnand %p7958_p11, %p8147_p5  ;;  %p7966_p2 = por %p7965_p1, %p7964_p0 }
 0x5d7   : > { %v6161_v0 = vmul.f32 %v11666_v19, %v6091_v7  ;;  %6247 = vadd.xlane.f32.xlu0 %v6160_v56 }
 0x5d8   : > { %v5916_v54 = vpop.f32.mrb[180].mxu1  ;;  %p7960_p13 = pneg %p7959_p12 }
 0x5d9   : > { %v5917_v14 = vadd.f32 %v11656_v15, %v5916_v54  ;;  %v5918_v57 = vpop.f32.mrb[181].mxu1  ;;  %6249 = vadd.xlane.f32.xlu1 %v6161_v0 }
 0x5da   : > { %v5919_v31 = vpop.f32.mrb[182].mxu1  ;;  %p7967_p3 = pnand %p7966_p2, %p7960_p13 }
 0x5db   : > { %v6092_v44 = vmax.f32 %v5917_v14, 0.0  ;;  %v5920_v16 = vadd.f32 %v11656_v15, %v5919_v31  ;;  %v5921_v45 = vpop.f32.mrb[183].mxu1 }
 0x5dd   : > { %v6162_v23 = vmul.f32 %v11666_v19, %v6092_v44  ;;  %v6093_v47 = vmax.f32 %v5920_v16, 0.0 }
 0x5df   : > { %v6163_v5 = vmul.f32 %v11666_v19, %v6093_v47  ;;  %6251 = vadd.xlane.f32.xlu0 %v6162_v23 }
 0x5e0   : > { %v5924_v27 = vpop.f32.mrb[184].mxu1 }
 0x5e1   : > { %v5925_v25 = vadd.f32 %v11656_v15, %v5924_v27  ;;  %v5926_v26 = vpop.f32.mrb[185].mxu1  ;;  %6253 = vadd.xlane.f32.xlu1 %v6163_v5 }
 0x5e2   : > { %v5927_v37 = vpop.f32.mrb[186].mxu1 }
 0x5e3   : > { %v6094_v18 = vmax.f32 %v5925_v25, 0.0  ;;  %v5928_v20 = vadd.f32 %v11656_v15, %v5927_v37  ;;  %v5929_v62 = vpop.f32.mrb[187].mxu1 }
 0x5e5   : > { %v6164_v58 = vmul.f32 %v11666_v19, %v6094_v18  ;;  %v6095_v46 = vmax.f32 %v5928_v20, 0.0 }
 0x5e7   : > { %v6165_v6 = vmul.f32 %v11666_v19, %v6095_v46  ;;  %6255 = vadd.xlane.f32.xlu0 %v6164_v58 }
 0x5e8   : > { %v5932_v34 = vpop.f32.mrb[188].mxu1 }
 0x5e9   : > { %v5933_v1 = vadd.f32 %v11656_v15, %v5932_v34  ;;  %v5934_v51 = vpop.f32.mrb[189].mxu1  ;;  %6257 = vadd.xlane.f32.xlu1 %v6165_v6 }
 0x5ea   : > { %v5935_v32 = vpop.f32.mrb[190].mxu1 }
 0x5eb   : > { %v6096_v24 = vmax.f32 %v5933_v1, 0.0  ;;  %v5936_v38 = vadd.f32 %v11656_v15, %v5935_v32  ;;  %v5937_v52 = vpop.f32.mrb[191].mxu1  ;;  %v12482_v1 = vlaneseq }
 0x5ed   : > { %v6166_v41 = vmul.f32 %v11666_v19, %v6096_v24  ;;  %v6097_v50 = vmax.f32 %v5936_v38, 0.0  ;;  %v11779_v51 = vand.u32 127, %v12482_v1 }
 0x5ef   : > { %v6167_v49 = vmul.f32 %v11666_v19, %v6097_v50  ;;  %6259 = vadd.xlane.f32.xlu0 %v6166_v41  ;;  %vm6644_vm0 = vcmp.eq.s32.totalorder %v11779_v51, 2 }
 0x5f0   : > { %v5940_v30 = vpop.f32.mrb[192].mxu1 }
 0x5f1   : > { %v5941_v13 = vadd.f32 %v11656_v15, %v5940_v30  ;;  %v5942_v2 = vpop.f32.mrb[193].mxu1  ;;  %6261 = vadd.xlane.f32.xlu1 %v6167_v49 }
 0x5f2   : > { %v5943_v39 = vpop.f32.mrb[194].mxu1 }
 0x5f3   : > { %v6098_v4 = vmax.f32 %v5941_v13, 0.0  ;;  %v5944_v59 = vadd.f32 %v11656_v15, %v5943_v39  ;;  %v5945_v17 = vpop.f32.mrb[195].mxu1 }
 0x5f5   : > { %v6168_v48 = vmul.f32 %v11666_v19, %v6098_v4  ;;  %v6099_v35 = vmax.f32 %v5944_v59, 0.0 }
 0x5f7   : > { %v6169_v36 = vmul.f32 %v11666_v19, %v6099_v35  ;;  %6263 = vadd.xlane.f32.xlu0 %v6168_v48 }
 0x5f8   : > { %v5948_v60 = vpop.f32.mrb[196].mxu1 }
 0x5f9   : > { %v5949_v33 = vadd.f32 %v11656_v15, %v5948_v60  ;;  %v5950_v10 = vpop.f32.mrb[197].mxu1  ;;  %6265 = vadd.xlane.f32.xlu1 %v6169_v36 }
 0x5fa   : > { %v5951_v12 = vpop.f32.mrb[198].mxu1 }
 0x5fb   : > { %v6100_v28 = vmax.f32 %v5949_v33, 0.0  ;;  %v5952_v55 = vadd.f32 %v11656_v15, %v5951_v12  ;;  %v5953_v43 = vpop.f32.mrb[199].mxu1  ;;  %v12483_v12 = vld [vmem:[#allocation11_spill] sm:$0xff] }
 0x5fd   : > { %v6170_v9 = vmul.f32 %v11666_v19, %v6100_v28  ;;  %v6101_v29 = vmax.f32 %v5952_v55, 0.0 }
 0x5ff   : > { %v6171_v21 = vmul.f32 %v11666_v19, %v6101_v29  ;;  %6267 = vadd.xlane.f32.xlu0 %v6170_v9 }
 0x600   : > { %v5956_v8 = vpop.f32.mrb[200].mxu1 }
 0x601   : > { %v5957_v40 = vadd.f32 %v11656_v15, %v5956_v8  ;;  %v5958_v63 = vpop.f32.mrb[201].mxu1  ;;  %6269 = vadd.xlane.f32.xlu1 %v6171_v21  ;;  %v12484_v8 = vld [vmem:[#allocation13_spill] sm:$0xff] }
 0x602   : > { %v5959_v22 = vpop.f32.mrb[202].mxu1  ;;  %v6200_v11 = vpop.xlane.xlu1 %6199 }
 0x603   : > { %v6102_v3 = vmax.f32 %v5957_v40, 0.0  ;;  %v5960_v42 = vadd.f32 %v11656_v15, %v5959_v22  ;;  %v5961_v61 = vpop.f32.mrb[203].mxu1  ;;  %v6327_v0 = vadd.f32 %v11764_v53, %v6200_v11 }
 0x604   : > { %v6202_v54 = vpop.xlane.xlu0 %6201 }
 0x605   : > { %v6172_v56 = vmul.f32 %v11666_v19, %v6102_v3  ;;  %v6103_v7 = vmax.f32 %v5960_v42, 0.0  ;;  %v6390_v57 = vmul.f32 0.5, %v6327_v0  ;;  %v6328_v31 = vadd.f32 %v11764_v53, %v6202_v54 }
 0x607   : > { %v6173_v14 = vmul.f32 %v11666_v19, %v6103_v7  ;;  %6271 = vadd.xlane.f32.xlu0 %v6172_v56  ;;  %7825 = vtanh.f32 %v6390_v57  ;;  %v6391_v16 = vmul.f32 0.5, %v6328_v31 }
 0x608   : > { %v5964_v44 = vpop.f32.mrb[204].mxu1 }
 0x609   : > { %v5965_v45 = vadd.f32 %v11656_v15, %v5964_v44  ;;  %v5966_v23 = vpop.f32.mrb[205].mxu1  ;;  %6273 = vadd.xlane.f32.xlu1 %v6173_v14  ;;  %7827 = vtanh.f32 %v6391_v16 }
 0x60a   : > { %v5967_v47 = vpop.f32.mrb[206].mxu1 }
 0x60b   : > { %v6104_v5 = vmax.f32 %v5965_v45, 0.0  ;;  %v5968_v27 = vadd.f32 %v11656_v15, %v5967_v47  ;;  %v5969_v25 = vpop.f32.mrb[207].mxu1  ;;  %v6204_v26 = vpop.xlane.xlu0 %6203  ;;  %v12485_v47 = vld [vmem:[#allocation10_spill] sm:$0xff] }
 0x60c   : > { %v6329_v20 = vadd.f32 %v11764_v53, %v6204_v26 }
 0x60d   : > { %v6174_v37 = vmul.f32 %v11666_v19, %v6104_v5  ;;  %v6105_v18 = vmax.f32 %v5968_v27, 0.0  ;;  %v6206_v62 = vpop.xlane.xlu1 %6205 }
 0x60e   : > { %v6392_v46 = vmul.f32 0.5, %v6329_v20  ;;  %v6330_v6 = vadd.f32 %v11764_v53, %v6206_v62  ;;  %v12486_v20 = vld [vmem:[#allocation12_spill] sm:$0xff] }
 0x60f   : > { %v6175_v58 = vmul.f32 %v11666_v19, %v6105_v18  ;;  %6275 = vadd.xlane.f32.xlu0 %v6174_v37 }
 0x610   : > { %v5972_v34 = vpop.f32.mrb[208].mxu1  ;;  %7829 = vtanh.f32 %v6392_v46  ;;  %v6393_v32 = vmul.f32 0.5, %v6330_v6 }
 0x611   : > { %v5973_v24 = vadd.f32 %v11656_v15, %v5972_v34  ;;  %v5974_v38 = vpop.f32.mrb[209].mxu1  ;;  %6277 = vadd.xlane.f32.xlu1 %v6175_v58  ;;  %v7826_v41 = vpop.eup %7825 }
 0x612   : > { %v5975_v52 = vpop.f32.mrb[210].mxu1  ;;  %7831 = vtanh.f32 %v6393_v32  ;;  %v6516_v13 = vadd.f32 1.0, %v7826_v41 }
 0x613   : > { %v6106_v50 = vmax.f32 %v5973_v24, 0.0  ;;  %v5976_v49 = vadd.f32 %v11656_v15, %v5975_v52  ;;  %v5977_v30 = vpop.f32.mrb[211].mxu1  ;;  %v6208_v2 = vpop.xlane.xlu0 %6207 }
 0x614   : > { %v7828_v39 = vpop.eup %7827  ;;  %v6331_v17 = vadd.f32 %v11764_v53, %v6208_v2  ;;  %v6579_v48 = vmul.f32 0.5, %v6516_v13 }
 0x615   : > { %v6176_v4 = vmul.f32 %v11666_v19, %v6106_v50  ;;  %v6107_v59 = vmax.f32 %v5976_v49, 0.0  ;;  %v6517_v35 = vadd.f32 1.0, %v7828_v39  ;;  %v6210_v36 = vpop.xlane.xlu1 %6209 }
 0x616   : > { %v6394_v33 = vmul.f32 0.5, %v6331_v17  ;;  %v6332_v10 = vadd.f32 %v11764_v53, %v6210_v36  ;;  %v6647_v28 = vsel %vm6644_vm0, %v6579_v48, %v12483_v12 }
 0x617   : > { %v6177_v60 = vmul.f32 %v11666_v19, %v6107_v59  ;;  %6279 = vadd.xlane.f32.xlu0 %v6176_v4  ;;  %v6580_v55 = vmul.f32 0.5, %v6517_v35  ;;  %6710 = vst [vmem:[%s11793_s22] sm:$0xff] %v6647_v28  ;;  %v12487_v59 = vld [vmem:[#allocation15_spill] sm:$0xff] }
 0x618   : > { %v5980_v43 = vpop.f32.mrb[212].mxu1  ;;  %7833 = vtanh.f32 %v6394_v33  ;;  %v6395_v9 = vmul.f32 0.5, %v6332_v10  ;;  %v12488_v10 = vld [vmem:[#allocation17_spill] sm:$0xff] }
 0x619   : > { %v5981_v29 = vadd.f32 %v11656_v15, %v5980_v43  ;;  %v5982_v21 = vpop.f32.mrb[213].mxu1  ;;  %6281 = vadd.xlane.f32.xlu1 %v6177_v60  ;;  %v6648_v40 = vsel %vm6644_vm0, %v6580_v55, %v12484_v8 }
 0x61a   : > { %v5983_v63 = vpop.f32.mrb[214].mxu1  ;;  %v7830_v22 = vpop.eup %7829  ;;  %6711 = vst [vmem:[%s11793_s22 + $0x8] sm:$0xff] %v6648_v40  ;;  %7835 = vtanh.f32 %v6395_v9 }
 0x61b   : > { %v6108_v3 = vmax.f32 %v5981_v29, 0.0  ;;  %v5984_v42 = vadd.f32 %v11656_v15, %v5983_v63  ;;  %v5985_v61 = vpop.f32.mrb[215].mxu1  ;;  %v6518_v11 = vadd.f32 1.0, %v7830_v22  ;;  %v6212_v56 = vpop.xlane.xlu0 %6211 }
 0x61c   : > { %v7832_v7 = vpop.eup %7831  ;;  %v6333_v14 = vadd.f32 %v11764_v53, %v6212_v56 }
 0x61d   : > { %v6178_v0 = vmul.f32 %v11666_v19, %v6108_v3  ;;  %v6109_v54 = vmax.f32 %v5984_v42, 0.0  ;;  %v6581_v57 = vmul.f32 0.5, %v6518_v11  ;;  %v6519_v31 = vadd.f32 1.0, %v7832_v7  ;;  %v6214_v44 = vpop.xlane.xlu1 %6213 }
 0x61e   : > { %v6396_v45 = vmul.f32 0.5, %v6333_v14  ;;  %v6334_v23 = vadd.f32 %v11764_v53, %v6214_v44 }
 0x61f   : > { %v6179_v16 = vmul.f32 %v11666_v19, %v6109_v54  ;;  %6283 = vadd.xlane.f32.xlu0 %v6178_v0  ;;  %v6649_v5 = vsel %vm6644_vm0, %v6581_v57, %v12485_v47  ;;  %v6582_v27 = vmul.f32 0.5, %v6519_v31  ;;  %v12489_v54 = vld [vmem:[#allocation14_spill] sm:$0xff] }
 0x620   : > { %v5988_v25 = vpop.f32.mrb[216].mxu1  ;;  %6712 = vst [vmem:[%s11793_s22 + $0x10] sm:$0xff] %v6649_v5  ;;  %7837 = vtanh.f32 %v6396_v45  ;;  %v6397_v26 = vmul.f32 0.5, %v6334_v23  ;;  %v12490_v23 = vld [vmem:[#allocation16_spill] sm:$0xff] }
 0x621   : > { %v5989_v37 = vadd.f32 %v11656_v15, %v5988_v25  ;;  %v5990_v18 = vpop.f32.mrb[217].mxu1  ;;  %6285 = vadd.xlane.f32.xlu1 %v6179_v16  ;;  %v6650_v62 = vsel %vm6644_vm0, %v6582_v27, %v12486_v20 }
 0x622   : > { %v5991_v58 = vpop.f32.mrb[218].mxu1  ;;  %v7834_v46 = vpop.eup %7833  ;;  %6713 = vst [vmem:[%s11793_s22 + $0x18] sm:$0xff] %v6650_v62  ;;  %7839 = vtanh.f32 %v6397_v26 }
 0x623   : > { %v6110_v6 = vmax.f32 %v5989_v37, 0.0  ;;  %v5992_v34 = vadd.f32 %v11656_v15, %v5991_v58  ;;  %v5993_v1 = vpop.f32.mrb[219].mxu1  ;;  %v6520_v32 = vadd.f32 1.0, %v7834_v46 }
 0x624   : > { %v6216_v24 = vpop.xlane.xlu0 %6215  ;;  %v7836_v38 = vpop.eup %7835 }
 0x625   : > { %v6180_v52 = vmul.f32 %v11666_v19, %v6110_v6  ;;  %v6111_v41 = vmax.f32 %v5992_v34, 0.0  ;;  %v6335_v50 = vadd.f32 %v11764_v53, %v6216_v24  ;;  %v6583_v49 = vmul.f32 0.5, %v6520_v32 }
 0x626   : > { %v6521_v30 = vadd.f32 1.0, %v7836_v38  ;;  %v6218_v13 = vpop.xlane.xlu1 %6217 }
 0x627   : > { %v6181_v2 = vmul.f32 %v11666_v19, %v6111_v41  ;;  %v6398_v39 = vmul.f32 0.5, %v6335_v50  ;;  %v6336_v4 = vadd.f32 %v11764_v53, %v6218_v13  ;;  %6287 = vadd.xlane.f32.xlu0 %v6180_v52  ;;  %v6651_v17 = vsel %vm6644_vm0, %v6583_v49, %v12487_v59  ;;  %v12491_v41 = vld [vmem:[#allocation19_spill] sm:$0xff] }
 0x628   : > { %v6584_v48 = vmul.f32 0.5, %v6521_v30  ;;  %v5996_v35 = vpop.f32.mrb[220].mxu1  ;;  %6714 = vst [vmem:[%s11793_s22 + $0x20] sm:$0xff] %v6651_v17 }
 0x629   : > { %7841 = vtanh.f32 %v6398_v39  ;;  %v6399_v36 = vmul.f32 0.5, %v6336_v4  ;;  %v5997_v60 = vadd.f32 %v11656_v15, %v5996_v35  ;;  %v5998_v33 = vpop.f32.mrb[221].mxu1  ;;  %6289 = vadd.xlane.f32.xlu1 %v6181_v2  ;;  %v12492_v4 = vld [vmem:[#allocation21_spill] sm:$0xff] }
 0x62a   : > { %v6652_v12 = vsel %vm6644_vm0, %v6584_v48, %v12488_v10  ;;  %v5999_v28 = vpop.f32.mrb[222].mxu1  ;;  %v7838_v55 = vpop.eup %7837 }
 0x62b   : > { %6715 = vst [vmem:[%s11793_s22 + $0x28] sm:$0xff] %v6652_v12  ;;  %7843 = vtanh.f32 %v6399_v36  ;;  %v6112_v43 = vmax.f32 %v5997_v60, 0.0  ;;  %v6000_v9 = vadd.f32 %v11656_v15, %v5999_v28  ;;  %v6001_v29 = vpop.f32.mrb[223].mxu1  ;;  %v6522_v21 = vadd.f32 1.0, %v7838_v55 }
 0x62c   : > { %v6220_v8 = vpop.xlane.xlu0 %6219  ;;  %v7840_v40 = vpop.eup %7839 }
 0x62d   : > { %v6182_v63 = vmul.f32 %v11666_v19, %v6112_v43  ;;  %v6113_v22 = vmax.f32 %v6000_v9, 0.0  ;;  %v6337_v3 = vadd.f32 %v11764_v53, %v6220_v8  ;;  %v6585_v42 = vmul.f32 0.5, %v6522_v21 }
 0x62e   : > { %v6523_v61 = vadd.f32 1.0, %v7840_v40  ;;  %v6222_v11 = vpop.xlane.xlu1 %6221 }
 0x62f   : > { %v6183_v56 = vmul.f32 %v11666_v19, %v6113_v22  ;;  %v6400_v7 = vmul.f32 0.5, %v6337_v3  ;;  %v6338_v0 = vadd.f32 %v11764_v53, %v6222_v11  ;;  %6291 = vadd.xlane.f32.xlu0 %v6182_v63  ;;  %v6653_v14 = vsel %vm6644_vm0, %v6585_v42, %v12489_v54  ;;  %v11869_v11 = vld [vmem:[%s12217_s12] ss:$0 sm:$0xff] }
 0x630   : > { %v6586_v57 = vmul.f32 0.5, %v6523_v61  ;;  %v6004_v31 = vpop.f32.mrb[224].mxu1  ;;  %6716 = vst [vmem:[%s11793_s22 + $0x30] sm:$0xff] %v6653_v14 }
 0x631   : > { %7845 = vtanh.f32 %v6400_v7  ;;  %v6401_v44 = vmul.f32 0.5, %v6338_v0  ;;  %v6005_v16 = vadd.f32 %v11656_v15, %v6004_v31  ;;  %v6006_v45 = vpop.f32.mrb[225].mxu1  ;;  %6293 = vadd.xlane.f32.xlu1 %v6183_v56  ;;  %v12494_v7 = vld [vmem:[#allocation20_spill] sm:$0xff] }
 0x632   : > { %v6654_v47 = vsel %vm6644_vm0, %v6586_v57, %v12490_v23  ;;  %v6007_v5 = vpop.f32.mrb[226].mxu1 }
 0x633   : > { %v7842_v27 = vpop.eup %7841  ;;  %6717 = vst [vmem:[%s11793_s22 + $0x38] sm:$0xff] %v6654_v47  ;;  %7847 = vtanh.f32 %v6401_v44  ;;  %v6114_v25 = vmax.f32 %v6005_v16, 0.0  ;;  %v6008_v26 = vadd.f32 %v11656_v15, %v6007_v5  ;;  %v6009_v37 = vpop.f32.mrb[227].mxu1  ;;  %v11880_v47 = vld [vmem:[%s12218_s13] ss:$0 sm:$0xff] }
 0x634   : > { %v6524_v18 = vadd.f32 1.0, %v7842_v27  ;;  %v6224_v20 = vpop.xlane.xlu0 %6223 }
 0x635   : > { %v7844_v62 = vpop.eup %7843  ;;  %v6184_v58 = vmul.f32 %v11666_v19, %v6114_v25  ;;  %v6115_v46 = vmax.f32 %v6008_v26, 0.0  ;;  %v6339_v6 = vadd.f32 %v11764_v53, %v6224_v20 }
 0x636   : > { %v6587_v34 = vmul.f32 0.5, %v6524_v18  ;;  %v6525_v1 = vadd.f32 1.0, %v7844_v62  ;;  %v6226_v32 = vpop.xlane.xlu1 %6225 }
 0x637   : > { %v6185_v24 = vmul.f32 %v11666_v19, %v6115_v46  ;;  %v6402_v38 = vmul.f32 0.5, %v6339_v6  ;;  %v6340_v52 = vadd.f32 %v11764_v53, %v6226_v32  ;;  %6295 = vadd.xlane.f32.xlu0 %v6184_v58  ;;  %v12495_v46 = vld [vmem:[#allocation23_spill] sm:$0xff] }
 0x638   : > { %v6655_v50 = vsel %vm6644_vm0, %v6587_v34, %v12491_v41  ;;  %v6588_v49 = vmul.f32 0.5, %v6525_v1  ;;  %v6012_v30 = vpop.f32.mrb[228].mxu1 }
 0x639   : > { %6718 = vst [vmem:[%s11793_s22 + $0x40] sm:$0xff] %v6655_v50  ;;  %7849 = vtanh.f32 %v6402_v38  ;;  %v6403_v13 = vmul.f32 0.5, %v6340_v52  ;;  %v6013_v2 = vadd.f32 %v11656_v15, %v6012_v30  ;;  %v6014_v39 = vpop.f32.mrb[229].mxu1  ;;  %6297 = vadd.xlane.f32.xlu1 %v6185_v24  ;;  %v12496_v52 = vld [vmem:[#allocation25_spill] sm:$0xff] }
 0x63a   : > { %v6656_v59 = vsel %vm6644_vm0, %v6588_v49, %v12492_v4  ;;  %v6015_v17 = vpop.f32.mrb[230].mxu1 }
 0x63b   : > { %v7846_v48 = vpop.eup %7845  ;;  %6719 = vst [vmem:[%s11793_s22 + $0x48] sm:$0xff] %v6656_v59  ;;  %7851 = vtanh.f32 %v6403_v13  ;;  %v6116_v35 = vmax.f32 %v6013_v2, 0.0  ;;  %v6016_v36 = vadd.f32 %v11656_v15, %v6015_v17  ;;  %v6017_v60 = vpop.f32.mrb[231].mxu1  ;;  %v12493_v15 = vld [vmem:[#allocation18_spill] sm:$0xff] }
 0x63c   : > { %v6526_v33 = vadd.f32 1.0, %v7846_v48  ;;  %v6228_v10 = vpop.xlane.xlu0 %6227 }
 0x63d   : > { %v7848_v12 = vpop.eup %7847  ;;  %v6186_v28 = vmul.f32 %v11666_v19, %v6116_v35  ;;  %v6117_v55 = vmax.f32 %v6016_v36, 0.0  ;;  %v6341_v43 = vadd.f32 %v11764_v53, %v6228_v10 }
 0x63e   : > { %v6589_v9 = vmul.f32 0.5, %v6526_v33  ;;  %v6527_v29 = vadd.f32 1.0, %v7848_v12  ;;  %v6230_v21 = vpop.xlane.xlu1 %6229 }
 0x63f   : > { %v6187_v8 = vmul.f32 %v11666_v19, %v6117_v55  ;;  %v6404_v40 = vmul.f32 0.5, %v6341_v43  ;;  %v6342_v63 = vadd.f32 %v11764_v53, %v6230_v21  ;;  %6299 = vadd.xlane.f32.xlu0 %v6186_v28  ;;  %v12497_v55 = vld [vmem:[#allocation22_spill] sm:$0xff] }
 0x640   : > { %v6657_v22 = vsel %vm6644_vm0, %v6589_v9, %v12493_v15  ;;  %v6590_v3 = vmul.f32 0.5, %v6527_v29  ;;  %v6020_v42 = vpop.f32.mrb[232].mxu1 }
 0x641   : > { %6720 = vst [vmem:[%s11793_s22 + $0x50] sm:$0xff] %v6657_v22  ;;  %7853 = vtanh.f32 %v6404_v40  ;;  %v6405_v61 = vmul.f32 0.5, %v6342_v63  ;;  %v6021_v19 = vadd.f32 %v11869_v11, %v6020_v42  ;;  %v6022_v56 = vpop.f32.mrb[233].mxu1  ;;  %6301 = vadd.xlane.f32.xlu1 %v6187_v8  ;;  %v12498_v63 = vld [vmem:[#allocation24_spill] sm:$0xff] }
 0x642   : > { %v6658_v0 = vsel %vm6644_vm0, %v6590_v3, %v12494_v7  ;;  %v6023_v54 = vpop.f32.mrb[234].mxu1 }
 0x643   : > { %v7850_v14 = vpop.eup %7849  ;;  %6721 = vst [vmem:[%s11793_s22 + $0x58] sm:$0xff] %v6658_v0  ;;  %7855 = vtanh.f32 %v6405_v61  ;;  %v6118_v57 = vmax.f32 %v6021_v19, 0.0  ;;  %v6024_v31 = vadd.f32 %v11869_v11, %v6023_v54  ;;  %v6025_v44 = vpop.f32.mrb[235].mxu1 }
 0x644   : > { %v6528_v16 = vadd.f32 1.0, %v7850_v14  ;;  %v6232_v45 = vpop.xlane.xlu0 %6231 }
 0x645   : > { %v7852_v23 = vpop.eup %7851  ;;  %v6188_v5 = vmul.f32 %v11880_v47, %v6118_v57  ;;  %v6119_v27 = vmax.f32 %v6024_v31, 0.0  ;;  %v6343_v25 = vadd.f32 %v11764_v53, %v6232_v45 }
 0x646   : > { %v6591_v26 = vmul.f32 0.5, %v6528_v16  ;;  %v6529_v37 = vadd.f32 1.0, %v7852_v23  ;;  %v6234_v18 = vpop.xlane.xlu1 %6233 }
 0x647   : > { %v6189_v20 = vmul.f32 %v11880_v47, %v6119_v27  ;;  %v6406_v62 = vmul.f32 0.5, %v6343_v25  ;;  %v6344_v58 = vadd.f32 %v11764_v53, %v6234_v18  ;;  %6303 = vadd.xlane.f32.xlu0 %v6188_v5  ;;  %v12499_v27 = vld [vmem:[#allocation27_spill] sm:$0xff] }
 0x648   : > { %v6659_v6 = vsel %vm6644_vm0, %v6591_v26, %v12495_v46  ;;  %v6592_v34 = vmul.f32 0.5, %v6529_v37  ;;  %v6028_v1 = vpop.f32.mrb[236].mxu1 }
 0x649   : > { %6722 = vst [vmem:[%s11793_s22 + $0x60] sm:$0xff] %v6659_v6  ;;  %7857 = vtanh.f32 %v6406_v62  ;;  %v6407_v32 = vmul.f32 0.5, %v6344_v58  ;;  %v6029_v24 = vadd.f32 %v11869_v11, %v6028_v1  ;;  %v6030_v38 = vpop.f32.mrb[237].mxu1  ;;  %6305 = vadd.xlane.f32.xlu1 %v6189_v20  ;;  %v12500_v58 = vld [vmem:[#allocation29_spill] sm:$0xff] }
 0x64a   : > { %v6660_v41 = vsel %vm6644_vm0, %v6592_v34, %v12496_v52  ;;  %v6031_v50 = vpop.f32.mrb[238].mxu1 }
 0x64b   : > { %v7854_v49 = vpop.eup %7853  ;;  %6723 = vst [vmem:[%s11793_s22 + $0x68] sm:$0xff] %v6660_v41  ;;  %7859 = vtanh.f32 %v6407_v32  ;;  %v6120_v30 = vmax.f32 %v6029_v24, 0.0  ;;  %v6032_v13 = vadd.f32 %v11869_v11, %v6031_v50  ;;  %v6033_v2 = vpop.f32.mrb[239].mxu1 }
 0x64c   : > { %v6530_v39 = vadd.f32 1.0, %v7854_v49  ;;  %v6236_v4 = vpop.xlane.xlu0 %6235 }
 0x64d   : > { %v7856_v59 = vpop.eup %7855  ;;  %v6190_v17 = vmul.f32 %v11880_v47, %v6120_v30  ;;  %v6121_v48 = vmax.f32 %v6032_v13, 0.0  ;;  %v6345_v35 = vadd.f32 %v11764_v53, %v6236_v4 }
 0x64e   : > { %v6593_v36 = vmul.f32 0.5, %v6530_v39  ;;  %v6531_v60 = vadd.f32 1.0, %v7856_v59  ;;  %v6238_v33 = vpop.xlane.xlu1 %6237 }
 0x64f   : > { %v6191_v10 = vmul.f32 %v11880_v47, %v6121_v48  ;;  %v6408_v12 = vmul.f32 0.5, %v6345_v35  ;;  %v6346_v28 = vadd.f32 %v11764_v53, %v6238_v33  ;;  %6307 = vadd.xlane.f32.xlu0 %v6190_v17  ;;  %v12501_v48 = vld [vmem:[#allocation26_spill] sm:$0xff] }
 0x650   : > { %v6661_v43 = vsel %vm6644_vm0, %v6593_v36, %v12497_v55  ;;  %v6594_v9 = vmul.f32 0.5, %v6531_v60  ;;  %v6036_v29 = vpop.f32.mrb[240].mxu1 }
 0x651   : > { %6724 = vst [vmem:[%s11793_s22 + $0x70] sm:$0xff] %v6661_v43  ;;  %7861 = vtanh.f32 %v6408_v12  ;;  %v6409_v21 = vmul.f32 0.5, %v6346_v28  ;;  %v6037_v8 = vadd.f32 %v11869_v11, %v6036_v29  ;;  %v6038_v40 = vpop.f32.mrb[241].mxu1  ;;  %6309 = vadd.xlane.f32.xlu1 %v6191_v10  ;;  %v12502_v28 = vld [vmem:[#allocation28_spill] sm:$0xff] }
 0x652   : > { %v6662_v15 = vsel %vm6644_vm0, %v6594_v9, %v12498_v63  ;;  %v6039_v22 = vpop.f32.mrb[242].mxu1 }
 0x653   : > { %v7858_v3 = vpop.eup %7857  ;;  %6725 = vst [vmem:[%s11793_s22 + $0x78] sm:$0xff] %v6662_v15  ;;  %7863 = vtanh.f32 %v6409_v21  ;;  %v6122_v42 = vmax.f32 %v6037_v8, 0.0  ;;  %v6040_v61 = vadd.f32 %v11869_v11, %v6039_v22  ;;  %v6041_v19 = vpop.f32.mrb[243].mxu1 }
 0x654   : > { %v6532_v56 = vadd.f32 1.0, %v7858_v3  ;;  %v6240_v7 = vpop.xlane.xlu0 %6239 }
 0x655   : > { %v7860_v0 = vpop.eup %7859  ;;  %v6192_v54 = vmul.f32 %v11880_v47, %v6122_v42  ;;  %v6123_v14 = vmax.f32 %v6040_v61, 0.0  ;;  %v6347_v57 = vadd.f32 %v11764_v53, %v6240_v7 }
 0x656   : > { %v6595_v31 = vmul.f32 0.5, %v6532_v56  ;;  %v6533_v44 = vadd.f32 1.0, %v7860_v0  ;;  %v6242_v16 = vpop.xlane.xlu1 %6241 }
 0x657   : > { %v6193_v45 = vmul.f32 %v11880_v47, %v6123_v14  ;;  %v6410_v23 = vmul.f32 0.5, %v6347_v57  ;;  %v6348_v5 = vadd.f32 %v11764_v53, %v6242_v16  ;;  %6311 = vadd.xlane.f32.xlu0 %v6192_v54  ;;  %v12503_v14 = vld [vmem:[#allocation31_spill] sm:$0xff] }
 0x658   : > { %v6663_v25 = vsel %vm6644_vm0, %v6595_v31, %v12499_v27  ;;  %v6596_v26 = vmul.f32 0.5, %v6533_v44  ;;  %v6044_v37 = vpop.f32.mrb[244].mxu1 }
 0x659   : > { %6726 = vst [vmem:[%s11793_s22 + $0x80] sm:$0xff] %v6663_v25  ;;  %7865 = vtanh.f32 %v6410_v23  ;;  %v6411_v18 = vmul.f32 0.5, %v6348_v5  ;;  %v6045_v20 = vadd.f32 %v11869_v11, %v6044_v37  ;;  %v6046_v62 = vpop.f32.mrb[245].mxu1  ;;  %6313 = vadd.xlane.f32.xlu1 %v6193_v45  ;;  %v12504_v5 = vld [vmem:[#allocation33_spill] sm:$0xff] }
 0x65a   : > { %v6664_v46 = vsel %vm6644_vm0, %v6596_v26, %v12500_v58  ;;  %v6047_v6 = vpop.f32.mrb[246].mxu1 }
 0x65b   : > { %v7862_v34 = vpop.eup %7861  ;;  %6727 = vst [vmem:[%s11793_s22 + $0x88] sm:$0xff] %v6664_v46  ;;  %7867 = vtanh.f32 %v6411_v18  ;;  %v6124_v1 = vmax.f32 %v6045_v20, 0.0  ;;  %v6048_v32 = vadd.f32 %v11869_v11, %v6047_v6  ;;  %v6049_v24 = vpop.f32.mrb[247].mxu1 }
 0x65c   : > { %v6534_v38 = vadd.f32 1.0, %v7862_v34  ;;  %v6244_v52 = vpop.xlane.xlu0 %6243 }
 0x65d   : > { %v7864_v41 = vpop.eup %7863  ;;  %v6194_v50 = vmul.f32 %v11880_v47, %v6124_v1  ;;  %v6125_v49 = vmax.f32 %v6048_v32, 0.0  ;;  %v6349_v30 = vadd.f32 %v11764_v53, %v6244_v52 }
 0x65e   : > { %v6597_v13 = vmul.f32 0.5, %v6534_v38  ;;  %v6535_v2 = vadd.f32 1.0, %v7864_v41  ;;  %v6246_v39 = vpop.xlane.xlu1 %6245  ;;  %v12505_v38 = vld [vmem:[#allocation30_spill] sm:$0xff] }
 0x65f   : > { %v6195_v4 = vmul.f32 %v11880_v47, %v6125_v49  ;;  %v6412_v59 = vmul.f32 0.5, %v6349_v30  ;;  %v6350_v17 = vadd.f32 %v11764_v53, %v6246_v39  ;;  %6315 = vadd.xlane.f32.xlu0 %v6194_v50  ;;  %v12506_v49 = vld [vmem:[#allocation32_spill] sm:$0xff] }
 0x660   : > { %v6665_v35 = vsel %vm6644_vm0, %v6597_v13, %v12501_v48  ;;  %v6598_v36 = vmul.f32 0.5, %v6535_v2  ;;  %v6052_v60 = vpop.f32.mrb[248].mxu1 }
 0x661   : > { %6728 = vst [vmem:[%s11793_s22 + $0x90] sm:$0xff] %v6665_v35  ;;  %7869 = vtanh.f32 %v6412_v59  ;;  %v6413_v33 = vmul.f32 0.5, %v6350_v17  ;;  %v6053_v10 = vadd.f32 %v11869_v11, %v6052_v60  ;;  %v6054_v12 = vpop.f32.mrb[249].mxu1  ;;  %6317 = vadd.xlane.f32.xlu1 %v6195_v4  ;;  %v12507_v60 = vld [vmem:[#allocation39_spill] sm:$0xff] }
 0x662   : > { %v6666_v55 = vsel %vm6644_vm0, %v6598_v36, %v12502_v28  ;;  %v6055_v43 = vpop.f32.mrb[250].mxu1  ;;  %v12508_v28 = vld [vmem:[#allocation41_spill] sm:$0xff] }
 0x663   : > { %v7866_v9 = vpop.eup %7865  ;;  %6729 = vst [vmem:[%s11793_s22 + $0x98] sm:$0xff] %v6666_v55  ;;  %7871 = vtanh.f32 %v6413_v33  ;;  %v6126_v29 = vmax.f32 %v6053_v10, 0.0  ;;  %v6056_v21 = vadd.f32 %v11869_v11, %v6055_v43  ;;  %v6057_v8 = vpop.f32.mrb[251].mxu1 }
 0x664   : > { %v6536_v40 = vadd.f32 1.0, %v7866_v9  ;;  %v6248_v63 = vpop.xlane.xlu0 %6247 }
 0x665   : > { %v7868_v15 = vpop.eup %7867  ;;  %v6196_v22 = vmul.f32 %v11880_v47, %v6126_v29  ;;  %v6127_v3 = vmax.f32 %v6056_v21, 0.0  ;;  %v6351_v42 = vadd.f32 %v11764_v53, %v6248_v63 }
 0x666   : > { %v6599_v61 = vmul.f32 0.5, %v6536_v40  ;;  %v6537_v19 = vadd.f32 1.0, %v7868_v15  ;;  %v6250_v56 = vpop.xlane.xlu1 %6249 }
 0x667   : > { %v6197_v7 = vmul.f32 %v11880_v47, %v6127_v3  ;;  %v6414_v0 = vmul.f32 0.5, %v6351_v42  ;;  %v6352_v54 = vadd.f32 %v11764_v53, %v6250_v56  ;;  %6319 = vadd.xlane.f32.xlu0 %v6196_v22  ;;  %v12509_v42 = vld [vmem:[#allocation38_spill] sm:$0xff] }
 0x668   : > { %v6667_v57 = vsel %vm6644_vm0, %v6599_v61, %v12503_v14  ;;  %v6600_v31 = vmul.f32 0.5, %v6537_v19  ;;  %v6060_v44 = vpop.f32.mrb[252].mxu1 }
 0x669   : > { %6730 = vst [vmem:[%s11793_s22 + $0xa0] sm:$0xff] %v6667_v57  ;;  %7873 = vtanh.f32 %v6414_v0  ;;  %v6415_v16 = vmul.f32 0.5, %v6352_v54  ;;  %v6061_v45 = vadd.f32 %v11869_v11, %v6060_v44  ;;  %6321 = vadd.xlane.f32.xlu1 %v6197_v7  ;;  %v6062_v23 = vpop.f32.mrb[253].mxu1  ;;  %v12510_v7 = vld [vmem:[#allocation40_spill] sm:$0xff] }
 0x66a   : > { %v6668_v27 = vsel %vm6644_vm0, %v6600_v31, %v12504_v5  ;;  %v6063_v25 = vpop.f32.mrb[254].mxu1 }
 0x66b   : > { %v7870_v26 = vpop.eup %7869  ;;  %6731 = vst [vmem:[%s11793_s22 + $0xa8] sm:$0xff] %v6668_v27  ;;  %7875 = vtanh.f32 %v6415_v16  ;;  %v6128_v37 = vmax.f32 %v6061_v45, 0.0  ;;  %v6064_v18 = vpop.f32.mrb[255].mxu1  ;;  %v12511_v25 = vld [vmem:[#allocation44_spill] sm:$0xff] }
 0x66c   : > { %v6538_v20 = vadd.f32 1.0, %v7870_v26  ;;  %v6252_v62 = vpop.xlane.xlu0 %6251 }
 0x66d   : > { %v7872_v58 = vpop.eup %7871  ;;  %v6198_v46 = vmul.f32 %v11880_v47, %v6128_v37  ;;  %v6353_v11 = vadd.f32 %v11764_v53, %v6252_v62 }
 0x66e   : > { %v6601_v6 = vmul.f32 0.5, %v6538_v20  ;;  %v6539_v34 = vadd.f32 1.0, %v7872_v58  ;;  %v6254_v1 = vpop.xlane.xlu1 %6253  ;;  %v12512_v20 = vld [vmem:[#allocation45_spill] sm:$0xff] }
 0x66f   : > { %v6416_v32 = vmul.f32 0.5, %v6353_v11  ;;  %v6354_v24 = vadd.f32 %v11764_v53, %v6254_v1  ;;  %6323 = vadd.xlane.f32.xlu0 %v6198_v46 }
 0x670   : > { %v6669_v52 = vsel %vm6644_vm0, %v6601_v6, %v12505_v38  ;;  %v6602_v41 = vmul.f32 0.5, %v6539_v34 }
 0x671   : > { %6732 = vst [vmem:[%s11793_s22 + $0xb0] sm:$0xff] %v6669_v52  ;;  %7877 = vtanh.f32 %v6416_v32  ;;  %v6417_v50 = vmul.f32 0.5, %v6354_v24 }
 0x672   : > { %v6670_v47 = vsel %vm6644_vm0, %v6602_v41, %v12506_v49  ;;  %v12513_v41 = vld [vmem:[#allocation43_spill] sm:$0xff] }
 0x673   : > { %v7874_v30 = vpop.eup %7873  ;;  %6733 = vst [vmem:[%s11793_s22 + $0xb8] sm:$0xff] %v6670_v47  ;;  %7879 = vtanh.f32 %v6417_v50 }
 0x674   : > { %v6540_v13 = vadd.f32 1.0, %v7874_v30  ;;  %v6256_v2 = vpop.xlane.xlu0 %6255  ;;  %v12514_v30 = vld [vmem:[#allocation46_spill] sm:$0xff] }
 0x675   : > { %v7876_v39 = vpop.eup %7875  ;;  %v6355_v4 = vadd.f32 %v11764_v53, %v6256_v2 }
 0x676   : > { %v6603_v59 = vmul.f32 0.5, %v6540_v13  ;;  %v6541_v17 = vadd.f32 1.0, %v7876_v39  ;;  %v6258_v48 = vpop.xlane.xlu1 %6257 }
 0x677   : > { %v6418_v35 = vmul.f32 0.5, %v6355_v4  ;;  %v6356_v36 = vadd.f32 %v11764_v53, %v6258_v48 }
 0x678   : > { %v6671_v33 = vsel %vm6644_vm0, %v6603_v59, %v12507_v60  ;;  %v6604_v10 = vmul.f32 0.5, %v6541_v17 }
 0x679   : > { %6734 = vst [vmem:[%s11793_s22 + $0xc0] sm:$0xff] %v6671_v33  ;;  %7881 = vtanh.f32 %v6418_v35  ;;  %v6419_v12 = vmul.f32 0.5, %v6356_v36 }
 0x67a   : > { %v6672_v55 = vsel %vm6644_vm0, %v6604_v10, %v12508_v28  ;;  %v12515_v10 = vld [vmem:[#allocation50_spill] sm:$0xff] }
 0x67b   : > { %v7878_v43 = vpop.eup %7877  ;;  %6735 = vst [vmem:[%s11793_s22 + $0xc8] sm:$0xff] %v6672_v55  ;;  %7883 = vtanh.f32 %v6419_v12 }
 0x67c   : > { %v6542_v9 = vadd.f32 1.0, %v7878_v43  ;;  %v6260_v29 = vpop.xlane.xlu0 %6259  ;;  %v12516_v43 = vld [vmem:[#allocation52_spill] sm:$0xff] }
 0x67d   : > { %v7880_v21 = vpop.eup %7879  ;;  %v6357_v8 = vadd.f32 %v11764_v53, %v6260_v29 }
 0x67e   : > { %v6605_v40 = vmul.f32 0.5, %v6542_v9  ;;  %v6543_v63 = vadd.f32 1.0, %v7880_v21  ;;  %v6262_v15 = vpop.xlane.xlu1 %6261 }
 0x67f   : > { %v6420_v22 = vmul.f32 0.5, %v6357_v8  ;;  %v6358_v3 = vadd.f32 %v11764_v53, %v6262_v15 }
 0x680   : > { %v6673_v61 = vsel %vm6644_vm0, %v6605_v40, %v12509_v42  ;;  %v6606_v19 = vmul.f32 0.5, %v6543_v63 }
 0x681   : > { %6736 = vst [vmem:[%s11793_s22 + $0xd0] sm:$0xff] %v6673_v61  ;;  %7885 = vtanh.f32 %v6420_v22  ;;  %v6421_v56 = vmul.f32 0.5, %v6358_v3 }
 0x682   : > { %v6674_v0 = vsel %vm6644_vm0, %v6606_v19, %v12510_v7  ;;  %v12517_v19 = vld [vmem:[#allocation49_spill] sm:$0xff] }
 0x683   : > { %v7882_v54 = vpop.eup %7881  ;;  %6737 = vst [vmem:[%s11793_s22 + $0xd8] sm:$0xff] %v6674_v0  ;;  %7887 = vtanh.f32 %v6421_v56 }
 0x684   : > { %v6544_v14 = vadd.f32 1.0, %v7882_v54  ;;  %v6264_v57 = vpop.xlane.xlu0 %6263  ;;  %v12518_v54 = vld [vmem:[#allocation51_spill] sm:$0xff] }
 0x685   : > { %v7884_v31 = vpop.eup %7883  ;;  %v6359_v44 = vadd.f32 %v11764_v53, %v6264_v57 }
 0x686   : > { %v6607_v16 = vmul.f32 0.5, %v6544_v14  ;;  %v6545_v45 = vadd.f32 1.0, %v7884_v31  ;;  %v6266_v23 = vpop.xlane.xlu1 %6265 }
 0x687   : > { %v6422_v5 = vmul.f32 0.5, %v6359_v44  ;;  %v6360_v27 = vadd.f32 %v11764_v53, %v6266_v23 }
 0x688   : > { %v6675_v26 = vsel %vm6644_vm0, %v6607_v16, %v12511_v25  ;;  %v6608_v37 = vmul.f32 0.5, %v6545_v45 }
 0x689   : > { %6738 = vst [vmem:[%s11793_s22 + $0xe0] sm:$0xff] %v6675_v26  ;;  %7889 = vtanh.f32 %v6422_v5  ;;  %v6423_v18 = vmul.f32 0.5, %v6360_v27 }
 0x68a   : > { %v6676_v62 = vsel %vm6644_vm0, %v6608_v37, %v12512_v20  ;;  %v12519_v37 = vld [vmem:[#allocation56_spill] sm:$0xff] }
 0x68b   : > { %v7886_v58 = vpop.eup %7885  ;;  %6739 = vst [vmem:[%s11793_s22 + $0xe8] sm:$0xff] %v6676_v62  ;;  %7891 = vtanh.f32 %v6423_v18 }
 0x68c   : > { %v6546_v46 = vadd.f32 1.0, %v7886_v58  ;;  %v6268_v11 = vpop.xlane.xlu0 %6267  ;;  %v12520_v58 = vld [vmem:[#allocation58_spill] sm:$0xff] }
 0x68d   : > { %v7888_v6 = vpop.eup %7887  ;;  %v6361_v34 = vadd.f32 %v11764_v53, %v6268_v11 }
 0x68e   : > { %v6609_v1 = vmul.f32 0.5, %v6546_v46  ;;  %v6547_v32 = vadd.f32 1.0, %v7888_v6  ;;  %v6270_v24 = vpop.xlane.xlu1 %6269 }
 0x68f   : > { %v6424_v38 = vmul.f32 0.5, %v6361_v34  ;;  %v6362_v52 = vadd.f32 %v11764_v53, %v6270_v24 }
 0x690   : > { %v6677_v50 = vsel %vm6644_vm0, %v6609_v1, %v12513_v41  ;;  %v6610_v49 = vmul.f32 0.5, %v6547_v32 }
 0x691   : > { %6740 = vst [vmem:[%s11793_s22 + $0xf0] sm:$0xff] %v6677_v50  ;;  %7893 = vtanh.f32 %v6424_v38  ;;  %v6425_v47 = vmul.f32 0.5, %v6362_v52 }
 0x692   : > { %v6678_v13 = vsel %vm6644_vm0, %v6610_v49, %v12514_v30  ;;  %v12521_v49 = vld [vmem:[#allocation55_spill] sm:$0xff] }
 0x693   : > { %v7890_v2 = vpop.eup %7889  ;;  %6741 = vst [vmem:[%s11793_s22 + $0xf8] sm:$0xff] %v6678_v13  ;;  %7895 = vtanh.f32 %v6425_v47 }
 0x694   : > { %v6548_v39 = vadd.f32 1.0, %v7890_v2  ;;  %v6272_v4 = vpop.xlane.xlu0 %6271  ;;  %v12522_v2 = vld [vmem:[#allocation57_spill] sm:$0xff] }
 0x695   : > { %v7892_v59 = vpop.eup %7891  ;;  %v6363_v17 = vadd.f32 %v11764_v53, %v6272_v4 }
 0x696   : > { %v6611_v48 = vmul.f32 0.5, %v6548_v39  ;;  %v6549_v35 = vadd.f32 1.0, %v7892_v59  ;;  %v6274_v36 = vpop.xlane.xlu1 %6273 }
 0x697   : > { %v6426_v60 = vmul.f32 0.5, %v6363_v17  ;;  %v6364_v33 = vadd.f32 %v11764_v53, %v6274_v36 }
 0x698   : > { %v6679_v12 = vsel %vm6644_vm0, %v6611_v48, %v12515_v10  ;;  %v6612_v28 = vmul.f32 0.5, %v6549_v35 }
 0x699   : > { %6742 = vst [vmem:[%s11793_s22 + $0x100] sm:$0xff] %v6679_v12  ;;  %7897 = vtanh.f32 %v6426_v60  ;;  %v6427_v55 = vmul.f32 0.5, %v6364_v33 }
 0x69a   : > { %v6680_v9 = vsel %vm6644_vm0, %v6612_v28, %v12516_v43  ;;  %v12523_v28 = vld [vmem:[#allocation65_spill] sm:$0xff] }
 0x69b   : > { %v7894_v29 = vpop.eup %7893  ;;  %6743 = vst [vmem:[%s11793_s22 + $0x108] sm:$0xff] %v6680_v9  ;;  %7899 = vtanh.f32 %v6427_v55 }
 0x69c   : > { %v6550_v21 = vadd.f32 1.0, %v7894_v29  ;;  %v6276_v8 = vpop.xlane.xlu0 %6275  ;;  %v12524_v29 = vld [vmem:[#allocation67_spill] sm:$0xff] }
 0x69d   : > { %v7896_v40 = vpop.eup %7895  ;;  %v6365_v63 = vadd.f32 %v11764_v53, %v6276_v8 }
 0x69e   : > { %v6613_v15 = vmul.f32 0.5, %v6550_v21  ;;  %v6551_v22 = vadd.f32 1.0, %v7896_v40  ;;  %v6278_v3 = vpop.xlane.xlu1 %6277 }
 0x69f   : > { %v6428_v42 = vmul.f32 0.5, %v6365_v63  ;;  %v6366_v61 = vadd.f32 %v11764_v53, %v6278_v3 }
 0x6a0   : > { %v6681_v56 = vsel %vm6644_vm0, %v6613_v15, %v12517_v19  ;;  %v6614_v7 = vmul.f32 0.5, %v6551_v22 }
 0x6a1   : > { %6744 = vst [vmem:[%s11793_s22 + $0x110] sm:$0xff] %v6681_v56  ;;  %7901 = vtanh.f32 %v6428_v42  ;;  %v6429_v0 = vmul.f32 0.5, %v6366_v61 }
 0x6a2   : > { %v6682_v14 = vsel %vm6644_vm0, %v6614_v7, %v12518_v54  ;;  %v12525_v7 = vld [vmem:[#allocation64_spill] sm:$0xff] }
 0x6a3   : > { %v7898_v57 = vpop.eup %7897  ;;  %6745 = vst [vmem:[%s11793_s22 + $0x118] sm:$0xff] %v6682_v14  ;;  %7903 = vtanh.f32 %v6429_v0 }
 0x6a4   : > { %v6552_v31 = vadd.f32 1.0, %v7898_v57  ;;  %v6280_v44 = vpop.xlane.xlu0 %6279  ;;  %v12526_v57 = vld [vmem:[#allocation66_spill] sm:$0xff] }
 0x6a5   : > { %v7900_v16 = vpop.eup %7899  ;;  %v6367_v45 = vadd.f32 %v11764_v53, %v6280_v44 }
 0x6a6   : > { %v6615_v23 = vmul.f32 0.5, %v6552_v31  ;;  %v6553_v5 = vadd.f32 1.0, %v7900_v16  ;;  %v6282_v27 = vpop.xlane.xlu1 %6281 }
 0x6a7   : > { %v6430_v25 = vmul.f32 0.5, %v6367_v45  ;;  %v6368_v26 = vadd.f32 %v11764_v53, %v6282_v27 }
 0x6a8   : > { %v6683_v18 = vsel %vm6644_vm0, %v6615_v23, %v12519_v37  ;;  %v6616_v20 = vmul.f32 0.5, %v6553_v5 }
 0x6a9   : > { %6746 = vst [vmem:[%s11793_s22 + $0x120] sm:$0xff] %v6683_v18  ;;  %7905 = vtanh.f32 %v6430_v25  ;;  %v6431_v62 = vmul.f32 0.5, %v6368_v26 }
 0x6aa   : > { %v6684_v46 = vsel %vm6644_vm0, %v6616_v20, %v12520_v58  ;;  %v12527_v20 = vld [vmem:[#allocation74_spill] sm:$0xff] }
 0x6ab   : > { %v7902_v11 = vpop.eup %7901  ;;  %6747 = vst [vmem:[%s11793_s22 + $0x128] sm:$0xff] %v6684_v46  ;;  %7907 = vtanh.f32 %v6431_v62 }
 0x6ac   : > { %v6554_v6 = vadd.f32 1.0, %v7902_v11  ;;  %v6284_v34 = vpop.xlane.xlu0 %6283  ;;  %v12528_v11 = vld [vmem:[#allocation76_spill] sm:$0xff] }
 0x6ad   : > { %v7904_v1 = vpop.eup %7903  ;;  %v6369_v32 = vadd.f32 %v11764_v53, %v6284_v34 }
 0x6ae   : > { %v6617_v24 = vmul.f32 0.5, %v6554_v6  ;;  %v6555_v38 = vadd.f32 1.0, %v7904_v1  ;;  %v6286_v52 = vpop.xlane.xlu1 %6285 }
 0x6af   : > { %v6432_v41 = vmul.f32 0.5, %v6369_v32  ;;  %v6370_v50 = vadd.f32 %v11764_v53, %v6286_v52 }
 0x6b0   : > { %v6685_v47 = vsel %vm6644_vm0, %v6617_v24, %v12521_v49  ;;  %v6618_v30 = vmul.f32 0.5, %v6555_v38 }
 0x6b1   : > { %6748 = vst [vmem:[%s11793_s22 + $0x130] sm:$0xff] %v6685_v47  ;;  %7909 = vtanh.f32 %v6432_v41  ;;  %v6433_v13 = vmul.f32 0.5, %v6370_v50 }
 0x6b2   : > { %v6686_v39 = vsel %vm6644_vm0, %v6618_v30, %v12522_v2  ;;  %v12529_v30 = vld [vmem:[#allocation73_spill] sm:$0xff] }
 0x6b3   : > { %v7906_v4 = vpop.eup %7905  ;;  %6749 = vst [vmem:[%s11793_s22 + $0x138] sm:$0xff] %v6686_v39  ;;  %7911 = vtanh.f32 %v6433_v13 }
 0x6b4   : > { %v6556_v59 = vadd.f32 1.0, %v7906_v4  ;;  %v6288_v17 = vpop.xlane.xlu0 %6287  ;;  %v12530_v4 = vld [vmem:[#allocation75_spill] sm:$0xff] }
 0x6b5   : > { %v7908_v48 = vpop.eup %7907  ;;  %v6371_v35 = vadd.f32 %v11764_v53, %v6288_v17 }
 0x6b6   : > { %v6619_v36 = vmul.f32 0.5, %v6556_v59  ;;  %v6557_v60 = vadd.f32 1.0, %v7908_v48  ;;  %v6290_v33 = vpop.xlane.xlu1 %6289 }
 0x6b7   : > { %v6434_v10 = vmul.f32 0.5, %v6371_v35  ;;  %v6372_v12 = vadd.f32 %v11764_v53, %v6290_v33 }
 0x6b8   : > { %v6687_v55 = vsel %vm6644_vm0, %v6619_v36, %v12523_v28  ;;  %v6620_v43 = vmul.f32 0.5, %v6557_v60 }
 0x6b9   : > { %6750 = vst [vmem:[%s11793_s22 + $0x140] sm:$0xff] %v6687_v55  ;;  %7913 = vtanh.f32 %v6434_v10  ;;  %v6435_v9 = vmul.f32 0.5, %v6372_v12 }
 0x6ba   : > { %v6688_v21 = vsel %vm6644_vm0, %v6620_v43, %v12524_v29  ;;  %v12531_v43 = vld [vmem:[#allocation81_spill] sm:$0xff] }
 0x6bb   : > { %v7910_v8 = vpop.eup %7909  ;;  %6751 = vst [vmem:[%s11793_s22 + $0x148] sm:$0xff] %v6688_v21  ;;  %7915 = vtanh.f32 %v6435_v9 }
 0x6bc   : > { %v6558_v40 = vadd.f32 1.0, %v7910_v8  ;;  %v6292_v63 = vpop.xlane.xlu0 %6291  ;;  %v12532_v8 = vld [vmem:[#allocation85_spill] sm:$0xff] }
 0x6bd   : > { %v7912_v15 = vpop.eup %7911  ;;  %v6373_v22 = vadd.f32 %v11764_v53, %v6292_v63 }
 0x6be   : > { %v6621_v3 = vmul.f32 0.5, %v6558_v40  ;;  %v6559_v42 = vadd.f32 1.0, %v7912_v15  ;;  %v6294_v61 = vpop.xlane.xlu1 %6293 }
 0x6bf   : > { %v6436_v19 = vmul.f32 0.5, %v6373_v22  ;;  %v6374_v56 = vadd.f32 %v11764_v53, %v6294_v61 }
 0x6c0   : > { %v6689_v0 = vsel %vm6644_vm0, %v6621_v3, %v12525_v7  ;;  %v6622_v54 = vmul.f32 0.5, %v6559_v42 }
 0x6c1   : > { %6752 = vst [vmem:[%s11793_s22 + $0x150] sm:$0xff] %v6689_v0  ;;  %7917 = vtanh.f32 %v6436_v19  ;;  %v6437_v14 = vmul.f32 0.5, %v6374_v56 }
 0x6c2   : > { %v6690_v31 = vsel %vm6644_vm0, %v6622_v54, %v12526_v57  ;;  %v12533_v54 = vld [vmem:[#allocation80_spill] sm:$0xff] }
 0x6c3   : > { %v7914_v44 = vpop.eup %7913  ;;  %6753 = vst [vmem:[%s11793_s22 + $0x158] sm:$0xff] %v6690_v31  ;;  %7919 = vtanh.f32 %v6437_v14 }
 0x6c4   : > { %v6560_v16 = vadd.f32 1.0, %v7914_v44  ;;  %v6296_v45 = vpop.xlane.xlu0 %6295  ;;  %v12534_v44 = vld [vmem:[#allocation82_spill] sm:$0xff] }
 0x6c5   : > { %v7916_v23 = vpop.eup %7915  ;;  %v6375_v5 = vadd.f32 %v11764_v53, %v6296_v45 }
 0x6c6   : > { %v6623_v27 = vmul.f32 0.5, %v6560_v16  ;;  %v6561_v25 = vadd.f32 1.0, %v7916_v23  ;;  %v6298_v26 = vpop.xlane.xlu1 %6297 }
 0x6c7   : > { %v6438_v37 = vmul.f32 0.5, %v6375_v5  ;;  %v6376_v18 = vadd.f32 %v11764_v53, %v6298_v26 }
 0x6c8   : > { %v6691_v62 = vsel %vm6644_vm0, %v6623_v27, %v12527_v20  ;;  %v6624_v58 = vmul.f32 0.5, %v6561_v25 }
 0x6c9   : > { %6754 = vst [vmem:[%s11793_s22 + $0x160] sm:$0xff] %v6691_v62  ;;  %7921 = vtanh.f32 %v6438_v37  ;;  %v6439_v46 = vmul.f32 0.5, %v6376_v18 }
 0x6ca   : > { %v6692_v6 = vsel %vm6644_vm0, %v6624_v58, %v12528_v11  ;;  %v12535_v58 = vld [vmem:[#allocation87_spill] sm:$0xff] }
 0x6cb   : > { %v7918_v34 = vpop.eup %7917  ;;  %6755 = vst [vmem:[%s11793_s22 + $0x168] sm:$0xff] %v6692_v6  ;;  %7923 = vtanh.f32 %v6439_v46 }
 0x6cc   : > { %v6562_v1 = vadd.f32 1.0, %v7918_v34  ;;  %v6300_v32 = vpop.xlane.xlu0 %6299  ;;  %v12536_v34 = vld [vmem:[#allocation90_spill] sm:$0xff] }
 0x6cd   : > { %v7920_v24 = vpop.eup %7919  ;;  %v6377_v38 = vadd.f32 %v11764_v53, %v6300_v32 }
 0x6ce   : > { %v6625_v52 = vmul.f32 0.5, %v6562_v1  ;;  %v6563_v41 = vadd.f32 1.0, %v7920_v24  ;;  %v6302_v50 = vpop.xlane.xlu1 %6301 }
 0x6cf   : > { %v6440_v49 = vmul.f32 0.5, %v6377_v38  ;;  %v6378_v47 = vadd.f32 %v11764_v53, %v6302_v50 }
 0x6d0   : > { %v6693_v13 = vsel %vm6644_vm0, %v6625_v52, %v12529_v30  ;;  %v6626_v2 = vmul.f32 0.5, %v6563_v41 }
 0x6d1   : > { %6756 = vst [vmem:[%s11793_s22 + $0x170] sm:$0xff] %v6693_v13  ;;  %7925 = vtanh.f32 %v6440_v49  ;;  %v6441_v39 = vmul.f32 0.5, %v6378_v47 }
 0x6d2   : > { %v6694_v59 = vsel %vm6644_vm0, %v6626_v2, %v12530_v4  ;;  %v12537_v2 = vld [vmem:[#allocation86_spill] sm:$0xff] }
 0x6d3   : > { %v7922_v17 = vpop.eup %7921  ;;  %6757 = vst [vmem:[%s11793_s22 + $0x178] sm:$0xff] %v6694_v59  ;;  %7927 = vtanh.f32 %v6441_v39 }
 0x6d4   : > { %v6564_v48 = vadd.f32 1.0, %v7922_v17  ;;  %v6304_v35 = vpop.xlane.xlu0 %6303  ;;  %v12538_v17 = vld [vmem:[#allocation89_spill] sm:$0xff] }
 0x6d5   : > { %v7924_v36 = vpop.eup %7923  ;;  %v6379_v60 = vadd.f32 %v11764_v53, %v6304_v35 }
 0x6d6   : > { %v6627_v33 = vmul.f32 0.5, %v6564_v48  ;;  %v6565_v10 = vadd.f32 1.0, %v7924_v36  ;;  %v6306_v12 = vpop.xlane.xlu1 %6305 }
 0x6d7   : > { %v6442_v28 = vmul.f32 0.5, %v6379_v60  ;;  %v6380_v55 = vadd.f32 %v11764_v53, %v6306_v12 }
 0x6d8   : > { %v6695_v9 = vsel %vm6644_vm0, %v6627_v33, %v12531_v43  ;;  %v6628_v29 = vmul.f32 0.5, %v6565_v10 }
 0x6d9   : > { %6758 = vst [vmem:[%s11793_s22 + $0x180] sm:$0xff] %v6695_v9  ;;  %7929 = vtanh.f32 %v6442_v28  ;;  %v6443_v21 = vmul.f32 0.5, %v6380_v55 }
 0x6da   : > { %v6696_v40 = vsel %vm6644_vm0, %v6628_v29, %v12532_v8  ;;  %v12539_v29 = vld [vmem:[#allocation37_spill] sm:$0xff] }
 0x6db   : > { %v7926_v63 = vpop.eup %7925  ;;  %6759 = vst [vmem:[%s11793_s22 + $0x188] sm:$0xff] %v6696_v40  ;;  %7931 = vtanh.f32 %v6443_v21 }
 0x6dc   : > { %v6566_v15 = vadd.f32 1.0, %v7926_v63  ;;  %v6308_v22 = vpop.xlane.xlu0 %6307  ;;  %v12540_v63 = vld [vmem:[#allocation36_spill] sm:$0xff] }
 0x6dd   : > { %v7928_v3 = vpop.eup %7927  ;;  %v6381_v42 = vadd.f32 %v11764_v53, %v6308_v22 }
 0x6de   : > { %v6629_v61 = vmul.f32 0.5, %v6566_v15  ;;  %v6567_v19 = vadd.f32 1.0, %v7928_v3  ;;  %v6310_v56 = vpop.xlane.xlu1 %6309 }
 0x6df   : > { %v6444_v7 = vmul.f32 0.5, %v6381_v42  ;;  %v6382_v0 = vadd.f32 %v11764_v53, %v6310_v56 }
 0x6e0   : > { %v6697_v14 = vsel %vm6644_vm0, %v6629_v61, %v12533_v54  ;;  %v6630_v57 = vmul.f32 0.5, %v6567_v19  ;;  %v12541_v54 = vld [vmem:[#allocation88_spill] sm:$0xff] }
 0x6e1   : > { %6760 = vst [vmem:[%s11793_s22 + $0x190] sm:$0xff] %v6697_v14  ;;  %7933 = vtanh.f32 %v6444_v7  ;;  %v6445_v31 = vmul.f32 0.5, %v6382_v0 }
 0x6e2   : > { %v6698_v16 = vsel %vm6644_vm0, %v6630_v57, %v12534_v44 }
 0x6e3   : > { %v7930_v45 = vpop.eup %7929  ;;  %6761 = vst [vmem:[%s11793_s22 + $0x198] sm:$0xff] %v6698_v16  ;;  %7935 = vtanh.f32 %v6445_v31  ;;  %v12542_v31 = vld [vmem:[#allocation34_spill] sm:$0xff] }
 0x6e4   : > { %v6568_v23 = vadd.f32 1.0, %v7930_v45  ;;  %v6312_v5 = vpop.xlane.xlu0 %6311 }
 0x6e5   : > { %v7932_v27 = vpop.eup %7931  ;;  %v6383_v25 = vadd.f32 %v11764_v53, %v6312_v5 }
 0x6e6   : > { %v6631_v26 = vmul.f32 0.5, %v6568_v23  ;;  %v6569_v37 = vadd.f32 1.0, %v7932_v27  ;;  %v6314_v18 = vpop.xlane.xlu1 %6313  ;;  %v12543_v27 = vld [vmem:[#allocation53_spill] sm:$0xff] }
 0x6e7   : > { %v6446_v20 = vmul.f32 0.5, %v6383_v25  ;;  %v6384_v62 = vadd.f32 %v11764_v53, %v6314_v18 }
 0x6e8   : > { %v6699_v46 = vsel %vm6644_vm0, %v6631_v26, %v12535_v58  ;;  %v6632_v11 = vmul.f32 0.5, %v6569_v37  ;;  %v12544_v37 = vld [vmem:[#allocation35_spill] sm:$0xff] }
 0x6e9   : > { %6762 = vst [vmem:[%s11793_s22 + $0x1a0] sm:$0xff] %v6699_v46  ;;  %7937 = vtanh.f32 %v6446_v20  ;;  %v6447_v6 = vmul.f32 0.5, %v6384_v62  ;;  %v12545_v46 = vld [vmem:[#allocation54_spill] sm:$0xff] }
 0x6ea   : > { %v6700_v1 = vsel %vm6644_vm0, %v6632_v11, %v12536_v34 }
 0x6eb   : > { %v7934_v32 = vpop.eup %7933  ;;  %6763 = vst [vmem:[%s11793_s22 + $0x1a8] sm:$0xff] %v6700_v1  ;;  %7939 = vtanh.f32 %v6447_v6 }
 0x6ec   : > { %v6570_v24 = vadd.f32 1.0, %v7934_v32  ;;  %v6316_v38 = vpop.xlane.xlu0 %6315 }
 0x6ed   : > { %v7936_v52 = vpop.eup %7935  ;;  %v6385_v41 = vadd.f32 %v11764_v53, %v6316_v38 }
 0x6ee   : > { %v6633_v50 = vmul.f32 0.5, %v6570_v24  ;;  %v6571_v49 = vadd.f32 1.0, %v7936_v52  ;;  %v6318_v47 = vpop.xlane.xlu1 %6317 }
 0x6ef   : > { %v6448_v30 = vmul.f32 0.5, %v6385_v41  ;;  %v6386_v13 = vadd.f32 %v11764_v53, %v6318_v47 }
 0x6f0   : > { %v6701_v39 = vsel %vm6644_vm0, %v6633_v50, %v12537_v2  ;;  %v6634_v4 = vmul.f32 0.5, %v6571_v49 }
 0x6f1   : > { %6764 = vst [vmem:[%s11793_s22 + $0x1b0] sm:$0xff] %v6701_v39  ;;  %7941 = vtanh.f32 %v6448_v30  ;;  %v6449_v59 = vmul.f32 0.5, %v6386_v13 }
 0x6f2   : > { %v6702_v48 = vsel %vm6644_vm0, %v6634_v4, %v12538_v17 }
 0x6f3   : > { %v7938_v35 = vpop.eup %7937  ;;  %6765 = vst [vmem:[%s11793_s22 + $0x1b8] sm:$0xff] %v6702_v48  ;;  %7943 = vtanh.f32 %v6449_v59 }
 0x6f4   : > { %v6572_v36 = vadd.f32 1.0, %v7938_v35  ;;  %v6320_v60 = vpop.xlane.xlu0 %6319 }
 0x6f5   : > { %v7940_v33 = vpop.eup %7939  ;;  %v6387_v10 = vadd.f32 %v11764_v53, %v6320_v60 }
 0x6f6   : > { %v6635_v12 = vmul.f32 0.5, %v6572_v36  ;;  %v6573_v28 = vadd.f32 1.0, %v7940_v33  ;;  %v6322_v55 = vpop.xlane.xlu1 %6321 }
 0x6f7   : > { %v6450_v43 = vmul.f32 0.5, %v6387_v10  ;;  %v6388_v9 = vadd.f32 %v11764_v53, %v6322_v55 }
 0x6f8   : > { %v6703_v21 = vsel %vm6644_vm0, %v6635_v12, %v12539_v29  ;;  %v6636_v8 = vmul.f32 0.5, %v6573_v28 }
 0x6f9   : > { %6766 = vst [vmem:[%s11793_s22 + $0x1c0] sm:$0xff] %v6703_v21  ;;  %7945 = vtanh.f32 %v6450_v43  ;;  %v6451_v40 = vmul.f32 0.5, %v6388_v9 }
 0x6fa   : > { %v6704_v15 = vsel %vm6644_vm0, %v6636_v8, %v12540_v63 }
 0x6fb   : > { %v7942_v22 = vpop.eup %7941  ;;  %6767 = vst [vmem:[%s11793_s22 + $0x1c8] sm:$0xff] %v6704_v15  ;;  %7947 = vtanh.f32 %v6451_v40 }
 0x6fc   : > { %v6574_v3 = vadd.f32 1.0, %v7942_v22  ;;  %v6324_v42 = vpop.xlane.xlu0 %6323 }
 0x6fd   : > { %v7944_v61 = vpop.eup %7943  ;;  %v6389_v19 = vadd.f32 %v11764_v53, %v6324_v42 }
 0x6fe   : > { %v6637_v56 = vmul.f32 0.5, %v6574_v3  ;;  %v6575_v7 = vadd.f32 1.0, %v7944_v61 }
 0x6ff   : > { %v6452_v0 = vmul.f32 0.5, %v6389_v19 }
 0x700   : > { %v6705_v14 = vsel %vm6644_vm0, %v6637_v56, %v12541_v54  ;;  %v6638_v57 = vmul.f32 0.5, %v6575_v7 }
 0x701   : > { %6768 = vst [vmem:[%s11793_s22 + $0x1d0] sm:$0xff] %v6705_v14  ;;  %7949 = vtanh.f32 %v6452_v0 }
 0x702   : > { %v6706_v44 = vsel %vm6644_vm0, %v6638_v57, %v12542_v31 }
 0x703   : > { %v7946_v16 = vpop.eup %7945  ;;  %6769 = vst [vmem:[%s11793_s22 + $0x1d8] sm:$0xff] %v6706_v44 }
 0x704   : > { %v6576_v53 = vadd.f32 1.0, %v7946_v16 }
 0x705   : > { %v7948_v45 = vpop.eup %7947 }
 0x706   : > { %v6639_v23 = vmul.f32 0.5, %v6576_v53  ;;  %v6577_v5 = vadd.f32 1.0, %v7948_v45 }
 0x708   : > { %v6707_v25 = vsel %vm6644_vm0, %v6639_v23, %v12543_v27  ;;  %v6640_v26 = vmul.f32 0.5, %v6577_v5 }
 0x709   : > { %6770 = vst [vmem:[%s11793_s22 + $0x1e0] sm:$0xff] %v6707_v25 }
 0x70a   : > { %v6708_v18 = vsel %vm6644_vm0, %v6640_v26, %v12544_v37 }
 0x70b   : > { %v7950_v20 = vpop.eup %7949  ;;  %6771 = vst [vmem:[%s11793_s22 + $0x1e8] sm:$0xff] %v6708_v18 }
 0x70c   : > { %v6578_v62 = vadd.f32 1.0, %v7950_v20 }
 0x70e   : > { %v6641_v58 = vmul.f32 0.5, %v6578_v62 }
 0x710   : > { %v6709_v11 = vsel %vm6644_vm0, %v6641_v58, %v12545_v46 }
 0x711   : > { %6772 = vst [vmem:[%s11793_s22 + $0x1f0] sm:$0xff] %v6709_v11 }
 0x712   : > { %7970 = shalt.err (!%p7967_p3)
}
 0x713   : > { %s7971_s28 = scalar_lea.hbm %s12154_s24, 8064  ;;  %s7975_s17 = scalar_lea.hbm %s12220_s15, 16128 }
 0x714   : > { %p7972_p4 = scmp.ne.s32.totalorder %s12154_s24, %s7971_s28  ;;  %p7976_p9 = scmp.lt.u32.totalorder %s12154_s24, %s12220_s15 }
 0x715   : > { %p7977_p10 = scmp.lt.u32.totalorder %s7975_s17, %s7971_s28  ;;  %p7979_p12 = scmp.lt.u32.totalorder %s7971_s28, %s12154_s24 }
 0x716   : > { %p7973_p7 = pnand %p7972_p4, %p8147_p5 }
 0x717   : > { %p7978_p11 = por %p7977_p10, %p7976_p9 }
 0x718   : > { %p7974_p8 = pneg %p7973_p7 }
 0x719   : > { %p7980_p13 = por %p7979_p12, %p7978_p11 }
 0x71b   : > { %p7981_p0 = pnand %p7980_p13, %p7974_p8 }
 0x71d   : > { %7984 = shalt.err (!%p7981_p0)
}
 0x71e   : > { %s8024_s26 = smov 128   ;;  %s8025_s16 = smov 8  }
 0x71f   : > { %7484 = dma.vmem_to_hbm [thread:$0]  (%p8147_p5), %s12156_s18, 8064, %s12154_s24, %s12164_s14, %s8024_s26, %s8024_s26, %s8025_s16  }
 0x720 PF: > { %p7490_p1 = scmp.ge.s32.totalorder %s8019_s23, 2  ;;  %s6802_s0 = sand.u32 1, %s8007_s20  }
 0x721   : > { %s6803_s28 = scalar_lea.sflag [#allocation4], %s6802_s0 }
 0x722   : > { %p7487_p2 = pnand %p7490_p1, %p8151_p6 }
 0x724   : > { %8002 = dma.done.wait (!%p7487_p2), %s6803_s28, 8064  }
 0x725   : > { %8004 = vsyncadd (!%p7487_p2), %s6803_s28, 4294959232  ;;  %s12546_s22 = sld [smem:[#allocation6_spill]]  ;;  %s12547_s19 = sld [smem:[#allocation7_spill]] }
 0x726   : > { %p26_p3 = scmp.ge.s32.totalorder %s8134_s25, 4   ;;  %s12548_s20 = smov %s8011_s21 }
 0x727   : > { %s12551_s23 = smov %s8134_s25 }
 0x728   :  { %28 = sbr.rel (!%p26_p3) target bundleno = 6 (0x6), region = 115 }
 0x72b   : > { %s12549_s21 = smov %s12546_s22  ;;  %s12550_s22 = smov %s12547_s19 }
 0x72f   :  { %6808 = vsyncpa [#allocation4], 1 }
 0x730   :  { %6810 = vsyncpa [#allocation4 + $0x1], 1 }

</bundles_post_ra>
